<compile_context>
chip_gen: v7x
topology: tpu7x:2x2x1
jax: 0.10.0
libtpu: 0.0.40
codegen_flags: <defaults>
</compile_context>

<pallas_src>
import functools
import math

import jax
import jax.numpy as jnp
from jax.experimental import pallas as pl
from jax.experimental.pallas import tpu as pltpu

_SCALE_CLAMP = math.log(1000.0 / 16.0)  # detectron2 Box2BoxTransform default


# ----------------------------------------------------------------------------
# Fused RPN kernel: normalize -> backbone 3x3 conv -> RPN 3x3 conv -> 1x1 heads
# -> box decode.  Everything stays in VMEM/vregs for one image.
# ----------------------------------------------------------------------------
def _rpn_fused_kernel(x_ref, mask_ref, anc_ref, mean_ref, istd_ref,
                      wb_ref, bb_ref, wr_ref, br_ref, wh_ref, bh_ref,
                      logit_ref, box_ref, *, H, W, A):
    HW = H * W
    pad_rows = ((W + 1 + 7) // 8) * 8  # sublane-aligned zero pad for shifted views

    def conv3x3(xn, w_ref, b_ref):
        # xn: (HW, Cin) f32 value; w_ref: (9, Cin, Cout) bf16; b_ref: (1, Cout) f32.
        cin = xn.shape[-1]
        cout = w_ref.shape[-1]
        zpad = jnp.zeros((pad_rows, cin), jnp.float32)
        xp = jnp.concatenate([zpad, xn, zpad], axis=0)  # (HW + 2*pad_rows, cin)
        acc = jnp.zeros((HW, cout), jnp.float32)
        for t in range(9):
            dy, dx = t // 3 - 1, t % 3 - 1
            s = dy * W + dx
            start = pad_rows + s
            sh = xp[start:start + HW, :]                 # shifted window (zeros outside)
            sh = sh * mask_ref[:, t:t + 1]               # zero x-wrapped rows
            acc = acc + jnp.dot(sh.astype(jnp.bfloat16), w_ref[t],
                                preferred_element_type=jnp.float32)
        return jnp.maximum(acc + b_ref[...], 0.0)        # bias + ReLU in f32

    # pixel normalization fused in-kernel (exact: zero padding happens in normalized space)
    xn = (x_ref[0] - mean_ref[...]) * istd_ref[...]      # (HW, Cin) f32

    feat = conv3x3(xn, wb_ref, bb_ref)                   # backbone conv   (HW, Cb)
    hid = conv3x3(feat, wr_ref, br_ref)                  # RPN shared conv (HW, Cb)

    # fused 1x1 heads: columns = [objectness(A) | dx(A) | dy(A) | dw(A) | dh(A)]
    head = jnp.dot(hid.astype(jnp.bfloat16), wh_ref[...],
                   preferred_element_type=jnp.float32) + bh_ref[...]   # (HW, 5A)

    logit_ref[0] = head[:, 0:A]

    # Box2BoxTransform.apply_deltas (weights = 1,1,1,1) + clip to image, in-epilogue.
    d_x = head[:, A:2 * A]
    d_y = head[:, 2 * A:3 * A]
    d_w = jnp.minimum(head[:, 3 * A:4 * A], _SCALE_CLAMP)
    d_h = jnp.minimum(head[:, 4 * A:5 * A], _SCALE_CLAMP)

    ax1 = anc_ref[:, 0:A]
    ay1 = anc_ref[:, A:2 * A]
    ax2 = anc_ref[:, 2 * A:3 * A]
    ay2 = anc_ref[:, 3 * A:4 * A]
    wa = ax2 - ax1
    ha = ay2 - ay1
    cxa = ax1 + 0.5 * wa
    cya = ay1 + 0.5 * ha

    pcx = d_x * wa + cxa
    pcy = d_y * ha + cya
    pw = jnp.exp(d_w) * wa
    ph = jnp.exp(d_h) * ha

    x1 = jnp.clip(pcx - 0.5 * pw, 0.0, float(W))
    y1 = jnp.clip(pcy - 0.5 * ph, 0.0, float(H))
    x2 = jnp.clip(pcx + 0.5 * pw, 0.0, float(W))
    y2 = jnp.clip(pcy + 0.5 * ph, 0.0, float(H))

    box_ref[0] = jnp.concatenate([x1, y1, x2, y2], axis=-1)  # planar (HW, 4A)


def rpn_fused(x_flat, masks, anchors, params, *, H, W, A):
    N, HW, C_in = x_flat.shape
    C_b = params["w_back"].shape[-1]
    kern = functools.partial(_rpn_fused_kernel, H=H, W=W, A=A)
    logits, boxes = pl.pallas_call(
        kern,
        out_shape=(jax.ShapeDtypeStruct((N, HW, A), jnp.float32),
                   jax.ShapeDtypeStruct((N, HW, 4 * A), jnp.float32)),
        grid=(N,),
        in_specs=[
            pl.BlockSpec((1, HW, C_in), lambda n: (n, 0, 0)),      # raw image (flattened NHWC)
            pl.BlockSpec((HW, 9), lambda n: (0, 0)),               # per-tap validity masks
            pl.BlockSpec((HW, 4 * A), lambda n: (0, 0)),           # anchors (planar)
            pl.BlockSpec((1, C_in), lambda n: (0, 0)),             # pixel_mean
            pl.BlockSpec((1, C_in), lambda n: (0, 0)),             # 1 / pixel_std
            pl.BlockSpec((9, C_in, C_b), lambda n: (0, 0, 0)),     # backbone conv taps (bf16)
            pl.BlockSpec((1, C_b), lambda n: (0, 0)),              # backbone bias
            pl.BlockSpec((9, C_b, C_b), lambda n: (0, 0, 0)),      # RPN conv taps (bf16)
            pl.BlockSpec((1, C_b), lambda n: (0, 0)),              # RPN bias
            pl.BlockSpec((C_b, 5 * A), lambda n: (0, 0)),          # fused head weight (bf16)
            pl.BlockSpec((1, 5 * A), lambda n: (0, 0)),            # fused head bias
        ],
        out_specs=(pl.BlockSpec((1, HW, A), lambda n: (n, 0, 0)),
                   pl.BlockSpec((1, HW, 4 * A), lambda n: (n, 0, 0))),
        compiler_params=pltpu.CompilerParams(dimension_semantics=("parallel",)),
    )(x_flat, masks, anchors,
      params["pixel_mean"], params["pixel_inv_std"],
      params["w_back"], params["b_back"],
      params["w_rpn"], params["b_rpn"],
      params["w_head"], params["b_head"])
    return logits, boxes


# ----------------------------------------------------------------------------
# Plain-JAX glue: parameter prep, anchors, tap masks, top-k postprocess
# ----------------------------------------------------------------------------
def make_tap_masks(H, W):
    ys, xs = jnp.meshgrid(jnp.arange(H), jnp.arange(W), indexing="ij")
    ys = ys.reshape(-1)
    xs = xs.reshape(-1)
    cols = []
    for t in range(9):
        dy, dx = t // 3 - 1, t % 3 - 1
        ok = ((ys + dy >= 0) & (ys + dy < H) & (xs + dx >= 0) & (xs + dx < W))
        cols.append(ok)
    return jnp.stack(cols, axis=1).astype(jnp.float32)  # (H*W, 9)


def make_anchors_planar(H, W, sizes=(4.0, 8.0, 16.0), stride=1.0):
    # anchors at flat position p = y*W + x, anchor a; planar columns [x1*A|y1*A|x2*A|y2*A]
    ys = (jnp.arange(H, dtype=jnp.float32) + 0.5) * stride
    xs = (jnp.arange(W, dtype=jnp.float32) + 0.5) * stride
    cy, cx = jnp.meshgrid(ys, xs, indexing="ij")
    cx = cx.reshape(-1, 1)
    cy = cy.reshape(-1, 1)
    half = jnp.asarray(sizes, jnp.float32) / 2.0        # (A,)
    x1, y1, x2, y2 = cx - half, cy - half, cx + half, cy + half   # each (H*W, A)
    return jnp.concatenate([x1, y1, x2, y2], axis=1)    # (H*W, 4A)


def init_params(key, c_in=3, c_back=32, num_anchors=3):
    ks = jax.random.split(key, 4)
    A = num_anchors

    def conv_w(k, co, ci, kh, kw, scale=0.05):
        return scale * jax.random.normal(k, (co, ci, kh, kw), jnp.float32)

    w_back = conv_w(ks[0], c_back, c_in, 3, 3)             # backbone 3x3 conv
    w_rpn = conv_w(ks[1], c_back, c_back, 3, 3)            # RPN shared 3x3 conv
    w_obj = conv_w(ks[2], A, c_back, 1, 1)                 # RPN objectness 1x1 conv
    w_del = conv_w(ks[3], 4 * A, c_back, 1, 1)             # RPN anchor-delta 1x1 conv

    def taps(w):  # PyTorch (Cout, Cin, 3, 3) -> per-tap (9, Cin, Cout), bf16 for the MXU
        co, ci = w.shape[0], w.shape[1]
        return jnp.transpose(w, (2, 3, 1, 0)).reshape(9, ci, co).astype(jnp.bfloat16)

    # fused head: [objectness | planar deltas (dx*A, dy*A, dw*A, dh*A)]
    w_obj_mat = w_obj.reshape(A, c_back).T                                          # (Cb, A)
    w_del_planar = jnp.transpose(w_del.reshape(A, 4, c_back), (1, 0, 2)).reshape(4 * A, c_back).T
    w_head = jnp.concatenate([w_obj_mat, w_del_planar], axis=1).astype(jnp.bfloat16)  # (Cb, 5A)
    b_obj = jnp.zeros((A,), jnp.float32)
    b_del_planar = jnp.transpose(jnp.zeros((4 * A,), jnp.float32).reshape(A, 4), (1, 0)).reshape(4 * A)
    b_head = jnp.concatenate([b_obj, b_del_planar])[None, :]

    return {
        "pixel_mean": jnp.asarray([103.53, 116.28, 123.675], jnp.float32)[None, :c_in],
        "pixel_inv_std": (1.0 / jnp.asarray([1.0, 1.0, 1.0], jnp.float32))[None, :c_in],
        "w_back": taps(w_back), "b_back": jnp.zeros((1, c_back), jnp.float32),
        "w_rpn": taps(w_rpn), "b_rpn": jnp.zeros((1, c_back), jnp.float32),
        "w_head": w_head, "b_head": b_head,
        "num_anchors": A,
    }


def proposal_network_forward(batched_inputs, params, *, post_topk=50):
    """Inference path of ProposalNetwork.forward (training loss branch not modeled)."""
    images = jnp.stack([b["image"].astype(jnp.float32) for b in batched_inputs], axis=0)  # (N,3,H,W)
    N, C, H, W = images.shape
    A = params["num_anchors"]
    # TODO(synk): ImageList.from_tensors size-divisibility padding for ragged image sizes is not modeled.

    x_flat = jnp.transpose(images, (0, 2, 3, 1)).reshape(N, H * W, C)  # flattened NHWC
    masks = make_tap_masks(H, W)
    anchors = make_anchors_planar(H, W)
    # TODO(synk): single stride / no aspect ratios / no FPN levels vs detectron2 default anchor generator.

    logits_p, boxes_p = rpn_fused(x_flat, masks, anchors, params, H=H, W=W, A=A)
    logits = logits_p.reshape(N, H * W * A)                                     # flat index = p*A + a
    boxes = boxes_p.reshape(N, H * W, 4, A).transpose(0, 1, 3, 2).reshape(N, H * W * A, 4)

    processed_results = []
    for i in range(N):
        k = min(post_topk, boxes.shape[1])
        top_scores, top_idx = jax.lax.top_k(logits[i], k)
        top_boxes = boxes[i][top_idx]
        # TODO(synk): the RPN's batched NMS has no clean Pallas equivalent; proposals are top-k by objectness only.
        # detector_postprocess: rescale boxes to the requested output resolution
        height = batched_inputs[i].get("height", H)
        width = batched_inputs[i].get("width", W)
        scale = jnp.asarray([width / W, height / H, width / W, height / H], jnp.float32)
        processed_results.append(
            {"proposals": {"proposal_boxes": top_boxes * scale, "objectness_logits": top_scores}}
        )
    return processed_results


if __name__ == "__main__":
    key = jax.random.PRNGKey(0)
    k_img, k_param = jax.random.split(key)

    N, C, H, W = 2, 3, 16, 16
    imgs = jax.random.uniform(k_img, (N, C, H, W), jnp.float32) * 255.0
    batched_inputs = [{"image": imgs[i]} for i in range(N)]

    params = init_params(k_param, c_in=C, c_back=32, num_anchors=3)
    results = proposal_network_forward(batched_inputs, params, post_topk=50)
    jax.block_until_ready(results)

    assert len(results) == N
    assert results[0]["proposals"]["proposal_boxes"].shape == (50, 4)
    assert results[0]["proposals"]["objectness_logits"].shape == (50,)
    print("KERNEL_OK")
</pallas_src>

<mosaic_0001>
module attributes {stable_mosaic.version = 11 : i64} {
  func.func @_rpn_fused_kernel(%arg0: i32, %arg1: memref<1x256x3xf32, #tpu.memory_space<vmem>>, %arg2: memref<256x9xf32, #tpu.memory_space<vmem>>, %arg3: memref<256x12xf32, #tpu.memory_space<vmem>>, %arg4: memref<1x3xf32, #tpu.memory_space<vmem>>, %arg5: memref<1x3xf32, #tpu.memory_space<vmem>>, %arg6: memref<9x3x32xbf16, #tpu.memory_space<vmem>>, %arg7: memref<1x32xf32, #tpu.memory_space<vmem>>, %arg8: memref<9x32x32xbf16, #tpu.memory_space<vmem>>, %arg9: memref<1x32xf32, #tpu.memory_space<vmem>>, %arg10: memref<32x15xbf16, #tpu.memory_space<vmem>>, %arg11: memref<1x15xf32, #tpu.memory_space<vmem>>, %arg12: memref<1x256x3xf32, #tpu.memory_space<vmem>>, %arg13: memref<1x256x12xf32, #tpu.memory_space<vmem>>) attributes {dimension_semantics = [#tpu.dimension_semantics<parallel>], iteration_bounds = array<i64: 2>, scalar_prefetch = 0 : i64, scratch_operands = 0 : i64, tpu.core_type = #tpu.core_type<tc>, window_params = [{transform_indices = @transform_0, window_bounds = array<i64: 1, 256, 3>}, {pipeline_mode = #tpu.pipeline_mode<synchronous>, transform_indices = @transform_1, window_bounds = array<i64: 256, 9>}, {pipeline_mode = #tpu.pipeline_mode<synchronous>, transform_indices = @transform_2, window_bounds = array<i64: 256, 12>}, {pipeline_mode = #tpu.pipeline_mode<synchronous>, transform_indices = @transform_3, window_bounds = array<i64: 1, 3>}, {pipeline_mode = #tpu.pipeline_mode<synchronous>, transform_indices = @transform_4, window_bounds = array<i64: 1, 3>}, {pipeline_mode = #tpu.pipeline_mode<synchronous>, transform_indices = @transform_5, window_bounds = array<i64: 9, 3, 32>}, {pipeline_mode = #tpu.pipeline_mode<synchronous>, transform_indices = @transform_6, window_bounds = array<i64: 1, 32>}, {pipeline_mode = #tpu.pipeline_mode<synchronous>, transform_indices = @transform_7, window_bounds = array<i64: 9, 32, 32>}, {pipeline_mode = #tpu.pipeline_mode<synchronous>, transform_indices = @transform_8, window_bounds = array<i64: 1, 32>}, {pipeline_mode = #tpu.pipeline_mode<synchronous>, transform_indices = @transform_9, window_bounds = array<i64: 32, 15>}, {pipeline_mode = #tpu.pipeline_mode<synchronous>, transform_indices = @transform_10, window_bounds = array<i64: 1, 15>}, {transform_indices = @transform_11, window_bounds = array<i64: 1, 256, 3>}, {transform_indices = @transform_12, window_bounds = array<i64: 1, 256, 12>}]} {
    %c0 = arith.constant 0 : index
    %c0_0 = arith.constant 0 : index
    %c0_1 = arith.constant 0 : index
    %0 = vector.load %arg1[%c0, %c0_0, %c0_1] : memref<1x256x3xf32, #tpu.memory_space<vmem>>, vector<1x256x3xf32>
    %1 = vector.shape_cast %0 : vector<1x256x3xf32> to vector<256x3xf32>
    %c0_2 = arith.constant 0 : index
    %c0_3 = arith.constant 0 : index
    %2 = vector.load %arg4[%c0_2, %c0_3] : memref<1x3xf32, #tpu.memory_space<vmem>>, vector<1x3xf32>
    %3 = vector.broadcast %2 : vector<1x3xf32> to vector<256x3xf32>
    %4 = arith.subf %1, %3 : vector<256x3xf32>
    %c0_4 = arith.constant 0 : index
    %c0_5 = arith.constant 0 : index
    %5 = vector.load %arg5[%c0_4, %c0_5] : memref<1x3xf32, #tpu.memory_space<vmem>>, vector<1x3xf32>
    %6 = vector.broadcast %5 : vector<1x3xf32> to vector<256x3xf32>
    %7 = arith.mulf %4, %6 : vector<256x3xf32>
    %cst = arith.constant 0.000000e+00 : f32
    %8 = vector.broadcast %cst : f32 to vector<24x3xf32>
    %9 = tpu.concatenate %8, %7, %8 in 0 : vector<24x3xf32>, vector<256x3xf32>, vector<24x3xf32> -> vector<304x3xf32>
    %cst_6 = arith.constant 0.000000e+00 : f32
    %10 = vector.broadcast %cst_6 : f32 to vector<256x32xf32>
    %11 = vector.extract_strided_slice %9 {offsets = [7, 0], sizes = [256, 3], strides = [1, 1]} : vector<304x3xf32> to vector<256x3xf32>
    %c0_7 = arith.constant 0 : index
    %c0_8 = arith.constant 0 : index
    %12 = vector.load %arg2[%c0_7, %c0_8] : memref<256x9xf32, #tpu.memory_space<vmem>>, vector<256x1xf32>
    %13 = vector.broadcast %12 : vector<256x1xf32> to vector<256x3xf32>
    %14 = arith.mulf %11, %13 : vector<256x3xf32>
    %15 = arith.truncf %14 : vector<256x3xf32> to vector<256x3xbf16>
    %c0_9 = arith.constant 0 : index
    %c0_10 = arith.constant 0 : index
    %c0_11 = arith.constant 0 : index
    %16 = vector.load %arg6[%c0_9, %c0_10, %c0_11] : memref<9x3x32xbf16, #tpu.memory_space<vmem>>, vector<1x3x32xbf16>
    %17 = vector.shape_cast %16 : vector<1x3x32xbf16> to vector<3x32xbf16>
    %cst_12 = arith.constant dense<0.000000e+00> : vector<256x32xf32>
    %18 = tpu.matmul %15, %17, %cst_12 {dimension_numbers = #tpu.dot_dimension_numbers<[1], [0], [0], [1], [0, 0, 1, 1], [], []>} : vector<256x3xbf16>, vector<3x32xbf16>, vector<256x32xf32> -> vector<256x32xf32>
    %19 = arith.addf %10, %18 : vector<256x32xf32>
    %20 = vector.extract_strided_slice %9 {offsets = [8, 0], sizes = [256, 3], strides = [1, 1]} : vector<304x3xf32> to vector<256x3xf32>
    %c0_13 = arith.constant 0 : index
    %c1 = arith.constant 1 : index
    %21 = vector.load %arg2[%c0_13, %c1] : memref<256x9xf32, #tpu.memory_space<vmem>>, vector<256x1xf32>
    %22 = vector.broadcast %21 : vector<256x1xf32> to vector<256x3xf32>
    %23 = arith.mulf %20, %22 : vector<256x3xf32>
    %24 = arith.truncf %23 : vector<256x3xf32> to vector<256x3xbf16>
    %c1_14 = arith.constant 1 : index
    %c0_15 = arith.constant 0 : index
    %c0_16 = arith.constant 0 : index
    %25 = vector.load %arg6[%c1_14, %c0_15, %c0_16] : memref<9x3x32xbf16, #tpu.memory_space<vmem>>, vector<1x3x32xbf16>
    %26 = vector.shape_cast %25 : vector<1x3x32xbf16> to vector<3x32xbf16>
    %cst_17 = arith.constant dense<0.000000e+00> : vector<256x32xf32>
    %27 = tpu.matmul %24, %26, %cst_17 {dimension_numbers = #tpu.dot_dimension_numbers<[1], [0], [0], [1], [0, 0, 1, 1], [], []>} : vector<256x3xbf16>, vector<3x32xbf16>, vector<256x32xf32> -> vector<256x32xf32>
    %28 = arith.addf %19, %27 : vector<256x32xf32>
    %29 = vector.extract_strided_slice %9 {offsets = [9, 0], sizes = [256, 3], strides = [1, 1]} : vector<304x3xf32> to vector<256x3xf32>
    %c0_18 = arith.constant 0 : index
    %c2 = arith.constant 2 : index
    %30 = vector.load %arg2[%c0_18, %c2] : memref<256x9xf32, #tpu.memory_space<vmem>>, vector<256x1xf32>
    %31 = vector.broadcast %30 : vector<256x1xf32> to vector<256x3xf32>
    %32 = arith.mulf %29, %31 : vector<256x3xf32>
    %33 = arith.truncf %32 : vector<256x3xf32> to vector<256x3xbf16>
    %c2_19 = arith.constant 2 : index
    %c0_20 = arith.constant 0 : index
    %c0_21 = arith.constant 0 : index
    %34 = vector.load %arg6[%c2_19, %c0_20, %c0_21] : memref<9x3x32xbf16, #tpu.memory_space<vmem>>, vector<1x3x32xbf16>
    %35 = vector.shape_cast %34 : vector<1x3x32xbf16> to vector<3x32xbf16>
    %cst_22 = arith.constant dense<0.000000e+00> : vector<256x32xf32>
    %36 = tpu.matmul %33, %35, %cst_22 {dimension_numbers = #tpu.dot_dimension_numbers<[1], [0], [0], [1], [0, 0, 1, 1], [], []>} : vector<256x3xbf16>, vector<3x32xbf16>, vector<256x32xf32> -> vector<256x32xf32>
    %37 = arith.addf %28, %36 : vector<256x32xf32>
    %38 = vector.extract_strided_slice %9 {offsets = [23, 0], sizes = [256, 3], strides = [1, 1]} : vector<304x3xf32> to vector<256x3xf32>
    %c0_23 = arith.constant 0 : index
    %c3 = arith.constant 3 : index
    %39 = vector.load %arg2[%c0_23, %c3] : memref<256x9xf32, #tpu.memory_space<vmem>>, vector<256x1xf32>
    %40 = vector.broadcast %39 : vector<256x1xf32> to vector<256x3xf32>
    %41 = arith.mulf %38, %40 : vector<256x3xf32>
    %42 = arith.truncf %41 : vector<256x3xf32> to vector<256x3xbf16>
    %c3_24 = arith.constant 3 : index
    %c0_25 = arith.constant 0 : index
    %c0_26 = arith.constant 0 : index
    %43 = vector.load %arg6[%c3_24, %c0_25, %c0_26] : memref<9x3x32xbf16, #tpu.memory_space<vmem>>, vector<1x3x32xbf16>
    %44 = vector.shape_cast %43 : vector<1x3x32xbf16> to vector<3x32xbf16>
    %cst_27 = arith.constant dense<0.000000e+00> : vector<256x32xf32>
    %45 = tpu.matmul %42, %44, %cst_27 {dimension_numbers = #tpu.dot_dimension_numbers<[1], [0], [0], [1], [0, 0, 1, 1], [], []>} : vector<256x3xbf16>, vector<3x32xbf16>, vector<256x32xf32> -> vector<256x32xf32>
    %46 = arith.addf %37, %45 : vector<256x32xf32>
    %47 = vector.extract_strided_slice %9 {offsets = [24, 0], sizes = [256, 3], strides = [1, 1]} : vector<304x3xf32> to vector<256x3xf32>
    %c0_28 = arith.constant 0 : index
    %c4 = arith.constant 4 : index
    %48 = vector.load %arg2[%c0_28, %c4] : memref<256x9xf32, #tpu.memory_space<vmem>>, vector<256x1xf32>
    %49 = vector.broadcast %48 : vector<256x1xf32> to vector<256x3xf32>
    %50 = arith.mulf %47, %49 : vector<256x3xf32>
    %51 = arith.truncf %50 : vector<256x3xf32> to vector<256x3xbf16>
    %c4_29 = arith.constant 4 : index
    %c0_30 = arith.constant 0 : index
    %c0_31 = arith.constant 0 : index
    %52 = vector.load %arg6[%c4_29, %c0_30, %c0_31] : memref<9x3x32xbf16, #tpu.memory_space<vmem>>, vector<1x3x32xbf16>
    %53 = vector.shape_cast %52 : vector<1x3x32xbf16> to vector<3x32xbf16>
    %cst_32 = arith.constant dense<0.000000e+00> : vector<256x32xf32>
    %54 = tpu.matmul %51, %53, %cst_32 {dimension_numbers = #tpu.dot_dimension_numbers<[1], [0], [0], [1], [0, 0, 1, 1], [], []>} : vector<256x3xbf16>, vector<3x32xbf16>, vector<256x32xf32> -> vector<256x32xf32>
    %55 = arith.addf %46, %54 : vector<256x32xf32>
    %56 = vector.extract_strided_slice %9 {offsets = [25, 0], sizes = [256, 3], strides = [1, 1]} : vector<304x3xf32> to vector<256x3xf32>
    %c0_33 = arith.constant 0 : index
    %c5 = arith.constant 5 : index
    %57 = vector.load %arg2[%c0_33, %c5] : memref<256x9xf32, #tpu.memory_space<vmem>>, vector<256x1xf32>
    %58 = vector.broadcast %57 : vector<256x1xf32> to vector<256x3xf32>
    %59 = arith.mulf %56, %58 : vector<256x3xf32>
    %60 = arith.truncf %59 : vector<256x3xf32> to vector<256x3xbf16>
    %c5_34 = arith.constant 5 : index
    %c0_35 = arith.constant 0 : index
    %c0_36 = arith.constant 0 : index
    %61 = vector.load %arg6[%c5_34, %c0_35, %c0_36] : memref<9x3x32xbf16, #tpu.memory_space<vmem>>, vector<1x3x32xbf16>
    %62 = vector.shape_cast %61 : vector<1x3x32xbf16> to vector<3x32xbf16>
    %cst_37 = arith.constant dense<0.000000e+00> : vector<256x32xf32>
    %63 = tpu.matmul %60, %62, %cst_37 {dimension_numbers = #tpu.dot_dimension_numbers<[1], [0], [0], [1], [0, 0, 1, 1], [], []>} : vector<256x3xbf16>, vector<3x32xbf16>, vector<256x32xf32> -> vector<256x32xf32>
    %64 = arith.addf %55, %63 : vector<256x32xf32>
    %65 = vector.extract_strided_slice %9 {offsets = [39, 0], sizes = [256, 3], strides = [1, 1]} : vector<304x3xf32> to vector<256x3xf32>
    %c0_38 = arith.constant 0 : index
    %c6 = arith.constant 6 : index
    %66 = vector.load %arg2[%c0_38, %c6] : memref<256x9xf32, #tpu.memory_space<vmem>>, vector<256x1xf32>
    %67 = vector.broadcast %66 : vector<256x1xf32> to vector<256x3xf32>
    %68 = arith.mulf %65, %67 : vector<256x3xf32>
    %69 = arith.truncf %68 : vector<256x3xf32> to vector<256x3xbf16>
    %c6_39 = arith.constant 6 : index
    %c0_40 = arith.constant 0 : index
    %c0_41 = arith.constant 0 : index
    %70 = vector.load %arg6[%c6_39, %c0_40, %c0_41] : memref<9x3x32xbf16, #tpu.memory_space<vmem>>, vector<1x3x32xbf16>
    %71 = vector.shape_cast %70 : vector<1x3x32xbf16> to vector<3x32xbf16>
    %cst_42 = arith.constant dense<0.000000e+00> : vector<256x32xf32>
    %72 = tpu.matmul %69, %71, %cst_42 {dimension_numbers = #tpu.dot_dimension_numbers<[1], [0], [0], [1], [0, 0, 1, 1], [], []>} : vector<256x3xbf16>, vector<3x32xbf16>, vector<256x32xf32> -> vector<256x32xf32>
    %73 = arith.addf %64, %72 : vector<256x32xf32>
    %74 = vector.extract_strided_slice %9 {offsets = [40, 0], sizes = [256, 3], strides = [1, 1]} : vector<304x3xf32> to vector<256x3xf32>
    %c0_43 = arith.constant 0 : index
    %c7 = arith.constant 7 : index
    %75 = vector.load %arg2[%c0_43, %c7] : memref<256x9xf32, #tpu.memory_space<vmem>>, vector<256x1xf32>
    %76 = vector.broadcast %75 : vector<256x1xf32> to vector<256x3xf32>
    %77 = arith.mulf %74, %76 : vector<256x3xf32>
    %78 = arith.truncf %77 : vector<256x3xf32> to vector<256x3xbf16>
    %c7_44 = arith.constant 7 : index
    %c0_45 = arith.constant 0 : index
    %c0_46 = arith.constant 0 : index
    %79 = vector.load %arg6[%c7_44, %c0_45, %c0_46] : memref<9x3x32xbf16, #tpu.memory_space<vmem>>, vector<1x3x32xbf16>
    %80 = vector.shape_cast %79 : vector<1x3x32xbf16> to vector<3x32xbf16>
    %cst_47 = arith.constant dense<0.000000e+00> : vector<256x32xf32>
    %81 = tpu.matmul %78, %80, %cst_47 {dimension_numbers = #tpu.dot_dimension_numbers<[1], [0], [0], [1], [0, 0, 1, 1], [], []>} : vector<256x3xbf16>, vector<3x32xbf16>, vector<256x32xf32> -> vector<256x32xf32>
    %82 = arith.addf %73, %81 : vector<256x32xf32>
    %83 = vector.extract_strided_slice %9 {offsets = [41, 0], sizes = [256, 3], strides = [1, 1]} : vector<304x3xf32> to vector<256x3xf32>
    %c0_48 = arith.constant 0 : index
    %c8 = arith.constant 8 : index
    %84 = vector.load %arg2[%c0_48, %c8] : memref<256x9xf32, #tpu.memory_space<vmem>>, vector<256x1xf32>
    %85 = vector.broadcast %84 : vector<256x1xf32> to vector<256x3xf32>
    %86 = arith.mulf %83, %85 : vector<256x3xf32>
    %87 = arith.truncf %86 : vector<256x3xf32> to vector<256x3xbf16>
    %c8_49 = arith.constant 8 : index
    %c0_50 = arith.constant 0 : index
    %c0_51 = arith.constant 0 : index
    %88 = vector.load %arg6[%c8_49, %c0_50, %c0_51] : memref<9x3x32xbf16, #tpu.memory_space<vmem>>, vector<1x3x32xbf16>
    %89 = vector.shape_cast %88 : vector<1x3x32xbf16> to vector<3x32xbf16>
    %cst_52 = arith.constant dense<0.000000e+00> : vector<256x32xf32>
    %90 = tpu.matmul %87, %89, %cst_52 {dimension_numbers = #tpu.dot_dimension_numbers<[1], [0], [0], [1], [0, 0, 1, 1], [], []>} : vector<256x3xbf16>, vector<3x32xbf16>, vector<256x32xf32> -> vector<256x32xf32>
    %91 = arith.addf %82, %90 : vector<256x32xf32>
    %c0_53 = arith.constant 0 : index
    %c0_54 = arith.constant 0 : index
    %92 = vector.load %arg7[%c0_53, %c0_54] : memref<1x32xf32, #tpu.memory_space<vmem>>, vector<1x32xf32>
    %93 = vector.broadcast %92 : vector<1x32xf32> to vector<256x32xf32>
    %94 = arith.addf %91, %93 : vector<256x32xf32>
    %cst_55 = arith.constant 0.000000e+00 : f32
    %95 = vector.broadcast %cst_55 : f32 to vector<256x32xf32>
    %96 = arith.maximumf %94, %95 : vector<256x32xf32>
    %cst_56 = arith.constant 0.000000e+00 : f32
    %97 = vector.broadcast %cst_56 : f32 to vector<24x32xf32>
    %98 = tpu.concatenate %97, %96, %97 in 0 : vector<24x32xf32>, vector<256x32xf32>, vector<24x32xf32> -> vector<304x32xf32>
    %cst_57 = arith.constant 0.000000e+00 : f32
    %99 = vector.broadcast %cst_57 : f32 to vector<256x32xf32>
    %100 = vector.extract_strided_slice %98 {offsets = [7, 0], sizes = [256, 32], strides = [1, 1]} : vector<304x32xf32> to vector<256x32xf32>
    %c0_58 = arith.constant 0 : index
    %c0_59 = arith.constant 0 : index
    %101 = vector.load %arg2[%c0_58, %c0_59] : memref<256x9xf32, #tpu.memory_space<vmem>>, vector<256x1xf32>
    %102 = vector.broadcast %101 : vector<256x1xf32> to vector<256x32xf32>
    %103 = arith.mulf %100, %102 : vector<256x32xf32>
    %104 = arith.truncf %103 : vector<256x32xf32> to vector<256x32xbf16>
    %c0_60 = arith.constant 0 : index
    %c0_61 = arith.constant 0 : index
    %c0_62 = arith.constant 0 : index
    %105 = vector.load %arg8[%c0_60, %c0_61, %c0_62] : memref<9x32x32xbf16, #tpu.memory_space<vmem>>, vector<1x32x32xbf16>
    %106 = vector.shape_cast %105 : vector<1x32x32xbf16> to vector<32x32xbf16>
    %cst_63 = arith.constant dense<0.000000e+00> : vector<256x32xf32>
    %107 = tpu.matmul %104, %106, %cst_63 {dimension_numbers = #tpu.dot_dimension_numbers<[1], [0], [0], [1], [0, 0, 1, 1], [], []>} : vector<256x32xbf16>, vector<32x32xbf16>, vector<256x32xf32> -> vector<256x32xf32>
    %108 = arith.addf %99, %107 : vector<256x32xf32>
    %109 = vector.extract_strided_slice %98 {offsets = [8, 0], sizes = [256, 32], strides = [1, 1]} : vector<304x32xf32> to vector<256x32xf32>
    %c0_64 = arith.constant 0 : index
    %c1_65 = arith.constant 1 : index
    %110 = vector.load %arg2[%c0_64, %c1_65] : memref<256x9xf32, #tpu.memory_space<vmem>>, vector<256x1xf32>
    %111 = vector.broadcast %110 : vector<256x1xf32> to vector<256x32xf32>
    %112 = arith.mulf %109, %111 : vector<256x32xf32>
    %113 = arith.truncf %112 : vector<256x32xf32> to vector<256x32xbf16>
    %c1_66 = arith.constant 1 : index
    %c0_67 = arith.constant 0 : index
    %c0_68 = arith.constant 0 : index
    %114 = vector.load %arg8[%c1_66, %c0_67, %c0_68] : memref<9x32x32xbf16, #tpu.memory_space<vmem>>, vector<1x32x32xbf16>
    %115 = vector.shape_cast %114 : vector<1x32x32xbf16> to vector<32x32xbf16>
    %cst_69 = arith.constant dense<0.000000e+00> : vector<256x32xf32>
    %116 = tpu.matmul %113, %115, %cst_69 {dimension_numbers = #tpu.dot_dimension_numbers<[1], [0], [0], [1], [0, 0, 1, 1], [], []>} : vector<256x32xbf16>, vector<32x32xbf16>, vector<256x32xf32> -> vector<256x32xf32>
    %117 = arith.addf %108, %116 : vector<256x32xf32>
    %118 = vector.extract_strided_slice %98 {offsets = [9, 0], sizes = [256, 32], strides = [1, 1]} : vector<304x32xf32> to vector<256x32xf32>
    %c0_70 = arith.constant 0 : index
    %c2_71 = arith.constant 2 : index
    %119 = vector.load %arg2[%c0_70, %c2_71] : memref<256x9xf32, #tpu.memory_space<vmem>>, vector<256x1xf32>
    %120 = vector.broadcast %119 : vector<256x1xf32> to vector<256x32xf32>
    %121 = arith.mulf %118, %120 : vector<256x32xf32>
    %122 = arith.truncf %121 : vector<256x32xf32> to vector<256x32xbf16>
    %c2_72 = arith.constant 2 : index
    %c0_73 = arith.constant 0 : index
    %c0_74 = arith.constant 0 : index
    %123 = vector.load %arg8[%c2_72, %c0_73, %c0_74] : memref<9x32x32xbf16, #tpu.memory_space<vmem>>, vector<1x32x32xbf16>
    %124 = vector.shape_cast %123 : vector<1x32x32xbf16> to vector<32x32xbf16>
    %cst_75 = arith.constant dense<0.000000e+00> : vector<256x32xf32>
    %125 = tpu.matmul %122, %124, %cst_75 {dimension_numbers = #tpu.dot_dimension_numbers<[1], [0], [0], [1], [0, 0, 1, 1], [], []>} : vector<256x32xbf16>, vector<32x32xbf16>, vector<256x32xf32> -> vector<256x32xf32>
    %126 = arith.addf %117, %125 : vector<256x32xf32>
    %127 = vector.extract_strided_slice %98 {offsets = [23, 0], sizes = [256, 32], strides = [1, 1]} : vector<304x32xf32> to vector<256x32xf32>
    %c0_76 = arith.constant 0 : index
    %c3_77 = arith.constant 3 : index
    %128 = vector.load %arg2[%c0_76, %c3_77] : memref<256x9xf32, #tpu.memory_space<vmem>>, vector<256x1xf32>
    %129 = vector.broadcast %128 : vector<256x1xf32> to vector<256x32xf32>
    %130 = arith.mulf %127, %129 : vector<256x32xf32>
    %131 = arith.truncf %130 : vector<256x32xf32> to vector<256x32xbf16>
    %c3_78 = arith.constant 3 : index
    %c0_79 = arith.constant 0 : index
    %c0_80 = arith.constant 0 : index
    %132 = vector.load %arg8[%c3_78, %c0_79, %c0_80] : memref<9x32x32xbf16, #tpu.memory_space<vmem>>, vector<1x32x32xbf16>
    %133 = vector.shape_cast %132 : vector<1x32x32xbf16> to vector<32x32xbf16>
    %cst_81 = arith.constant dense<0.000000e+00> : vector<256x32xf32>
    %134 = tpu.matmul %131, %133, %cst_81 {dimension_numbers = #tpu.dot_dimension_numbers<[1], [0], [0], [1], [0, 0, 1, 1], [], []>} : vector<256x32xbf16>, vector<32x32xbf16>, vector<256x32xf32> -> vector<256x32xf32>
    %135 = arith.addf %126, %134 : vector<256x32xf32>
    %136 = vector.extract_strided_slice %98 {offsets = [24, 0], sizes = [256, 32], strides = [1, 1]} : vector<304x32xf32> to vector<256x32xf32>
    %c0_82 = arith.constant 0 : index
    %c4_83 = arith.constant 4 : index
    %137 = vector.load %arg2[%c0_82, %c4_83] : memref<256x9xf32, #tpu.memory_space<vmem>>, vector<256x1xf32>
    %138 = vector.broadcast %137 : vector<256x1xf32> to vector<256x32xf32>
    %139 = arith.mulf %136, %138 : vector<256x32xf32>
    %140 = arith.truncf %139 : vector<256x32xf32> to vector<256x32xbf16>
    %c4_84 = arith.constant 4 : index
    %c0_85 = arith.constant 0 : index
    %c0_86 = arith.constant 0 : index
    %141 = vector.load %arg8[%c4_84, %c0_85, %c0_86] : memref<9x32x32xbf16, #tpu.memory_space<vmem>>, vector<1x32x32xbf16>
    %142 = vector.shape_cast %141 : vector<1x32x32xbf16> to vector<32x32xbf16>
    %cst_87 = arith.constant dense<0.000000e+00> : vector<256x32xf32>
    %143 = tpu.matmul %140, %142, %cst_87 {dimension_numbers = #tpu.dot_dimension_numbers<[1], [0], [0], [1], [0, 0, 1, 1], [], []>} : vector<256x32xbf16>, vector<32x32xbf16>, vector<256x32xf32> -> vector<256x32xf32>
    %144 = arith.addf %135, %143 : vector<256x32xf32>
    %145 = vector.extract_strided_slice %98 {offsets = [25, 0], sizes = [256, 32], strides = [1, 1]} : vector<304x32xf32> to vector<256x32xf32>
    %c0_88 = arith.constant 0 : index
    %c5_89 = arith.constant 5 : index
    %146 = vector.load %arg2[%c0_88, %c5_89] : memref<256x9xf32, #tpu.memory_space<vmem>>, vector<256x1xf32>
    %147 = vector.broadcast %146 : vector<256x1xf32> to vector<256x32xf32>
    %148 = arith.mulf %145, %147 : vector<256x32xf32>
    %149 = arith.truncf %148 : vector<256x32xf32> to vector<256x32xbf16>
    %c5_90 = arith.constant 5 : index
    %c0_91 = arith.constant 0 : index
    %c0_92 = arith.constant 0 : index
    %150 = vector.load %arg8[%c5_90, %c0_91, %c0_92] : memref<9x32x32xbf16, #tpu.memory_space<vmem>>, vector<1x32x32xbf16>
    %151 = vector.shape_cast %150 : vector<1x32x32xbf16> to vector<32x32xbf16>
    %cst_93 = arith.constant dense<0.000000e+00> : vector<256x32xf32>
    %152 = tpu.matmul %149, %151, %cst_93 {dimension_numbers = #tpu.dot_dimension_numbers<[1], [0], [0], [1], [0, 0, 1, 1], [], []>} : vector<256x32xbf16>, vector<32x32xbf16>, vector<256x32xf32> -> vector<256x32xf32>
    %153 = arith.addf %144, %152 : vector<256x32xf32>
    %154 = vector.extract_strided_slice %98 {offsets = [39, 0], sizes = [256, 32], strides = [1, 1]} : vector<304x32xf32> to vector<256x32xf32>
    %c0_94 = arith.constant 0 : index
    %c6_95 = arith.constant 6 : index
    %155 = vector.load %arg2[%c0_94, %c6_95] : memref<256x9xf32, #tpu.memory_space<vmem>>, vector<256x1xf32>
    %156 = vector.broadcast %155 : vector<256x1xf32> to vector<256x32xf32>
    %157 = arith.mulf %154, %156 : vector<256x32xf32>
    %158 = arith.truncf %157 : vector<256x32xf32> to vector<256x32xbf16>
    %c6_96 = arith.constant 6 : index
    %c0_97 = arith.constant 0 : index
    %c0_98 = arith.constant 0 : index
    %159 = vector.load %arg8[%c6_96, %c0_97, %c0_98] : memref<9x32x32xbf16, #tpu.memory_space<vmem>>, vector<1x32x32xbf16>
    %160 = vector.shape_cast %159 : vector<1x32x32xbf16> to vector<32x32xbf16>
    %cst_99 = arith.constant dense<0.000000e+00> : vector<256x32xf32>
    %161 = tpu.matmul %158, %160, %cst_99 {dimension_numbers = #tpu.dot_dimension_numbers<[1], [0], [0], [1], [0, 0, 1, 1], [], []>} : vector<256x32xbf16>, vector<32x32xbf16>, vector<256x32xf32> -> vector<256x32xf32>
    %162 = arith.addf %153, %161 : vector<256x32xf32>
    %163 = vector.extract_strided_slice %98 {offsets = [40, 0], sizes = [256, 32], strides = [1, 1]} : vector<304x32xf32> to vector<256x32xf32>
    %c0_100 = arith.constant 0 : index
    %c7_101 = arith.constant 7 : index
    %164 = vector.load %arg2[%c0_100, %c7_101] : memref<256x9xf32, #tpu.memory_space<vmem>>, vector<256x1xf32>
    %165 = vector.broadcast %164 : vector<256x1xf32> to vector<256x32xf32>
    %166 = arith.mulf %163, %165 : vector<256x32xf32>
    %167 = arith.truncf %166 : vector<256x32xf32> to vector<256x32xbf16>
    %c7_102 = arith.constant 7 : index
    %c0_103 = arith.constant 0 : index
    %c0_104 = arith.constant 0 : index
    %168 = vector.load %arg8[%c7_102, %c0_103, %c0_104] : memref<9x32x32xbf16, #tpu.memory_space<vmem>>, vector<1x32x32xbf16>
    %169 = vector.shape_cast %168 : vector<1x32x32xbf16> to vector<32x32xbf16>
    %cst_105 = arith.constant dense<0.000000e+00> : vector<256x32xf32>
    %170 = tpu.matmul %167, %169, %cst_105 {dimension_numbers = #tpu.dot_dimension_numbers<[1], [0], [0], [1], [0, 0, 1, 1], [], []>} : vector<256x32xbf16>, vector<32x32xbf16>, vector<256x32xf32> -> vector<256x32xf32>
    %171 = arith.addf %162, %170 : vector<256x32xf32>
    %172 = vector.extract_strided_slice %98 {offsets = [41, 0], sizes = [256, 32], strides = [1, 1]} : vector<304x32xf32> to vector<256x32xf32>
    %c0_106 = arith.constant 0 : index
    %c8_107 = arith.constant 8 : index
    %173 = vector.load %arg2[%c0_106, %c8_107] : memref<256x9xf32, #tpu.memory_space<vmem>>, vector<256x1xf32>
    %174 = vector.broadcast %173 : vector<256x1xf32> to vector<256x32xf32>
    %175 = arith.mulf %172, %174 : vector<256x32xf32>
    %176 = arith.truncf %175 : vector<256x32xf32> to vector<256x32xbf16>
    %c8_108 = arith.constant 8 : index
    %c0_109 = arith.constant 0 : index
    %c0_110 = arith.constant 0 : index
    %177 = vector.load %arg8[%c8_108, %c0_109, %c0_110] : memref<9x32x32xbf16, #tpu.memory_space<vmem>>, vector<1x32x32xbf16>
    %178 = vector.shape_cast %177 : vector<1x32x32xbf16> to vector<32x32xbf16>
    %cst_111 = arith.constant dense<0.000000e+00> : vector<256x32xf32>
    %179 = tpu.matmul %176, %178, %cst_111 {dimension_numbers = #tpu.dot_dimension_numbers<[1], [0], [0], [1], [0, 0, 1, 1], [], []>} : vector<256x32xbf16>, vector<32x32xbf16>, vector<256x32xf32> -> vector<256x32xf32>
    %180 = arith.addf %171, %179 : vector<256x32xf32>
    %c0_112 = arith.constant 0 : index
    %c0_113 = arith.constant 0 : index
    %181 = vector.load %arg9[%c0_112, %c0_113] : memref<1x32xf32, #tpu.memory_space<vmem>>, vector<1x32xf32>
    %182 = vector.broadcast %181 : vector<1x32xf32> to vector<256x32xf32>
    %183 = arith.addf %180, %182 : vector<256x32xf32>
    %cst_114 = arith.constant 0.000000e+00 : f32
    %184 = vector.broadcast %cst_114 : f32 to vector<256x32xf32>
    %185 = arith.maximumf %183, %184 : vector<256x32xf32>
    %186 = arith.truncf %185 : vector<256x32xf32> to vector<256x32xbf16>
    %c0_115 = arith.constant 0 : index
    %c0_116 = arith.constant 0 : index
    %187 = vector.load %arg10[%c0_115, %c0_116] : memref<32x15xbf16, #tpu.memory_space<vmem>>, vector<32x15xbf16>
    %cst_117 = arith.constant dense<0.000000e+00> : vector<256x15xf32>
    %188 = tpu.matmul %186, %187, %cst_117 {dimension_numbers = #tpu.dot_dimension_numbers<[1], [0], [0], [1], [0, 0, 1, 1], [], []>} : vector<256x32xbf16>, vector<32x15xbf16>, vector<256x15xf32> -> vector<256x15xf32>
    %c0_118 = arith.constant 0 : index
    %c0_119 = arith.constant 0 : index
    %189 = vector.load %arg11[%c0_118, %c0_119] : memref<1x15xf32, #tpu.memory_space<vmem>>, vector<1x15xf32>
    %190 = vector.broadcast %189 : vector<1x15xf32> to vector<256x15xf32>
    %191 = arith.addf %188, %190 : vector<256x15xf32>
    %192 = vector.extract_strided_slice %191 {offsets = [0, 0], sizes = [256, 3], strides = [1, 1]} : vector<256x15xf32> to vector<256x3xf32>
    %c0_120 = arith.constant 0 : index
    %c0_121 = arith.constant 0 : index
    %c0_122 = arith.constant 0 : index
    %193 = vector.load %arg12[%c0_120, %c0_121, %c0_122] : memref<1x256x3xf32, #tpu.memory_space<vmem>>, vector<1x256x3xf32>
    %194 = vector.shape_cast %193 : vector<1x256x3xf32> to vector<256x3xf32>
    %195 = vector.shape_cast %192 : vector<256x3xf32> to vector<1x256x3xf32>
    tpu.vector_store %arg12[%c0_120, %c0_121, %c0_122], %195 {strides = array<i32>} : memref<1x256x3xf32, #tpu.memory_space<vmem>>, vector<1x256x3xf32>,
    %196 = vector.extract_strided_slice %191 {offsets = [0, 3], sizes = [256, 3], strides = [1, 1]} : vector<256x15xf32> to vector<256x3xf32>
    %197 = vector.extract_strided_slice %191 {offsets = [0, 6], sizes = [256, 3], strides = [1, 1]} : vector<256x15xf32> to vector<256x3xf32>
    %198 = vector.extract_strided_slice %191 {offsets = [0, 9], sizes = [256, 3], strides = [1, 1]} : vector<256x15xf32> to vector<256x3xf32>
    %cst_123 = arith.constant 4.13516665 : f32
    %199 = vector.broadcast %cst_123 : f32 to vector<256x3xf32>
    %200 = arith.minimumf %198, %199 : vector<256x3xf32>
    %201 = vector.extract_strided_slice %191 {offsets = [0, 12], sizes = [256, 3], strides = [1, 1]} : vector<256x15xf32> to vector<256x3xf32>
    %cst_124 = arith.constant 4.13516665 : f32
    %202 = vector.broadcast %cst_124 : f32 to vector<256x3xf32>
    %203 = arith.minimumf %201, %202 : vector<256x3xf32>
    %c0_125 = arith.constant 0 : index
    %c0_126 = arith.constant 0 : index
    %204 = vector.load %arg3[%c0_125, %c0_126] : memref<256x12xf32, #tpu.memory_space<vmem>>, vector<256x3xf32>
    %c0_127 = arith.constant 0 : index
    %c3_128 = arith.constant 3 : index
    %205 = vector.load %arg3[%c0_127, %c3_128] : memref<256x12xf32, #tpu.memory_space<vmem>>, vector<256x3xf32>
    %c0_129 = arith.constant 0 : index
    %c6_130 = arith.constant 6 : index
    %206 = vector.load %arg3[%c0_129, %c6_130] : memref<256x12xf32, #tpu.memory_space<vmem>>, vector<256x3xf32>
    %c0_131 = arith.constant 0 : index
    %c9 = arith.constant 9 : index
    %207 = vector.load %arg3[%c0_131, %c9] : memref<256x12xf32, #tpu.memory_space<vmem>>, vector<256x3xf32>
    %208 = arith.subf %206, %204 : vector<256x3xf32>
    %209 = arith.subf %207, %205 : vector<256x3xf32>
    %cst_132 = arith.constant 5.000000e-01 : f32
    %210 = vector.broadcast %cst_132 : f32 to vector<256x3xf32>
    %211 = arith.mulf %210, %208 : vector<256x3xf32>
    %212 = arith.addf %204, %211 : vector<256x3xf32>
    %cst_133 = arith.constant 5.000000e-01 : f32
    %213 = vector.broadcast %cst_133 : f32 to vector<256x3xf32>
    %214 = arith.mulf %213, %209 : vector<256x3xf32>
    %215 = arith.addf %205, %214 : vector<256x3xf32>
    %216 = arith.mulf %196, %208 : vector<256x3xf32>
    %217 = arith.addf %216, %212 : vector<256x3xf32>
    %218 = arith.mulf %197, %209 : vector<256x3xf32>
    %219 = arith.addf %218, %215 : vector<256x3xf32>
    %220 = math.exp %200 : vector<256x3xf32>
    %221 = arith.mulf %220, %208 : vector<256x3xf32>
    %222 = math.exp %203 : vector<256x3xf32>
    %223 = arith.mulf %222, %209 : vector<256x3xf32>
    %cst_134 = arith.constant 5.000000e-01 : f32
    %224 = vector.broadcast %cst_134 : f32 to vector<256x3xf32>
    %225 = arith.mulf %224, %221 : vector<256x3xf32>
    %226 = arith.subf %217, %225 : vector<256x3xf32>
    %cst_135 = arith.constant 0.000000e+00 : f32
    %cst_136 = arith.constant 1.600000e+01 : f32
    %227 = vector.broadcast %cst_135 : f32 to vector<256x3xf32>
    %228 = arith.maximumf %227, %226 : vector<256x3xf32>
    %229 = vector.broadcast %cst_136 : f32 to vector<256x3xf32>
    %230 = arith.minimumf %229, %228 : vector<256x3xf32>
    %cst_137 = arith.constant 5.000000e-01 : f32
    %231 = vector.broadcast %cst_137 : f32 to vector<256x3xf32>
    %232 = arith.mulf %231, %223 : vector<256x3xf32>
    %233 = arith.subf %219, %232 : vector<256x3xf32>
    %cst_138 = arith.constant 0.000000e+00 : f32
    %cst_139 = arith.constant 1.600000e+01 : f32
    %234 = vector.broadcast %cst_138 : f32 to vector<256x3xf32>
    %235 = arith.maximumf %234, %233 : vector<256x3xf32>
    %236 = vector.broadcast %cst_139 : f32 to vector<256x3xf32>
    %237 = arith.minimumf %236, %235 : vector<256x3xf32>
    %cst_140 = arith.constant 5.000000e-01 : f32
    %238 = vector.broadcast %cst_140 : f32 to vector<256x3xf32>
    %239 = arith.mulf %238, %221 : vector<256x3xf32>
    %240 = arith.addf %217, %239 : vector<256x3xf32>
    %cst_141 = arith.constant 0.000000e+00 : f32
    %cst_142 = arith.constant 1.600000e+01 : f32
    %241 = vector.broadcast %cst_141 : f32 to vector<256x3xf32>
    %242 = arith.maximumf %241, %240 : vector<256x3xf32>
    %243 = vector.broadcast %cst_142 : f32 to vector<256x3xf32>
    %244 = arith.minimumf %243, %242 : vector<256x3xf32>
    %cst_143 = arith.constant 5.000000e-01 : f32
    %245 = vector.broadcast %cst_143 : f32 to vector<256x3xf32>
    %246 = arith.mulf %245, %223 : vector<256x3xf32>
    %247 = arith.addf %219, %246 : vector<256x3xf32>
    %cst_144 = arith.constant 0.000000e+00 : f32
    %cst_145 = arith.constant 1.600000e+01 : f32
    %248 = vector.broadcast %cst_144 : f32 to vector<256x3xf32>
    %249 = arith.maximumf %248, %247 : vector<256x3xf32>
    %250 = vector.broadcast %cst_145 : f32 to vector<256x3xf32>
    %251 = arith.minimumf %250, %249 : vector<256x3xf32>
    %252 = tpu.concatenate %230, %237, %244, %251 in 1 : vector<256x3xf32>, vector<256x3xf32>, vector<256x3xf32>, vector<256x3xf32> -> vector<256x12xf32>
    %c0_146 = arith.constant 0 : index
    %c0_147 = arith.constant 0 : index
    %c0_148 = arith.constant 0 : index
    %253 = vector.load %arg13[%c0_146, %c0_147, %c0_148] : memref<1x256x12xf32, #tpu.memory_space<vmem>>, vector<1x256x12xf32>
    %254 = vector.shape_cast %253 : vector<1x256x12xf32> to vector<256x12xf32>
    %255 = vector.shape_cast %252 : vector<256x12xf32> to vector<1x256x12xf32>
    tpu.vector_store %arg13[%c0_146, %c0_147, %c0_148], %255 {strides = array<i32>} : memref<1x256x12xf32, #tpu.memory_space<vmem>>, vector<1x256x12xf32>,
    return
  }
  func.func @transform_0(%arg0: i32) -> (i32, i32, i32) {
    %c0_i32 = arith.constant 0 : i32
    %c0_i32_0 = arith.constant 0 : i32
    %c0_i32_1 = arith.constant 0 : i32
    return %arg0, %c0_i32, %c0_i32_0 : i32, i32, i32
  }
  func.func @transform_1(%arg0: i32) -> (i32, i32) {
    %c0_i32 = arith.constant 0 : i32
    %c0_i32_0 = arith.constant 0 : i32
    %c0_i32_1 = arith.constant 0 : i32
    return %c0_i32, %c0_i32_0 : i32, i32
  }
  func.func @transform_2(%arg0: i32) -> (i32, i32) {
    %c0_i32 = arith.constant 0 : i32
    %c0_i32_0 = arith.constant 0 : i32
    %c0_i32_1 = arith.constant 0 : i32
    return %c0_i32, %c0_i32_0 : i32, i32
  }
  func.func @transform_3(%arg0: i32) -> (i32, i32) {
    %c0_i32 = arith.constant 0 : i32
    %c0_i32_0 = arith.constant 0 : i32
    %c0_i32_1 = arith.constant 0 : i32
    return %c0_i32, %c0_i32_0 : i32, i32
  }
  func.func @transform_4(%arg0: i32) -> (i32, i32) {
    %c0_i32 = arith.constant 0 : i32
    %c0_i32_0 = arith.constant 0 : i32
    %c0_i32_1 = arith.constant 0 : i32
    return %c0_i32, %c0_i32_0 : i32, i32
  }
  func.func @transform_5(%arg0: i32) -> (i32, i32, i32) {
    %c0_i32 = arith.constant 0 : i32
    %c0_i32_0 = arith.constant 0 : i32
    %c0_i32_1 = arith.constant 0 : i32
    %c0_i32_2 = arith.constant 0 : i32
    return %c0_i32, %c0_i32_0, %c0_i32_1 : i32, i32, i32
  }
  func.func @transform_6(%arg0: i32) -> (i32, i32) {
    %c0_i32 = arith.constant 0 : i32
    %c0_i32_0 = arith.constant 0 : i32
    %c0_i32_1 = arith.constant 0 : i32
    return %c0_i32, %c0_i32_0 : i32, i32
  }
  func.func @transform_7(%arg0: i32) -> (i32, i32, i32) {
    %c0_i32 = arith.constant 0 : i32
    %c0_i32_0 = arith.constant 0 : i32
    %c0_i32_1 = arith.constant 0 : i32
    %c0_i32_2 = arith.constant 0 : i32
    return %c0_i32, %c0_i32_0, %c0_i32_1 : i32, i32, i32
  }
  func.func @transform_8(%arg0: i32) -> (i32, i32) {
    %c0_i32 = arith.constant 0 : i32
    %c0_i32_0 = arith.constant 0 : i32
    %c0_i32_1 = arith.constant 0 : i32
    return %c0_i32, %c0_i32_0 : i32, i32
  }
  func.func @transform_9(%arg0: i32) -> (i32, i32) {
    %c0_i32 = arith.constant 0 : i32
    %c0_i32_0 = arith.constant 0 : i32
    %c0_i32_1 = arith.constant 0 : i32
    return %c0_i32, %c0_i32_0 : i32, i32
  }
  func.func @transform_10(%arg0: i32) -> (i32, i32) {
    %c0_i32 = arith.constant 0 : i32
    %c0_i32_0 = arith.constant 0 : i32
    %c0_i32_1 = arith.constant 0 : i32
    return %c0_i32, %c0_i32_0 : i32, i32
  }
  func.func @transform_11(%arg0: i32) -> (i32, i32, i32) {
    %c0_i32 = arith.constant 0 : i32
    %c0_i32_0 = arith.constant 0 : i32
    %c0_i32_1 = arith.constant 0 : i32
    return %arg0, %c0_i32, %c0_i32_0 : i32, i32, i32
  }
  func.func @transform_12(%arg0: i32) -> (i32, i32, i32) {
    %c0_i32 = arith.constant 0 : i32
    %c0_i32_0 = arith.constant 0 : i32
    %c0_i32_1 = arith.constant 0 : i32
    return %arg0, %c0_i32, %c0_i32_0 : i32, i32, i32
  }
}

</mosaic_0001>

<bundles_post_ra>
// kernel: tpu_custom_call.1
= control target key start
LH: loop header
LB: loop body
LE: loop exit
PB: predicated region body
PF: predicated region fallthrough
CT: control target
= control target key end

     0   :  { %s13455_s21 = smov 0   ;;  %s18828_s0 = inlined_call_operand.vmem [shape: f32[2,256,3], index: 0, kind: input, shape index: {}]   ;;  %s18829_s1 = inlined_call_operand.vmem [shape: f32[256,9], index: 1, kind: input, shape index: {}]   ;;  %s18830_s2 = inlined_call_operand.vmem [shape: f32[256,12], index: 2, kind: input, shape index: {}]   ;;  %s18831_s3 = inlined_call_operand.vmem [shape: f32[1,3], index: 3, kind: input, shape index: {}]   ;;  %s18832_s4 = inlined_call_operand.vmem [shape: f32[1,3], index: 4, kind: input, shape index: {}]   ;;  %s18833_s5 = inlined_call_operand.vmem [shape: bf16[9,3,32], index: 5, kind: input, shape index: {}]   ;;  %s18834_s6 = inlined_call_operand.vmem [shape: f32[1,32], index: 6, kind: input, shape index: {}]   ;;  %s18835_s7 = inlined_call_operand.vmem [shape: bf16[9,32,32], index: 7, kind: input, shape index: {}]   ;;  %s18836_s8 = inlined_call_operand.vmem [shape: f32[1,32], index: 8, kind: input, shape index: {}]   ;;  %s18837_s9 = inlined_call_operand.vmem [shape: bf16[32,15], index: 9, kind: input, shape index: {}]   ;;  %s18838_s10 = inlined_call_operand.vmem [shape: f32[1,15], index: 10, kind: input, shape index: {}]   ;;  %s18839_s11 = inlined_call_operand.vmem [shape: f32[2,256,3], index: 11, kind: output, shape index: {0}]   ;;  %s18840_s12 = inlined_call_operand.vmem [shape: f32[2,256,12], index: 12, kind: output, shape index: {1}]  }
   0x1 LB: > { %s11224_s22 = sadd.s32 4294967295, %s13374_s21   ;;  %p11228_p0 = scmp.ge.s32.totalorder %s13374_s21, 1  ;;  %s13374_s21 = sphi %s13455_s21, %s23_s21  }
   0x2   : > { %p365_p1 = scmp.lt.s32.totalorder %s13374_s21, 3 }
   0x4   : > { %p366_p2 = pnand %p11228_p0, %p365_p1 }
   0x6   : > { %369 = sbr.rel (%p366_p2) target bundleno = 2276 (0x8e4), region = 64 }
   0xd   : > { %v13466_v0 = vld [vmem:[%s18829_s1 + $0x10] sm:$0xff]  ;;  %v13471_v1 = vld [vmem:[%s18829_s1] sm:$0xff]  ;;  %v18841_v2 = vmov 1   ;;  %v13480_v3 = vld [vmem:[%s18829_s1 + $0x18] sm:$0xff]  ;;  %vm1073_vm0 = vcmask 1040384   ;;  %vm1074_vm1 = vcmask 1041408  }
   0xe   : > { %13145 = vset.pattern.permute.xlu1 %v18841_v2  ;;  %13144 = vset.pattern.permute.xlu0 %v18841_v2  ;;  %v13485_v4 = vld [vmem:[%s18829_s1 + $0x8] sm:$0xff]  ;;  %v13497_v6 = vld [vmem:[%s18829_s1 + $0x20] sm:$0xff]  ;;  %v13377_v7 = vmov 65535   ;;  %v13507_v10 = vld [vmem:[%s18829_s1 + $0x38] sm:$0xff]  ;;  %v13378_v19 = vmov 0   ;;  %v13379_v40 = vmov 2  }
   0xf   : > { %855 = vperm.xlu1 %13145, %v13466_v0   ;;  %847 = vperm.xlu0 %13144, %v13471_v1   ;;  %v13492_v5 = vld [vmem:[%s18829_s1 + $0x28] sm:$0xff]  ;;  %v1075_v8 = vsel %vm1073_vm0, 4294967295, %v13377_v7  ;;  %v13512_v11 = vld [vmem:[%s18829_s1 + $0x30] sm:$0xff]  ;;  %v11237_v12 = vld [vmem:[%s18833_s5 + $0x2] sm:$0x3]  ;;  %p412_p3 = scmp.lt.s32.totalorder %s11224_s22, 1 }
  0x10   : > { %v13502_v9 = vsel %vm1074_vm1, %v1075_v8, 0  ;;  %v13520_v13 = vld [vmem:[%s18829_s1 + $0x48] sm:$0xff]  ;;  %v13528_v15 = vld [vmem:[%s18829_s1 + $0x40] sm:$0xff]  ;;  %v13533_v16 = vld [vmem:[%s18829_s1 + $0x58] sm:$0xff]  ;;  %vm1024_vm2 = vcmask 23552   ;;  %vm698_vm3 = vcmask 1046528  }
  0x11   : > { %19301 = vst [vmem:[#allocation2_spill] sm:$0xff] %v13502_v9  ;;  %v1078_v14 = vand.u32 %v11237_v12, %v13502_v9  ;;  %v13538_v17 = vld [vmem:[%s18829_s1 + $0x50] sm:$0xff]  ;;  %v13545_v18 = vld [vmem:[%s18829_s1 + $0x68] sm:$0xff]  ;;  %v13558_v20 = vld [vmem:[%s18829_s1 + $0x60] sm:$0xff]  ;;  %s20196_s22 = smov (!%p412_p3, %s11224_s22), 1  ;;  %vm5774_vm6 = vcmask 261120  }
  0x12   : > { %v13566_v21 = vld [vmem:[%s18829_s1 + $0x70] sm:$0xff]  ;;  %v13573_v22 = vld [vmem:[%s18829_s1 + $0x78] sm:$0xff]  ;;  %v845_v23 = vld [vmem:[%s18833_s5] sm:$0x3]  ;;  %s13701_s27 = sshll.u32 %s20196_s22, 8  ;;  %s13386_s24 = smov 6  }
  0x13   : > { %859 = vperm.xlu1 %13145, %v13480_v3   ;;  %851 = vperm.xlu0 %13144, %v13485_v4   ;;  %v13584_v24 = vand.u32 %v13502_v9, %v845_v23  ;;  %v13592_v25 = vld [vmem:[%s18829_s1 + $0x88] sm:$0xff]  ;;  %v13599_v26 = vld [vmem:[%s18829_s1 + $0x98] sm:$0xff]  ;;  %v13612_v28 = vld [vmem:[%s18829_s1 + $0x80] sm:$0xff]  ;;  %s13708_s30 = scalar_lea.vmem %s18828_s0, %s13701_s27  ;;  %vm1241_vm4 = vsmask.f32 4352  ;;  %s13387_s17 = smov 122  }
  0x14   : > { %11942 = vmatprep.subr.bf16.mxu0 %v1078_v14  ;;  %12608 = vmatprep.subr.bf16.mxu1 %v1078_v14  ;;  %v13606_v27 = vld [vmem:[%s18829_s1 + $0xa8] sm:$0xff]  ;;  %v13618_v29 = vld [vmem:[%s18829_s1 + $0xb8] sm:$0xff]  ;;  %v13624_v30 = vld [vmem:[%s18829_s1 + $0x90] sm:$0xff]  ;;  %vm1850_vm5 = vsmask.f32 7424  ;;  %s13388_s23 = smov 125   ;;  %s18216_s19 = scalar_lea.vmem %s18839_s11, %s13701_s27 }
  0x15   : > { %11943 = vmatpush3.bf16.msra.mxu0 %v1078_v14  ;;  %12609 = vmatpush3.bf16.msra.mxu1 %v1078_v14  ;;  %v13630_v31 = vld [vmem:[%s18829_s1 + $0xc8] sm:$0xff]  ;;  %v13636_v32 = vld [vmem:[%s18829_s1 + $0xa0] sm:$0xff]  ;;  %v13642_v33 = vld [vmem:[%s18829_s1 + $0xd8] sm:$0xff]  ;;  %s13389_s20 = smov 3   ;;  %vm11037_vm7 = vcmask 48128   ;;  %vm11070_vm8 = vcmask 72704   ;;  %s18690_s25 = scalar_lea.vmem %s18840_s12, %s13701_s27 }
  0x16   : > { %11976 = vmatprep.subr.bf16.mxu0 %v13584_v24  ;;  %v13648_v34 = vld [vmem:[%s18829_s1 + $0xb0] sm:$0xff]  ;;  %v13654_v35 = vld [vmem:[%s18829_s1 + $0xe8] sm:$0xff]  ;;  %v13660_v36 = vld [vmem:[%s18829_s1 + $0xc0] sm:$0xff]  ;;  %vm11103_vm9 = vcmask 97280  }
  0x17   : > { %867 = vperm.xlu1 %13145, %v13492_v5   ;;  %863 = vperm.xlu0 %13144, %v13497_v6   ;;  %v13666_v37 = vld [vmem:[%s18829_s1 + $0xf8] sm:$0xff]  ;;  %v13672_v38 = vld [vmem:[%s18829_s1 + $0xd0] sm:$0xff]  ;;  %v13679_v39 = vld [vmem:[%s18829_s1 + $0xe0] sm:$0xff] }
  0x18   : > { %v13686_v41 = vld [vmem:[%s18829_s1 + $0xf0] sm:$0xff]  ;;  %v428_v42 = vld [vmem:[%s13708_s30] sm:$0xff]  ;;  %v429_v44 = vld [vmem:[%s13708_s30 + $0x8] sm:$0xff] }
  0x19   : > { %v13716_v43 = vld [vmem:[%s18831_s3] ss:$0 sm:$0xff]  ;;  %v431_v47 = vld [vmem:[%s13708_s30 + $0x18] sm:$0xff]  ;;  %v430_v48 = vld [vmem:[%s13708_s30 + $0x10] sm:$0xff] }
  0x1a   : > { %v467_v45 = vsub.f32 %v428_v42, %v13716_v43  ;;  %v468_v46 = vsub.f32 %v429_v44, %v13716_v43  ;;  %v13728_v49 = vld [vmem:[%s18832_s4] ss:$0 sm:$0xff]  ;;  %v470_v52 = vsub.f32 %v431_v47, %v13716_v43  ;;  %v469_v53 = vsub.f32 %v430_v48, %v13716_v43  ;;  %v433_v56 = vld [vmem:[%s13708_s30 + $0x28] sm:$0xff]  ;;  %v434_v23 = vld [vmem:[%s13708_s30 + $0x30] sm:$0xff] }
  0x1b   : > { %875 = vperm.xlu1 %13145, %v13507_v10   ;;  %871 = vperm.xlu0 %13144, %v13512_v11   ;;  %v432_v57 = vld [vmem:[%s13708_s30 + $0x20] sm:$0xff]  ;;  %v472_v63 = vsub.f32 %v433_v56, %v13716_v43 }
  0x1c   : > { %v13736_v54 = vmul.f32 %v13728_v49, %v467_v45  ;;  %v13740_v55 = vmul.f32 %v13728_v49, %v468_v46  ;;  %v13748_v61 = vmul.f32 %v13728_v49, %v470_v52  ;;  %v13751_v62 = vmul.f32 %v13728_v49, %v469_v53 }
  0x1d   : > { %v471_v14 = vsub.f32 %v432_v57, %v13716_v43  ;;  %v13773_v47 = vmul.f32 %v13728_v49, %v472_v63 }
  0x1e   : > { %19303 = vst [vmem:[#allocation4_spill] sm:$0xff] %v13736_v54  ;;  %19304 = vst [vmem:[#allocation5_spill] sm:$0xff] %v13740_v55 }
  0x1f   : > { %883 = vperm.xlu1 %13145, %v13520_v13   ;;  %879 = vperm.xlu0 %13144, %v13528_v15   ;;  %19306 = vst [vmem:[#allocation7_spill] sm:$0xff] %v13748_v61  ;;  %19307 = vst [vmem:[#allocation8_spill] sm:$0xff] %v13751_v62  ;;  %v13788_v57 = vmul.f32 %v13728_v49, %v471_v14 }
  0x20   : > { %19311 = vst [vmem:[#allocation12_spill] sm:$0xff] %v13773_v47 }
  0x21   : > { %19312 = vst [vmem:[#allocation13_spill] sm:$0xff] %v13788_v57 }
  0x23   : > { %891 = vperm.xlu1 %13145, %v13533_v16   ;;  %887 = vperm.xlu0 %13144, %v13538_v17  }
  0x27   : > { %13146 = vset.pattern.permute.xlu1 %v13378_v19  ;;  %899 = vperm.xlu0 %13144, %v13545_v18  }
  0x28   : > { %576 = vperm.xlu1 %13146, %v13485_v4  }
  0x2b   : > { %13148 = vset.pattern.permute.xlu0 %v13378_v19 }
  0x2c   : > { %580 = vperm.xlu1 %13146, %v13466_v0   ;;  %572 = vperm.xlu0 %13148, %v13471_v1  }
  0x30   : > { %588 = vperm.xlu1 %13146, %v13497_v6   ;;  %584 = vperm.xlu0 %13148, %v13480_v3  }
  0x34   : > { %13147 = vset.pattern.permute.xlu1 %v18841_v2  ;;  %592 = vperm.xlu0 %13148, %v13492_v5  }
  0x35   : > { %895 = vperm.xlu1 %13147, %v13558_v20  }
  0x38   : > { %596 = vperm.xlu0 %13148, %v13512_v11  }
  0x39   : > { %903 = vperm.xlu1 %13147, %v13566_v21  }
  0x3c   : > { %608 = vperm.xlu0 %13148, %v13520_v13  }
  0x3d   : > { %907 = vperm.xlu1 %13147, %v13573_v22  }
  0x40   : > { %616 = vperm.xlu0 %13148, %v13533_v16  }
  0x41   : > { %13149 = vset.pattern.permute.xlu1 %v13378_v19  ;;  %v435_v19 = vld [vmem:[%s13708_s30 + $0x38] sm:$0xff] }
  0x42   : > { %600 = vperm.xlu1 %13149, %v13507_v10   ;;  %v474_v48 = vsub.f32 %v435_v19, %v13716_v43 }
  0x44   : > { %624 = vperm.xlu0 %13148, %v13545_v18  }
  0x46   : > { %604 = vperm.xlu1 %13149, %v13528_v15  }
  0x48   : > { %632 = vperm.xlu0 %13148, %v13573_v22  }
  0x4a   : > { %612 = vperm.xlu1 %13149, %v13538_v17  }
  0x4c   : > { %640 = vperm.xlu0 %13148, %v13592_v25  }
  0x4e   : > { %620 = vperm.xlu1 %13149, %v13558_v20  }
  0x50   : > { %648 = vperm.xlu0 %13148, %v13599_v26  }
  0x52   : > { %628 = vperm.xlu1 %13149, %v13566_v21  }
  0x54   : > { %656 = vperm.xlu0 %13148, %v13606_v27  }
  0x56   : > { %636 = vperm.xlu1 %13149, %v13612_v28  }
  0x58   : > { %664 = vperm.xlu0 %13148, %v13618_v29  }
  0x5a   : > { %644 = vperm.xlu1 %13149, %v13624_v30  }
  0x5c   : > { %672 = vperm.xlu0 %13148, %v13630_v31  }
  0x5e   : > { %652 = vperm.xlu1 %13149, %v13636_v32  }
  0x60   : > { %680 = vperm.xlu0 %13148, %v13642_v33  }
  0x62   : > { %660 = vperm.xlu1 %13149, %v13648_v34  }
  0x64   : > { %688 = vperm.xlu0 %13148, %v13654_v35  }
  0x66   : > { %668 = vperm.xlu1 %13149, %v13660_v36  }
  0x68   : > { %696 = vperm.xlu0 %13148, %v13666_v37  }
  0x6a   : > { %676 = vperm.xlu1 %13149, %v13672_v38  }
  0x6c   : > { %13151 = vset.pattern.permute.xlu0 %v13379_v40 }
  0x6d   : > { %1610 = vperm.xlu0 %13151, %v13485_v4  }
  0x6e   : > { %684 = vperm.xlu1 %13149, %v13679_v39  }
  0x71   : > { %1619 = vperm.xlu0 %13151, %v13497_v6  }
  0x72   : > { %692 = vperm.xlu1 %13149, %v13686_v41  }
  0x75   : > { %1625 = vperm.xlu0 %13151, %v13512_v11  }
  0x76   : > { %13150 = vset.pattern.permute.xlu1 %v13379_v40  ;;  %v11270_v40 = vld [vmem:[%s18833_s5 + $0x4] sm:$0x3] }
  0x77   : > { %1607 = vperm.xlu1 %13150, %v13471_v1   ;;  %v13778_v52 = vand.u32 %v11270_v40, %v13502_v9 }
  0x79   : > { %1631 = vperm.xlu0 %13151, %v13528_v15  }
  0x7b   : > { %1613 = vperm.xlu1 %13150, %v13466_v0  }
  0x7d   : > { %1637 = vperm.xlu0 %13151, %v13538_v17  }
  0x7f   : > { %1616 = vperm.xlu1 %13150, %v13480_v3  }
  0x81   : > { %1643 = vperm.xlu0 %13151, %v13558_v20  }
  0x83   : > { %1622 = vperm.xlu1 %13150, %v13492_v5  }
  0x85   : > { %1649 = vperm.xlu0 %13151, %v13566_v21  }
  0x87   : > { %1628 = vperm.xlu1 %13150, %v13507_v10  }
  0x89   : > { %1655 = vperm.xlu0 %13151, %v13612_v28  }
  0x8b   : > { %1634 = vperm.xlu1 %13150, %v13520_v13  }
  0x8d   : > { %1661 = vperm.xlu0 %13151, %v13624_v30  }
  0x8e   : > { %v13731_v50 = vpop.permute.xlu1 %855  ;;  %v848_v51 = vpop.permute.xlu0 %847 }
  0x8f   : > { %19302 = vst [vmem:[#allocation3_spill] sm:$0xff] %v13731_v50  ;;  %1640 = vperm.xlu1 %13150, %v13533_v16   ;;  %v974_v58 = vmul.f32 0.0, %v848_v51  ;;  %v976_v7 = vmul.f32 %v13731_v50, %v13736_v54  ;;  %v473_v51 = vsub.f32 %v434_v23, %v13716_v43 }
  0x91   : > { %1667 = vperm.xlu0 %13151, %v13636_v32   ;;  %v13803_v19 = vmul.f32 %v13728_v49, %v473_v51 }
  0x92   : > { %v13745_v59 = vpop.permute.xlu1 %859  ;;  %v852_v60 = vpop.permute.xlu0 %851 }
  0x93   : > { %19305 = vst [vmem:[#allocation6_spill] sm:$0xff] %v13745_v59  ;;  %v977_v8 = vmul.f32 %v13745_v59, %v13740_v55  ;;  %v975_v12 = vmul.f32 0.0, %v852_v60  ;;  %1646 = vperm.xlu1 %13150, %v13545_v18   ;;  %v436_v60 = vld [vmem:[%s13708_s30 + $0x40] sm:$0xff]  ;;  %19315 = vst [vmem:[#allocation16_spill] sm:$0xff] %v13803_v19 }
  0x94   : > { %v475_v40 = vsub.f32 %v436_v60, %v13716_v43 }
  0x95   : > { %v1007_v42 = vpack.c.bf16 %v977_v8, %v976_v7  ;;  %v13765_v44 = vpack.c.bf16 %v975_v12, %v974_v58  ;;  %1673 = vperm.xlu0 %13151, %v13648_v34   ;;  %v437_v58 = vld [vmem:[%s13708_s30 + $0x48] sm:$0xff]  ;;  %v13800_v12 = vmul.f32 %v13728_v49, %v474_v48 }
  0x96   : > { %v13768_v45 = vpop.permute.xlu1 %867  ;;  %v13770_v46 = vpop.permute.xlu0 %863  ;;  %v476_v14 = vsub.f32 %v437_v58, %v13716_v43  ;;  %v13828_v60 = vmul.f32 %v13728_v49, %v475_v40 }
  0x97   : > { %19308 = vst [vmem:[#allocation9_spill] sm:$0xff] %v13765_v44  ;;  %19309 = vst [vmem:[#allocation10_spill] sm:$0xff] %v13768_v45  ;;  %v979_v53 = vmul.f32 %v13768_v45, %v13748_v61  ;;  %v978_v56 = vmul.f32 %v13770_v46, %v13751_v62  ;;  %1652 = vperm.xlu1 %13150, %v13573_v22   ;;  %11944 = vmatprep.mubr.msk.bf16.mxu0 %vm1024_vm2, %v13765_v44  ;;  %v441_v44 = vld [vmem:[%s13708_s30 + $0x68] sm:$0xff] }
  0x98   : > { %19310 = vst [vmem:[#allocation11_spill] sm:$0xff] %v13770_v46  ;;  %11945 = vmatmul.mubr.msk.bf16.vlgmr.msra.gmra.mrb[0].mxu0 %vm1024_vm2, %v1007_v42  ;;  %v13825_v58 = vmul.f32 %v13728_v49, %v476_v14 }
  0x99   : > { %v1008_v63 = vpack.c.bf16 %v979_v53, %v978_v56  ;;  %1679 = vperm.xlu0 %13151, %v13660_v36   ;;  %11977 = vmatpush3.bf16.msra.mxu0 %v13584_v24 }
  0x9a   : > { %v13795_v7 = vpop.permute.xlu1 %875  ;;  %v13797_v8 = vpop.permute.xlu0 %871  ;;  %12010 = vmatprep.subr.bf16.mxu0 %v13778_v52 }
  0x9b   : > { %19313 = vst [vmem:[#allocation14_spill] sm:$0xff] %v13795_v7  ;;  %19314 = vst [vmem:[#allocation15_spill] sm:$0xff] %v13797_v8  ;;  %v981_v23 = vmul.f32 %v13795_v7, %v13773_v47  ;;  %v980_v24 = vmul.f32 %v13797_v8, %v13788_v57  ;;  %1658 = vperm.xlu1 %13150, %v13592_v25   ;;  %11948 = vmatprep.mubr.msk.bf16.mxu0 %vm1024_vm2, %v1008_v63 }
  0x9d   : > { %v1009_v42 = vpack.c.bf16 %v981_v23, %v980_v24  ;;  %1685 = vperm.xlu0 %13151, %v13672_v38  }
  0x9e   : > { %v13815_v48 = vpop.permute.xlu1 %883  ;;  %v13817_v51 = vpop.permute.xlu0 %879 }
  0x9f   : > { %19316 = vst [vmem:[#allocation17_spill] sm:$0xff] %v13815_v48  ;;  %19317 = vst [vmem:[#allocation18_spill] sm:$0xff] %v13817_v51  ;;  %v983_v53 = vmul.f32 %v13815_v48, %v13800_v12  ;;  %v982_v56 = vmul.f32 %v13817_v51, %v13803_v19  ;;  %1664 = vperm.xlu1 %13150, %v13599_v26   ;;  %v13380_v51 = vmov 3  }
  0xa0   : > { %11949 = vmatmul.mubr.msk.bf16.gmra.mrb[4].mxu0 %vm1024_vm2, %v1009_v42 }
  0xa1   : > { %v1010_v63 = vpack.c.bf16 %v983_v53, %v982_v56  ;;  %1691 = vperm.xlu0 %13151, %v13679_v39   ;;  %v439_v56 = vld [vmem:[%s13708_s30 + $0x58] sm:$0xff] }
  0xa2   : > { %v13832_v23 = vpop.permute.xlu1 %891  ;;  %v13834_v24 = vpop.permute.xlu0 %887 }
  0xa3   : > { %19318 = vst [vmem:[#allocation19_spill] sm:$0xff] %v13832_v23  ;;  %19319 = vst [vmem:[#allocation20_spill] sm:$0xff] %v13834_v24  ;;  %v985_v2 = vmul.f32 %v13832_v23, %v13825_v58  ;;  %v984_v14 = vmul.f32 %v13834_v24, %v13828_v60  ;;  %1670 = vperm.xlu1 %13150, %v13606_v27   ;;  %11952 = vmatprep.mubr.msk.bf16.mxu0 %vm1024_vm2, %v1010_v63  ;;  %v438_v23 = vld [vmem:[%s13708_s30 + $0x50] sm:$0xff] }
  0xa4   : > { %v478_v24 = vsub.f32 %v439_v56, %v13716_v43  ;;  %v477_v48 = vsub.f32 %v438_v23, %v13716_v43 }
  0xa5   : > { %v1011_v40 = vpack.c.bf16 %v985_v2, %v984_v14  ;;  %1697 = vperm.xlu0 %13151, %v13686_v41  }
  0xa6   : > { %v13843_v42 = vpop.permute.xlu0 %899  ;;  %v13861_v23 = vmul.f32 %v13728_v49, %v477_v48 }
  0xa7   : > { %19320 = vst [vmem:[#allocation21_spill] sm:$0xff] %v13843_v42  ;;  %v577_v53 = vpop.permute.xlu1 %576  ;;  %1676 = vperm.xlu1 %13150, %v13618_v29  }
  0xa8   : > { %11953 = vmatmul.mubr.msk.bf16.gmra.mrb[8].mxu0 %vm1024_vm2, %v1011_v40  ;;  %v700_v14 = vrot.slane %v577_v53, 1  ;;  %19322 = vst [vmem:[#allocation23_spill] sm:$0xff] %v13861_v23 }
  0xa9   : > { %13152 = vset.pattern.permute.xlu0 %v13380_v51 }
  0xaa   : > { %2228 = vperm.xlu0 %13152, %v13471_v1   ;;  %v13856_v1 = vmul.f32 %v13728_v49, %v478_v24 }
  0xab   : > { %v581_v63 = vpop.permute.xlu1 %580  ;;  %1682 = vperm.xlu1 %13150, %v13630_v31   ;;  %v573_v2 = vpop.permute.xlu0 %572 }
  0xac   : > { %v702_v7 = vrot.slane %v581_v63, 1  ;;  %v699_v8 = vrot.slane %v573_v2, 1  ;;  %19321 = vst [vmem:[#allocation22_spill] sm:$0xff] %v13856_v1  ;;  %v987_v24 = vmul.f32 %v13843_v42, %v13856_v1 }
  0xae   : > { %v701_v40 = vsel %vm698_vm3, %v699_v8, %v700_v14  ;;  %v795_v46 = vmul.f32 0.0, %v699_v8  ;;  %2237 = vperm.xlu0 %13152, %v13480_v3   ;;  %v703_v53 = vsel %vm698_vm3, %v700_v14, %v702_v7  ;;  %v440_v3 = vld [vmem:[%s13708_s30 + $0x60] sm:$0xff] }
  0xaf   : > { %v796_v56 = vmul.f32 0.0, %v701_v40  ;;  %v589_v59 = vpop.permute.xlu1 %588  ;;  %1688 = vperm.xlu1 %13150, %v13642_v33   ;;  %v585_v50 = vpop.permute.xlu0 %584  ;;  %v13871_v40 = vmul.f32 0.0, %v703_v53  ;;  %v480_v53 = vsub.f32 %v441_v44, %v13716_v43 }
  0xb0   : > { %v706_v63 = vrot.slane %v589_v59, 1  ;;  %v704_v2 = vrot.slane %v585_v50, 1 }
  0xb1   : > { %v828_v45 = vpack.c.bf16 %v796_v56, %v795_v46  ;;  %19324 = vst [vmem:[#allocation25_spill] sm:$0xff] %v13871_v40  ;;  %v479_v56 = vsub.f32 %v440_v3, %v13716_v43 }
  0xb2   : > { %v13864_v8 = vsel %vm698_vm3, %v702_v7, %v704_v2  ;;  %2243 = vperm.xlu0 %13152, %v13492_v5   ;;  %v13877_v46 = vsel %vm698_vm3, %v704_v2, %v706_v63 }
  0xb3   : > { %19323 = vst [vmem:[#allocation24_spill] sm:$0xff] %v13864_v8  ;;  %v798_v59 = vmul.f32 %v13864_v8, %v13736_v54  ;;  %1694 = vperm.xlu1 %13150, %v13654_v35   ;;  %v593_v50 = vpop.permute.xlu0 %592  ;;  %19325 = vst [vmem:[#allocation26_spill] sm:$0xff] %v13877_v46  ;;  %v1243_v42 = vshrl.u32 %v828_v45, 16  ;;  %v1246_v8 = vshll.u32 %v828_v45, 16  ;;  %v799_v2 = vmul.f32 %v13877_v46, %v13740_v55 }
  0xb4   : > { %v708_v7 = vrot.slane %v593_v50, 1  ;;  %v13879_v48 = vpop.permute.xlu1 %895 }
  0xb5   : > { %19326 = vst [vmem:[#allocation27_spill] sm:$0xff] %v13879_v48  ;;  %v829_v14 = vpack.c.bf16 %v798_v59, %v13871_v40  ;;  %v986_v5 = vmul.f32 %v13879_v48, %v13861_v23 }
  0xb6   : > { %v13887_v54 = vsel %vm698_vm3, %v706_v63, %v708_v7  ;;  %2249 = vperm.xlu0 %13152, %v13507_v10   ;;  %v13898_v63 = vmul.f32 %v13728_v49, %v479_v56  ;;  %v13902_v10 = vmul.f32 %v13728_v49, %v480_v53 }
  0xb7   : > { %19327 = vst [vmem:[#allocation28_spill] sm:$0xff] %v13887_v54  ;;  %v800_v59 = vmul.f32 %v13887_v54, %v13751_v62  ;;  %v1012_v50 = vpack.c.bf16 %v987_v24, %v986_v5  ;;  %1700 = vperm.xlu1 %13150, %v13666_v37   ;;  %v597_v40 = vpop.permute.xlu0 %596  ;;  %v1251_v3 = vshrl.u32 %v829_v14, 16  ;;  %v1254_v44 = vshll.u32 %v829_v14, 16 }
  0xb8   : > { %v13895_v48 = vpop.permute.xlu1 %903  ;;  %19329 = vst [vmem:[#allocation30_spill] sm:$0xff] %v13902_v10  ;;  %v1245_v24 = vrot.slane %v1243_v42, 3  ;;  %v1248_v5 = vrot.slane %v1246_v8, 4  ;;  %v710_v56 = vrot.slane %v597_v40, 1 }
  0xb9   : > { %19328 = vst [vmem:[#allocation29_spill] sm:$0xff] %v13895_v48  ;;  %v830_v45 = vpack.c.bf16 %v800_v59, %v799_v2  ;;  %11956 = vmatprep.mubr.msk.bf16.mxu0 %vm1024_vm2, %v1012_v50  ;;  %v1253_v46 = vrot.slane %v1251_v3, 3  ;;  %v1256_v55 = vrot.slane %v1254_v44, 4  ;;  %v988_v53 = vmul.f32 %v13895_v48, %v13898_v63  ;;  %v444_v44 = vld [vmem:[%s13708_s30 + $0x80] sm:$0xff] }
  0xba   : > { %2255 = vperm.xlu0 %13152, %v13520_v13   ;;  %v13921_v40 = vsel %vm698_vm3, %v708_v7, %v710_v56  ;;  %v443_v7 = vld [vmem:[%s13708_s30 + $0x78] sm:$0xff]  ;;  %v14337_v48 = vld [vmem:[%s18829_s1 + $0x80] sm:$0xff] }
  0xbb   : > { %13153 = vset.pattern.permute.xlu1 %v13380_v51  ;;  %v13905_v54 = vpop.permute.xlu0 %608  ;;  %v1260_v62 = vshrl.u32 %v830_v45, 16  ;;  %v1263_v14 = vshll.u32 %v830_v45, 16  ;;  %v1257_v50 = vor.u32 %v1256_v55, %v1253_v46  ;;  %v13915_v51 = vor.u32 %v1248_v5, %v1245_v24  ;;  %19332 = vst [vmem:[#allocation33_spill] sm:$0xff] %v13921_v40  ;;  %19376 = vst [vmem:[#allocation70_spill] sm:$0xff] %v14337_v48 }
  0xbc   : > { %v13907_v2 = vpop.permute.xlu1 %907  ;;  %2231 = vperm.xlu1 %13153, %v13485_v4   ;;  %v716_v24 = vrot.slane %v13905_v54, 1 }
  0xbd   : > { %19330 = vst [vmem:[#allocation31_spill] sm:$0xff] %v13907_v2  ;;  %v989_v59 = vmul.f32 %v13907_v2, %v13902_v10  ;;  %19331 = vst [vmem:[#allocation32_spill] sm:$0xff] %v13915_v51  ;;  %v1262_v4 = vrot.slane %v1260_v62, 3  ;;  %v1265_v8 = vrot.slane %v1263_v14, 4  ;;  %v801_v62 = vmul.f32 %v13921_v40, %v13748_v61  ;;  %v445_v14 = vld [vmem:[%s13708_s30 + $0x88] sm:$0xff] }
  0xbe   : > { %2261 = vperm.xlu0 %13152, %v13533_v16   ;;  %v1258_v16 = vsel %vm1241_vm4, %v13915_v51, %v1257_v50  ;;  %v484_v54 = vsub.f32 %v445_v14, %v13716_v43 }
  0xbf   : > { %v1013_v13 = vpack.c.bf16 %v989_v59, %v988_v53  ;;  %v13917_v42 = vpop.permute.xlu0 %616  ;;  %v1266_v5 = vor.u32 %v1265_v8, %v1262_v4 }
  0xc0   : > { %2234 = vperm.xlu1 %13153, %v13466_v0   ;;  %v442_v0 = vld [vmem:[%s13708_s30 + $0x70] sm:$0xff] }
  0xc1   : > { %v601_v55 = vpop.permute.xlu1 %600  ;;  %11957 = vmatmul.mubr.msk.bf16.gmra.mrb[12].mxu0 %vm1024_vm2, %v1013_v13  ;;  %v481_v13 = vsub.f32 %v442_v0, %v13716_v43  ;;  %v720_v0 = vrot.slane %v13917_v42, 1 }
  0xc2   : > { %v712_v46 = vrot.slane %v601_v55, 1  ;;  %11978 = vmatprep.mubr.msk.bf16.mxu0 %vm1024_vm2, %v1258_v16  ;;  %2267 = vperm.xlu0 %13152, %v13545_v18   ;;  %v482_v55 = vsub.f32 %v443_v7, %v13716_v43  ;;  %v446_v7 = vld [vmem:[%s13708_s30 + $0x90] sm:$0xff] }
  0xc3   : > { %v13930_v3 = vpop.permute.xlu0 %624 }
  0xc4   : > { %v13936_v45 = vsel %vm698_vm3, %v710_v56, %v712_v46  ;;  %2240 = vperm.xlu1 %13153, %v13497_v6   ;;  %v483_v56 = vsub.f32 %v444_v44, %v13716_v43  ;;  %v13969_v42 = vmul.f32 %v13728_v49, %v482_v55 }
  0xc5   : > { %19333 = vst [vmem:[#allocation34_spill] sm:$0xff] %v13936_v45  ;;  %v802_v18 = vmul.f32 %v13936_v45, %v13788_v57  ;;  %v605_v53 = vpop.permute.xlu1 %604  ;;  %v450_v45 = vld [vmem:[%s13708_s30 + $0xb0] sm:$0xff] }
  0xc6   : > { %v714_v59 = vrot.slane %v605_v53, 1  ;;  %2273 = vperm.xlu0 %13152, %v13573_v22   ;;  %v1267_v22 = vsel %vm1241_vm4, %v1257_v50, %v1266_v5  ;;  %19337 = vst [vmem:[#allocation38_spill] sm:$0xff] %v13969_v42  ;;  %v13972_v50 = vmul.f32 %v13728_v49, %v483_v56 }
  0xc7   : > { %v831_v16 = vpack.c.bf16 %v802_v18, %v801_v62  ;;  %v13947_v6 = vpop.permute.xlu0 %632 }
  0xc8   : > { %v13951_v4 = vsel %vm698_vm3, %v712_v46, %v714_v59  ;;  %v13954_v8 = vsel %vm698_vm3, %v714_v59, %v716_v24  ;;  %2246 = vperm.xlu1 %13153, %v13512_v11   ;;  %v13966_v11 = vmul.f32 %v13728_v49, %v481_v13 }
  0xc9   : > { %19334 = vst [vmem:[#allocation35_spill] sm:$0xff] %v13951_v4  ;;  %19335 = vst [vmem:[#allocation36_spill] sm:$0xff] %v13954_v8  ;;  %v803_v62 = vmul.f32 %v13951_v4, %v13773_v47  ;;  %v804_v44 = vmul.f32 %v13954_v8, %v13803_v19  ;;  %v613_v14 = vpop.permute.xlu1 %612  ;;  %11979 = vmatmul.mubr.msk.bf16.vlgmr.msra.gmra.mrb[0].mxu0 %vm1024_vm2, %v1267_v22  ;;  %v1269_v46 = vshrl.u32 %v831_v16, 16  ;;  %v1272_v18 = vshll.u32 %v831_v16, 16  ;;  %v448_v4 = vld [vmem:[%s13708_s30 + $0xa0] sm:$0xff] }
  0xca   : > { %v718_v53 = vrot.slane %v613_v14, 1  ;;  %19336 = vst [vmem:[#allocation37_spill] sm:$0xff] %v13966_v11  ;;  %2279 = vperm.xlu0 %13152, %v13592_v25   ;;  %12011 = vmatpush3.bf16.msra.mxu0 %v13778_v52  ;;  %v485_v16 = vsub.f32 %v446_v7, %v13716_v43  ;;  %v447_v14 = vld [vmem:[%s13708_s30 + $0x98] sm:$0xff]  ;;  %v724_v25 = vrot.slane %v13930_v3, 1  ;;  %v13989_v52 = vmul.f32 %v13728_v49, %v484_v54 }
  0xcb   : > { %v832_v59 = vpack.c.bf16 %v804_v44, %v803_v62  ;;  %v1271_v51 = vrot.slane %v1269_v46, 3  ;;  %v1274_v8 = vrot.slane %v1272_v18, 4  ;;  %v13976_v22 = vpop.permute.xlu0 %640  ;;  %v11287_v46 = vld [vmem:[%s18833_s5 + $0x6] sm:$0x3]  ;;  %v486_v3 = vsub.f32 %v447_v14, %v13716_v43 }
  0xcc   : > { %v13981_v13 = vsel %vm698_vm3, %v716_v24, %v718_v53  ;;  %v13984_v55 = vsel %vm698_vm3, %v718_v53, %v720_v0  ;;  %2252 = vperm.xlu1 %13153, %v13528_v15   ;;  %v14001_v54 = vand.u32 %v11287_v46, %v13502_v9  ;;  %v728_v14 = vrot.slane %v13947_v6, 1 }
  0xcd   : > { %19338 = vst [vmem:[#allocation39_spill] sm:$0xff] %v13981_v13  ;;  %19339 = vst [vmem:[#allocation40_spill] sm:$0xff] %v13984_v55  ;;  %v805_v56 = vmul.f32 %v13981_v13, %v13800_v12  ;;  %v806_v7 = vmul.f32 %v13984_v55, %v13828_v60  ;;  %v621_v62 = vpop.permute.xlu1 %620  ;;  %v1275_v24 = vor.u32 %v1274_v8, %v1271_v51  ;;  %v1278_v44 = vshrl.u32 %v832_v59, 16 }
  0xce   : > { %v722_v15 = vrot.slane %v621_v62, 1  ;;  %v1281_v18 = vshll.u32 %v832_v59, 16  ;;  %2285 = vperm.xlu0 %13152, %v13599_v26   ;;  %v14007_v8 = vmul.f32 %v13728_v49, %v485_v16  ;;  %12044 = vmatprep.subr.bf16.mxu0 %v14001_v54  ;;  %v487_v6 = vsub.f32 %v448_v4, %v13716_v43 }
  0xcf   : > { %v833_v53 = vpack.c.bf16 %v806_v7, %v805_v56  ;;  %v1276_v13 = vsel %vm1241_vm4, %v1266_v5, %v1275_v24  ;;  %v1280_v55 = vrot.slane %v1278_v44, 3  ;;  %v14004_v51 = vpop.permute.xlu0 %648  ;;  %v449_v56 = vld [vmem:[%s13708_s30 + $0xa8] sm:$0xff] }
  0xd0   : > { %v14011_v59 = vsel %vm698_vm3, %v720_v0, %v722_v15  ;;  %v14014_v26 = vsel %vm698_vm3, %v722_v15, %v724_v25  ;;  %2258 = vperm.xlu1 %13153, %v13538_v17   ;;  %11982 = vmatprep.mubr.msk.bf16.mxu0 %vm1024_vm2, %v1276_v13  ;;  %v1283_v5 = vrot.slane %v1281_v18, 4  ;;  %v14026_v13 = vmul.f32 %v13728_v49, %v486_v3 }
  0xd1   : > { %19340 = vst [vmem:[#allocation41_spill] sm:$0xff] %v14011_v59  ;;  %19341 = vst [vmem:[#allocation42_spill] sm:$0xff] %v14014_v26  ;;  %v807_v7 = vmul.f32 %v14011_v59, %v13825_v58  ;;  %v808_v16 = vmul.f32 %v14014_v26, %v13861_v23  ;;  %v629_v0 = vpop.permute.xlu1 %628  ;;  %v1287_v62 = vshrl.u32 %v833_v53, 16  ;;  %v1290_v44 = vshll.u32 %v833_v53, 16 }
  0xd2   : > { %v726_v46 = vrot.slane %v629_v0, 1  ;;  %v1284_v17 = vor.u32 %v1283_v5, %v1280_v55  ;;  %2291 = vperm.xlu0 %13152, %v13606_v27   ;;  %v488_v26 = vsub.f32 %v449_v56, %v13716_v43  ;;  %v732_v27 = vrot.slane %v13976_v22, 1 }
  0xd3   : > { %v834_v15 = vpack.c.bf16 %v808_v16, %v807_v7  ;;  %v1289_v18 = vrot.slane %v1287_v62, 3  ;;  %v1292_v59 = vrot.slane %v1290_v44, 4  ;;  %v14030_v40 = vpop.permute.xlu0 %656  ;;  %v489_v22 = vsub.f32 %v450_v45, %v13716_v43 }
  0xd4   : > { %v14035_v53 = vsel %vm698_vm3, %v724_v25, %v726_v46  ;;  %v14038_v55 = vsel %vm698_vm3, %v726_v46, %v728_v14  ;;  %2264 = vperm.xlu1 %13153, %v13558_v20   ;;  %v1285_v4 = vsel %vm1241_vm4, %v1275_v24, %v1284_v17  ;;  %v14049_v20 = vmul.f32 %v13728_v49, %v487_v6 }
  0xd5   : > { %19342 = vst [vmem:[#allocation43_spill] sm:$0xff] %v14035_v53  ;;  %19343 = vst [vmem:[#allocation44_spill] sm:$0xff] %v14038_v55  ;;  %v809_v3 = vmul.f32 %v14035_v53, %v13856_v1  ;;  %v810_v5 = vmul.f32 %v14038_v55, %v13898_v63  ;;  %11983 = vmatmul.mubr.msk.bf16.gmra.mrb[4].mxu0 %vm1024_vm2, %v1285_v4  ;;  %v637_v25 = vpop.permute.xlu1 %636  ;;  %v1293_v56 = vor.u32 %v1292_v59, %v1289_v18  ;;  %v451_v59 = vld [vmem:[%s13708_s30 + $0xb8] sm:$0xff]  ;;  %v453_v53 = vld [vmem:[%s13708_s30 + $0xc8] sm:$0xff] }
  0xd6   : > { %v1296_v7 = vshrl.u32 %v834_v15, 16  ;;  %v730_v16 = vrot.slane %v637_v25, 1  ;;  %v1299_v0 = vshll.u32 %v834_v15, 16  ;;  %2297 = vperm.xlu0 %13152, %v13618_v29   ;;  %v14057_v4 = vmul.f32 %v13728_v49, %v488_v26 }
  0xd7   : > { %v835_v24 = vpack.c.bf16 %v810_v5, %v809_v3  ;;  %v1294_v62 = vsel %vm1241_vm4, %v1284_v17, %v1293_v56  ;;  %v14054_v46 = vpop.permute.xlu0 %664  ;;  %v736_v29 = vrot.slane %v14004_v51, 1  ;;  %v452_v17 = vld [vmem:[%s13708_s30 + $0xc0] sm:$0xff]  ;;  %v490_v51 = vsub.f32 %v451_v59, %v13716_v43  ;;  %v454_v59 = vld [vmem:[%s13708_s30 + $0xd0] sm:$0xff] }
  0xd8   : > { %v1298_v44 = vrot.slane %v1296_v7, 3  ;;  %v14061_v15 = vsel %vm698_vm3, %v728_v14, %v730_v16  ;;  %v14064_v6 = vsel %vm698_vm3, %v730_v16, %v732_v27  ;;  %2270 = vperm.xlu1 %13153, %v13566_v21   ;;  %11986 = vmatprep.mubr.msk.bf16.mxu0 %vm1024_vm2, %v1294_v62  ;;  %v1301_v45 = vrot.slane %v1299_v0, 4 }
  0xd9   : > { %19344 = vst [vmem:[#allocation45_spill] sm:$0xff] %v14061_v15  ;;  %19345 = vst [vmem:[#allocation46_spill] sm:$0xff] %v14064_v6  ;;  %v811_v26 = vmul.f32 %v14061_v15, %v13902_v10  ;;  %v812_v18 = vmul.f32 %v14064_v6, %v13966_v11  ;;  %v645_v14 = vpop.permute.xlu1 %644  ;;  %v1305_v3 = vshrl.u32 %v835_v24, 16  ;;  %v1308_v5 = vshll.u32 %v835_v24, 16 }
  0xda   : > { %v734_v25 = vrot.slane %v645_v14, 1  ;;  %v1302_v7 = vor.u32 %v1301_v45, %v1298_v44  ;;  %v14075_v21 = vmul.f32 %v13728_v49, %v489_v22  ;;  %2303 = vperm.xlu0 %13152, %v13630_v31   ;;  %v491_v6 = vsub.f32 %v452_v17, %v13716_v43 }
  0xdb   : > { %v836_v16 = vpack.c.bf16 %v812_v18, %v811_v26  ;;  %v1307_v0 = vrot.slane %v1305_v3, 3  ;;  %v1310_v62 = vrot.slane %v1308_v5, 4  ;;  %v14079_v15 = vpop.permute.xlu0 %672  ;;  %v740_v31 = vrot.slane %v14030_v40, 1 }
  0xdc   : > { %v14084_v24 = vsel %vm698_vm3, %v732_v27, %v734_v25  ;;  %v14087_v44 = vsel %vm698_vm3, %v734_v25, %v736_v29  ;;  %2276 = vperm.xlu1 %13153, %v13612_v28   ;;  %v1303_v22 = vsel %vm1241_vm4, %v1293_v56, %v1302_v7  ;;  %v14099_v28 = vmul.f32 %v13728_v49, %v490_v51 }
  0xdd   : > { %19346 = vst [vmem:[#allocation47_spill] sm:$0xff] %v14084_v24  ;;  %19347 = vst [vmem:[#allocation48_spill] sm:$0xff] %v14087_v44  ;;  %v813_v45 = vmul.f32 %v14084_v24, %v13969_v42  ;;  %v814_v17 = vmul.f32 %v14087_v44, %v13972_v50  ;;  %11987 = vmatmul.mubr.msk.bf16.gmra.mrb[8].mxu0 %vm1024_vm2, %v1303_v22  ;;  %v653_v27 = vpop.permute.xlu1 %652  ;;  %v1311_v26 = vor.u32 %v1310_v62, %v1307_v0  ;;  %v14310_v44 = vld [vmem:[%s18829_s1 + $0x70] sm:$0xff] }
  0xde   : > { %v1314_v18 = vshrl.u32 %v836_v16, 16  ;;  %v738_v14 = vrot.slane %v653_v27, 1  ;;  %v1317_v3 = vshll.u32 %v836_v16, 16  ;;  %19348 = vst [vmem:[#allocation49_spill] sm:$0xff] %v14099_v28  ;;  %v492_v56 = vsub.f32 %v453_v53, %v13716_v43  ;;  %2309 = vperm.xlu0 %13152, %v13642_v33  }
  0xdf   : > { %v837_v40 = vpack.c.bf16 %v814_v17, %v813_v45  ;;  %v1312_v5 = vsel %vm1241_vm4, %v1302_v7, %v1311_v26  ;;  %v14104_v24 = vpop.permute.xlu0 %680  ;;  %v493_v22 = vsub.f32 %v454_v59, %v13716_v43  ;;  %v744_v33 = vrot.slane %v14054_v46, 1 }
  0xe0   : > { %v1316_v25 = vrot.slane %v1314_v18, 3  ;;  %v14108_v0 = vsel %vm698_vm3, %v736_v29, %v738_v14  ;;  %v14111_v16 = vsel %vm698_vm3, %v738_v14, %v740_v31  ;;  %2282 = vperm.xlu1 %13153, %v13624_v30   ;;  %11990 = vmatprep.mubr.msk.bf16.mxu0 %vm1024_vm2, %v1312_v5  ;;  %v1319_v53 = vrot.slane %v1317_v3, 4 }
  0xe1   : > { %19349 = vst [vmem:[#allocation50_spill] sm:$0xff] %v14108_v0  ;;  %19350 = vst [vmem:[#allocation51_spill] sm:$0xff] %v14111_v16  ;;  %v815_v7 = vmul.f32 %v14108_v0, %v13989_v52  ;;  %v816_v51 = vmul.f32 %v14111_v16, %v14007_v8  ;;  %v661_v29 = vpop.permute.xlu1 %660  ;;  %v1323_v62 = vshrl.u32 %v837_v40, 16  ;;  %v1326_v59 = vshll.u32 %v837_v40, 16  ;;  %v455_v16 = vld [vmem:[%s13708_s30 + $0xd8] sm:$0xff]  ;;  %v457_v40 = vld [vmem:[%s13708_s30 + $0xe8] sm:$0xff] }
  0xe2   : > { %v742_v45 = vrot.slane %v661_v29, 1  ;;  %v1320_v17 = vor.u32 %v1319_v53, %v1316_v25  ;;  %v14121_v30 = vmul.f32 %v13728_v49, %v491_v6  ;;  %v14124_v27 = vmul.f32 %v13728_v49, %v492_v56  ;;  %2315 = vperm.xlu0 %13152, %v13654_v35   ;;  %v456_v0 = vld [vmem:[%s13708_s30 + $0xe0] sm:$0xff] }
  0xe3   : > { %v838_v46 = vpack.c.bf16 %v816_v51, %v815_v7  ;;  %v1325_v18 = vrot.slane %v1323_v62, 3  ;;  %v1328_v14 = vrot.slane %v1326_v59, 4  ;;  %v14127_v3 = vpop.permute.xlu0 %688  ;;  %v14130_v5 = vmul.f32 %v13728_v49, %v493_v22 }
  0xe4   : > { %v14135_v25 = vsel %vm698_vm3, %v740_v31, %v742_v45  ;;  %v14138_v6 = vsel %vm698_vm3, %v742_v45, %v744_v33  ;;  %2288 = vperm.xlu1 %13153, %v13636_v32   ;;  %v1321_v35 = vsel %vm1241_vm4, %v1311_v26, %v1320_v17  ;;  %v748_v56 = vrot.slane %v14079_v15, 1 }
  0xe5   : > { %19351 = vst [vmem:[#allocation52_spill] sm:$0xff] %v14135_v25  ;;  %19352 = vst [vmem:[#allocation53_spill] sm:$0xff] %v14138_v6  ;;  %v817_v53 = vmul.f32 %v14135_v25, %v14026_v13  ;;  %v818_v22 = vmul.f32 %v14138_v6, %v14049_v20  ;;  %11991 = vmatmul.mubr.msk.bf16.gmra.mrb[12].mxu0 %vm1024_vm2, %v1321_v35  ;;  %v669_v31 = vpop.permute.xlu1 %668  ;;  %v1329_v7 = vor.u32 %v1328_v14, %v1325_v18 }
  0xe6   : > { %v1332_v51 = vshrl.u32 %v838_v46, 16  ;;  %v746_v29 = vrot.slane %v669_v31, 1  ;;  %v1335_v62 = vshll.u32 %v838_v46, 16  ;;  %v494_v32 = vsub.f32 %v455_v16, %v13716_v43  ;;  %2321 = vperm.xlu0 %13152, %v13666_v37  }
  0xe7   : > { %v496_v26 = vsub.f32 %v457_v40, %v13716_v43  ;;  %v839_v15 = vpack.c.bf16 %v818_v22, %v817_v53  ;;  %v1330_v59 = vsel %vm1241_vm4, %v1320_v17, %v1329_v7  ;;  %v697_v25 = vpop.permute.xlu0 %696  ;;  %v752_v16 = vrot.slane %v14104_v24, 1 }
  0xe8   : > { %v1334_v45 = vrot.slane %v1332_v51, 3  ;;  %v14154_v6 = vsel %vm698_vm3, %v744_v33, %v746_v29  ;;  %v14157_v18 = vsel %vm698_vm3, %v746_v29, %v748_v56  ;;  %2294 = vperm.xlu1 %13153, %v13648_v34   ;;  %11994 = vmatprep.mubr.msk.bf16.mxu0 %vm1024_vm2, %v1330_v59  ;;  %v1337_v46 = vrot.slane %v1335_v62, 4  ;;  %v14176_v59 = vld [vmem:[%s18829_s1 + $0x8] sm:$0xff] }
  0xe9   : > { %19353 = vst [vmem:[#allocation54_spill] sm:$0xff] %v14154_v6  ;;  %19354 = vst [vmem:[#allocation55_spill] sm:$0xff] %v14157_v18  ;;  %v819_v37 = vmul.f32 %v14154_v6, %v14057_v4  ;;  %v820_v17 = vmul.f32 %v14157_v18, %v14075_v21  ;;  %v677_v14 = vpop.permute.xlu1 %676  ;;  %v1341_v40 = vshrl.u32 %v839_v15, 16  ;;  %v1344_v33 = vshll.u32 %v839_v15, 16 }
  0xea   : > { %v750_v35 = vrot.slane %v677_v14, 1  ;;  %v1338_v53 = vor.u32 %v1337_v46, %v1334_v45  ;;  %v495_v22 = vsub.f32 %v456_v0, %v13716_v43  ;;  %v14168_v34 = vmul.f32 %v13728_v49, %v496_v26 }
  0xeb   : > { %v18883_v31 = vmov 4   ;;  %v840_v24 = vpack.c.bf16 %v820_v17, %v819_v37  ;;  %v1343_v51 = vrot.slane %v1341_v40, 3  ;;  %v1346_v29 = vrot.slane %v1344_v33, 4 }
  0xec   : > { %13155 = vset.pattern.permute.xlu0 %v18883_v31  ;;  %v14171_v62 = vrot.slane %v697_v25, 1  ;;  %v14180_v43 = vsel %vm698_vm3, %v748_v56, %v750_v35  ;;  %v14183_v0 = vsel %vm698_vm3, %v750_v35, %v752_v16  ;;  %2300 = vperm.xlu1 %13153, %v13660_v36   ;;  %v1339_v26 = vsel %vm1241_vm4, %v1329_v7, %v1338_v53  ;;  %v14188_v15 = vpop.permute.xlu0 %1610  ;;  %v14204_v31 = vld [vmem:[%s18829_s1 + $0x20] sm:$0xff] }
  0xed   : > { %2872 = vperm.xlu0 %13155, %v14176_v59   ;;  %19356 = vst [vmem:[#allocation57_spill] sm:$0xff] %v14180_v43  ;;  %19357 = vst [vmem:[#allocation58_spill] sm:$0xff] %v14183_v0  ;;  %v756_v25 = vrot.slane %v14127_v3, 1  ;;  %v821_v45 = vmul.f32 %v14180_v43, %v14099_v28  ;;  %v822_v46 = vmul.f32 %v14183_v0, %v14121_v30  ;;  %11995 = vmatmul.mubr.msk.bf16.gmra.mrb[16].mxu0 %vm1024_vm2, %v1339_v26  ;;  %v685_v56 = vpop.permute.xlu1 %684 }
  0xee   : > { %19355 = vst [vmem:[#allocation56_spill] sm:$0xff] %v14171_v62  ;;  %v1347_v37 = vor.u32 %v1346_v29, %v1343_v51  ;;  %v1350_v17 = vshrl.u32 %v840_v24, 16  ;;  %v754_v14 = vrot.slane %v685_v56, 1  ;;  %v14196_v36 = vmul.f32 %v13728_v49, %v494_v32 }
  0xef   : > { %v1353_v7 = vshll.u32 %v840_v24, 16  ;;  %v841_v40 = vpack.c.bf16 %v822_v46, %v821_v45  ;;  %v827_v33 = vmul.f32 %v14171_v62, %v14168_v34 }
  0xf0   : > { %v1348_v3 = vsel %vm1241_vm4, %v1338_v53, %v1347_v37  ;;  %v1352_v35 = vrot.slane %v1350_v17, 3  ;;  %v14208_v51 = vsel %vm698_vm3, %v752_v16, %v754_v14  ;;  %v14211_v32 = vsel %vm698_vm3, %v754_v14, %v756_v25  ;;  %2306 = vperm.xlu1 %13153, %v13672_v38   ;;  %v14218_v24 = vpop.permute.xlu0 %1619 }
  0xf1   : > { %2884 = vperm.xlu0 %13155, %v14204_v31   ;;  %19358 = vst [vmem:[#allocation59_spill] sm:$0xff] %v14208_v51  ;;  %19359 = vst [vmem:[#allocation60_spill] sm:$0xff] %v14211_v32  ;;  %11998 = vmatprep.mubr.msk.bf16.mxu0 %vm1024_vm2, %v1348_v3  ;;  %v14216_v53 = vmul.f32 %v13728_v49, %v495_v22  ;;  %v823_v29 = vmul.f32 %v14208_v51, %v14124_v27  ;;  %v693_v16 = vpop.permute.xlu1 %692  ;;  %v1355_v45 = vrot.slane %v1353_v7, 4  ;;  %v14227_v49 = vld [vmem:[%s18829_s1 + $0x30] sm:$0xff] }
  0xf2   : > { %v824_v26 = vmul.f32 %v14211_v32, %v14130_v5  ;;  %v1359_v46 = vshrl.u32 %v841_v40, 16  ;;  %v758_v56 = vrot.slane %v693_v16, 1  ;;  %v1362_v17 = vshll.u32 %v841_v40, 16  ;;  %19360 = vst [vmem:[#allocation61_spill] sm:$0xff] %v14227_v49 }
  0xf3   : > { %v844_v38 = vpack.c.bf16 %v827_v33, %v827_v33  ;;  %v1356_v43 = vor.u32 %v1355_v45, %v1352_v35  ;;  %v1703_v40 = vrot.slane %v14188_v15, 7 }
  0xf4   : > { %v842_v14 = vpack.c.bf16 %v824_v26, %v823_v29  ;;  %v1361_v3 = vrot.slane %v1359_v46, 3  ;;  %v14231_v22 = vsel %vm698_vm3, %v756_v25, %v758_v56  ;;  %v14235_v7 = vsel %vm698_vm3, %v758_v56, %v14171_v62  ;;  %2312 = vperm.xlu1 %13153, %v13679_v39   ;;  %v14239_v35 = vpop.permute.xlu0 %1625 }
  0xf5   : > { %2892 = vperm.xlu0 %13155, %v14227_v49   ;;  %19361 = vst [vmem:[#allocation62_spill] sm:$0xff] %v14231_v22  ;;  %19362 = vst [vmem:[#allocation63_spill] sm:$0xff] %v14235_v7  ;;  %v1364_v33 = vrot.slane %v1362_v17, 4  ;;  %v825_v29 = vmul.f32 %v14231_v22, %v14196_v36  ;;  %v826_v26 = vmul.f32 %v14235_v7, %v14216_v53  ;;  %v14250_v17 = vld [vmem:[%s18829_s1 + $0x40] sm:$0xff]  ;;  %v1386_v22 = vshrl.u32 %v844_v38, 16 }
  0xf6   : > { %v1357_v25 = vsel %vm1241_vm4, %v1347_v37, %v1356_v43  ;;  %v1368_v16 = vshrl.u32 %v842_v14, 16  ;;  %v1608_v45 = vpop.permute.xlu1 %1607  ;;  %v1371_v56 = vshll.u32 %v842_v14, 16  ;;  %19363 = vst [vmem:[#allocation64_spill] sm:$0xff] %v14250_v17  ;;  %v1389_v32 = vshll.u32 %v844_v38, 16 }
  0xf7   : > { %11999 = vmatmul.mubr.msk.bf16.gmra.mrb[20].mxu0 %vm1024_vm2, %v1357_v25  ;;  %v1365_v46 = vor.u32 %v1364_v33, %v1361_v3  ;;  %v843_v39 = vpack.c.bf16 %v826_v26, %v825_v29  ;;  %v1702_v62 = vrot.slane %v1608_v45, 7  ;;  %v1713_v6 = vrot.slane %v14239_v35, 7  ;;  %v14322_v35 = vld [vmem:[%s18829_s1 + $0x18] sm:$0xff] }
  0xf8   : > { %v1370_v15 = vrot.slane %v1368_v16, 3  ;;  %2318 = vperm.xlu1 %13153, %v13686_v41   ;;  %v1373_v25 = vrot.slane %v1371_v56, 4  ;;  %v14255_v7 = vpop.permute.xlu0 %1631  ;;  %v14262_v41 = vld [vmem:[%s18829_s1 + $0x50] sm:$0xff]  ;;  %v19365_v56 = vmov 4  }
  0xf9   : > { %2900 = vperm.xlu0 %13155, %v14250_v17   ;;  %v1366_v37 = vsel %vm1241_vm4, %v1356_v43, %v1365_v46  ;;  %v1798_v14 = vmul.f32 0.0, %v1702_v62  ;;  %v1704_v3 = vsel %vm1073_vm0, %v1702_v62, %v1703_v40  ;;  %v1377_v33 = vshrl.u32 %v843_v39, 16  ;;  %19364 = vst [vmem:[#allocation65_spill] sm:$0xff] %v14262_v41 }
  0xfa   : > { %12002 = vmatprep.mubr.msk.bf16.mxu0 %vm1024_vm2, %v1366_v37  ;;  %v1380_v29 = vshll.u32 %v843_v39, 16  ;;  %v1799_v26 = vmul.f32 0.0, %v1704_v3  ;;  %v1614_v16 = vpop.permute.xlu1 %1613  ;;  %v1374_v45 = vor.u32 %v1373_v25, %v1370_v15  ;;  %v1388_v39 = vrot.slane %v1386_v22, 3  ;;  %v14272_v15 = vld [vmem:[%s18829_s1] sm:$0xff] }
  0xfb   : > { %v1705_v51 = vrot.slane %v1614_v16, 7  ;;  %v1379_v18 = vrot.slane %v1377_v33, 3  ;;  %v1391_v3 = vrot.slane %v1389_v32, 4  ;;  %v14284_v32 = vld [vmem:[%s18829_s1 + $0x60] sm:$0xff]  ;;  %v1717_v2 = vrot.slane %v14255_v7, 7  ;;  %v14350_v7 = vld [vmem:[%s18829_s1 + $0x28] sm:$0xff] }
  0xfc   : > { %v1382_v38 = vrot.slane %v1380_v29, 4  ;;  %v1831_v43 = vpack.c.bf16 %v1799_v26, %v1798_v14  ;;  %13154 = vset.pattern.permute.xlu1 %v19365_v56  ;;  %v1375_v62 = vsel %vm1241_vm4, %v1365_v46, %v1374_v45  ;;  %v14267_v37 = vpop.permute.xlu0 %1637  ;;  %v1709_v46 = vrot.slane %v14218_v24, 7  ;;  %19367 = vst [vmem:[#allocation67_spill] sm:$0xff] %v14284_v32  ;;  %v14296_v24 = vld [vmem:[%s18829_s1 + $0x10] sm:$0xff] }
  0xfd   : > { %2908 = vperm.xlu0 %13155, %v14262_v41   ;;  %2868 = vperm.xlu1 %13154, %v14272_v15   ;;  %v14277_v14 = vsel %vm1073_vm0, %v1703_v40, %v1705_v51  ;;  %v1392_v16 = vor.u32 %v1391_v3, %v1388_v39 }
  0xfe   : > { %v1383_v25 = vor.u32 %v1382_v38, %v1379_v18  ;;  %v1617_v33 = vpop.permute.xlu1 %1616  ;;  %19366 = vst [vmem:[#allocation66_spill] sm:$0xff] %v14277_v14  ;;  %v1854_v18 = vshll.u32 %v1831_v43, 16 }
  0xff   : > { %12003 = vmatmul.mubr.msk.bf16.gmra.mrb[24].mxu0 %vm1024_vm2, %v1375_v62  ;;  %v1707_v29 = vrot.slane %v1617_v33, 7  ;;  %v19370_v62 = vld [vmem:[#allocation5_spill] sm:$0xff] }
 0x100   : > { %v1384_v22 = vsel %vm1241_vm4, %v1374_v45, %v1383_v25  ;;  %v14288_v26 = vpop.permute.xlu0 %1643  ;;  %v19369_v45 = vld [vmem:[#allocation4_spill] sm:$0xff]  ;;  %19372 = vst [vmem:[#allocation5_spill] sm:$0xff] %v14310_v44  ;;  %v1856_v3 = vrot.slane %v1854_v18, 1 }
 0x101   : > { %2916 = vperm.xlu0 %13155, %v14284_v32   ;;  %12006 = vmatprep.mubr.msk.bf16.mxu0 %vm1024_vm2, %v1384_v22  ;;  %v14291_v40 = vsel %vm1073_vm0, %v1705_v51, %v1707_v29  ;;  %v1800_v38 = vmul.f32 %v14277_v14, %v19369_v45  ;;  %v14304_v0 = vsel %vm1073_vm0, %v1707_v29, %v1709_v46 }
 0x102   : > { %19368 = vst [vmem:[#allocation68_spill] sm:$0xff] %v14291_v40  ;;  %2876 = vperm.xlu1 %13154, %v14296_v24   ;;  %v1801_v33 = vmul.f32 %v14291_v40, %v19370_v62  ;;  %v1623_v22 = vpop.permute.xlu1 %1622  ;;  %19371 = vst [vmem:[#allocation4_spill] sm:$0xff] %v14304_v0  ;;  %v1393_v29 = vsel %vm1241_vm4, %v1383_v25, %v1392_v16 }
 0x103   : > { %v1711_v51 = vrot.slane %v1623_v22, 7  ;;  %v19374_v22 = vld [vmem:[#allocation8_spill] sm:$0xff] }
 0x104   : > { %v1832_v39 = vpack.c.bf16 %v1801_v33, %v1800_v38  ;;  %v14313_v14 = vpop.permute.xlu0 %1649  ;;  %v1802_v55 = vmul.f32 %v14304_v0, %v19374_v22 }
 0x105   : > { %2924 = vperm.xlu0 %13155, %v14310_v44   ;;  %v14316_v40 = vsel %vm1073_vm0, %v1709_v46, %v1711_v51  ;;  %v1852_v46 = vshrl.u32 %v1831_v43, 16  ;;  %v14331_v25 = vsel %vm1073_vm0, %v1711_v51, %v1713_v6  ;;  %v1729_v49 = vrot.slane %v14313_v14, 7  ;;  %v14440_v14 = vld [vmem:[%s18829_s1 + $0x58] sm:$0xff] }
 0x106   : > { %19373 = vst [vmem:[#allocation69_spill] sm:$0xff] %v14316_v40  ;;  %2880 = vperm.xlu1 %13154, %v14322_v35   ;;  %v1803_v18 = vmul.f32 %v14316_v40, %v13748_v61  ;;  %v1629_v38 = vpop.permute.xlu1 %1628  ;;  %v1859_v33 = vshll.u32 %v1832_v39, 16  ;;  %19375 = vst [vmem:[#allocation8_spill] sm:$0xff] %v14331_v25  ;;  %v1863_v44 = vshrl.u32 %v1832_v39, 16 }
 0x107   : > { %12007 = vmatmul.mubr.msk.bf16.gmra.mrb[28].mxu0 %vm1024_vm2, %v1393_v29  ;;  %v1715_v16 = vrot.slane %v1629_v38, 7  ;;  %v14340_v40 = vor.u32 %v1856_v3, %v1852_v46 }
 0x108   : > { %v1833_v0 = vpack.c.bf16 %v1803_v18, %v1802_v55  ;;  %v1861_v29 = vrot.slane %v1859_v33, 1  ;;  %v14342_v43 = vpop.permute.xlu0 %1655  ;;  %v1804_v55 = vmul.f32 %v14331_v25, %v13788_v57  ;;  %v1721_v33 = vrot.slane %v14267_v37, 7  ;;  %v14378_v37 = vld [vmem:[%s18829_s1 + $0x38] sm:$0xff] }
 0x109   : > { %2932 = vperm.xlu0 %13155, %v14337_v48   ;;  %19377 = vst [vmem:[#allocation71_spill] sm:$0xff] %v14340_v40  ;;  %v14345_v51 = vsel %vm1073_vm0, %v1713_v6, %v1715_v16  ;;  %v14360_v6 = vsel %vm1073_vm0, %v1715_v16, %v1717_v2  ;;  %v14367_v48 = vld [vmem:[%s18829_s1 + $0x90] sm:$0xff] }
 0x10a   : > { %19378 = vst [vmem:[#allocation72_spill] sm:$0xff] %v14345_v51  ;;  %2888 = vperm.xlu1 %13154, %v14350_v7   ;;  %v1867_v38 = vshll.u32 %v1833_v0, 16  ;;  %v1805_v3 = vmul.f32 %v14345_v51, %v13773_v47  ;;  %v1635_v18 = vpop.permute.xlu1 %1634  ;;  %v1862_v39 = vsel %vm1850_vm5, %v14340_v40, %v1861_v29  ;;  %19379 = vst [vmem:[#allocation73_spill] sm:$0xff] %v14360_v6 }
 0x10b   : > { %v1719_v46 = vrot.slane %v1635_v18, 7  ;;  %12012 = vmatprep.mubr.msk.bf16.mxu0 %vm1024_vm2, %v1862_v39  ;;  %19380 = vst [vmem:[#allocation74_spill] sm:$0xff] %v14367_v48  ;;  %v1865_v32 = vor.u32 %v1863_v44, %v1861_v29  ;;  %v1725_v18 = vrot.slane %v14288_v26, 7  ;;  %v1806_v44 = vmul.f32 %v14360_v6, %v13803_v19 }
 0x10c   : > { %v1869_v25 = vrot.slane %v1867_v38, 1  ;;  %v1834_v51 = vpack.c.bf16 %v1805_v3, %v1804_v55  ;;  %v14370_v41 = vpop.permute.xlu0 %1661  ;;  %v11304_v38 = vld [vmem:[%s18833_s5 + $0x8] sm:$0x3]  ;;  %v1871_v3 = vshrl.u32 %v1833_v0, 16 }
 0x10d   : > { %2940 = vperm.xlu0 %13155, %v14367_v48   ;;  %v14373_v16 = vsel %vm1073_vm0, %v1717_v2, %v1719_v46  ;;  %v14391_v39 = vsel %vm1073_vm0, %v1719_v46, %v1721_v33  ;;  %v14397_v48 = vld [vmem:[%s18829_s1 + $0xa0] sm:$0xff]  ;;  %v14401_v6 = vand.u32 %v11304_v38, %v13502_v9  ;;  %v14412_v46 = vld [vmem:[%s18829_s1 + $0x48] sm:$0xff] }
 0x10e   : > { %19381 = vst [vmem:[#allocation75_spill] sm:$0xff] %v14373_v16  ;;  %2896 = vperm.xlu1 %13154, %v14378_v37   ;;  %v1807_v2 = vmul.f32 %v14373_v16, %v13800_v12  ;;  %v1641_v29 = vpop.permute.xlu1 %1640  ;;  %v1870_v55 = vsel %vm1850_vm5, %v1865_v32, %v1869_v25  ;;  %19382 = vst [vmem:[#allocation76_spill] sm:$0xff] %v14391_v39  ;;  %v1875_v26 = vshll.u32 %v1834_v51, 16 }
 0x10f   : > { %v1723_v40 = vrot.slane %v1641_v29, 7  ;;  %12013 = vmatmul.mubr.msk.bf16.vlgmr.msra.gmra.mrb[0].mxu0 %vm1024_vm2, %v1870_v55  ;;  %19383 = vst [vmem:[#allocation77_spill] sm:$0xff] %v14397_v48  ;;  %19384 = vst [vmem:[#allocation78_spill] sm:$0xff] %v14401_v6  ;;  %v1873_v29 = vor.u32 %v1871_v3, %v1869_v25  ;;  %v1808_v38 = vmul.f32 %v14391_v39, %v13828_v60  ;;  %v14428_v3 = vld [vmem:[%s18829_s1 + $0xb0] sm:$0xff] }
 0x110   : > { %v1835_v16 = vpack.c.bf16 %v1807_v2, %v1806_v44  ;;  %v14403_v32 = vpop.permute.xlu0 %1667  ;;  %12045 = vmatpush3.bf16.msra.mxu0 %v14001_v54  ;;  %v1877_v55 = vrot.slane %v1875_v26, 1  ;;  %19387 = vst [vmem:[#allocation81_spill] sm:$0xff] %v14428_v3 }
 0x111   : > { %2948 = vperm.xlu0 %13155, %v14397_v48   ;;  %v14407_v0 = vsel %vm1073_vm0, %v1721_v33, %v1723_v40  ;;  %12078 = vmatprep.subr.bf16.mxu0 %v14401_v6  ;;  %v1879_v33 = vshrl.u32 %v1834_v51, 16  ;;  %v14421_v48 = vsel %vm1073_vm0, %v1723_v40, %v1725_v18  ;;  %v1737_v6 = vrot.slane %v14370_v41, 7  ;;  %v14494_v41 = vld [vmem:[%s18829_s1 + $0x78] sm:$0xff] }
 0x112   : > { %19385 = vst [vmem:[#allocation79_spill] sm:$0xff] %v14407_v0  ;;  %2904 = vperm.xlu1 %13154, %v14412_v46   ;;  %v1809_v54 = vmul.f32 %v14407_v0, %v13825_v58  ;;  %v1647_v44 = vpop.permute.xlu1 %1646  ;;  %v1883_v2 = vshll.u32 %v1835_v16, 16  ;;  %19386 = vst [vmem:[#allocation80_spill] sm:$0xff] %v14421_v48  ;;  %v1878_v25 = vsel %vm1850_vm5, %v1873_v29, %v1877_v55 }
 0x113   : > { %v1727_v17 = vrot.slane %v1647_v44, 7  ;;  %12016 = vmatprep.mubr.msk.bf16.mxu0 %vm1024_vm2, %v1878_v25  ;;  %v1881_v51 = vor.u32 %v1879_v33, %v1877_v55  ;;  %v1810_v29 = vmul.f32 %v14421_v48, %v13861_v23  ;;  %v14456_v48 = vld [vmem:[%s18829_s1 + $0xc0] sm:$0xff] }
 0x114   : > { %v1836_v26 = vpack.c.bf16 %v1809_v54, %v1808_v38  ;;  %v1885_v39 = vrot.slane %v1883_v2, 1  ;;  %v14432_v0 = vpop.permute.xlu0 %1673  ;;  %v1733_v54 = vrot.slane %v14342_v43, 7  ;;  %v1887_v2 = vshrl.u32 %v1835_v16, 16  ;;  %19390 = vst [vmem:[#allocation84_spill] sm:$0xff] %v14456_v48 }
 0x115   : > { %2956 = vperm.xlu0 %13155, %v14428_v3   ;;  %v14435_v40 = vsel %vm1073_vm0, %v1725_v18, %v1727_v17  ;;  %v14450_v18 = vsel %vm1073_vm0, %v1727_v17, %v1729_v49  ;;  %v14467_v17 = vld [vmem:[%s18829_s1 + $0x68] sm:$0xff] }
 0x116   : > { %19388 = vst [vmem:[#allocation82_spill] sm:$0xff] %v14435_v40  ;;  %2912 = vperm.xlu1 %13154, %v14440_v14   ;;  %v1811_v38 = vmul.f32 %v14435_v40, %v13856_v1  ;;  %v1653_v55 = vpop.permute.xlu1 %1652  ;;  %v1886_v44 = vsel %vm1850_vm5, %v1881_v51, %v1885_v39  ;;  %19389 = vst [vmem:[#allocation83_spill] sm:$0xff] %v14450_v18  ;;  %v1891_v25 = vshll.u32 %v1836_v26, 16 }
 0x117   : > { %v1731_v33 = vrot.slane %v1653_v55, 7  ;;  %12017 = vmatmul.mubr.msk.bf16.gmra.mrb[4].mxu0 %vm1024_vm2, %v1886_v44  ;;  %v1889_v16 = vor.u32 %v1887_v2, %v1885_v39  ;;  %v1812_v55 = vmul.f32 %v14450_v18, %v13898_v63  ;;  %v1895_v44 = vshrl.u32 %v1836_v26, 16  ;;  %v14482_v39 = vld [vmem:[%s18829_s1 + $0xd0] sm:$0xff] }
 0x118   : > { %v1837_v40 = vpack.c.bf16 %v1811_v38, %v1810_v29  ;;  %v14459_v3 = vpop.permute.xlu0 %1679  ;;  %v1893_v51 = vrot.slane %v1891_v25, 1  ;;  %19393 = vst [vmem:[#allocation87_spill] sm:$0xff] %v14482_v39 }
 0x119   : > { %2964 = vperm.xlu0 %13155, %v14456_v48   ;;  %v14462_v43 = vsel %vm1073_vm0, %v1729_v49, %v1731_v33  ;;  %v14475_v49 = vsel %vm1073_vm0, %v1731_v33, %v1733_v54 }
 0x11a   : > { %19391 = vst [vmem:[#allocation85_spill] sm:$0xff] %v14462_v43  ;;  %2920 = vperm.xlu1 %13154, %v14467_v17   ;;  %v1813_v29 = vmul.f32 %v14462_v43, %v13902_v10  ;;  %v1659_v38 = vpop.permute.xlu1 %1658  ;;  %v1899_v48 = vshll.u32 %v1837_v40, 16  ;;  %19392 = vst [vmem:[#allocation86_spill] sm:$0xff] %v14475_v49  ;;  %v1894_v23 = vsel %vm1850_vm5, %v1889_v16, %v1893_v51  ;;  %v18940_v10 = vmov 5  }
 0x11b   : > { %v1735_v1 = vrot.slane %v1659_v38, 7  ;;  %12020 = vmatprep.mubr.msk.bf16.mxu0 %vm1024_vm2, %v1894_v23  ;;  %v1897_v26 = vor.u32 %v1895_v44, %v1893_v51  ;;  %v1814_v16 = vmul.f32 %v14475_v49, %v13966_v11  ;;  %v1903_v38 = vshrl.u32 %v1837_v40, 16  ;;  %v14510_v49 = vld [vmem:[%s18829_s1 + $0xe8] sm:$0xff] }
 0x11c   : > { %v1838_v2 = vpack.c.bf16 %v1813_v29, %v1812_v55  ;;  %v1901_v25 = vrot.slane %v1899_v48, 1  ;;  %v14486_v18 = vpop.permute.xlu0 %1685  ;;  %v1741_v48 = vrot.slane %v14403_v32, 7  ;;  %19396 = vst [vmem:[#allocation90_spill] sm:$0xff] %v14510_v49 }
 0x11d   : > { %2972 = vperm.xlu0 %13155, %v14482_v39   ;;  %v14489_v33 = vsel %vm1073_vm0, %v1733_v54, %v1735_v1  ;;  %v14504_v54 = vsel %vm1073_vm0, %v1735_v1, %v1737_v6  ;;  %v14521_v1 = vld [vmem:[%s18829_s1 + $0x88] sm:$0xff] }
 0x11e   : > { %19394 = vst [vmem:[#allocation88_spill] sm:$0xff] %v14489_v33  ;;  %2928 = vperm.xlu1 %13154, %v14494_v41   ;;  %v1815_v23 = vmul.f32 %v14489_v33, %v13969_v42  ;;  %v1665_v51 = vpop.permute.xlu1 %1664  ;;  %v1902_v55 = vsel %vm1850_vm5, %v1897_v26, %v1901_v25  ;;  %19395 = vst [vmem:[#allocation89_spill] sm:$0xff] %v14504_v54  ;;  %v1907_v44 = vshll.u32 %v1838_v2, 16 }
 0x11f   : > { %v1739_v29 = vrot.slane %v1665_v51, 7  ;;  %12021 = vmatmul.mubr.msk.bf16.gmra.mrb[8].mxu0 %vm1024_vm2, %v1902_v55  ;;  %v1905_v40 = vor.u32 %v1903_v38, %v1901_v25  ;;  %v1816_v51 = vmul.f32 %v14504_v54, %v13972_v50  ;;  %v1911_v55 = vshrl.u32 %v1838_v2, 16 }
 0x120   : > { %v1839_v33 = vpack.c.bf16 %v1815_v23, %v1814_v16  ;;  %v14513_v43 = vpop.permute.xlu0 %1691  ;;  %v1909_v26 = vrot.slane %v1907_v44, 1 }
 0x121   : > { %2984 = vperm.xlu0 %13155, %v14510_v49   ;;  %v14516_v32 = vsel %vm1073_vm0, %v1737_v6, %v1739_v29  ;;  %v14529_v6 = vsel %vm1073_vm0, %v1739_v29, %v1741_v48  ;;  %v1745_v49 = vrot.slane %v14432_v0, 7  ;;  %v14542_v29 = vld [vmem:[%s18829_s1 + $0x98] sm:$0xff] }
 0x122   : > { %19397 = vst [vmem:[#allocation91_spill] sm:$0xff] %v14516_v32  ;;  %2936 = vperm.xlu1 %13154, %v14521_v1   ;;  %v1817_v16 = vmul.f32 %v14516_v32, %v13989_v52  ;;  %v1671_v23 = vpop.permute.xlu1 %1670  ;;  %v1915_v39 = vshll.u32 %v1839_v33, 16  ;;  %19398 = vst [vmem:[#allocation92_spill] sm:$0xff] %v14529_v6  ;;  %v1910_v11 = vsel %vm1850_vm5, %v1905_v40, %v1909_v26 }
 0x123   : > { %v1743_v42 = vrot.slane %v1671_v23, 7  ;;  %12024 = vmatprep.mubr.msk.bf16.mxu0 %vm1024_vm2, %v1910_v11  ;;  %v1913_v38 = vor.u32 %v1911_v55, %v1909_v26  ;;  %v1818_v40 = vmul.f32 %v14529_v6, %v14007_v8 }
 0x124   : > { %v1840_v25 = vpack.c.bf16 %v1817_v16, %v1816_v51  ;;  %v1917_v44 = vrot.slane %v1915_v39, 1  ;;  %v14545_v0 = vpop.permute.xlu0 %1697  ;;  %v1919_v16 = vshrl.u32 %v1839_v33, 16 }
 0x125   : > { %13158 = vset.pattern.permute.xlu0 %v18940_v10  ;;  %v14537_v2 = vsel %vm1073_vm0, %v1741_v48, %v1743_v42  ;;  %v14554_v26 = vsel %vm1073_vm0, %v1743_v42, %v1745_v49 }
 0x126   : > { %3290 = vperm.xlu0 %13158, %v14272_v15   ;;  %19399 = vst [vmem:[#allocation93_spill] sm:$0xff] %v14537_v2  ;;  %2944 = vperm.xlu1 %13154, %v14542_v29   ;;  %v1819_v11 = vmul.f32 %v14537_v2, %v14026_v13  ;;  %v1677_v39 = vpop.permute.xlu1 %1676  ;;  %v1749_v15 = vrot.slane %v14459_v3, 7  ;;  %v1918_v48 = vsel %vm1850_vm5, %v1913_v38, %v1917_v44  ;;  %19400 = vst [vmem:[#allocation94_spill] sm:$0xff] %v14554_v26  ;;  %v14564_v3 = vld [vmem:[%s18829_s1 + $0xa8] sm:$0xff] }
 0x127   : > { %v1747_v51 = vrot.slane %v1677_v39, 7  ;;  %12025 = vmatmul.mubr.msk.bf16.gmra.mrb[12].mxu0 %vm1024_vm2, %v1918_v48  ;;  %v1923_v23 = vshll.u32 %v1840_v25, 16  ;;  %v1921_v42 = vor.u32 %v1919_v16, %v1917_v44  ;;  %v1820_v33 = vmul.f32 %v14554_v26, %v14049_v20 }
 0x128   : > { %v1841_v55 = vpack.c.bf16 %v1819_v11, %v1818_v40  ;;  %v1753_v2 = vrot.slane %v14486_v18, 7 }
 0x129   : > { %v14559_v10 = vsel %vm1073_vm0, %v1745_v49, %v1747_v51  ;;  %v1925_v38 = vrot.slane %v1923_v23, 1  ;;  %v14567_v39 = vpop.permute.xlu0 %2228  ;;  %v1927_v49 = vshrl.u32 %v1840_v25, 16  ;;  %v14574_v48 = vsel %vm1073_vm0, %v1747_v51, %v1749_v15  ;;  %v14586_v25 = vld [vmem:[%s18829_s1 + $0xb8] sm:$0xff] }
 0x12a   : > { %3299 = vperm.xlu0 %13158, %v14322_v35   ;;  %19401 = vst [vmem:[#allocation95_spill] sm:$0xff] %v14559_v10  ;;  %2952 = vperm.xlu1 %13154, %v14564_v3   ;;  %v1821_v35 = vmul.f32 %v14559_v10, %v14057_v4  ;;  %v1683_v40 = vpop.permute.xlu1 %1682  ;;  %v1931_v11 = vshll.u32 %v1841_v55, 16  ;;  %19402 = vst [vmem:[#allocation96_spill] sm:$0xff] %v14574_v48  ;;  %v1822_v51 = vmul.f32 %v14574_v48, %v14075_v21 }
 0x12b   : > { %v1751_v6 = vrot.slane %v1683_v40, 7  ;;  %v1926_v44 = vsel %vm1850_vm5, %v1921_v42, %v1925_v38  ;;  %v1929_v23 = vor.u32 %v1927_v49, %v1925_v38  ;;  %v1935_v49 = vshrl.u32 %v1841_v55, 16  ;;  %v14615_v55 = vld [vmem:[%s18831_s3] ss:$0 sm:$0xff] }
 0x12c   : > { %v1842_v16 = vpack.c.bf16 %v1821_v35, %v1820_v33  ;;  %12028 = vmatprep.mubr.msk.bf16.mxu0 %vm1024_vm2, %v1926_v44  ;;  %v1933_v26 = vrot.slane %v1931_v11, 1  ;;  %v458_v33 = vld [vmem:[%s13708_s30 + $0xf0] sm:$0xff] }
 0x12d   : > { %v14581_v10 = vsel %vm1073_vm0, %v1749_v15, %v1751_v6  ;;  %v14589_v18 = vpop.permute.xlu0 %2237  ;;  %v14599_v35 = vsel %vm1073_vm0, %v1751_v6, %v1753_v2 }
 0x12e   : > { %3302 = vperm.xlu0 %13158, %v14204_v31   ;;  %19403 = vst [vmem:[#allocation97_spill] sm:$0xff] %v14581_v10  ;;  %2960 = vperm.xlu1 %13154, %v14586_v25   ;;  %v1823_v42 = vmul.f32 %v14581_v10, %v14099_v28  ;;  %v1689_v38 = vpop.permute.xlu1 %1688  ;;  %v1757_v31 = vrot.slane %v14513_v43, 7  ;;  %v1934_v15 = vsel %vm1850_vm5, %v1929_v23, %v1933_v26  ;;  %19404 = vst [vmem:[#allocation98_spill] sm:$0xff] %v14599_v35  ;;  %v14609_v43 = vld [vmem:[%s18829_s1 + $0xc8] sm:$0xff] }
 0x12f   : > { %v1755_v40 = vrot.slane %v1689_v38, 7  ;;  %12029 = vmatmul.mubr.msk.bf16.gmra.mrb[16].mxu0 %vm1024_vm2, %v1934_v15  ;;  %v1939_v11 = vshll.u32 %v1842_v16, 16  ;;  %v1937_v6 = vor.u32 %v1935_v49, %v1933_v26  ;;  %v1943_v15 = vshrl.u32 %v1842_v16, 16  ;;  %v14637_v16 = vld [vmem:[%s18829_s1 + $0xd8] sm:$0xff] }
 0x130   : > { %v1843_v44 = vpack.c.bf16 %v1823_v42, %v1822_v51  ;;  %v497_v51 = vsub.f32 %v458_v33, %v14615_v55 }
 0x131   : > { %v14604_v48 = vsel %vm1073_vm0, %v1753_v2, %v1755_v40  ;;  %v1941_v23 = vrot.slane %v1939_v11, 1  ;;  %v1824_v2 = vmul.f32 %v14599_v35, %v14121_v30  ;;  %v14625_v26 = vsel %vm1073_vm0, %v1755_v40, %v1757_v31 }
 0x132   : > { %3311 = vperm.xlu0 %13158, %v14378_v37   ;;  %19405 = vst [vmem:[#allocation99_spill] sm:$0xff] %v14604_v48  ;;  %2968 = vperm.xlu1 %13154, %v14609_v43   ;;  %v14618_v37 = vpop.permute.xlu0 %2243  ;;  %v1825_v42 = vmul.f32 %v14604_v48, %v14124_v27  ;;  %v1695_v38 = vpop.permute.xlu1 %1694  ;;  %v1947_v10 = vshll.u32 %v1843_v44, 16  ;;  %19406 = vst [vmem:[#allocation100_spill] sm:$0xff] %v14625_v26  ;;  %v1761_v11 = vrot.slane %v14545_v0, 7  ;;  %v14643_v0 = vld [vmem:[%s18832_s4] ss:$0 sm:$0xff] }
 0x133   : > { %v1759_v49 = vrot.slane %v1695_v38, 7  ;;  %v1942_v54 = vsel %vm1850_vm5, %v1937_v6, %v1941_v23  ;;  %v1945_v32 = vor.u32 %v1943_v15, %v1941_v23  ;;  %v2323_v15 = vrot.slane %v14567_v39, 1 }
 0x134   : > { %v1844_v33 = vpack.c.bf16 %v1825_v42, %v1824_v2  ;;  %12032 = vmatprep.mubr.msk.bf16.mxu0 %vm1024_vm2, %v1942_v54  ;;  %v1949_v28 = vrot.slane %v1947_v10, 1  ;;  %v14646_v54 = vmul.f32 %v14643_v0, %v497_v51  ;;  %v1951_v51 = vshrl.u32 %v1843_v44, 16 }
 0x135   : > { %v14632_v35 = vsel %vm1073_vm0, %v1757_v31, %v1759_v49  ;;  %v14656_v23 = vsel %vm1073_vm0, %v1759_v49, %v1761_v11  ;;  %v19412_v49 = vmov 5  }
 0x136   : > { %3317 = vperm.xlu0 %13158, %v14412_v46   ;;  %19407 = vst [vmem:[#allocation101_spill] sm:$0xff] %v14632_v35  ;;  %2976 = vperm.xlu1 %13154, %v14637_v16   ;;  %19408 = vst [vmem:[#allocation102_spill] sm:$0xff] %v14646_v54  ;;  %v14648_v10 = vpop.permute.xlu0 %2249  ;;  %v1826_v46 = vmul.f32 %v14625_v26, %v14130_v5  ;;  %v1827_v31 = vmul.f32 %v14632_v35, %v14196_v36  ;;  %v1701_v40 = vpop.permute.xlu1 %1700  ;;  %v1955_v42 = vshll.u32 %v1844_v33, 16 }
 0x137   : > { %v1950_v6 = vsel %vm1850_vm5, %v1945_v32, %v1949_v28  ;;  %19409 = vst [vmem:[#allocation103_spill] sm:$0xff] %v14656_v23  ;;  %v14658_v2 = vrot.slane %v1701_v40, 7  ;;  %v1953_v40 = vor.u32 %v1951_v51, %v1949_v28  ;;  %v1828_v44 = vmul.f32 %v14656_v23, %v14216_v53 }
 0x138   : > { %12033 = vmatmul.mubr.msk.bf16.gmra.mrb[20].mxu0 %vm1024_vm2, %v1950_v6  ;;  %v1845_v38 = vpack.c.bf16 %v1827_v31, %v1826_v46  ;;  %v1957_v35 = vrot.slane %v1955_v42, 1  ;;  %v14680_v42 = vmul.f32 0.0, %v2323_v15  ;;  %v2328_v23 = vrot.slane %v14589_v18, 1 }
 0x139   : > { %19410 = vst [vmem:[#allocation104_spill] sm:$0xff] %v14658_v2  ;;  %v14665_v26 = vsel %vm1073_vm0, %v1761_v11, %v14658_v2  ;;  %v1830_v32 = vmul.f32 %v14658_v2, %v14646_v54 }
 0x13a   : > { %3323 = vperm.xlu0 %13158, %v14440_v14   ;;  %19411 = vst [vmem:[#allocation105_spill] sm:$0xff] %v14665_v26  ;;  %13156 = vset.pattern.permute.xlu1 %v19412_v49  ;;  %v14670_v48 = vpop.permute.xlu0 %2255  ;;  %v1829_v39 = vmul.f32 %v14665_v26, %v14168_v34  ;;  %v1959_v14 = vshrl.u32 %v1844_v33, 16  ;;  %v1963_v11 = vshll.u32 %v1845_v38, 16  ;;  %v1958_v6 = vsel %vm1850_vm5, %v1953_v40, %v1957_v35 }
 0x13b   : > { %3293 = vperm.xlu1 %13156, %v14176_v59   ;;  %v1847_v46 = vpack.c.bf16 %v1830_v32, %v1830_v32  ;;  %v2232_v31 = vpop.permute.xlu1 %2231  ;;  %12036 = vmatprep.mubr.msk.bf16.mxu0 %vm1024_vm2, %v1958_v6  ;;  %19413 = vst [vmem:[#allocation106_spill] sm:$0xff] %v14680_v42  ;;  %v1967_v32 = vshrl.u32 %v1845_v38, 16 }
 0x13c   : > { %v1846_v2 = vpack.c.bf16 %v1829_v39, %v1828_v44  ;;  %v2324_v54 = vrot.slane %v2232_v31, 1  ;;  %v1961_v28 = vor.u32 %v1959_v14, %v1957_v35  ;;  %v1965_v51 = vrot.slane %v1963_v11, 1 }
 0x13d   : > { %v1979_v44 = vshll.u32 %v1847_v46, 16 }
 0x13e   : > { %3329 = vperm.xlu0 %13158, %v14467_v17   ;;  %v14683_v26 = vpop.permute.xlu0 %2261  ;;  %v14686_v59 = vsel %vm698_vm3, %v2323_v15, %v2324_v54  ;;  %v1966_v33 = vsel %vm1850_vm5, %v1961_v28, %v1965_v51  ;;  %v1971_v40 = vshll.u32 %v1846_v2, 16  ;;  %v1969_v18 = vor.u32 %v1967_v32, %v1965_v51 }
 0x13f   : > { %19414 = vst [vmem:[#allocation107_spill] sm:$0xff] %v14686_v59  ;;  %3296 = vperm.xlu1 %13156, %v14296_v24   ;;  %v2420_v35 = vmul.f32 %v14686_v59, %v19369_v45  ;;  %v2235_v17 = vpop.permute.xlu1 %2234  ;;  %v1975_v11 = vshrl.u32 %v1846_v2, 16  ;;  %v2332_v24 = vrot.slane %v14618_v37, 1  ;;  %v14713_v37 = vld [vmem:[%s18829_s1 + $0xe0] sm:$0xff]  ;;  %v2344_v59 = vrot.slane %v14683_v26, 1 }
 0x140   : > { %12037 = vmatmul.mubr.msk.bf16.gmra.mrb[24].mxu0 %vm1024_vm2, %v1966_v33  ;;  %v2326_v39 = vrot.slane %v2235_v17, 1  ;;  %v1973_v14 = vrot.slane %v1971_v40, 1 }
 0x141   : > { %v2452_v15 = vpack.c.bf16 %v2420_v35, %v14680_v42 }
 0x142   : > { %3335 = vperm.xlu0 %13158, %v14494_v41   ;;  %v14696_v31 = vpop.permute.xlu0 %2267  ;;  %v14699_v38 = vsel %vm698_vm3, %v2324_v54, %v2326_v39  ;;  %v14702_v46 = vsel %vm698_vm3, %v2326_v39, %v2328_v23  ;;  %v1974_v6 = vsel %vm1850_vm5, %v1969_v18, %v1973_v14  ;;  %v1977_v28 = vor.u32 %v1975_v11, %v1973_v14 }
 0x143   : > { %19415 = vst [vmem:[#allocation108_spill] sm:$0xff] %v14699_v38  ;;  %19416 = vst [vmem:[#allocation109_spill] sm:$0xff] %v14702_v46  ;;  %13157 = vset.pattern.permute.xlu1 %v19365_v56  ;;  %v2421_v41 = vmul.f32 %v14699_v38, %v19370_v62  ;;  %v2422_v2 = vmul.f32 %v14702_v46, %v19374_v22  ;;  %v2241_v54 = vpop.permute.xlu1 %2240  ;;  %12040 = vmatprep.mubr.msk.bf16.mxu0 %vm1024_vm2, %v1974_v6  ;;  %v1981_v56 = vrot.slane %v1979_v44, 1 }
 0x144   : > { %2980 = vperm.xlu1 %13157, %v14713_v37   ;;  %v2472_v51 = vshrl.u32 %v2452_v15, 16  ;;  %v2475_v33 = vshll.u32 %v2452_v15, 16  ;;  %v2330_v32 = vrot.slane %v2241_v54, 1  ;;  %v2336_v18 = vrot.slane %v14648_v10, 1 }
 0x145   : > { %v2453_v40 = vpack.c.bf16 %v2422_v2, %v2421_v41  ;;  %v1982_v14 = vsel %vm1850_vm5, %v1977_v28, %v1981_v56 }
 0x146   : > { %3341 = vperm.xlu0 %13158, %v14521_v1   ;;  %v14718_v35 = vpop.permute.xlu0 %2273  ;;  %v14721_v17 = vsel %vm698_vm3, %v2328_v23, %v2330_v32  ;;  %v14724_v39 = vsel %vm698_vm3, %v2330_v32, %v2332_v24  ;;  %v14735_v1 = vld [vmem:[%s18829_s1 + $0xf0] sm:$0xff]  ;;  %v2474_v10 = vrot.slane %v2472_v51, 3  ;;  %v2477_v6 = vrot.slane %v2475_v33, 4 }
 0x147   : > { %19417 = vst [vmem:[#allocation110_spill] sm:$0xff] %v14721_v17  ;;  %19418 = vst [vmem:[#allocation111_spill] sm:$0xff] %v14724_v39  ;;  %v2423_v44 = vmul.f32 %v14721_v17, %v13748_v61  ;;  %v2424_v11 = vmul.f32 %v14724_v39, %v13788_v57  ;;  %v2247_v23 = vpop.permute.xlu1 %2246  ;;  %v2480_v15 = vshrl.u32 %v2453_v40, 16  ;;  %v2483_v41 = vshll.u32 %v2453_v40, 16  ;;  %v14756_v40 = vld [vmem:[%s18829_s1 + $0xf8] sm:$0xff] }
 0x148   : > { %2988 = vperm.xlu1 %13157, %v14735_v1   ;;  %12041 = vmatmul.mubr.msk.bf16.gmra.mrb[28].mxu0 %vm1024_vm2, %v1982_v14  ;;  %v2334_v28 = vrot.slane %v2247_v23, 1  ;;  %v2340_v39 = vrot.slane %v14670_v48, 1  ;;  %19421 = vst [vmem:[#allocation114_spill] sm:$0xff] %v14756_v40 }
 0x149   : > { %v2454_v2 = vpack.c.bf16 %v2424_v11, %v2423_v44  ;;  %v2482_v54 = vrot.slane %v2480_v15, 3  ;;  %v2485_v14 = vrot.slane %v2483_v41, 4  ;;  %v2478_v11 = vor.u32 %v2477_v6, %v2474_v10  ;;  %v11321_v10 = vld [vmem:[%s18833_s5 + $0xa] sm:$0x3] }
 0x14a   : > { %3347 = vperm.xlu0 %13158, %v14542_v29   ;;  %v14740_v56 = vpop.permute.xlu0 %2279  ;;  %v14743_v32 = vsel %vm698_vm3, %v2332_v24, %v2334_v28  ;;  %v14746_v17 = vsel %vm698_vm3, %v2334_v28, %v2336_v18 }
 0x14b   : > { %19419 = vst [vmem:[#allocation112_spill] sm:$0xff] %v14743_v32  ;;  %19420 = vst [vmem:[#allocation113_spill] sm:$0xff] %v14746_v17  ;;  %v2489_v42 = vshrl.u32 %v2454_v2, 16  ;;  %v2492_v51 = vshll.u32 %v2454_v2, 16  ;;  %v2425_v33 = vmul.f32 %v14743_v32, %v13773_v47  ;;  %v2426_v29 = vmul.f32 %v14746_v17, %v13803_v19  ;;  %v2253_v24 = vpop.permute.xlu1 %2252 }
 0x14c   : > { %2992 = vperm.xlu1 %13157, %v14756_v40   ;;  %v2338_v44 = vrot.slane %v2253_v24, 1  ;;  %v2486_v48 = vor.u32 %v2485_v14, %v2482_v54 }
 0x14d   : > { %v2491_v23 = vrot.slane %v2489_v42, 3  ;;  %v2494_v15 = vrot.slane %v2492_v51, 4  ;;  %v2455_v28 = vpack.c.bf16 %v2426_v29, %v2425_v33 }
 0x14e   : > { %3353 = vperm.xlu0 %13158, %v14564_v3   ;;  %v14760_v41 = vpop.permute.xlu0 %2285  ;;  %v14763_v2 = vsel %vm698_vm3, %v2336_v18, %v2338_v44  ;;  %v14766_v17 = vsel %vm698_vm3, %v2338_v44, %v2340_v39  ;;  %v2487_v32 = vsel %vm1241_vm4, %v2478_v11, %v2486_v48  ;;  %v14785_v44 = vand.u32 %v11321_v10, %v13502_v9 }
 0x14f   : > { %19422 = vst [vmem:[#allocation115_spill] sm:$0xff] %v14763_v2  ;;  %19423 = vst [vmem:[#allocation116_spill] sm:$0xff] %v14766_v17  ;;  %v2427_v3 = vmul.f32 %v14763_v2, %v13800_v12  ;;  %v2428_v42 = vmul.f32 %v14766_v17, %v13828_v60  ;;  %12046 = vmatprep.mubr.msk.bf16.mxu0 %vm1024_vm2, %v2487_v32  ;;  %v2259_v18 = vpop.permute.xlu1 %2258  ;;  %v2495_v6 = vor.u32 %v2494_v15, %v2491_v23  ;;  %v19426_v23 = vld [vmem:[#allocation23_spill] sm:$0xff] }
 0x150   : > { %13159 = vset.pattern.permute.xlu1 %v19412_v49  ;;  %v2498_v54 = vshrl.u32 %v2455_v28, 16  ;;  %v2342_v14 = vrot.slane %v2259_v18, 1  ;;  %v2501_v26 = vshll.u32 %v2455_v28, 16  ;;  %v19428_v18 = vld [vmem:[#allocation61_spill] sm:$0xff] }
 0x151   : > { %3305 = vperm.xlu1 %13159, %v14350_v7   ;;  %v2456_v51 = vpack.c.bf16 %v2428_v42, %v2427_v3  ;;  %v2496_v33 = vsel %vm1241_vm4, %v2486_v48, %v2495_v6  ;;  %v2348_v7 = vrot.slane %v14696_v31, 1  ;;  %v19427_v42 = vld [vmem:[#allocation78_spill] sm:$0xff] }
 0x152   : > { %3359 = vperm.xlu0 %13158, %v14586_v25   ;;  %v2500_v29 = vrot.slane %v2498_v54, 3  ;;  %v14782_v24 = vpop.permute.xlu0 %2291  ;;  %v14788_v49 = vsel %vm698_vm3, %v2340_v39, %v2342_v14  ;;  %v14791_v32 = vsel %vm698_vm3, %v2342_v14, %v2344_v59  ;;  %12047 = vmatmul.mubr.msk.bf16.vlgmr.msra.gmra.mrb[0].mxu0 %vm1024_vm2, %v2496_v33  ;;  %v2503_v11 = vrot.slane %v2501_v26, 4 }
 0x153   : > { %19424 = vst [vmem:[#allocation117_spill] sm:$0xff] %v14788_v49  ;;  %19425 = vst [vmem:[#allocation118_spill] sm:$0xff] %v14791_v32  ;;  %v2429_v48 = vmul.f32 %v14788_v49, %v13825_v58  ;;  %v2430_v15 = vmul.f32 %v14791_v32, %v19426_v23  ;;  %v2265_v28 = vpop.permute.xlu1 %2264  ;;  %v2507_v10 = vshrl.u32 %v2456_v51, 16  ;;  %v2510_v3 = vshll.u32 %v2456_v51, 16  ;;  %12079 = vmatpush3.bf16.msra.mxu0 %v19427_v42 }
 0x154   : > { %v2346_v39 = vrot.slane %v2265_v28, 1  ;;  %v2504_v54 = vor.u32 %v2503_v11, %v2500_v29  ;;  %12112 = vmatprep.subr.bf16.mxu0 %v14785_v44  ;;  %v2352_v42 = vrot.slane %v14718_v35, 1  ;;  %v19431_v29 = vld [vmem:[#allocation22_spill] sm:$0xff] }
 0x155   : > { %3308 = vperm.xlu1 %13159, %v19428_v18   ;;  %v2457_v14 = vpack.c.bf16 %v2430_v15, %v2429_v48  ;;  %v2509_v31 = vrot.slane %v2507_v10, 3  ;;  %v2512_v26 = vrot.slane %v2510_v3, 4  ;;  %v19432_v18 = vld [vmem:[#allocation64_spill] sm:$0xff] }
 0x156   : > { %3365 = vperm.xlu0 %13158, %v14609_v43   ;;  %v14802_v33 = vpop.permute.xlu0 %2297  ;;  %v14806_v32 = vsel %vm698_vm3, %v2344_v59, %v2346_v39  ;;  %v14809_v51 = vsel %vm698_vm3, %v2346_v39, %v2348_v7  ;;  %v2505_v28 = vsel %vm1241_vm4, %v2495_v6, %v2504_v54 }
 0x157   : > { %19429 = vst [vmem:[#allocation23_spill] sm:$0xff] %v14806_v32  ;;  %19430 = vst [vmem:[#allocation78_spill] sm:$0xff] %v14809_v51  ;;  %v2431_v11 = vmul.f32 %v14806_v32, %v19431_v29  ;;  %v2432_v48 = vmul.f32 %v14809_v51, %v13898_v63  ;;  %12050 = vmatprep.mubr.msk.bf16.mxu0 %vm1024_vm2, %v2505_v28  ;;  %v2271_v15 = vpop.permute.xlu1 %2270  ;;  %v2513_v10 = vor.u32 %v2512_v26, %v2509_v31 }
 0x158   : > { %v2516_v3 = vshrl.u32 %v2457_v14, 16  ;;  %v2350_v59 = vrot.slane %v2271_v15, 1  ;;  %v2519_v39 = vshll.u32 %v2457_v14, 16  ;;  %v2356_v31 = vrot.slane %v14740_v56, 1  ;;  %v19435_v14 = vld [vmem:[#allocation30_spill] sm:$0xff] }
 0x159   : > { %3314 = vperm.xlu1 %13159, %v19432_v18   ;;  %v2458_v6 = vpack.c.bf16 %v2432_v48, %v2431_v11  ;;  %v2514_v35 = vsel %vm1241_vm4, %v2504_v54, %v2513_v10  ;;  %v19436_v11 = vld [vmem:[#allocation37_spill] sm:$0xff] }
 0x15a   : > { %3371 = vperm.xlu0 %13158, %v14637_v16   ;;  %v2518_v2 = vrot.slane %v2516_v3, 3  ;;  %v14821_v49 = vpop.permute.xlu0 %2303  ;;  %v14824_v32 = vsel %vm698_vm3, %v2348_v7, %v2350_v59  ;;  %v14827_v28 = vsel %vm698_vm3, %v2350_v59, %v2352_v42  ;;  %12051 = vmatmul.mubr.msk.bf16.gmra.mrb[4].mxu0 %vm1024_vm2, %v2514_v35  ;;  %v2521_v26 = vrot.slane %v2519_v39, 4  ;;  %v19437_v7 = vld [vmem:[#allocation65_spill] sm:$0xff]  ;;  %v19438_v59 = vld [vmem:[#allocation90_spill] sm:$0xff] }
 0x15b   : > { %19433 = vst [vmem:[#allocation61_spill] sm:$0xff] %v14824_v32  ;;  %19434 = vst [vmem:[#allocation22_spill] sm:$0xff] %v14827_v28  ;;  %v2433_v15 = vmul.f32 %v14824_v32, %v19435_v14  ;;  %v2434_v54 = vmul.f32 %v14827_v28, %v19436_v11  ;;  %v2277_v48 = vpop.permute.xlu1 %2276  ;;  %v2525_v3 = vshrl.u32 %v2458_v6, 16  ;;  %v2528_v18 = vshll.u32 %v2458_v6, 16 }
 0x15c   : > { %v2354_v51 = vrot.slane %v2277_v48, 1  ;;  %v2522_v17 = vor.u32 %v2521_v26, %v2518_v2  ;;  %v2360_v6 = vrot.slane %v14760_v41, 1  ;;  %v19441_v48 = vld [vmem:[#allocation38_spill] sm:$0xff] }
 0x15d   : > { %3320 = vperm.xlu1 %13159, %v19437_v7   ;;  %v2459_v46 = vpack.c.bf16 %v2434_v54, %v2433_v15  ;;  %v2527_v35 = vrot.slane %v2525_v3, 3  ;;  %v2530_v38 = vrot.slane %v2528_v18, 4  ;;  %v19442_v18 = vld [vmem:[#allocation67_spill] sm:$0xff] }
 0x15e   : > { %3377 = vperm.xlu0 %13158, %v19438_v59   ;;  %v14837_v56 = vpop.permute.xlu0 %2309  ;;  %v14840_v39 = vsel %vm698_vm3, %v2352_v42, %v2354_v51  ;;  %v14843_v32 = vsel %vm698_vm3, %v2354_v51, %v2356_v31  ;;  %v2523_v28 = vsel %vm1241_vm4, %v2513_v10, %v2522_v17 }
 0x15f   : > { %19439 = vst [vmem:[#allocation64_spill] sm:$0xff] %v14840_v39  ;;  %19440 = vst [vmem:[#allocation30_spill] sm:$0xff] %v14843_v32  ;;  %v2435_v2 = vmul.f32 %v14840_v39, %v19441_v48  ;;  %v2436_v26 = vmul.f32 %v14843_v32, %v13972_v50  ;;  %12054 = vmatprep.mubr.msk.bf16.mxu0 %vm1024_vm2, %v2523_v28  ;;  %v2283_v15 = vpop.permute.xlu1 %2282  ;;  %v2531_v54 = vor.u32 %v2530_v38, %v2527_v35 }
 0x160   : > { %v2534_v3 = vshrl.u32 %v2459_v46, 16  ;;  %v2358_v42 = vrot.slane %v2283_v15, 1  ;;  %v2537_v51 = vshll.u32 %v2459_v46, 16  ;;  %v2364_v38 = vrot.slane %v14782_v24, 1 }
 0x161   : > { %3326 = vperm.xlu1 %13159, %v19442_v18   ;;  %v2460_v10 = vpack.c.bf16 %v2436_v26, %v2435_v2  ;;  %v2532_v41 = vsel %vm1241_vm4, %v2522_v17, %v2531_v54 }
 0x162   : > { %3383 = vperm.xlu0 %13158, %v14756_v40   ;;  %v2536_v7 = vrot.slane %v2534_v3, 3  ;;  %v14855_v59 = vpop.permute.xlu0 %2315  ;;  %v14858_v39 = vsel %vm698_vm3, %v2356_v31, %v2358_v42  ;;  %v14861_v28 = vsel %vm698_vm3, %v2358_v42, %v2360_v6  ;;  %12055 = vmatmul.mubr.msk.bf16.gmra.mrb[8].mxu0 %vm1024_vm2, %v2532_v41  ;;  %v2539_v35 = vrot.slane %v2537_v51, 4  ;;  %v19445_v31 = vld [vmem:[#allocation5_spill] sm:$0xff]  ;;  %v14918_v40 = vld [vmem:[%s18829_s1 + $0x30] sm:$0xff] }
 0x163   : > { %19443 = vst [vmem:[#allocation37_spill] sm:$0xff] %v14858_v39  ;;  %19444 = vst [vmem:[#allocation65_spill] sm:$0xff] %v14861_v28  ;;  %v2437_v46 = vmul.f32 %v14858_v39, %v13989_v52  ;;  %v2438_v17 = vmul.f32 %v14861_v28, %v14007_v8  ;;  %v2289_v2 = vpop.permute.xlu1 %2288  ;;  %v2543_v26 = vshrl.u32 %v2460_v10, 16  ;;  %v2546_v15 = vshll.u32 %v2460_v10, 16  ;;  %v14874_v39 = vld [vmem:[%s18829_s1 + $0x8] sm:$0xff] }
 0x164   : > { %v2362_v3 = vrot.slane %v2289_v2, 1  ;;  %v2540_v18 = vor.u32 %v2539_v35, %v2536_v7  ;;  %v18980_v42 = vmov 6   ;;  %19446 = vst [vmem:[#allocation90_spill] sm:$0xff] %v14874_v39 }
 0x165   : > { %3332 = vperm.xlu1 %13159, %v19445_v31   ;;  %v2461_v41 = vpack.c.bf16 %v2438_v17, %v2437_v46  ;;  %v2545_v32 = vrot.slane %v2543_v26, 3  ;;  %v2548_v24 = vrot.slane %v2546_v15, 4  ;;  %v2368_v46 = vrot.slane %v14802_v33, 1  ;;  %v459_v33 = vld [vmem:[%s13708_s30 + $0xf8] sm:$0xff] }
 0x166   : > { %13161 = vset.pattern.permute.xlu0 %v18980_v42  ;;  %v2322_v51 = vpop.permute.xlu0 %2321  ;;  %v14878_v10 = vsel %vm698_vm3, %v2360_v6, %v2362_v3  ;;  %v14881_v7 = vsel %vm698_vm3, %v2362_v3, %v2364_v38  ;;  %v2541_v35 = vsel %vm1241_vm4, %v2531_v54, %v2540_v18  ;;  %v19449_v42 = vld [vmem:[#allocation70_spill] sm:$0xff] }
 0x167   : > { %3913 = vperm.xlu0 %13161, %v14874_v39   ;;  %19447 = vst [vmem:[#allocation38_spill] sm:$0xff] %v14878_v10  ;;  %19448 = vst [vmem:[#allocation67_spill] sm:$0xff] %v14881_v7  ;;  %v2439_v17 = vmul.f32 %v14878_v10, %v14026_v13  ;;  %v2440_v2 = vmul.f32 %v14881_v7, %v14049_v20  ;;  %12058 = vmatprep.mubr.msk.bf16.mxu0 %vm1024_vm2, %v2541_v35  ;;  %v2295_v26 = vpop.permute.xlu1 %2294  ;;  %v2552_v6 = vshrl.u32 %v2461_v41, 16  ;;  %v14896_v10 = vld [vmem:[%s18829_s1 + $0x20] sm:$0xff] }
 0x168   : > { %v2549_v15 = vor.u32 %v2548_v24, %v2545_v32  ;;  %v2366_v31 = vrot.slane %v2295_v26, 1  ;;  %v2555_v3 = vshll.u32 %v2461_v41, 16  ;;  %19450 = vst [vmem:[#allocation5_spill] sm:$0xff] %v14896_v10  ;;  %v19454_v7 = vld [vmem:[#allocation74_spill] sm:$0xff] }
 0x169   : > { %3338 = vperm.xlu1 %13159, %v19449_v42   ;;  %v2462_v28 = vpack.c.bf16 %v2440_v2, %v2439_v17  ;;  %v2554_v39 = vrot.slane %v2552_v6, 3  ;;  %v2372_v42 = vrot.slane %v14821_v49, 1  ;;  %19455 = vst [vmem:[#allocation74_spill] sm:$0xff] %v14918_v40 }
 0x16a   : > { %v2550_v54 = vsel %vm1241_vm4, %v2540_v18, %v2549_v15  ;;  %v14900_v35 = vsel %vm698_vm3, %v2364_v38, %v2366_v31  ;;  %v14903_v32 = vsel %vm698_vm3, %v2366_v31, %v2368_v46  ;;  %v2557_v18 = vrot.slane %v2555_v3, 4 }
 0x16b   : > { %3922 = vperm.xlu0 %13161, %v14896_v10   ;;  %19451 = vst [vmem:[#allocation70_spill] sm:$0xff] %v14900_v35  ;;  %19452 = vst [vmem:[#allocation119_spill] sm:$0xff] %v14903_v32  ;;  %12059 = vmatmul.mubr.msk.bf16.gmra.mrb[12].mxu0 %vm1024_vm2, %v2550_v54  ;;  %v2441_v24 = vmul.f32 %v14900_v35, %v14057_v4  ;;  %v2442_v17 = vmul.f32 %v14903_v32, %v14075_v21  ;;  %v2301_v2 = vpop.permute.xlu1 %2300  ;;  %v2561_v26 = vshrl.u32 %v2462_v28, 16 }
 0x16c   : > { %v14907_v41 = vpop.permute.xlu0 %2872  ;;  %v2564_v38 = vshll.u32 %v2462_v28, 16  ;;  %v2370_v6 = vrot.slane %v2301_v2, 1  ;;  %v2558_v31 = vor.u32 %v2557_v18, %v2554_v39  ;;  %v498_v54 = vsub.f32 %v459_v33, %v14615_v55  ;;  %v19459_v33 = vld [vmem:[#allocation49_spill] sm:$0xff] }
 0x16d   : > { %19453 = vst [vmem:[#allocation120_spill] sm:$0xff] %v14907_v41  ;;  %3344 = vperm.xlu1 %13159, %v19454_v7   ;;  %v2463_v10 = vpack.c.bf16 %v2442_v17, %v2441_v24  ;;  %v2563_v49 = vrot.slane %v2561_v26, 3  ;;  %v2376_v55 = vrot.slane %v14837_v56, 1  ;;  %v14940_v56 = vrot.slane %v2322_v51, 1 }
 0x16e   : > { %v2566_v3 = vrot.slane %v2564_v38, 4  ;;  %v14922_v32 = vsel %vm698_vm3, %v2368_v46, %v2370_v6  ;;  %v14925_v28 = vsel %vm698_vm3, %v2370_v6, %v2372_v42  ;;  %v2559_v39 = vsel %vm1241_vm4, %v2549_v15, %v2558_v31  ;;  %v19460_v38 = vld [vmem:[#allocation77_spill] sm:$0xff] }
 0x16f   : > { %3928 = vperm.xlu0 %13161, %v14918_v40   ;;  %19456 = vst [vmem:[#allocation121_spill] sm:$0xff] %v14922_v32  ;;  %19457 = vst [vmem:[#allocation122_spill] sm:$0xff] %v14925_v28  ;;  %v2443_v18 = vmul.f32 %v14922_v32, %v19459_v33  ;;  %v2444_v24 = vmul.f32 %v14925_v28, %v14121_v30  ;;  %12062 = vmatprep.mubr.msk.bf16.mxu0 %vm1024_vm2, %v2559_v39  ;;  %v2307_v17 = vpop.permute.xlu1 %2306  ;;  %v2570_v2 = vshrl.u32 %v2463_v10, 16  ;;  %v14946_v39 = vld [vmem:[%s18829_s1 + $0x40] sm:$0xff]  ;;  %v19472_v28 = vld [vmem:[#allocation84_spill] sm:$0xff] }
 0x170   : > { %v14929_v7 = vpop.permute.xlu0 %2884  ;;  %v2567_v46 = vor.u32 %v2566_v3, %v2563_v49  ;;  %v2374_v26 = vrot.slane %v2307_v17, 1  ;;  %v2573_v6 = vshll.u32 %v2463_v10, 16  ;;  %v14938_v15 = vmul.f32 %v14643_v0, %v498_v54  ;;  %19462 = vst [vmem:[#allocation124_spill] sm:$0xff] %v14940_v56  ;;  %19463 = vst [vmem:[#allocation125_spill] sm:$0xff] %v14946_v39 }
 0x171   : > { %19458 = vst [vmem:[#allocation123_spill] sm:$0xff] %v14929_v7  ;;  %3350 = vperm.xlu1 %13159, %v19460_v38   ;;  %v2464_v35 = vpack.c.bf16 %v2444_v24, %v2443_v18  ;;  %v2572_v40 = vrot.slane %v2570_v2, 3  ;;  %v2380_v0 = vrot.slane %v14855_v59, 1  ;;  %v19467_v2 = vld [vmem:[#allocation81_spill] sm:$0xff] }
 0x172   : > { %19461 = vst [vmem:[#allocation77_spill] sm:$0xff] %v14938_v15  ;;  %v2568_v32 = vsel %vm1241_vm4, %v2558_v31, %v2567_v46  ;;  %v14950_v49 = vsel %vm698_vm3, %v2372_v42, %v2374_v26  ;;  %v14953_v10 = vsel %vm698_vm3, %v2374_v26, %v2376_v55  ;;  %v2575_v51 = vrot.slane %v2573_v6, 4 }
 0x173   : > { %3934 = vperm.xlu0 %13161, %v14946_v39   ;;  %19464 = vst [vmem:[#allocation126_spill] sm:$0xff] %v14950_v49  ;;  %19465 = vst [vmem:[#allocation127_spill] sm:$0xff] %v14953_v10  ;;  %12063 = vmatmul.mubr.msk.bf16.gmra.mrb[16].mxu0 %vm1024_vm2, %v2568_v32  ;;  %v2445_v54 = vmul.f32 %v14950_v49, %v14124_v27  ;;  %v2446_v3 = vmul.f32 %v14953_v10, %v14130_v5  ;;  %v2313_v18 = vpop.permute.xlu1 %2312  ;;  %v2579_v24 = vshrl.u32 %v2464_v35, 16  ;;  %v14969_v49 = vld [vmem:[%s18829_s1 + $0x50] sm:$0xff] }
 0x174   : > { %v14957_v31 = vpop.permute.xlu0 %2892  ;;  %v2582_v42 = vshll.u32 %v2464_v35, 16  ;;  %v2378_v17 = vrot.slane %v2313_v18, 1  ;;  %v2576_v26 = vor.u32 %v2575_v51, %v2572_v40  ;;  %v2451_v32 = vmul.f32 %v14940_v56, %v14938_v15  ;;  %19468 = vst [vmem:[#allocation81_spill] sm:$0xff] %v14969_v49  ;;  %v15014_v15 = vld [vmem:[%s18829_s1 + $0x70] sm:$0xff] }
 0x175   : > { %19466 = vst [vmem:[#allocation128_spill] sm:$0xff] %v14957_v31  ;;  %3356 = vperm.xlu1 %13159, %v19467_v2   ;;  %v2465_v59 = vpack.c.bf16 %v2446_v3, %v2445_v54  ;;  %v2581_v38 = vrot.slane %v2579_v24, 3 }
 0x176   : > { %v2584_v6 = vrot.slane %v2582_v42, 4  ;;  %v14973_v10 = vsel %vm698_vm3, %v2376_v55, %v2378_v17  ;;  %v14976_v35 = vsel %vm698_vm3, %v2378_v17, %v2380_v0  ;;  %v2577_v40 = vsel %vm1241_vm4, %v2567_v46, %v2576_v26 }
 0x177   : > { %3940 = vperm.xlu0 %13161, %v14969_v49   ;;  %19469 = vst [vmem:[#allocation129_spill] sm:$0xff] %v14973_v10  ;;  %19470 = vst [vmem:[#allocation130_spill] sm:$0xff] %v14976_v35  ;;  %v2447_v54 = vmul.f32 %v14973_v10, %v14196_v36  ;;  %v2448_v3 = vmul.f32 %v14976_v35, %v14216_v53  ;;  %12066 = vmatprep.mubr.msk.bf16.mxu0 %vm1024_vm2, %v2577_v40  ;;  %v2319_v18 = vpop.permute.xlu1 %2318  ;;  %v2588_v42 = vshrl.u32 %v2465_v59, 16  ;;  %v14991_v10 = vld [vmem:[%s18829_s1 + $0x60] sm:$0xff] }
 0x178   : > { %v14979_v51 = vpop.permute.xlu0 %2900  ;;  %v2585_v24 = vor.u32 %v2584_v6, %v2581_v38  ;;  %v2382_v55 = vrot.slane %v2319_v18, 1  ;;  %v2468_v2 = vpack.c.bf16 %v2451_v32, %v2451_v32  ;;  %v2591_v17 = vshll.u32 %v2465_v59, 16  ;;  %19473 = vst [vmem:[#allocation84_spill] sm:$0xff] %v14991_v10  ;;  %v19477_v6 = vld [vmem:[#allocation102_spill] sm:$0xff] }
 0x179   : > { %19471 = vst [vmem:[#allocation131_spill] sm:$0xff] %v14979_v51  ;;  %3362 = vperm.xlu1 %13159, %v19472_v28   ;;  %v2466_v49 = vpack.c.bf16 %v2448_v3, %v2447_v54  ;;  %v2590_v39 = vrot.slane %v2588_v42, 3 }
 0x17a   : > { %v2586_v46 = vsel %vm1241_vm4, %v2576_v26, %v2585_v24  ;;  %v14995_v40 = vsel %vm698_vm3, %v2380_v0, %v2382_v55  ;;  %v14999_v32 = vsel %vm698_vm3, %v2382_v55, %v14940_v56  ;;  %v2593_v59 = vrot.slane %v2591_v17, 4  ;;  %v19478_v0 = vld [vmem:[#allocation87_spill] sm:$0xff] }
 0x17b   : > { %3946 = vperm.xlu0 %13161, %v14991_v10   ;;  %19474 = vst [vmem:[#allocation132_spill] sm:$0xff] %v14995_v40  ;;  %19475 = vst [vmem:[#allocation133_spill] sm:$0xff] %v14999_v32  ;;  %12067 = vmatmul.mubr.msk.bf16.gmra.mrb[20].mxu0 %vm1024_vm2, %v2586_v46  ;;  %v2449_v26 = vmul.f32 %v14995_v40, %v14168_v34  ;;  %v2450_v54 = vmul.f32 %v14999_v32, %v19477_v6  ;;  %v2597_v3 = vshrl.u32 %v2466_v49, 16 }
 0x17c   : > { %v15002_v38 = vpop.permute.xlu0 %2908  ;;  %v2600_v18 = vshll.u32 %v2466_v49, 16  ;;  %v2615_v42 = vshrl.u32 %v2468_v2, 16  ;;  %v15009_v35 = vpop.permute.xlu1 %2868  ;;  %v2594_v55 = vor.u32 %v2593_v59, %v2590_v39  ;;  %v2618_v10 = vshll.u32 %v2468_v2, 16 }
 0x17d   : > { %19476 = vst [vmem:[#allocation134_spill] sm:$0xff] %v15002_v38  ;;  %3368 = vperm.xlu1 %13159, %v19478_v0   ;;  %19479 = vst [vmem:[#allocation87_spill] sm:$0xff] %v15009_v35  ;;  %v2467_v56 = vpack.c.bf16 %v2450_v54, %v2449_v26  ;;  %v2599_v46 = vrot.slane %v2597_v3, 3 }
 0x17e   : > { %v2602_v17 = vrot.slane %v2600_v18, 4  ;;  %v2595_v32 = vsel %vm1241_vm4, %v2585_v24, %v2594_v55  ;;  %v2617_v59 = vrot.slane %v2615_v42, 3  ;;  %v2620_v26 = vrot.slane %v2618_v10, 4  ;;  %v15028_v24 = vld [vmem:[%s18829_s1 + $0x80] sm:$0xff] }
 0x17f   : > { %3952 = vperm.xlu0 %13161, %v15014_v15   ;;  %12070 = vmatprep.mubr.msk.bf16.mxu0 %vm1024_vm2, %v2595_v32  ;;  %v2606_v6 = vshrl.u32 %v2467_v56, 16  ;;  %v2609_v39 = vshll.u32 %v2467_v56, 16  ;;  %v2995_v10 = vmul.f32 %v15009_v35, %v19369_v45  ;;  %v11338_v35 = vld [vmem:[%s18833_s5 + $0xc] sm:$0x3] }
 0x180   : > { %v15018_v49 = vpop.permute.xlu0 %2916  ;;  %v2603_v40 = vor.u32 %v2602_v17, %v2599_v46  ;;  %v2621_v46 = vor.u32 %v2620_v26, %v2617_v59  ;;  %v15045_v17 = vld [vmem:[%s18829_s1 + $0x90] sm:$0xff]  ;;  %v15064_v26 = vld [vmem:[%s18829_s1 + $0xa0] sm:$0xff] }
 0x181   : > { %19480 = vst [vmem:[#allocation135_spill] sm:$0xff] %v15018_v49  ;;  %3374 = vperm.xlu1 %13159, %v14713_v37   ;;  %v15022_v2 = vpop.permute.xlu1 %2876  ;;  %v2608_v3 = vrot.slane %v2606_v6, 3  ;;  %v2611_v18 = vrot.slane %v2609_v39, 4  ;;  %v2996_v6 = vmul.f32 %v14907_v41, %v19370_v62  ;;  %19484 = vst [vmem:[#allocation139_spill] sm:$0xff] %v15045_v17 }
 0x182   : > { %19481 = vst [vmem:[#allocation136_spill] sm:$0xff] %v15022_v2  ;;  %v2604_v54 = vsel %vm1241_vm4, %v2594_v55, %v2603_v40  ;;  %19489 = vst [vmem:[#allocation143_spill] sm:$0xff] %v15064_v26 }
 0x183   : > { %3958 = vperm.xlu0 %13161, %v15028_v24   ;;  %12071 = vmatmul.mubr.msk.bf16.gmra.mrb[24].mxu0 %vm1024_vm2, %v2604_v54  ;;  %v2612_v32 = vor.u32 %v2611_v18, %v2608_v3  ;;  %v19486_v54 = vmov 6   ;;  %v3027_v18 = vpack.c.bf16 %v2996_v6, %v2995_v10 }
 0x184   : > { %v15032_v56 = vpop.permute.xlu0 %2924 }
 0x185   : > { %19482 = vst [vmem:[#allocation137_spill] sm:$0xff] %v15032_v56  ;;  %3380 = vperm.xlu1 %13159, %v14735_v1   ;;  %v15035_v42 = vpop.permute.xlu1 %2880  ;;  %v2613_v55 = vsel %vm1241_vm4, %v2603_v40, %v2612_v32  ;;  %v15057_v40 = vld [vmem:[%s18829_s1] sm:$0xff]  ;;  %v2622_v59 = vsel %vm1241_vm4, %v2612_v32, %v2621_v46  ;;  %v2999_v32 = vmul.f32 %v14929_v7, %v13788_v57 }
 0x186   : > { %19483 = vst [vmem:[#allocation138_spill] sm:$0xff] %v15035_v42  ;;  %12074 = vmatprep.mubr.msk.bf16.mxu0 %vm1024_vm2, %v2613_v55  ;;  %19488 = vst [vmem:[#allocation142_spill] sm:$0xff] %v15057_v40  ;;  %v2998_v10 = vmul.f32 %v15035_v42, %v13748_v61 }
 0x187   : > { %3964 = vperm.xlu0 %13161, %v15045_v17  }
 0x188   : > { %v15049_v39 = vpop.permute.xlu0 %2932 }
 0x189   : > { %19485 = vst [vmem:[#allocation140_spill] sm:$0xff] %v15049_v39  ;;  %13160 = vset.pattern.permute.xlu1 %v19486_v54  ;;  %v15052_v3 = vpop.permute.xlu1 %2888  ;;  %v15082_v54 = vld [vmem:[%s18829_s1 + $0x10] sm:$0xff] }
 0x18a   : > { %19487 = vst [vmem:[#allocation141_spill] sm:$0xff] %v15052_v3  ;;  %3910 = vperm.xlu1 %13160, %v15057_v40   ;;  %v3000_v46 = vmul.f32 %v15052_v3, %v13773_v47 }
 0x18b   : > { %3970 = vperm.xlu0 %13161, %v15064_v26   ;;  %12075 = vmatmul.mubr.msk.bf16.gmra.mrb[28].mxu0 %vm1024_vm2, %v2622_v59  ;;  %v2997_v59 = vmul.f32 %v15022_v2, %v19374_v22  ;;  %v15103_v26 = vld [vmem:[%s18829_s1 + $0x18] sm:$0xff]  ;;  %v15108_v2 = vand.u32 %v11338_v35, %v13502_v9 }
 0x18c   : > { %v15068_v55 = vpop.permute.xlu0 %2940  ;;  %12080 = vmatprep.mubr.msk.bf16.mxu0 %vm1024_vm2, %v3027_v18  ;;  %v15088_v18 = vld [vmem:[%s18829_s1 + $0xb0] sm:$0xff]  ;;  %v3029_v41 = vpack.c.bf16 %v3000_v46, %v2999_v32  ;;  %19495 = vst [vmem:[#allocation149_spill] sm:$0xff] %v15103_v26  ;;  %v3001_v32 = vmul.f32 %v14957_v31, %v13803_v19 }
 0x18d   : > { %19490 = vst [vmem:[#allocation144_spill] sm:$0xff] %v15068_v55  ;;  %v15073_v6 = vpop.permute.xlu1 %2896  ;;  %19492 = vst [vmem:[#allocation146_spill] sm:$0xff] %v15088_v18  ;;  %v3028_v3 = vpack.c.bf16 %v2998_v10, %v2997_v59 }
 0x18e   : > { %19491 = vst [vmem:[#allocation145_spill] sm:$0xff] %v15073_v6  ;;  %3916 = vperm.xlu1 %13160, %v15082_v54   ;;  %v3002_v46 = vmul.f32 %v15073_v6, %v13800_v12 }
 0x18f   : > { %3976 = vperm.xlu0 %13161, %v15088_v18  }
 0x190   : > { %v15093_v7 = vpop.permute.xlu0 %2948 }
 0x191   : > { %19493 = vst [vmem:[#allocation147_spill] sm:$0xff] %v15093_v7  ;;  %v15095_v42 = vpop.permute.xlu1 %2904 }
 0x192   : > { %19494 = vst [vmem:[#allocation148_spill] sm:$0xff] %v15095_v42  ;;  %3919 = vperm.xlu1 %13160, %v15103_v26   ;;  %v3004_v35 = vmul.f32 %v15095_v42, %v13825_v58 }
 0x193   : > { %3982 = vperm.xlu0 %13161, %v19472_v28   ;;  %12081 = vmatmul.mubr.msk.bf16.vlgmr.msra.gmra.mrb[0].mxu0 %vm1024_vm2, %v3028_v3  ;;  %v3003_v28 = vmul.f32 %v14979_v51, %v13828_v60  ;;  %v3030_v3 = vpack.c.bf16 %v3002_v46, %v3001_v32  ;;  %v15140_v51 = vld [vmem:[%s18829_s1 + $0x38] sm:$0xff] }
 0x194   : > { %v15111_v10 = vpop.permute.xlu0 %2956  ;;  %12084 = vmatprep.mubr.msk.bf16.mxu0 %vm1024_vm2, %v3029_v41  ;;  %12113 = vmatpush3.bf16.msra.mxu0 %v14785_v44  ;;  %v15129_v44 = vld [vmem:[%s18829_s1 + $0x28] sm:$0xff]  ;;  %19500 = vst [vmem:[#allocation154_spill] sm:$0xff] %v15140_v51 }
 0x195   : > { %19496 = vst [vmem:[#allocation150_spill] sm:$0xff] %v15111_v10  ;;  %v15119_v59 = vpop.permute.xlu1 %2912  ;;  %12146 = vmatprep.subr.bf16.mxu0 %v15108_v2  ;;  %v3031_v6 = vpack.c.bf16 %v3004_v35, %v3003_v28  ;;  %v3007_v28 = vmul.f32 %v15018_v49, %v13898_v63  ;;  %v15172_v49 = vld [vmem:[%s18829_s1 + $0x58] sm:$0xff] }
 0x196   : > { %19497 = vst [vmem:[#allocation151_spill] sm:$0xff] %v15119_v59  ;;  %3925 = vperm.xlu1 %13160, %v15129_v44   ;;  %v3006_v32 = vmul.f32 %v15119_v59, %v19431_v29  ;;  %19506 = vst [vmem:[#allocation160_spill] sm:$0xff] %v15172_v49 }
 0x197   : > { %3988 = vperm.xlu0 %13161, %v19478_v0   ;;  %v3005_v0 = vmul.f32 %v15002_v38, %v19426_v23 }
 0x198   : > { %v15133_v41 = vpop.permute.xlu0 %2964 }
 0x199   : > { %19498 = vst [vmem:[#allocation152_spill] sm:$0xff] %v15133_v41  ;;  %v15135_v31 = vpop.permute.xlu1 %2920  ;;  %v3032_v38 = vpack.c.bf16 %v3006_v32, %v3005_v0  ;;  %v3009_v0 = vmul.f32 %v15032_v56, %v19436_v11 }
 0x19a   : > { %19499 = vst [vmem:[#allocation153_spill] sm:$0xff] %v15135_v31  ;;  %3931 = vperm.xlu1 %13160, %v15140_v51   ;;  %v3008_v35 = vmul.f32 %v15135_v31, %v19435_v14  ;;  %v19027_v31 = vmov 7  }
 0x19b   : > { %3994 = vperm.xlu0 %13161, %v14713_v37   ;;  %12085 = vmatmul.mubr.msk.bf16.gmra.mrb[4].mxu0 %vm1024_vm2, %v3030_v3  ;;  %v15161_v3 = vld [vmem:[%s18829_s1 + $0x48] sm:$0xff] }
 0x19c   : > { %v15145_v42 = vpop.permute.xlu0 %2972  ;;  %12088 = vmatprep.mubr.msk.bf16.mxu0 %vm1024_vm2, %v3031_v6  ;;  %19503 = vst [vmem:[#allocation157_spill] sm:$0xff] %v15161_v3  ;;  %v3033_v18 = vpack.c.bf16 %v3008_v35, %v3007_v28  ;;  %v3011_v35 = vmul.f32 %v15049_v39, %v13972_v50  ;;  %v13312_v39 = vld [vmem:[%s18829_s1 + $0x78] sm:$0xff] }
 0x19d   : > { %19501 = vst [vmem:[#allocation155_spill] sm:$0xff] %v15145_v42  ;;  %v15152_v46 = vpop.permute.xlu1 %2928 }
 0x19e   : > { %19502 = vst [vmem:[#allocation156_spill] sm:$0xff] %v15152_v46  ;;  %3937 = vperm.xlu1 %13160, %v15161_v3   ;;  %v3010_v32 = vmul.f32 %v15152_v46, %v19441_v48 }
 0x19f   : > { %4000 = vperm.xlu0 %13161, %v14735_v1  }
 0x1a0   : > { %v15165_v6 = vpop.permute.xlu0 %2984  ;;  %v3034_v56 = vpack.c.bf16 %v3010_v32, %v3009_v0  ;;  %v3015_v32 = vmul.f32 %v15093_v7, %v14049_v20  ;;  %v15229_v7 = vld [vmem:[%s18829_s1 + $0x98] sm:$0xff] }
 0x1a1   : > { %19504 = vst [vmem:[#allocation158_spill] sm:$0xff] %v15165_v6  ;;  %v15167_v59 = vpop.permute.xlu1 %2936  ;;  %19512 = vst [vmem:[#allocation166_spill] sm:$0xff] %v15229_v7 }
 0x1a2   : > { %19505 = vst [vmem:[#allocation159_spill] sm:$0xff] %v15167_v59  ;;  %3943 = vperm.xlu1 %13160, %v15172_v49  }
 0x1a3   : > { %13162 = vset.pattern.permute.xlu0 %v19027_v31  ;;  %12089 = vmatmul.mubr.msk.bf16.gmra.mrb[8].mxu0 %vm1024_vm2, %v3032_v38  ;;  %v3012_v31 = vmul.f32 %v15167_v59, %v13989_v52  ;;  %v15192_v38 = vld [vmem:[%s18829_s1 + $0x68] sm:$0xff] }
 0x1a4   : > { %4550 = vperm.xlu0 %13162, %v15057_v40   ;;  %12092 = vmatprep.mubr.msk.bf16.mxu0 %vm1024_vm2, %v3033_v18  ;;  %19508 = vst [vmem:[#allocation162_spill] sm:$0xff] %v15192_v38 }
 0x1a5   : > { %v3291_v1 = vpop.permute.xlu0 %3290  ;;  %v15183_v28 = vpop.permute.xlu1 %2944  ;;  %v3035_v40 = vpack.c.bf16 %v3012_v31, %v3011_v35 }
 0x1a6   : > { %19507 = vst [vmem:[#allocation161_spill] sm:$0xff] %v15183_v28  ;;  %3949 = vperm.xlu1 %13160, %v15192_v38   ;;  %v3014_v0 = vmul.f32 %v15183_v28, %v14026_v13 }
 0x1a8   : > { %4562 = vperm.xlu0 %13162, %v15103_v26   ;;  %v3013_v26 = vmul.f32 %v15068_v55, %v14007_v8 }
 0x1a9   : > { %v15196_v18 = vpop.permute.xlu0 %3299  ;;  %v15198_v46 = vpop.permute.xlu1 %2952 }
 0x1aa   : > { %19509 = vst [vmem:[#allocation163_spill] sm:$0xff] %v15198_v46  ;;  %3955 = vperm.xlu1 %13160, %v13312_v39   ;;  %v3036_v55 = vpack.c.bf16 %v3014_v0, %v3013_v26  ;;  %v3017_v26 = vmul.f32 %v15111_v10, %v14075_v21 }
 0x1ab   : > { %12093 = vmatmul.mubr.msk.bf16.gmra.mrb[12].mxu0 %vm1024_vm2, %v3034_v56  ;;  %v3016_v56 = vmul.f32 %v15198_v46, %v14057_v4 }
 0x1ac   : > { %4570 = vperm.xlu0 %13162, %v15129_v44   ;;  %12096 = vmatprep.mubr.msk.bf16.mxu0 %vm1024_vm2, %v3035_v40  ;;  %v13313_v40 = vld [vmem:[%s18829_s1 + $0x88] sm:$0xff] }
 0x1ad   : > { %v15206_v59 = vpop.permute.xlu0 %3302  ;;  %v15212_v31 = vpop.permute.xlu1 %2960  ;;  %v3037_v28 = vpack.c.bf16 %v3016_v56, %v3015_v32  ;;  %v3019_v56 = vmul.f32 %v15133_v41, %v14121_v30 }
 0x1ae   : > { %19510 = vst [vmem:[#allocation164_spill] sm:$0xff] %v15212_v31  ;;  %3961 = vperm.xlu1 %13160, %v13313_v40   ;;  %v3018_v0 = vmul.f32 %v15212_v31, %v19459_v33 }
 0x1b0   : > { %4578 = vperm.xlu0 %13162, %v15140_v51   ;;  %v3038_v10 = vpack.c.bf16 %v3018_v0, %v3017_v26  ;;  %v15253_v51 = vrot.slane %v3291_v1, 7 }
 0x1b1   : > { %v15222_v35 = vpop.permute.xlu0 %3311  ;;  %v15224_v17 = vpop.permute.xlu1 %2968 }
 0x1b2   : > { %19511 = vst [vmem:[#allocation165_spill] sm:$0xff] %v15224_v17  ;;  %3967 = vperm.xlu1 %13160, %v15229_v7   ;;  %19514 = vst [vmem:[#allocation168_spill] sm:$0xff] %v15253_v51 }
 0x1b3   : > { %12097 = vmatmul.mubr.msk.bf16.gmra.mrb[16].mxu0 %vm1024_vm2, %v3036_v55  ;;  %v3020_v55 = vmul.f32 %v15224_v17, %v14124_v27 }
 0x1b4   : > { %4586 = vperm.xlu0 %13162, %v15161_v3   ;;  %12100 = vmatprep.mubr.msk.bf16.mxu0 %vm1024_vm2, %v3037_v28  ;;  %v13315_v28 = vld [vmem:[%s18829_s1 + $0xa8] sm:$0xff] }
 0x1b5   : > { %v15235_v46 = vpop.permute.xlu0 %3317  ;;  %v15241_v32 = vpop.permute.xlu1 %2976  ;;  %v3039_v31 = vpack.c.bf16 %v3020_v55, %v3019_v56 }
 0x1b6   : > { %19513 = vst [vmem:[#allocation167_spill] sm:$0xff] %v15241_v32  ;;  %3973 = vperm.xlu1 %13160, %v13315_v28   ;;  %v3022_v1 = vmul.f32 %v15241_v32, %v14196_v36 }
 0x1b8   : > { %4594 = vperm.xlu0 %13162, %v15172_v49   ;;  %v3021_v49 = vmul.f32 %v15145_v42, %v14130_v5 }
 0x1b9   : > { %v15251_v3 = vpop.permute.xlu0 %3323 }
 0x1ba   : > { %3979 = vperm.xlu1 %13160, %v14586_v25   ;;  %v3294_v33 = vpop.permute.xlu1 %3293  ;;  %v3390_v25 = vrot.slane %v15196_v18, 7  ;;  %v3040_v55 = vpack.c.bf16 %v3022_v1, %v3021_v49  ;;  %v3024_v49 = vmul.f32 %v15165_v6, %v14168_v34 }
 0x1bb   : > { %v3386_v41 = vrot.slane %v3294_v33, 7  ;;  %12101 = vmatmul.mubr.msk.bf16.gmra.mrb[20].mxu0 %vm1024_vm2, %v3038_v10  ;;  %v3481_v33 = vmul.f32 %v15253_v51, %v19369_v45 }
 0x1bc   : > { %4602 = vperm.xlu0 %13162, %v15192_v38   ;;  %12104 = vmatprep.mubr.msk.bf16.mxu0 %vm1024_vm2, %v3039_v31 }
 0x1bd   : > { %v15259_v17 = vpop.permute.xlu0 %3329  ;;  %v15267_v26 = vsel %vm1073_vm0, %v15253_v51, %v3386_v41 }
 0x1be   : > { %19515 = vst [vmem:[#allocation169_spill] sm:$0xff] %v15267_v26  ;;  %v3482_v10 = vmul.f32 %v15267_v26, %v19370_v62  ;;  %3985 = vperm.xlu1 %13160, %v14609_v43   ;;  %v3297_v31 = vpop.permute.xlu1 %3296 }
 0x1bf   : > { %v3388_v0 = vrot.slane %v3297_v31, 7 }
 0x1c0   : > { %4610 = vperm.xlu0 %13162, %v13312_v39   ;;  %v3514_v18 = vpack.c.bf16 %v3482_v10, %v3481_v33 }
 0x1c1   : > { %v15275_v56 = vpop.permute.xlu0 %3335  ;;  %v15278_v42 = vsel %vm1073_vm0, %v3386_v41, %v3388_v0  ;;  %v15281_v32 = vsel %vm1073_vm0, %v3388_v0, %v3390_v25  ;;  %v19521_v0 = vld [vmem:[#allocation114_spill] sm:$0xff] }
 0x1c2   : > { %19516 = vst [vmem:[#allocation170_spill] sm:$0xff] %v15278_v42  ;;  %19517 = vst [vmem:[#allocation171_spill] sm:$0xff] %v15281_v32  ;;  %v3483_v45 = vmul.f32 %v15278_v42, %v19374_v22  ;;  %v3484_v51 = vmul.f32 %v15281_v32, %v13748_v61  ;;  %3991 = vperm.xlu1 %13160, %v14637_v16   ;;  %v3536_v33 = vshll.u32 %v3514_v18, 16  ;;  %v15300_v16 = vld [vmem:[%s18829_s1 + $0xe8] sm:$0xff]  ;;  %v19524_v42 = vld [vmem:[#allocation77_spill] sm:$0xff]  ;;  %v3534_v32 = vshrl.u32 %v3514_v18, 16 }
 0x1c3   : > { %v15288_v43 = vpop.permute.xlu1 %2980  ;;  %12105 = vmatmul.mubr.msk.bf16.gmra.mrb[24].mxu0 %vm1024_vm2, %v3040_v55  ;;  %19519 = vst [vmem:[#allocation173_spill] sm:$0xff] %v15300_v16 }
 0x1c4   : > { %19518 = vst [vmem:[#allocation172_spill] sm:$0xff] %v15288_v43  ;;  %4618 = vperm.xlu0 %13162, %v13313_v40   ;;  %v3515_v39 = vpack.c.bf16 %v3484_v51, %v3483_v45  ;;  %v3023_v41 = vmul.f32 %v15288_v43, %v14216_v53  ;;  %v3538_v55 = vrot.slane %v3536_v33, 1  ;;  %v3392_v45 = vrot.slane %v15206_v59, 7  ;;  %v19527_v59 = vld [vmem:[#allocation90_spill] sm:$0xff] }
 0x1c5   : > { %v15295_v1 = vpop.permute.xlu0 %3341 }
 0x1c6   : > { %v3041_v10 = vpack.c.bf16 %v3024_v49, %v3023_v41  ;;  %3997 = vperm.xlu1 %13160, %v15300_v16   ;;  %v3541_v51 = vshll.u32 %v3515_v39, 16  ;;  %v19523_v41 = vld [vmem:[#allocation102_spill] sm:$0xff]  ;;  %v3539_v61 = vor.u32 %v3538_v55, %v3534_v32  ;;  %v15321_v33 = vsel %vm1073_vm0, %v3390_v25, %v3392_v45 }
 0x1c7   : > { %v15303_v31 = vpop.permute.xlu1 %2988  ;;  %19526 = vst [vmem:[#allocation102_spill] sm:$0xff] %v15321_v33  ;;  %v3485_v25 = vmul.f32 %v15321_v33, %v13788_v57  ;;  %v15363_v57 = vld [vmem:[%s18829_s1 + $0xd8] sm:$0xff] }
 0x1c8   : > { %19520 = vst [vmem:[#allocation174_spill] sm:$0xff] %v15303_v31  ;;  %4626 = vperm.xlu0 %13162, %v15229_v7   ;;  %12108 = vmatprep.mubr.msk.bf16.mxu0 %vm1024_vm2, %v3041_v10  ;;  %v3025_v43 = vmul.f32 %v15303_v31, %v19523_v41  ;;  %v3543_v26 = vrot.slane %v3541_v51, 1  ;;  %v19525_v7 = vmov 7   ;;  %v3398_v51 = vrot.slane %v15222_v35, 7 }
 0x1c9   : > { %v15307_v40 = vpop.permute.xlu0 %3347 }
 0x1ca   : > { %4003 = vperm.xlu1 %13160, %v19521_v0  }
 0x1cb   : > { %v15311_v49 = vpop.permute.xlu1 %2992 }
 0x1cc   : > { %19522 = vst [vmem:[#allocation114_spill] sm:$0xff] %v15311_v49  ;;  %4634 = vperm.xlu0 %13162, %v13315_v28   ;;  %v3026_v6 = vmul.f32 %v15311_v49, %v19524_v42  ;;  %v15327_v28 = vld [vmem:[%s18829_s1 + $0xb8] sm:$0xff] }
 0x1cd   : > { %v15317_v10 = vpop.permute.xlu0 %3353  ;;  %19528 = vst [vmem:[#allocation90_spill] sm:$0xff] %v15327_v28 }
 0x1ce   : > { %v3042_v38 = vpack.c.bf16 %v3026_v6, %v3025_v43  ;;  %13163 = vset.pattern.permute.xlu1 %v19525_v7  ;;  %v3544_v6 = vsel %vm1850_vm5, %v3539_v61, %v3543_v26 }
 0x1cf   : > { %4554 = vperm.xlu1 %13163, %v19527_v59  }
 0x1d0   : > { %4642 = vperm.xlu0 %13162, %v15327_v28   ;;  %v3306_v18 = vpop.permute.xlu1 %3305  ;;  %12109 = vmatmul.mubr.msk.bf16.gmra.mrb[28].mxu0 %vm1024_vm2, %v3042_v38  ;;  %v15345_v38 = vld [vmem:[%s18829_s1 + $0xc8] sm:$0xff]  ;;  %v19532_v28 = vld [vmem:[#allocation5_spill] sm:$0xff] }
 0x1d1   : > { %v15332_v43 = vpop.permute.xlu0 %3359  ;;  %v3394_v32 = vrot.slane %v3306_v18, 7  ;;  %12114 = vmatprep.mubr.msk.bf16.mxu0 %vm1024_vm2, %v3544_v6  ;;  %19533 = vst [vmem:[#allocation5_spill] sm:$0xff] %v15363_v57 }
 0x1d3   : > { %v15339_v55 = vsel %vm1073_vm0, %v3392_v45, %v3394_v32  ;;  %4558 = vperm.xlu1 %13163, %v15082_v54   ;;  %v3402_v45 = vrot.slane %v15235_v46, 7 }
 0x1d4   : > { %19529 = vst [vmem:[#allocation175_spill] sm:$0xff] %v15339_v55  ;;  %4650 = vperm.xlu0 %13162, %v15345_v38   ;;  %v3486_v61 = vmul.f32 %v15339_v55, %v13773_v47  ;;  %v3309_v18 = vpop.permute.xlu1 %3308  ;;  %v3545_v55 = vshrl.u32 %v3515_v39, 16  ;;  %v3406_v39 = vrot.slane %v15251_v3, 7 }
 0x1d5   : > { %v15350_v6 = vpop.permute.xlu0 %3365  ;;  %v3396_v31 = vrot.slane %v3309_v18, 7 }
 0x1d6   : > { %v3516_v35 = vpack.c.bf16 %v3486_v61, %v3485_v25  ;;  %v3547_v7 = vor.u32 %v3545_v55, %v3543_v26 }
 0x1d7   : > { %v15354_v49 = vsel %vm1073_vm0, %v3394_v32, %v3396_v31  ;;  %v15357_v33 = vsel %vm1073_vm0, %v3396_v31, %v3398_v51  ;;  %4566 = vperm.xlu1 %13163, %v19532_v28   ;;  %v11355_v28 = vld [vmem:[%s18833_s5 + $0xe] sm:$0x3] }
 0x1d8   : > { %19530 = vst [vmem:[#allocation176_spill] sm:$0xff] %v15354_v49  ;;  %19531 = vst [vmem:[#allocation177_spill] sm:$0xff] %v15357_v33  ;;  %4658 = vperm.xlu0 %13162, %v15363_v57   ;;  %v3549_v18 = vshll.u32 %v3516_v35, 16  ;;  %v3487_v46 = vmul.f32 %v15354_v49, %v13803_v19  ;;  %v3488_v32 = vmul.f32 %v15357_v33, %v13800_v12  ;;  %v3315_v25 = vpop.permute.xlu1 %3314  ;;  %v19536_v33 = vld [vmem:[#allocation74_spill] sm:$0xff] }
 0x1d9   : > { %v15370_v31 = vpop.permute.xlu0 %3371  ;;  %v3400_v61 = vrot.slane %v3315_v25, 7 }
 0x1da   : > { %v3551_v47 = vrot.slane %v3549_v18, 1  ;;  %v3517_v16 = vpack.c.bf16 %v3488_v32, %v3487_v46 }
 0x1db   : > { %v15377_v57 = vsel %vm1073_vm0, %v3398_v51, %v3400_v61  ;;  %v15380_v49 = vsel %vm1073_vm0, %v3400_v61, %v3402_v45  ;;  %4574 = vperm.xlu1 %13163, %v19536_v33   ;;  %v15392_v51 = vand.u32 %v11355_v28, %v13502_v9  ;;  %v3553_v33 = vshrl.u32 %v3516_v35, 16 }
 0x1dc   : > { %19534 = vst [vmem:[#allocation178_spill] sm:$0xff] %v15377_v57  ;;  %19535 = vst [vmem:[#allocation179_spill] sm:$0xff] %v15380_v49  ;;  %4662 = vperm.xlu0 %13162, %v14713_v37   ;;  %v3489_v25 = vmul.f32 %v15377_v57, %v13828_v60  ;;  %v3490_v18 = vmul.f32 %v15380_v49, %v13825_v58  ;;  %v3321_v26 = vpop.permute.xlu1 %3320  ;;  %v3552_v55 = vsel %vm1850_vm5, %v3547_v7, %v3551_v47  ;;  %v19539_v49 = vld [vmem:[#allocation125_spill] sm:$0xff] }
 0x1dd   : > { %v15389_v3 = vpop.permute.xlu0 %3377  ;;  %v3404_v46 = vrot.slane %v3321_v26, 7  ;;  %12115 = vmatmul.mubr.msk.bf16.vlgmr.msra.gmra.mrb[0].mxu0 %vm1024_vm2, %v3552_v55  ;;  %v3557_v32 = vshll.u32 %v3517_v16, 16  ;;  %v3410_v37 = vrot.slane %v15259_v17, 7  ;;  %v3555_v28 = vor.u32 %v3553_v33, %v3551_v47 }
 0x1de   : > { %v3518_v61 = vpack.c.bf16 %v3490_v18, %v3489_v25  ;;  %12147 = vmatpush3.bf16.msra.mxu0 %v15108_v2  ;;  %v3561_v2 = vshrl.u32 %v3517_v16, 16  ;;  %v3414_v33 = vrot.slane %v15275_v56, 7 }
 0x1df   : > { %v15398_v57 = vsel %vm1073_vm0, %v3402_v45, %v3404_v46  ;;  %v15401_v7 = vsel %vm1073_vm0, %v3404_v46, %v3406_v39  ;;  %4582 = vperm.xlu1 %13163, %v19539_v49   ;;  %v3559_v9 = vrot.slane %v3557_v32, 1  ;;  %12180 = vmatprep.subr.bf16.mxu0 %v15392_v51 }
 0x1e0   : > { %19537 = vst [vmem:[#allocation74_spill] sm:$0xff] %v15398_v57  ;;  %19538 = vst [vmem:[#allocation180_spill] sm:$0xff] %v15401_v7  ;;  %4674 = vperm.xlu0 %13162, %v19521_v0   ;;  %v3491_v35 = vmul.f32 %v15398_v57, %v19426_v23  ;;  %v3492_v17 = vmul.f32 %v15401_v7, %v19431_v29  ;;  %v3327_v25 = vpop.permute.xlu1 %3326  ;;  %v3565_v18 = vshll.u32 %v3518_v61, 16  ;;  %v19542_v57 = vld [vmem:[#allocation81_spill] sm:$0xff] }
 0x1e1   : > { %v3408_v45 = vrot.slane %v3327_v25, 7  ;;  %v3560_v26 = vsel %vm1850_vm5, %v3555_v28, %v3559_v9  ;;  %v15411_v55 = vpop.permute.xlu0 %3383  ;;  %v3563_v0 = vor.u32 %v3561_v2, %v3559_v9  ;;  %v19080_v25 = vmov 8  }
 0x1e2   : > { %v3519_v47 = vpack.c.bf16 %v3492_v17, %v3491_v35  ;;  %12118 = vmatprep.mubr.msk.bf16.mxu0 %vm1024_vm2, %v3560_v26  ;;  %v3567_v46 = vrot.slane %v3565_v18, 1  ;;  %v3569_v17 = vshrl.u32 %v3518_v61, 16 }
 0x1e3   : > { %v15416_v32 = vsel %vm1073_vm0, %v3406_v39, %v3408_v45  ;;  %v15419_v16 = vsel %vm1073_vm0, %v3408_v45, %v3410_v37  ;;  %4590 = vperm.xlu1 %13163, %v19542_v57   ;;  %v3418_v45 = vrot.slane %v15295_v1, 7 }
 0x1e4   : > { %19540 = vst [vmem:[#allocation125_spill] sm:$0xff] %v15416_v32  ;;  %19541 = vst [vmem:[#allocation181_spill] sm:$0xff] %v15419_v16  ;;  %13166 = vset.pattern.permute.xlu0 %v19080_v25  ;;  %v3493_v28 = vmul.f32 %v15416_v32, %v13898_v63  ;;  %v3494_v9 = vmul.f32 %v15419_v16, %v19435_v14  ;;  %v3333_v35 = vpop.permute.xlu1 %3332  ;;  %v3568_v56 = vsel %vm1850_vm5, %v3563_v0, %v3567_v46  ;;  %v19545_v16 = vld [vmem:[#allocation84_spill] sm:$0xff] }
 0x1e5   : > { %4975 = vperm.xlu0 %13166, %v19527_v59   ;;  %v3412_v39 = vrot.slane %v3333_v35, 7  ;;  %12119 = vmatmul.mubr.msk.bf16.gmra.mrb[4].mxu0 %vm1024_vm2, %v3568_v56  ;;  %v3573_v2 = vshll.u32 %v3519_v47, 16  ;;  %v3571_v0 = vor.u32 %v3569_v17, %v3567_v46  ;;  %v3577_v7 = vshrl.u32 %v3519_v47, 16 }
 0x1e6   : > { %v15430_v18 = vpop.permute.xlu0 %3913  ;;  %v3520_v26 = vpack.c.bf16 %v3494_v9, %v3493_v28 }
 0x1e7   : > { %v15434_v25 = vsel %vm1073_vm0, %v3410_v37, %v3412_v39  ;;  %v15437_v32 = vsel %vm1073_vm0, %v3412_v39, %v3414_v33  ;;  %4598 = vperm.xlu1 %13163, %v19545_v16   ;;  %v3575_v59 = vrot.slane %v3573_v2, 1  ;;  %v3422_v2 = vrot.slane %v15307_v40, 7 }
 0x1e8   : > { %19543 = vst [vmem:[#allocation81_spill] sm:$0xff] %v15434_v25  ;;  %19544 = vst [vmem:[#allocation182_spill] sm:$0xff] %v15437_v32  ;;  %v3495_v35 = vmul.f32 %v15434_v25, %v19436_v11  ;;  %v3496_v61 = vmul.f32 %v15437_v32, %v19441_v48  ;;  %v3339_v56 = vpop.permute.xlu1 %3338  ;;  %v3581_v1 = vshll.u32 %v3520_v26, 16 }
 0x1e9   : > { %4987 = vperm.xlu0 %13166, %v15129_v44   ;;  %v3416_v37 = vrot.slane %v3339_v56, 7  ;;  %v3576_v28 = vsel %vm1850_vm5, %v3571_v0, %v3575_v59  ;;  %v3579_v46 = vor.u32 %v3577_v7, %v3575_v59  ;;  %v3426_v56 = vrot.slane %v15317_v10, 7 }
 0x1ea   : > { %v15446_v9 = vpop.permute.xlu0 %3922  ;;  %v3521_v39 = vpack.c.bf16 %v3496_v61, %v3495_v35  ;;  %12122 = vmatprep.mubr.msk.bf16.mxu0 %vm1024_vm2, %v3576_v28  ;;  %v3583_v17 = vrot.slane %v3581_v1, 1 }
 0x1eb   : > { %v15451_v25 = vsel %vm1073_vm0, %v3414_v33, %v3416_v37  ;;  %v15454_v47 = vsel %vm1073_vm0, %v3416_v37, %v3418_v45  ;;  %4606 = vperm.xlu1 %13163, %v15014_v15   ;;  %v3585_v33 = vshrl.u32 %v3520_v26, 16 }
 0x1ec   : > { %19546 = vst [vmem:[#allocation84_spill] sm:$0xff] %v15451_v25  ;;  %19547 = vst [vmem:[#allocation183_spill] sm:$0xff] %v15454_v47  ;;  %v3497_v44 = vmul.f32 %v15451_v25, %v13972_v50  ;;  %v3498_v0 = vmul.f32 %v15454_v47, %v13989_v52  ;;  %v3345_v35 = vpop.permute.xlu1 %3344  ;;  %v3584_v7 = vsel %vm1850_vm5, %v3579_v46, %v3583_v17  ;;  %v3589_v59 = vshll.u32 %v3521_v39, 16 }
 0x1ed   : > { %4996 = vperm.xlu0 %13166, %v19539_v49   ;;  %v3420_v40 = vrot.slane %v3345_v35, 7  ;;  %12123 = vmatmul.mubr.msk.bf16.gmra.mrb[8].mxu0 %vm1024_vm2, %v3584_v7  ;;  %v3587_v46 = vor.u32 %v3585_v33, %v3583_v17  ;;  %v3593_v25 = vshrl.u32 %v3521_v39, 16 }
 0x1ee   : > { %v15464_v61 = vpop.permute.xlu0 %3928  ;;  %v3522_v1 = vpack.c.bf16 %v3498_v0, %v3497_v44  ;;  %v3591_v49 = vrot.slane %v3589_v59, 1  ;;  %v3430_v59 = vrot.slane %v15332_v43, 7 }
 0x1ef   : > { %v15468_v37 = vsel %vm1073_vm0, %v3418_v45, %v3420_v40  ;;  %v15471_v28 = vsel %vm1073_vm0, %v3420_v40, %v3422_v2  ;;  %4614 = vperm.xlu1 %13163, %v15028_v24  }
 0x1f0   : > { %19548 = vst [vmem:[#allocation184_spill] sm:$0xff] %v15468_v37  ;;  %19549 = vst [vmem:[#allocation185_spill] sm:$0xff] %v15471_v28  ;;  %v3499_v35 = vmul.f32 %v15468_v37, %v14007_v8  ;;  %v3500_v26 = vmul.f32 %v15471_v28, %v14026_v13  ;;  %v3351_v7 = vpop.permute.xlu1 %3350  ;;  %v3597_v10 = vshll.u32 %v3522_v1, 16  ;;  %v3592_v44 = vsel %vm1850_vm5, %v3587_v46, %v3591_v49  ;;  %v19552_v28 = vld [vmem:[#allocation139_spill] sm:$0xff] }
 0x1f1   : > { %5002 = vperm.xlu0 %13166, %v19542_v57   ;;  %v3424_v45 = vrot.slane %v3351_v7, 7  ;;  %12126 = vmatprep.mubr.msk.bf16.mxu0 %vm1024_vm2, %v3592_v44  ;;  %v3595_v17 = vor.u32 %v3593_v25, %v3591_v49  ;;  %v19555_v44 = vld [vmem:[#allocation143_spill] sm:$0xff] }
 0x1f2   : > { %v15480_v0 = vpop.permute.xlu0 %3934  ;;  %v3523_v40 = vpack.c.bf16 %v3500_v26, %v3499_v35  ;;  %v3599_v33 = vrot.slane %v3597_v10, 1 }
 0x1f3   : > { %v15485_v37 = vsel %vm1073_vm0, %v3422_v2, %v3424_v45  ;;  %v15488_v39 = vsel %vm1073_vm0, %v3424_v45, %v3426_v56  ;;  %4622 = vperm.xlu1 %13163, %v19552_v28   ;;  %v3601_v2 = vshrl.u32 %v3522_v1, 16 }
 0x1f4   : > { %19550 = vst [vmem:[#allocation186_spill] sm:$0xff] %v15485_v37  ;;  %19551 = vst [vmem:[#allocation187_spill] sm:$0xff] %v15488_v39  ;;  %v3501_v57 = vmul.f32 %v15485_v37, %v14049_v20  ;;  %v3502_v46 = vmul.f32 %v15488_v39, %v14057_v4  ;;  %v3357_v35 = vpop.permute.xlu1 %3356  ;;  %v3600_v25 = vsel %vm1850_vm5, %v3595_v17, %v3599_v33  ;;  %v3605_v49 = vshll.u32 %v3523_v40, 16 }
 0x1f5   : > { %5008 = vperm.xlu0 %13166, %v19545_v16   ;;  %v3428_v43 = vrot.slane %v3357_v35, 7  ;;  %12127 = vmatmul.mubr.msk.bf16.gmra.mrb[12].mxu0 %vm1024_vm2, %v3600_v25  ;;  %v3603_v37 = vor.u32 %v3601_v2, %v3599_v33  ;;  %v19556_v35 = vld [vmem:[#allocation49_spill] sm:$0xff]  ;;  %v3609_v39 = vshrl.u32 %v3523_v40, 16 }
 0x1f6   : > { %v15498_v26 = vpop.permute.xlu0 %3940  ;;  %v3524_v7 = vpack.c.bf16 %v3502_v46, %v3501_v57  ;;  %v3607_v17 = vrot.slane %v3605_v49, 1 }
 0x1f7   : > { %v15501_v10 = vsel %vm1073_vm0, %v3426_v56, %v3428_v43  ;;  %v15504_v45 = vsel %vm1073_vm0, %v3428_v43, %v3430_v59  ;;  %4630 = vperm.xlu1 %13163, %v19555_v44   ;;  %v3434_v56 = vrot.slane %v15350_v6, 7 }
 0x1f8   : > { %19553 = vst [vmem:[#allocation139_spill] sm:$0xff] %v15501_v10  ;;  %19554 = vst [vmem:[#allocation188_spill] sm:$0xff] %v15504_v45  ;;  %v3503_v16 = vmul.f32 %v15501_v10, %v14075_v21  ;;  %v3504_v1 = vmul.f32 %v15504_v45, %v19556_v35  ;;  %v3363_v25 = vpop.permute.xlu1 %3362  ;;  %v3613_v47 = vshll.u32 %v3524_v7, 16  ;;  %v3608_v46 = vsel %vm1850_vm5, %v3603_v37, %v3607_v17  ;;  %v19559_v45 = vld [vmem:[#allocation146_spill] sm:$0xff] }
 0x1f9   : > { %5014 = vperm.xlu0 %13166, %v15014_v15   ;;  %v3432_v57 = vrot.slane %v3363_v25, 7  ;;  %12130 = vmatprep.mubr.msk.bf16.mxu0 %vm1024_vm2, %v3608_v46  ;;  %v3611_v2 = vor.u32 %v3609_v39, %v3607_v17  ;;  %v3617_v39 = vshrl.u32 %v3524_v7, 16 }
 0x1fa   : > { %v15514_v43 = vpop.permute.xlu0 %3946  ;;  %v3525_v33 = vpack.c.bf16 %v3504_v1, %v3503_v16  ;;  %v3615_v49 = vrot.slane %v3613_v47, 1  ;;  %v3438_v47 = vrot.slane %v15370_v31, 7 }
 0x1fb   : > { %v15518_v10 = vsel %vm1073_vm0, %v3430_v59, %v3432_v57  ;;  %v15521_v40 = vsel %vm1073_vm0, %v3432_v57, %v3434_v56  ;;  %4638 = vperm.xlu1 %13163, %v19559_v45  }
 0x1fc   : > { %19557 = vst [vmem:[#allocation143_spill] sm:$0xff] %v15518_v10  ;;  %19558 = vst [vmem:[#allocation49_spill] sm:$0xff] %v15521_v40  ;;  %v3505_v15 = vmul.f32 %v15518_v10, %v14121_v30  ;;  %v3506_v6 = vmul.f32 %v15521_v40, %v14124_v27  ;;  %v3369_v37 = vpop.permute.xlu1 %3368  ;;  %v3616_v16 = vsel %vm1850_vm5, %v3611_v2, %v3615_v49  ;;  %v3621_v17 = vshll.u32 %v3525_v33, 16  ;;  %v15543_v2 = vld [vmem:[%s18829_s1 + $0xc0] sm:$0xff] }
 0x1fd   : > { %5020 = vperm.xlu0 %13166, %v15028_v24   ;;  %v3436_v59 = vrot.slane %v3369_v37, 7  ;;  %12131 = vmatmul.mubr.msk.bf16.gmra.mrb[16].mxu0 %vm1024_vm2, %v3616_v16  ;;  %v3619_v31 = vor.u32 %v3617_v39, %v3615_v49  ;;  %v3446_v10 = vrot.slane %v15411_v55, 7 }
 0x1fe   : > { %v15532_v1 = vpop.permute.xlu0 %3952  ;;  %v3526_v25 = vpack.c.bf16 %v3506_v6, %v3505_v15  ;;  %v3623_v37 = vrot.slane %v3621_v17, 1  ;;  %v3625_v6 = vshrl.u32 %v3525_v33, 16 }
 0x1ff   : > { %v15535_v57 = vsel %vm1073_vm0, %v3434_v56, %v3436_v59  ;;  %v15538_v46 = vsel %vm1073_vm0, %v3436_v59, %v3438_v47  ;;  %4646 = vperm.xlu1 %13163, %v15543_v2   ;;  %v3442_v59 = vrot.slane %v15389_v3, 7  ;;  %v15566_v3 = vld [vmem:[%s18829_s1 + $0xd0] sm:$0xff] }
 0x200   : > { %19560 = vst [vmem:[#allocation146_spill] sm:$0xff] %v15535_v57  ;;  %19561 = vst [vmem:[#allocation189_spill] sm:$0xff] %v15538_v46  ;;  %v3507_v7 = vmul.f32 %v15535_v57, %v14130_v5  ;;  %v3508_v15 = vmul.f32 %v15538_v46, %v14196_v36  ;;  %v3375_v56 = vpop.permute.xlu1 %3374  ;;  %v3629_v16 = vshll.u32 %v3526_v25, 16  ;;  %v3624_v32 = vsel %vm1850_vm5, %v3619_v31, %v3623_v37 }
 0x201   : > { %5026 = vperm.xlu0 %13166, %v19552_v28   ;;  %v3440_v40 = vrot.slane %v3375_v56, 7  ;;  %12134 = vmatprep.mubr.msk.bf16.mxu0 %vm1024_vm2, %v3624_v32  ;;  %v3627_v17 = vor.u32 %v3625_v6, %v3623_v37  ;;  %19564 = vst [vmem:[#allocation192_spill] sm:$0xff] %v15566_v3  ;;  %v3633_v37 = vshrl.u32 %v3526_v25, 16  ;;  %v4006_v56 = vrot.slane %v15430_v18, 1 }
 0x202   : > { %v15554_v49 = vpop.permute.xlu0 %3958  ;;  %v3527_v39 = vpack.c.bf16 %v3508_v15, %v3507_v7  ;;  %v3631_v57 = vrot.slane %v3629_v16, 1 }
 0x203   : > { %v15558_v46 = vsel %vm1073_vm0, %v3438_v47, %v3440_v40  ;;  %v15561_v33 = vsel %vm1073_vm0, %v3440_v40, %v3442_v59  ;;  %4654 = vperm.xlu1 %13163, %v15566_v3   ;;  %v3513_v40 = vmul.f32 0.0, %v3446_v10 }
 0x204   : > { %19562 = vst [vmem:[#allocation190_spill] sm:$0xff] %v15558_v46  ;;  %19563 = vst [vmem:[#allocation191_spill] sm:$0xff] %v15561_v33  ;;  %v3509_v55 = vmul.f32 %v15558_v46, %v14216_v53  ;;  %v3510_v32 = vmul.f32 %v15561_v33, %v14168_v34  ;;  %v3381_v28 = vpop.permute.xlu1 %3380  ;;  %v3632_v47 = vsel %vm1850_vm5, %v3627_v17, %v3631_v57  ;;  %v3637_v7 = vshll.u32 %v3527_v39, 16 }
 0x205   : > { %5032 = vperm.xlu0 %13166, %v19555_v44   ;;  %v3444_v31 = vrot.slane %v3381_v28, 7  ;;  %12135 = vmatmul.mubr.msk.bf16.gmra.mrb[20].mxu0 %vm1024_vm2, %v3632_v47  ;;  %v19567_v17 = vmov 8   ;;  %v3635_v33 = vor.u32 %v3633_v37, %v3631_v57  ;;  %v19568_v47 = vld [vmem:[#allocation142_spill] sm:$0xff]  ;;  %v3641_v18 = vshrl.u32 %v3527_v39, 16 }
 0x206   : > { %v15576_v15 = vpop.permute.xlu0 %3964  ;;  %v3528_v6 = vpack.c.bf16 %v3510_v32, %v3509_v55  ;;  %v3639_v3 = vrot.slane %v3637_v7, 1 }
 0x207   : > { %v15580_v16 = vsel %vm1073_vm0, %v3442_v59, %v3444_v31  ;;  %v15583_v46 = vsel %vm1073_vm0, %v3444_v31, %v3446_v10  ;;  %13164 = vset.pattern.permute.xlu1 %v19567_v17  ;;  %v3530_v59 = vpack.c.bf16 %v3513_v40, %v3513_v40 }
 0x208   : > { %19565 = vst [vmem:[#allocation193_spill] sm:$0xff] %v15580_v16  ;;  %19566 = vst [vmem:[#allocation194_spill] sm:$0xff] %v15583_v46  ;;  %v3511_v28 = vmul.f32 %v15580_v16, %v19523_v41  ;;  %v3512_v25 = vmul.f32 %v15583_v46, %v19524_v42  ;;  %4972 = vperm.xlu1 %13164, %v19568_v47   ;;  %v3645_v55 = vshll.u32 %v3528_v6, 16  ;;  %v3649_v40 = vshrl.u32 %v3528_v6, 16  ;;  %v19573_v42 = vld [vmem:[#allocation173_spill] sm:$0xff] }
 0x209   : > { %5038 = vperm.xlu0 %13166, %v19559_v45   ;;  %v3911_v32 = vpop.permute.xlu1 %3910  ;;  %v3640_v10 = vsel %vm1850_vm5, %v3635_v33, %v3639_v3  ;;  %v3643_v7 = vor.u32 %v3641_v18, %v3639_v3  ;;  %v15604_v39 = vshll.u32 %v3530_v59, 16  ;;  %v19572_v59 = vld [vmem:[#allocation149_spill] sm:$0xff]  ;;  %v4012_v6 = vrot.slane %v15446_v9, 1 }
 0x20a   : > { %v15593_v31 = vpop.permute.xlu0 %3970  ;;  %v3529_v57 = vpack.c.bf16 %v3512_v25, %v3511_v28  ;;  %v15595_v37 = vrot.slane %v3911_v32, 1  ;;  %12138 = vmatprep.mubr.msk.bf16.mxu0 %vm1024_vm2, %v3640_v10  ;;  %v3647_v16 = vrot.slane %v3645_v55, 1 }
 0x20b   : > { %19571 = vst [vmem:[#allocation196_spill] sm:$0xff] %v15604_v39 }
 0x20c   : > { %19569 = vst [vmem:[#allocation142_spill] sm:$0xff] %v15595_v37  ;;  %v15600_v47 = vsel %vm698_vm3, %v15595_v37, %v4006_v56  ;;  %4978 = vperm.xlu1 %13164, %v15082_v54   ;;  %v3648_v45 = vsel %vm1850_vm5, %v3643_v7, %v3647_v16  ;;  %v3653_v28 = vshll.u32 %v3529_v57, 16  ;;  %v4101_v3 = vmul.f32 %v15595_v37, %v19370_v62 }
 0x20d   : > { %19570 = vst [vmem:[#allocation195_spill] sm:$0xff] %v15600_v47  ;;  %v3917_v33 = vpop.permute.xlu1 %3916  ;;  %12139 = vmatmul.mubr.msk.bf16.gmra.mrb[24].mxu0 %vm1024_vm2, %v3648_v45  ;;  %5047 = vperm.xlu0 %13166, %v15345_v38   ;;  %v4102_v18 = vmul.f32 %v15600_v47, %v19374_v22  ;;  %v3651_v55 = vor.u32 %v3649_v40, %v3647_v16  ;;  %v3657_v10 = vshrl.u32 %v3529_v57, 16  ;;  %v19107_v7 = vrot.slane %v15604_v39, 1  ;;  %v19582_v39 = vld [vmem:[#allocation12_spill] sm:$0xff] }
 0x20e   : > { %v15607_v25 = vpop.permute.xlu0 %3976  ;;  %v4008_v54 = vrot.slane %v3917_v33, 1  ;;  %v3655_v32 = vrot.slane %v3653_v28, 1  ;;  %v19576_v40 = vmov 7   ;;  %v4016_v28 = vrot.slane %v15464_v61, 1 }
 0x20f   : > { %v4134_v62 = vpack.c.bf16 %v4102_v18, %v4101_v3  ;;  %v19580_v61 = vmov 1  }
 0x210   : > { %4981 = vperm.xlu1 %13164, %v19572_v59   ;;  %v3656_v46 = vsel %vm1850_vm5, %v3651_v55, %v3655_v32  ;;  %v15622_v47 = vsel %vm698_vm3, %v4006_v56, %v4008_v54  ;;  %v3659_v33 = vor.u32 %v3657_v10, %v3655_v32  ;;  %v19577_v55 = vld [vmem:[#allocation7_spill] sm:$0xff]  ;;  %v19578_v56 = vld [vmem:[#allocation13_spill] sm:$0xff] }
 0x211   : > { %v3920_v45 = vpop.permute.xlu1 %3919  ;;  %5059 = vperm.xlu0 %13166, %v19573_v42   ;;  %19574 = vst [vmem:[#allocation149_spill] sm:$0xff] %v15622_v47  ;;  %12142 = vmatprep.mubr.msk.bf16.mxu0 %vm1024_vm2, %v3656_v46  ;;  %v4103_v3 = vmul.f32 %v15622_v47, %v19577_v55  ;;  %v4154_v32 = vshrl.u32 %v4134_v62, 16  ;;  %v4157_v59 = vshll.u32 %v4134_v62, 16 }
 0x212   : > { %v15618_v38 = vpop.permute.xlu0 %3982  ;;  %v4010_v16 = vrot.slane %v3920_v45, 1  ;;  %v3664_v9 = vsel %vm1850_vm5, %v3659_v33, %v19107_v7 }
 0x213   : > { %v4159_v47 = vrot.slane %v4157_v59, 4 }
 0x214   : > { %v15626_v57 = vsel %vm698_vm3, %v4008_v54, %v4010_v16  ;;  %13165 = vset.pattern.permute.xlu1 %v19576_v40  ;;  %v15642_v10 = vsel %vm698_vm3, %v4010_v16, %v4012_v6  ;;  %v4020_v40 = vrot.slane %v15480_v0, 1  ;;  %v15657_v16 = vld [vmem:[%s18829_s1 + $0xf0] sm:$0xff] }
 0x215   : > { %19575 = vst [vmem:[#allocation173_spill] sm:$0xff] %v15626_v57  ;;  %v4104_v18 = vmul.f32 %v15626_v57, %v19578_v56  ;;  %4666 = vperm.xlu1 %13165, %v19573_v42   ;;  %v3926_v46 = vpop.permute.xlu1 %3925  ;;  %12143 = vmatmul.mubr.msk.bf16.gmra.mrb[28].mxu0 %vm1024_vm2, %v3664_v9  ;;  %19579 = vst [vmem:[#allocation197_spill] sm:$0xff] %v15642_v10  ;;  %v4105_v9 = vmul.f32 %v15642_v10, %v19582_v39  ;;  %v4156_v10 = vrot.slane %v4154_v32, 3 }
 0x216   : > { %v15639_v54 = vpop.permute.xlu0 %3988  ;;  %v4014_v45 = vrot.slane %v3926_v46, 1  ;;  %13172 = vset.pattern.permute.xlu0 %v19580_v61  ;;  %19583 = vst [vmem:[#allocation199_spill] sm:$0xff] %v15657_v16  ;;  %v4024_v56 = vrot.slane %v15498_v26, 1 }
 0x217   : > { %v4135_v33 = vpack.c.bf16 %v4104_v18, %v4103_v3  ;;  %911 = vperm.xlu0 %13172, %v15028_v24  }
 0x218   : > { %v15648_v7 = vsel %vm698_vm3, %v4012_v6, %v4014_v45  ;;  %v15663_v6 = vsel %vm698_vm3, %v4014_v45, %v4016_v28 }
 0x219   : > { %19581 = vst [vmem:[#allocation198_spill] sm:$0xff] %v15648_v7  ;;  %v4106_v62 = vmul.f32 %v15648_v7, %v13803_v19  ;;  %4670 = vperm.xlu1 %13165, %v15657_v16   ;;  %v3932_v3 = vpop.permute.xlu1 %3931  ;;  %v4162_v24 = vshrl.u32 %v4135_v33, 16  ;;  %v4165_v18 = vshll.u32 %v4135_v33, 16  ;;  %19584 = vst [vmem:[#allocation200_spill] sm:$0xff] %v15663_v6  ;;  %v19585_v19 = vld [vmem:[#allocation166_spill] sm:$0xff]  ;;  %v4107_v33 = vmul.f32 %v15663_v6, %v13800_v12 }
 0x21a   : > { %v15660_v0 = vpop.permute.xlu0 %3994  ;;  %v4018_v46 = vrot.slane %v3932_v3, 1 }
 0x21b   : > { %v4136_v37 = vpack.c.bf16 %v4106_v62, %v4105_v9  ;;  %v4164_v7 = vrot.slane %v4162_v24, 3  ;;  %v4167_v57 = vrot.slane %v4165_v18, 4  ;;  %923 = vperm.xlu0 %13172, %v19585_v19   ;;  %v4160_v9 = vor.u32 %v4159_v47, %v4156_v10  ;;  %v11372_v18 = vld [vmem:[%s18833_s5 + $0x10] sm:$0x3] }
 0x21c   : > { %v15668_v16 = vsel %vm698_vm3, %v4016_v28, %v4018_v46  ;;  %v15678_v19 = vsel %vm698_vm3, %v4018_v46, %v4020_v40  ;;  %v13323_v28 = vld [vmem:[%s18829_s1 + $0x20] sm:$0xff]  ;;  %v4028_v46 = vrot.slane %v15514_v43, 1  ;;  %v13324_v10 = vld [vmem:[%s18829_s1 + $0x30] sm:$0xff] }
 0x21d   : > { %19586 = vst [vmem:[#allocation166_spill] sm:$0xff] %v15668_v16  ;;  %v4171_v39 = vshrl.u32 %v4136_v37, 16  ;;  %v4174_v55 = vshll.u32 %v4136_v37, 16  ;;  %v4108_v45 = vmul.f32 %v15668_v16, %v13828_v60  ;;  %13167 = vset.pattern.permute.xlu1 %v19567_v17  ;;  %v3938_v32 = vpop.permute.xlu1 %3937  ;;  %19587 = vst [vmem:[#allocation201_spill] sm:$0xff] %v15678_v19  ;;  %v4168_v62 = vor.u32 %v4167_v57, %v4164_v7  ;;  %v19854_v16 = vld [vmem:[#allocation163_spill] sm:$0xff] }
 0x21e   : > { %v15675_v59 = vpop.permute.xlu0 %4000  ;;  %v4022_v26 = vrot.slane %v3938_v32, 1  ;;  %4984 = vperm.xlu1 %13167, %v13323_v28   ;;  %v4109_v47 = vmul.f32 %v15678_v19, %v13825_v58  ;;  %v19600_v19 = vld [vmem:[#allocation5_spill] sm:$0xff] }
 0x21f   : > { %v4173_v37 = vrot.slane %v4171_v39, 3  ;;  %v4176_v3 = vrot.slane %v4174_v55, 4  ;;  %v4137_v24 = vpack.c.bf16 %v4108_v45, %v4107_v33  ;;  %927 = vperm.xlu0 %13172, %v19555_v44   ;;  %v4169_v6 = vsel %vm1241_vm4, %v4160_v9, %v4168_v62  ;;  %v19591_v45 = vld [vmem:[#allocation2_spill] sm:$0xff] }
 0x220   : > { %v15689_v32 = vsel %vm698_vm3, %v4020_v40, %v4022_v26  ;;  %12148 = vmatprep.mubr.msk.bf16.mxu0 %vm1024_vm2, %v4169_v6  ;;  %v15698_v55 = vsel %vm698_vm3, %v4022_v26, %v4024_v56  ;;  %v15706_v28 = vand.u32 %v11372_v18, %v19591_v45 }
 0x221   : > { %19588 = vst [vmem:[#allocation202_spill] sm:$0xff] %v15689_v32  ;;  %v4110_v39 = vmul.f32 %v15689_v32, %v19426_v23  ;;  %v3944_v44 = vpop.permute.xlu1 %3943  ;;  %v4177_v7 = vor.u32 %v4176_v3, %v4173_v37  ;;  %v4180_v57 = vshrl.u32 %v4137_v24, 16  ;;  %19589 = vst [vmem:[#allocation203_spill] sm:$0xff] %v15698_v55  ;;  %v4183_v40 = vshll.u32 %v4137_v24, 16  ;;  %v19592_v3 = vld [vmem:[#allocation90_spill] sm:$0xff] }
 0x222   : > { %v4026_v43 = vrot.slane %v3944_v44, 1  ;;  %4990 = vperm.xlu1 %13167, %v13324_v10   ;;  %v4111_v24 = vmul.f32 %v15698_v55, %v19431_v29 }
 0x223   : > { %v15703_v33 = vpop.permute.xlu0 %4550  ;;  %v4138_v9 = vpack.c.bf16 %v4110_v39, %v4109_v47  ;;  %v4178_v6 = vsel %vm1241_vm4, %v4168_v62, %v4177_v7  ;;  %v4182_v37 = vrot.slane %v4180_v57, 3  ;;  %939 = vperm.xlu0 %13172, %v19592_v3   ;;  %v4185_v44 = vrot.slane %v4183_v40, 4  ;;  %v19595_v57 = vld [vmem:[#allocation154_spill] sm:$0xff] }
 0x224   : > { %19590 = vst [vmem:[#allocation204_spill] sm:$0xff] %v15703_v33  ;;  %v15711_v26 = vsel %vm698_vm3, %v4024_v56, %v4026_v43  ;;  %12149 = vmatmul.mubr.msk.bf16.vlgmr.msra.gmra.mrb[0].mxu0 %vm1024_vm2, %v4178_v6  ;;  %v4032_v62 = vrot.slane %v15532_v1, 1  ;;  %v15721_v39 = vsel %vm698_vm3, %v4026_v43, %v4028_v46 }
 0x225   : > { %19593 = vst [vmem:[#allocation2_spill] sm:$0xff] %v15711_v26  ;;  %v4112_v10 = vmul.f32 %v15711_v26, %v13898_v63  ;;  %v3950_v18 = vpop.permute.xlu1 %3949  ;;  %v4189_v45 = vshrl.u32 %v4138_v9, 16  ;;  %v4192_v47 = vshll.u32 %v4138_v9, 16  ;;  %12181 = vmatpush3.bf16.msra.mxu0 %v15392_v51  ;;  %19594 = vst [vmem:[#allocation90_spill] sm:$0xff] %v15721_v39  ;;  %v4186_v40 = vor.u32 %v4185_v44, %v4182_v37 }
 0x226   : > { %v4030_v56 = vrot.slane %v3950_v18, 1  ;;  %4993 = vperm.xlu1 %13167, %v19595_v57   ;;  %12214 = vmatprep.subr.bf16.mxu0 %v15706_v28  ;;  %v4113_v43 = vmul.f32 %v15721_v39, %v19435_v14 }
 0x227   : > { %v4139_v6 = vpack.c.bf16 %v4112_v10, %v4111_v24  ;;  %v4191_v55 = vrot.slane %v4189_v45, 3  ;;  %v4194_v32 = vrot.slane %v4192_v47, 4  ;;  %v15725_v26 = vpop.permute.xlu0 %4562  ;;  %943 = vperm.xlu0 %13172, %v15543_v2   ;;  %v4187_v1 = vsel %vm1241_vm4, %v4177_v7, %v4186_v40  ;;  %v19599_v45 = vld [vmem:[#allocation157_spill] sm:$0xff] }
 0x228   : > { %19596 = vst [vmem:[#allocation154_spill] sm:$0xff] %v15725_v26  ;;  %v15729_v51 = vsel %vm698_vm3, %v4028_v46, %v4030_v56  ;;  %12152 = vmatprep.mubr.msk.bf16.mxu0 %vm1024_vm2, %v4187_v1  ;;  %v4036_v10 = vrot.slane %v15554_v49, 1  ;;  %v15739_v18 = vsel %vm698_vm3, %v4030_v56, %v4032_v62 }
 0x229   : > { %19597 = vst [vmem:[#allocation205_spill] sm:$0xff] %v15729_v51  ;;  %v4114_v9 = vmul.f32 %v15729_v51, %v19436_v11  ;;  %v3956_v37 = vpop.permute.xlu1 %3955  ;;  %v4195_v44 = vor.u32 %v4194_v32, %v4191_v55  ;;  %v4198_v24 = vshrl.u32 %v4139_v6, 16  ;;  %19598 = vst [vmem:[#allocation206_spill] sm:$0xff] %v15739_v18  ;;  %v4201_v7 = vshll.u32 %v4139_v6, 16 }
 0x22a   : > { %v4034_v46 = vrot.slane %v3956_v37, 1  ;;  %4999 = vperm.xlu1 %13167, %v19599_v45   ;;  %v4115_v49 = vmul.f32 %v15739_v18, %v19441_v48  ;;  %v19604_v37 = vld [vmem:[#allocation160_spill] sm:$0xff] }
 0x22b   : > { %v4140_v47 = vpack.c.bf16 %v4114_v9, %v4113_v43  ;;  %v4196_v57 = vsel %vm1241_vm4, %v4186_v40, %v4195_v44  ;;  %v4200_v39 = vrot.slane %v4198_v24, 3  ;;  %955 = vperm.xlu0 %13172, %v19600_v19   ;;  %v4203_v32 = vrot.slane %v4201_v7, 4  ;;  %v15752_v9 = vpop.permute.xlu0 %4570 }
 0x22c   : > { %v15745_v1 = vsel %vm698_vm3, %v4032_v62, %v4034_v46  ;;  %12153 = vmatmul.mubr.msk.bf16.gmra.mrb[4].mxu0 %vm1024_vm2, %v4196_v57  ;;  %19602 = vst [vmem:[#allocation5_spill] sm:$0xff] %v15752_v9  ;;  %v4040_v40 = vrot.slane %v15576_v15, 1  ;;  %v15756_v19 = vsel %vm698_vm3, %v4034_v46, %v4036_v10 }
 0x22d   : > { %19601 = vst [vmem:[#allocation157_spill] sm:$0xff] %v15745_v1  ;;  %v4116_v55 = vmul.f32 %v15745_v1, %v13972_v50  ;;  %v3962_v56 = vpop.permute.xlu1 %3961  ;;  %v4207_v6 = vshrl.u32 %v4140_v47, 16  ;;  %v4210_v43 = vshll.u32 %v4140_v47, 16  ;;  %19603 = vst [vmem:[#allocation207_spill] sm:$0xff] %v15756_v19  ;;  %v4204_v24 = vor.u32 %v4203_v32, %v4200_v39 }
 0x22e   : > { %v4038_v62 = vrot.slane %v3962_v56, 1  ;;  %5005 = vperm.xlu1 %13167, %v19604_v37   ;;  %v4117_v15 = vmul.f32 %v15756_v19, %v13989_v52 }
 0x22f   : > { %v4141_v45 = vpack.c.bf16 %v4116_v55, %v4115_v49  ;;  %v4209_v7 = vrot.slane %v4207_v6, 3  ;;  %v4212_v57 = vrot.slane %v4210_v43, 4  ;;  %963 = vperm.xlu0 %13172, %v19573_v42   ;;  %v4205_v47 = vsel %vm1241_vm4, %v4195_v44, %v4204_v24  ;;  %v19607_v55 = vld [vmem:[#allocation162_spill] sm:$0xff]  ;;  %v15775_v19 = vpop.permute.xlu0 %4578 }
 0x230   : > { %v15761_v18 = vsel %vm698_vm3, %v4036_v10, %v4038_v62  ;;  %12156 = vmatprep.mubr.msk.bf16.mxu0 %vm1024_vm2, %v4205_v47  ;;  %v4044_v49 = vrot.slane %v15593_v31, 1  ;;  %v15771_v42 = vsel %vm698_vm3, %v4038_v62, %v4040_v40  ;;  %19608 = vst [vmem:[#allocation162_spill] sm:$0xff] %v15775_v19 }
 0x231   : > { %19605 = vst [vmem:[#allocation160_spill] sm:$0xff] %v15761_v18  ;;  %v4118_v46 = vmul.f32 %v15761_v18, %v14007_v8  ;;  %v3968_v56 = vpop.permute.xlu1 %3967  ;;  %v4213_v39 = vor.u32 %v4212_v57, %v4209_v7  ;;  %v4216_v32 = vshrl.u32 %v4141_v45, 16  ;;  %19606 = vst [vmem:[#allocation208_spill] sm:$0xff] %v15771_v42  ;;  %v4219_v44 = vshll.u32 %v4141_v45, 16  ;;  %v15780_v7 = vld [vmem:[%s18829_s1 + $0xf8] sm:$0xff] }
 0x232   : > { %v4042_v10 = vrot.slane %v3968_v56, 1  ;;  %5011 = vperm.xlu1 %13167, %v19607_v55   ;;  %v4119_v45 = vmul.f32 %v15771_v42, %v14026_v13 }
 0x233   : > { %v4142_v6 = vpack.c.bf16 %v4118_v46, %v4117_v15  ;;  %v4214_v43 = vsel %vm1241_vm4, %v4204_v24, %v4213_v39  ;;  %v4218_v37 = vrot.slane %v4216_v32, 3  ;;  %971 = vperm.xlu0 %13172, %v15780_v7   ;;  %v4221_v62 = vrot.slane %v4219_v44, 4 }
 0x234   : > { %v15784_v31 = vsel %vm698_vm3, %v4040_v40, %v4042_v10  ;;  %12157 = vmatmul.mubr.msk.bf16.gmra.mrb[8].mxu0 %vm1024_vm2, %v4214_v43  ;;  %v4048_v46 = vrot.slane %v15607_v25, 1  ;;  %v15793_v56 = vsel %vm698_vm3, %v4042_v10, %v4044_v49  ;;  %v13326_v40 = vld [vmem:[%s18829_s1 + $0x78] sm:$0xff] }
 0x235   : > { %19609 = vst [vmem:[#allocation209_spill] sm:$0xff] %v15784_v31  ;;  %v4120_v24 = vmul.f32 %v15784_v31, %v14049_v20  ;;  %v3974_v57 = vpop.permute.xlu1 %3973  ;;  %v4225_v47 = vshrl.u32 %v4142_v6, 16  ;;  %v4228_v15 = vshll.u32 %v4142_v6, 16  ;;  %19610 = vst [vmem:[#allocation210_spill] sm:$0xff] %v15793_v56  ;;  %v4222_v55 = vor.u32 %v4221_v62, %v4218_v37 }
 0x236   : > { %v4046_v32 = vrot.slane %v3974_v57, 1  ;;  %5017 = vperm.xlu1 %13167, %v13326_v40   ;;  %v4121_v10 = vmul.f32 %v15793_v56, %v14057_v4 }
 0x237   : > { %v4143_v44 = vpack.c.bf16 %v4120_v24, %v4119_v45  ;;  %v4227_v43 = vrot.slane %v4225_v47, 3  ;;  %v4230_v42 = vrot.slane %v4228_v15, 4  ;;  %13174 = vset.pattern.permute.xlu0 %v19567_v17  ;;  %v4223_v25 = vsel %vm1241_vm4, %v4213_v39, %v4222_v55  ;;  %v15808_v45 = vpop.permute.xlu0 %4586  ;;  %v15816_v39 = vld [vmem:[%s18829_s1 + $0x88] sm:$0xff] }
 0x238   : > { %v15800_v18 = vsel %vm698_vm3, %v4044_v49, %v4046_v32  ;;  %12160 = vmatprep.mubr.msk.bf16.mxu0 %vm1024_vm2, %v4223_v25  ;;  %19612 = vst [vmem:[#allocation212_spill] sm:$0xff] %v15808_v45  ;;  %v15811_v24 = vsel %vm698_vm3, %v4046_v32, %v4048_v46 }
 0x239   : > { %19611 = vst [vmem:[#allocation211_spill] sm:$0xff] %v15800_v18  ;;  %v4122_v6 = vmul.f32 %v15800_v18, %v14075_v21  ;;  %v3980_v57 = vpop.permute.xlu1 %3979  ;;  %v4231_v37 = vor.u32 %v4230_v42, %v4227_v43  ;;  %v4234_v62 = vshrl.u32 %v4143_v44, 16  ;;  %19613 = vst [vmem:[#allocation213_spill] sm:$0xff] %v15811_v24  ;;  %v4237_v47 = vshll.u32 %v4143_v44, 16 }
 0x23a   : > { %v4050_v49 = vrot.slane %v3980_v57, 1  ;;  %5023 = vperm.xlu1 %13167, %v15816_v39   ;;  %v4052_v42 = vrot.slane %v15618_v38, 1  ;;  %v4123_v57 = vmul.f32 %v15811_v24, %v19556_v35  ;;  %v13328_v38 = vld [vmem:[%s18829_s1 + $0x98] sm:$0xff] }
 0x23b   : > { %v4144_v15 = vpack.c.bf16 %v4122_v6, %v4121_v10  ;;  %v4232_v40 = vsel %vm1241_vm4, %v4222_v55, %v4231_v37  ;;  %v4236_v25 = vrot.slane %v4234_v62, 3  ;;  %v4239_v32 = vrot.slane %v4237_v47, 4  ;;  %v15835_v24 = vpop.permute.xlu0 %4594 }
 0x23c   : > { %v15822_v43 = vsel %vm698_vm3, %v4048_v46, %v4050_v49  ;;  %12161 = vmatmul.mubr.msk.bf16.gmra.mrb[12].mxu0 %vm1024_vm2, %v4232_v40  ;;  %v15830_v55 = vsel %vm698_vm3, %v4050_v49, %v4052_v42  ;;  %19616 = vst [vmem:[#allocation216_spill] sm:$0xff] %v15835_v24 }
 0x23d   : > { %19614 = vst [vmem:[#allocation214_spill] sm:$0xff] %v15822_v43  ;;  %v4124_v18 = vmul.f32 %v15822_v43, %v14121_v30  ;;  %v3986_v56 = vpop.permute.xlu1 %3985  ;;  %v4243_v44 = vshrl.u32 %v4144_v15, 16  ;;  %v4246_v10 = vshll.u32 %v4144_v15, 16  ;;  %19615 = vst [vmem:[#allocation215_spill] sm:$0xff] %v15830_v55  ;;  %v4240_v46 = vor.u32 %v4239_v32, %v4236_v25 }
 0x23e   : > { %v4054_v6 = vrot.slane %v3986_v56, 1  ;;  %5029 = vperm.xlu1 %13167, %v13328_v38   ;;  %v4056_v43 = vrot.slane %v15639_v54, 1  ;;  %v4125_v56 = vmul.f32 %v15830_v55, %v14124_v27 }
 0x23f   : > { %v4145_v62 = vpack.c.bf16 %v4124_v18, %v4123_v57  ;;  %v4245_v47 = vrot.slane %v4243_v44, 3  ;;  %v4248_v40 = vrot.slane %v4246_v10, 4  ;;  %v4241_v49 = vsel %vm1241_vm4, %v4231_v37, %v4240_v46 }
 0x240   : > { %v15839_v31 = vsel %vm698_vm3, %v4052_v42, %v4054_v6  ;;  %12164 = vmatprep.mubr.msk.bf16.mxu0 %vm1024_vm2, %v4241_v49  ;;  %v15848_v57 = vsel %vm698_vm3, %v4054_v6, %v4056_v43  ;;  %v15853_v42 = vld [vmem:[%s18829_s1 + $0xa8] sm:$0xff]  ;;  %v4060_v49 = vrot.slane %v15660_v0, 1 }
 0x241   : > { %19617 = vst [vmem:[#allocation217_spill] sm:$0xff] %v15839_v31  ;;  %v4126_v15 = vmul.f32 %v15839_v31, %v14130_v5  ;;  %v3992_v18 = vpop.permute.xlu1 %3991  ;;  %v4249_v25 = vor.u32 %v4248_v40, %v4245_v47  ;;  %v4252_v32 = vshrl.u32 %v4145_v62, 16  ;;  %19618 = vst [vmem:[#allocation218_spill] sm:$0xff] %v15848_v57  ;;  %v4255_v37 = vshll.u32 %v4145_v62, 16 }
 0x242   : > { %v4058_v54 = vrot.slane %v3992_v18, 1  ;;  %5035 = vperm.xlu1 %13167, %v15853_v42   ;;  %v4127_v40 = vmul.f32 %v15848_v57, %v14196_v36  ;;  %v4064_v57 = vrot.slane %v15675_v59, 1 }
 0x243   : > { %v4146_v44 = vpack.c.bf16 %v4126_v15, %v4125_v56  ;;  %v4250_v10 = vsel %vm1241_vm4, %v4240_v46, %v4249_v25  ;;  %v4254_v38 = vrot.slane %v4252_v32, 3  ;;  %v4257_v6 = vrot.slane %v4255_v37, 4  ;;  %v15866_v15 = vpop.permute.xlu0 %4602 }
 0x244   : > { %v15859_v47 = vsel %vm698_vm3, %v4056_v43, %v4058_v54  ;;  %12165 = vmatmul.mubr.msk.bf16.gmra.mrb[16].mxu0 %vm1024_vm2, %v4250_v10  ;;  %19620 = vst [vmem:[#allocation220_spill] sm:$0xff] %v15866_v15  ;;  %v15869_v46 = vsel %vm698_vm3, %v4058_v54, %v4060_v49 }
 0x245   : > { %19619 = vst [vmem:[#allocation219_spill] sm:$0xff] %v15859_v47  ;;  %v4128_v18 = vmul.f32 %v15859_v47, %v14216_v53  ;;  %v3998_v31 = vpop.permute.xlu1 %3997  ;;  %v4261_v62 = vshrl.u32 %v4146_v44, 16  ;;  %v4264_v56 = vshll.u32 %v4146_v44, 16  ;;  %19621 = vst [vmem:[#allocation221_spill] sm:$0xff] %v15869_v46  ;;  %v4258_v43 = vor.u32 %v4257_v6, %v4254_v38 }
 0x246   : > { %v4062_v0 = vrot.slane %v3998_v31, 1  ;;  %5041 = vperm.xlu1 %13167, %v19592_v3   ;;  %v4129_v44 = vmul.f32 %v15869_v46, %v14168_v34 }
 0x247   : > { %v4147_v32 = vpack.c.bf16 %v4128_v18, %v4127_v40  ;;  %v4263_v37 = vrot.slane %v4261_v62, 3  ;;  %v4266_v10 = vrot.slane %v4264_v56, 4  ;;  %v4259_v47 = vsel %vm1241_vm4, %v4249_v25, %v4258_v43  ;;  %v15888_v62 = vpop.permute.xlu0 %4610 }
 0x248   : > { %v15874_v55 = vsel %vm698_vm3, %v4060_v49, %v4062_v0  ;;  %12168 = vmatprep.mubr.msk.bf16.mxu0 %vm1024_vm2, %v4259_v47  ;;  %v15883_v6 = vsel %vm698_vm3, %v4062_v0, %v4064_v57  ;;  %19624 = vst [vmem:[#allocation224_spill] sm:$0xff] %v15888_v62  ;;  %v19625_v0 = vld [vmem:[#allocation77_spill] sm:$0xff] }
 0x249   : > { %19622 = vst [vmem:[#allocation222_spill] sm:$0xff] %v15874_v55  ;;  %v4130_v54 = vmul.f32 %v15874_v55, %v19523_v41  ;;  %v4004_v3 = vpop.permute.xlu1 %4003  ;;  %v4267_v31 = vor.u32 %v4266_v10, %v4263_v37  ;;  %v4270_v38 = vshrl.u32 %v4147_v32, 16  ;;  %19623 = vst [vmem:[#allocation223_spill] sm:$0xff] %v15883_v6  ;;  %v4273_v49 = vshll.u32 %v4147_v32, 16 }
 0x24a   : > { %v4066_v59 = vrot.slane %v4004_v3, 1  ;;  %13168 = vset.pattern.permute.xlu1 %v19580_v61  ;;  %v4131_v10 = vmul.f32 %v15883_v6, %v19625_v0 }
 0x24b   : > { %v4148_v40 = vpack.c.bf16 %v4130_v54, %v4129_v44  ;;  %915 = vperm.xlu1 %13168, %v15816_v39   ;;  %v4268_v25 = vsel %vm1241_vm4, %v4258_v43, %v4267_v31  ;;  %v4272_v18 = vrot.slane %v4270_v38, 3  ;;  %v4275_v37 = vrot.slane %v4273_v49, 4 }
 0x24c   : > { %v4067_v47 = vsel %vm698_vm3, %v4064_v57, %v4066_v59  ;;  %v4133_v56 = vmul.f32 0.0, %v4066_v59  ;;  %12169 = vmatmul.mubr.msk.bf16.gmra.mrb[20].mxu0 %vm1024_vm2, %v4268_v25  ;;  %v13330_v57 = vld [vmem:[%s18829_s1 + $0x90] sm:$0xff] }
 0x24d   : > { %v15894_v3 = vmul.f32 0.0, %v4067_v47  ;;  %v4279_v32 = vshrl.u32 %v4148_v40, 16  ;;  %v4282_v44 = vshll.u32 %v4148_v40, 16  ;;  %v4276_v43 = vor.u32 %v4275_v37, %v4272_v18 }
 0x24e   : > { %v4150_v54 = vpack.c.bf16 %v4133_v56, %v4133_v56  ;;  %v15896_v39 = vpop.permute.xlu1 %4554  ;;  %v15904_v56 = vpop.permute.xlu0 %4618 }
 0x24f   : > { %19626 = vst [vmem:[#allocation77_spill] sm:$0xff] %v15894_v3  ;;  %19627 = vst [vmem:[#allocation225_spill] sm:$0xff] %v15896_v39  ;;  %v4149_v38 = vpack.c.bf16 %v15894_v3, %v4131_v10  ;;  %919 = vperm.xlu1 %13168, %v13330_v57   ;;  %v4281_v59 = vrot.slane %v4279_v32, 3  ;;  %v4284_v49 = vrot.slane %v4282_v44, 4  ;;  %v4277_v47 = vsel %vm1241_vm4, %v4267_v31, %v4276_v43 }
 0x250   : > { %v4297_v25 = vshrl.u32 %v4150_v54, 16  ;;  %v4300_v55 = vshll.u32 %v4150_v54, 16  ;;  %12172 = vmatprep.mubr.msk.bf16.mxu0 %vm1024_vm2, %v4277_v47  ;;  %19628 = vst [vmem:[#allocation226_spill] sm:$0xff] %v15904_v56 }
 0x251   : > { %v4285_v40 = vor.u32 %v4284_v49, %v4281_v59  ;;  %v4288_v6 = vshrl.u32 %v4149_v38, 16  ;;  %v4291_v18 = vshll.u32 %v4149_v38, 16  ;;  %v4677_v38 = vmul.f32 %v15703_v33, %v19374_v22  ;;  %v19631_v59 = vld [vmem:[#allocation7_spill] sm:$0xff] }
 0x252   : > { %v4299_v37 = vrot.slane %v4297_v25, 3  ;;  %v15906_v10 = vpop.permute.xlu1 %4558  ;;  %v4302_v3 = vrot.slane %v4300_v55, 4  ;;  %v4678_v49 = vmul.f32 %v15896_v39, %v19631_v59  ;;  %v15919_v25 = vpop.permute.xlu0 %4626 }
 0x253   : > { %19629 = vst [vmem:[#allocation227_spill] sm:$0xff] %v15906_v10  ;;  %13169 = vset.pattern.permute.xlu1 %v19567_v17  ;;  %v4286_v32 = vsel %vm1241_vm4, %v4276_v43, %v4285_v40  ;;  %v4290_v44 = vrot.slane %v4288_v6, 3  ;;  %v4293_v57 = vrot.slane %v4291_v18, 4  ;;  %19632 = vst [vmem:[#allocation7_spill] sm:$0xff] %v15919_v25  ;;  %v19634_v6 = vld [vmem:[#allocation192_spill] sm:$0xff] }
 0x254   : > { %5044 = vperm.xlu1 %13169, %v15543_v2   ;;  %12173 = vmatmul.mubr.msk.bf16.gmra.mrb[24].mxu0 %vm1024_vm2, %v4286_v32  ;;  %v15921_v43 = vor.u32 %v4302_v3, %v4299_v37  ;;  %v4709_v47 = vpack.c.bf16 %v4678_v49, %v4677_v38  ;;  %v13331_v32 = vld [vmem:[%s18829_s1 + $0xd8] sm:$0xff]  ;;  %v19640_v49 = vld [vmem:[#allocation16_spill] sm:$0xff] }
 0x255   : > { %v4294_v31 = vor.u32 %v4293_v57, %v4290_v44  ;;  %v19638_v44 = vld [vmem:[#allocation13_spill] sm:$0xff] }
 0x256   : > { %v15912_v54 = vpop.permute.xlu1 %4566  ;;  %19633 = vst [vmem:[#allocation229_spill] sm:$0xff] %v15921_v43  ;;  %v15934_v3 = vpop.permute.xlu0 %4634  ;;  %v4679_v57 = vmul.f32 %v15906_v10, %v19638_v44  ;;  %v13332_v10 = vld [vmem:[%s18829_s1 + $0xb0] sm:$0xff] }
 0x257   : > { %19630 = vst [vmem:[#allocation228_spill] sm:$0xff] %v15912_v54  ;;  %v4295_v55 = vsel %vm1241_vm4, %v4285_v40, %v4294_v31  ;;  %v4304_v18 = vsel %vm1241_vm4, %v4294_v31, %v15921_v43  ;;  %19636 = vst [vmem:[#allocation230_spill] sm:$0xff] %v15934_v3  ;;  %v19637_v40 = vld [vmem:[#allocation12_spill] sm:$0xff]  ;;  %v4682_v31 = vmul.f32 %v15752_v9, %v13800_v12 }
 0x258   : > { %5050 = vperm.xlu1 %13169, %v19634_v6   ;;  %12176 = vmatprep.mubr.msk.bf16.mxu0 %vm1024_vm2, %v4295_v55  ;;  %v4680_v37 = vmul.f32 %v15725_v26, %v19637_v40  ;;  %v4681_v55 = vmul.f32 %v15912_v54, %v19640_v49  ;;  %v4684_v54 = vmul.f32 %v15775_v19, %v13825_v58  ;;  %v19724_v19 = vld [vmem:[#allocation28_spill] sm:$0xff] }
 0x25a   : > { %v15925_v2 = vpop.permute.xlu1 %4574  ;;  %v15950_v26 = vpop.permute.xlu0 %4642 }
 0x25b   : > { %19635 = vst [vmem:[#allocation192_spill] sm:$0xff] %v15925_v2  ;;  %19642 = vst [vmem:[#allocation16_spill] sm:$0xff] %v15950_v26 }
 0x25c   : > { %5053 = vperm.xlu1 %13169, %v13331_v32   ;;  %12177 = vmatmul.mubr.msk.bf16.gmra.mrb[28].mxu0 %vm1024_vm2, %v4304_v18  ;;  %v4711_v32 = vpack.c.bf16 %v4682_v31, %v4681_v55 }
 0x25d   : > { %12182 = vmatprep.mubr.msk.bf16.mxu0 %vm1024_vm2, %v4709_v47  ;;  %v4710_v47 = vpack.c.bf16 %v4680_v37, %v4679_v57  ;;  %v4686_v57 = vmul.f32 %v15808_v45, %v19431_v29 }
 0x25e   : > { %v15940_v38 = vpop.permute.xlu1 %4582  ;;  %v15968_v55 = vpop.permute.xlu0 %4650 }
 0x25f   : > { %19639 = vst [vmem:[#allocation12_spill] sm:$0xff] %v15940_v38  ;;  %v4685_v31 = vmul.f32 %v15940_v38, %v19426_v23  ;;  %19644 = vst [vmem:[#allocation232_spill] sm:$0xff] %v15968_v55 }
 0x260   : > { %13170 = vset.pattern.permute.xlu1 %v19580_v61 }
 0x261   : > { %931 = vperm.xlu1 %13170, %v15853_v42   ;;  %v4683_v42 = vmul.f32 %v15925_v2, %v13828_v60  ;;  %v4713_v2 = vpack.c.bf16 %v4686_v57, %v4685_v31 }
 0x262   : > { %v15948_v18 = vpop.permute.xlu1 %4590  ;;  %v15989_v31 = vpop.permute.xlu0 %4658 }
 0x263   : > { %19641 = vst [vmem:[#allocation13_spill] sm:$0xff] %v15948_v18  ;;  %v4687_v38 = vmul.f32 %v15948_v18, %v13898_v63  ;;  %19648 = vst [vmem:[#allocation234_spill] sm:$0xff] %v15989_v31 }
 0x264   : > { %12183 = vmatmul.mubr.msk.bf16.vlgmr.msra.gmra.mrb[0].mxu0 %vm1024_vm2, %v4710_v47  ;;  %v13333_v47 = vld [vmem:[%s18829_s1 + $0xe0] sm:$0xff] }
 0x265   : > { %935 = vperm.xlu1 %13170, %v13332_v10   ;;  %12186 = vmatprep.mubr.msk.bf16.mxu0 %vm1024_vm2, %v4711_v32  ;;  %v4712_v10 = vpack.c.bf16 %v4684_v54, %v4683_v42  ;;  %v4690_v42 = vmul.f32 %v15866_v15, %v19441_v48  ;;  %v4692_v15 = vmul.f32 %v15888_v62, %v13989_v52 }
 0x266   : > { %v15961_v37 = vpop.permute.xlu1 %4598  ;;  %12215 = vmatpush3.bf16.msra.mxu0 %v15706_v28  ;;  %v4688_v28 = vmul.f32 %v15835_v24, %v19435_v14  ;;  %v15995_v18 = vpop.permute.xlu0 %4662 }
 0x267   : > { %19643 = vst [vmem:[#allocation231_spill] sm:$0xff] %v15961_v37  ;;  %v4689_v57 = vmul.f32 %v15961_v37, %v19436_v11  ;;  %19650 = vst [vmem:[#allocation236_spill] sm:$0xff] %v15995_v18 }
 0x269   : > { %13171 = vset.pattern.permute.xlu1 %v19567_v17  ;;  %v19646_v17 = vld [vmem:[#allocation199_spill] sm:$0xff]  ;;  %v4715_v24 = vpack.c.bf16 %v4690_v42, %v4689_v57 }
 0x26a   : > { %5056 = vperm.xlu1 %13171, %v13333_v47   ;;  %v15974_v32 = vpop.permute.xlu1 %4606 }
 0x26b   : > { %19645 = vst [vmem:[#allocation233_spill] sm:$0xff] %v15974_v32  ;;  %v4691_v37 = vmul.f32 %v15974_v32, %v13972_v50  ;;  %v4675_v32 = vpop.permute.xlu0 %4674 }
 0x26c   : > { %12187 = vmatmul.mubr.msk.bf16.gmra.mrb[4].mxu0 %vm1024_vm2, %v4712_v10  ;;  %v4714_v10 = vpack.c.bf16 %v4688_v28, %v4687_v38 }
 0x26d   : > { %12190 = vmatprep.mubr.msk.bf16.mxu0 %vm1024_vm2, %v4713_v2  ;;  %v4716_v42 = vpack.c.bf16 %v4692_v15, %v4691_v37 }
 0x26e   : > { %5062 = vperm.xlu1 %13171, %v19646_v17   ;;  %v15983_v54 = vpop.permute.xlu1 %4614 }
 0x26f   : > { %19647 = vst [vmem:[#allocation199_spill] sm:$0xff] %v15983_v54  ;;  %v4693_v28 = vmul.f32 %v15983_v54, %v14007_v8  ;;  %v4976_v37 = vpop.permute.xlu0 %4975 }
 0x272   : > { %5065 = vperm.xlu1 %13171, %v15780_v7   ;;  %v15992_v2 = vpop.permute.xlu1 %4622  ;;  %v4694_v7 = vmul.f32 %v15904_v56, %v14026_v13 }
 0x273   : > { %19649 = vst [vmem:[#allocation235_spill] sm:$0xff] %v15992_v2  ;;  %v4695_v54 = vmul.f32 %v15992_v2, %v14049_v20 }
 0x274   : > { %12191 = vmatmul.mubr.msk.bf16.gmra.mrb[8].mxu0 %vm1024_vm2, %v4714_v10  ;;  %v4717_v10 = vpack.c.bf16 %v4694_v7, %v4693_v28 }
 0x275   : > { %12194 = vmatprep.mubr.msk.bf16.mxu0 %vm1024_vm2, %v4715_v24  ;;  %v13334_v24 = vld [vmem:[%s18829_s1 + $0xc8] sm:$0xff] }
 0x276   : > { %13173 = vset.pattern.permute.xlu1 %v19580_v61  ;;  %v16003_v38 = vpop.permute.xlu1 %4630  ;;  %v4696_v61 = vmul.f32 %v15919_v25, %v14057_v4  ;;  %v19721_v25 = vld [vmem:[#allocation25_spill] sm:$0xff] }
 0x277   : > { %19651 = vst [vmem:[#allocation237_spill] sm:$0xff] %v16003_v38  ;;  %947 = vperm.xlu1 %13173, %v13334_v24   ;;  %v4697_v15 = vmul.f32 %v16003_v38, %v14075_v21 }
 0x278   : > { %v4718_v7 = vpack.c.bf16 %v4696_v61, %v4695_v54  ;;  %v4700_v54 = vmul.f32 %v15950_v26, %v14124_v27 }
 0x27a   : > { %v16012_v57 = vpop.permute.xlu1 %4638 }
 0x27b   : > { %19652 = vst [vmem:[#allocation238_spill] sm:$0xff] %v16012_v57  ;;  %951 = vperm.xlu1 %13173, %v19634_v6   ;;  %v4698_v6 = vmul.f32 %v15934_v3, %v19556_v35 }
 0x27c   : > { %12195 = vmatmul.mubr.msk.bf16.gmra.mrb[12].mxu0 %vm1024_vm2, %v4716_v42  ;;  %v16030_v42 = vpop.permute.xlu0 %4987 }
 0x27d   : > { %12198 = vmatprep.mubr.msk.bf16.mxu0 %vm1024_vm2, %v4717_v10  ;;  %v4719_v24 = vpack.c.bf16 %v4698_v6, %v4697_v15  ;;  %v4699_v10 = vmul.f32 %v16012_v57, %v14121_v30 }
 0x27e   : > { %v16021_v56 = vpop.permute.xlu1 %4646 }
 0x27f   : > { %19653 = vst [vmem:[#allocation239_spill] sm:$0xff] %v16021_v56  ;;  %959 = vperm.xlu1 %13173, %v13333_v47   ;;  %v5068_v47 = vrot.slane %v4976_v37, 7  ;;  %v4701_v38 = vmul.f32 %v16021_v56, %v14130_v5  ;;  %v4720_v6 = vpack.c.bf16 %v4700_v54, %v4699_v10 }
 0x280   : > { %v16044_v15 = vpop.permute.xlu0 %4996 }
 0x282   : > { %v16027_v28 = vpop.permute.xlu1 %4654 }
 0x283   : > { %19654 = vst [vmem:[#allocation240_spill] sm:$0xff] %v16027_v28  ;;  %967 = vperm.xlu1 %13173, %v19646_v17   ;;  %v4702_v17 = vmul.f32 %v15968_v55, %v14196_v36  ;;  %v4703_v10 = vmul.f32 %v16027_v28, %v14216_v53 }
 0x284   : > { %12199 = vmatmul.mubr.msk.bf16.gmra.mrb[16].mxu0 %vm1024_vm2, %v4718_v7  ;;  %v16058_v26 = vpop.permute.xlu0 %5002 }
 0x285   : > { %12202 = vmatprep.mubr.msk.bf16.mxu0 %vm1024_vm2, %v4719_v24  ;;  %v4721_v37 = vpack.c.bf16 %v4702_v17, %v4701_v38  ;;  %v4704_v38 = vmul.f32 %v15989_v31, %v14168_v34  ;;  %v4708_v31 = vmul.f32 0.0, %v4675_v32 }
 0x287   : > { %v4973_v2 = vpop.permute.xlu1 %4972  ;;  %v4722_v17 = vpack.c.bf16 %v4704_v38, %v4703_v10 }
 0x288   : > { %v16040_v61 = vrot.slane %v4973_v2, 7 }
 0x28a   : > { %19655 = vst [vmem:[#allocation241_spill] sm:$0xff] %v16040_v61  ;;  %v16048_v7 = vsel %vm1073_vm0, %v16040_v61, %v5068_v47  ;;  %v5163_v24 = vmul.f32 %v16040_v61, %v19374_v22 }
 0x28b   : > { %19656 = vst [vmem:[#allocation242_spill] sm:$0xff] %v16048_v7  ;;  %v5164_v56 = vmul.f32 %v16048_v7, %v19631_v59  ;;  %v4979_v57 = vpop.permute.xlu1 %4978 }
 0x28c   : > { %v5070_v2 = vrot.slane %v4979_v57, 7  ;;  %12203 = vmatmul.mubr.msk.bf16.gmra.mrb[20].mxu0 %vm1024_vm2, %v4720_v6 }
 0x28d   : > { %12206 = vmatprep.mubr.msk.bf16.mxu0 %vm1024_vm2, %v4721_v37  ;;  %v5196_v54 = vpack.c.bf16 %v5164_v56, %v5163_v24 }
 0x28e   : > { %v16063_v22 = vsel %vm1073_vm0, %v5068_v47, %v5070_v2  ;;  %v4705_v47 = vmul.f32 %v15995_v18, %v19523_v41 }
 0x28f   : > { %v4982_v55 = vpop.permute.xlu1 %4981  ;;  %19657 = vst [vmem:[#allocation243_spill] sm:$0xff] %v16063_v22  ;;  %v5165_v6 = vmul.f32 %v16063_v22, %v19638_v44  ;;  %v5218_v37 = vshll.u32 %v5196_v54, 16 }
 0x290   : > { %v5072_v59 = vrot.slane %v4982_v55, 7 }
 0x291   : > { %v5220_v38 = vrot.slane %v5218_v37, 1 }
 0x292   : > { %v16066_v57 = vsel %vm1073_vm0, %v5070_v2, %v5072_v59  ;;  %v16079_v2 = vpop.permute.xlu0 %5008 }
 0x293   : > { %19658 = vst [vmem:[#allocation244_spill] sm:$0xff] %v16066_v57  ;;  %v5166_v56 = vmul.f32 %v16066_v57, %v19637_v40  ;;  %v5216_v57 = vshrl.u32 %v5196_v54, 16 }
 0x294   : > { %v16072_v24 = vpop.permute.xlu1 %4666  ;;  %12207 = vmatmul.mubr.msk.bf16.gmra.mrb[24].mxu0 %vm1024_vm2, %v4722_v17 }
 0x295   : > { %19659 = vst [vmem:[#allocation245_spill] sm:$0xff] %v16072_v24  ;;  %v5197_v28 = vpack.c.bf16 %v5166_v56, %v5165_v6  ;;  %v4706_v55 = vmul.f32 %v16072_v24, %v19625_v0  ;;  %v5221_v6 = vor.u32 %v5220_v38, %v5216_v57  ;;  %v5076_v56 = vrot.slane %v16030_v42, 7 }
 0x296   : > { %v16084_v7 = vpop.permute.xlu0 %5014 }
 0x297   : > { %v4723_v10 = vpack.c.bf16 %v4706_v55, %v4705_v47  ;;  %v5223_v44 = vshll.u32 %v5197_v28, 16 }
 0x298   : > { %v4671_v22 = vpop.permute.xlu1 %4670 }
 0x299   : > { %v4707_v40 = vmul.f32 0.0, %v4671_v22  ;;  %12210 = vmatprep.mubr.msk.bf16.mxu0 %vm1024_vm2, %v4723_v10  ;;  %v5225_v61 = vrot.slane %v5223_v44, 1 }
 0x29a   : > { %v16101_v57 = vpop.permute.xlu0 %5020 }
 0x29b   : > { %v16082_v17 = vpack.c.bf16 %v4708_v31, %v4707_v40  ;;  %v5226_v37 = vsel %vm1850_vm5, %v5221_v6, %v5225_v61 }
 0x29d   : > { %19660 = vst [vmem:[#allocation246_spill] sm:$0xff] %v16082_v17  ;;  %v4985_v18 = vpop.permute.xlu1 %4984  ;;  %12211 = vmatmul.mubr.msk.bf16.gmra.mrb[28].mxu0 %vm1024_vm2, %v16082_v17 }
 0x29e   : > { %v5074_v47 = vrot.slane %v4985_v18, 7  ;;  %12216 = vmatprep.mubr.msk.bf16.mxu0 %vm1024_vm2, %v5226_v37  ;;  %v5227_v18 = vshrl.u32 %v5197_v28, 16 }
 0x2a0   : > { %v16092_v32 = vsel %vm1073_vm0, %v5072_v59, %v5074_v47  ;;  %v16095_v31 = vsel %vm1073_vm0, %v5074_v47, %v5076_v56  ;;  %v5082_v59 = vrot.slane %v16044_v15, 7  ;;  %v5229_v47 = vor.u32 %v5227_v18, %v5225_v61 }
 0x2a1   : > { %19661 = vst [vmem:[#allocation247_spill] sm:$0xff] %v16092_v32  ;;  %19662 = vst [vmem:[#allocation248_spill] sm:$0xff] %v16095_v31  ;;  %v5167_v54 = vmul.f32 %v16092_v32, %v19640_v49  ;;  %v5168_v42 = vmul.f32 %v16095_v31, %v13800_v12  ;;  %v4991_v22 = vpop.permute.xlu1 %4990  ;;  %v16107_v49 = vpop.permute.xlu0 %5026 }
 0x2a2   : > { %v5078_v55 = vrot.slane %v4991_v22, 7 }
 0x2a3   : > { %v5198_v10 = vpack.c.bf16 %v5168_v42, %v5167_v54 }
 0x2a4   : > { %v16105_v40 = vsel %vm1073_vm0, %v5076_v56, %v5078_v55  ;;  %v5086_v56 = vrot.slane %v16058_v26, 7 }
 0x2a5   : > { %v5231_v38 = vshll.u32 %v5198_v10, 16  ;;  %v4994_v44 = vpop.permute.xlu1 %4993  ;;  %19663 = vst [vmem:[#allocation249_spill] sm:$0xff] %v16105_v40  ;;  %v5169_v22 = vmul.f32 %v16105_v40, %v13828_v60  ;;  %v5235_v26 = vshrl.u32 %v5198_v10, 16 }
 0x2a6   : > { %v5080_v6 = vrot.slane %v4994_v44, 7 }
 0x2a7   : > { %v5233_v37 = vrot.slane %v5231_v38, 1  ;;  %v16129_v38 = vpop.permute.xlu0 %5032 }
 0x2a8   : > { %v16110_v12 = vsel %vm1073_vm0, %v5078_v55, %v5080_v6  ;;  %v16119_v42 = vsel %vm1073_vm0, %v5080_v6, %v5082_v59  ;;  %v5090_v6 = vrot.slane %v16079_v2, 7 }
 0x2a9   : > { %19664 = vst [vmem:[#allocation250_spill] sm:$0xff] %v16110_v12  ;;  %v5170_v28 = vmul.f32 %v16110_v12, %v13825_v58  ;;  %v5000_v54 = vpop.permute.xlu1 %4999  ;;  %v5234_v15 = vsel %vm1850_vm5, %v5229_v47, %v5233_v37  ;;  %19665 = vst [vmem:[#allocation251_spill] sm:$0xff] %v16119_v42  ;;  %v5171_v60 = vmul.f32 %v16119_v42, %v19426_v23  ;;  %v5094_v23 = vrot.slane %v16084_v7, 7 }
 0x2aa   : > { %v5084_v61 = vrot.slane %v5000_v54, 7  ;;  %12217 = vmatmul.mubr.msk.bf16.vlgmr.msra.gmra.mrb[0].mxu0 %vm1024_vm2, %v5234_v15 }
 0x2ab   : > { %v5199_v18 = vpack.c.bf16 %v5170_v28, %v5169_v22 }
 0x2ac   : > { %v16123_v55 = vsel %vm1073_vm0, %v5082_v59, %v5084_v61  ;;  %v16133_v54 = vsel %vm1073_vm0, %v5084_v61, %v5086_v56  ;;  %v5237_v59 = vor.u32 %v5235_v26, %v5233_v37 }
 0x2ad   : > { %19666 = vst [vmem:[#allocation252_spill] sm:$0xff] %v16123_v55  ;;  %v5172_v58 = vmul.f32 %v16123_v55, %v19431_v29  ;;  %v5006_v44 = vpop.permute.xlu1 %5005  ;;  %v5239_v47 = vshll.u32 %v5199_v18, 16  ;;  %19667 = vst [vmem:[#allocation253_spill] sm:$0xff] %v16133_v54  ;;  %v5173_v29 = vmul.f32 %v16133_v54, %v13898_v63  ;;  %v5243_v37 = vshrl.u32 %v5199_v18, 16 }
 0x2ae   : > { %v5088_v22 = vrot.slane %v5006_v44, 7  ;;  %v16148_v44 = vpop.permute.xlu0 %5038  ;;  %v5098_v18 = vrot.slane %v16101_v57, 7 }
 0x2af   : > { %v5200_v28 = vpack.c.bf16 %v5172_v58, %v5171_v60  ;;  %v5241_v15 = vrot.slane %v5239_v47, 1 }
 0x2b0   : > { %v16136_v17 = vsel %vm1073_vm0, %v5086_v56, %v5088_v22  ;;  %v16145_v61 = vsel %vm1073_vm0, %v5088_v22, %v5090_v6 }
 0x2b1   : > { %19668 = vst [vmem:[#allocation254_spill] sm:$0xff] %v16136_v17  ;;  %v5174_v10 = vmul.f32 %v16136_v17, %v19435_v14  ;;  %v5012_v42 = vpop.permute.xlu1 %5011  ;;  %v5242_v2 = vsel %vm1850_vm5, %v5237_v59, %v5241_v15  ;;  %19669 = vst [vmem:[#allocation255_spill] sm:$0xff] %v16145_v61  ;;  %v5247_v56 = vshll.u32 %v5200_v28, 16  ;;  %v5245_v63 = vor.u32 %v5243_v37, %v5241_v15 }
 0x2b2   : > { %v5092_v60 = vrot.slane %v5012_v42, 7  ;;  %12220 = vmatprep.mubr.msk.bf16.mxu0 %vm1024_vm2, %v5242_v2  ;;  %v5175_v14 = vmul.f32 %v16145_v61, %v19436_v11  ;;  %v5251_v42 = vshrl.u32 %v5200_v28, 16  ;;  %v16168_v61 = vpop.permute.xlu0 %5047 }
 0x2b3   : > { %v5201_v58 = vpack.c.bf16 %v5174_v10, %v5173_v29  ;;  %v5249_v26 = vrot.slane %v5247_v56, 1 }
 0x2b4   : > { %v16151_v7 = vsel %vm1073_vm0, %v5090_v6, %v5092_v60  ;;  %v16159_v29 = vsel %vm1073_vm0, %v5092_v60, %v5094_v23 }
 0x2b5   : > { %19670 = vst [vmem:[#allocation256_spill] sm:$0xff] %v16151_v7  ;;  %v5176_v47 = vmul.f32 %v16151_v7, %v19441_v48  ;;  %v5018_v22 = vpop.permute.xlu1 %5017  ;;  %v5255_v59 = vshll.u32 %v5201_v58, 16  ;;  %19671 = vst [vmem:[#allocation257_spill] sm:$0xff] %v16159_v29  ;;  %v5250_v6 = vsel %vm1850_vm5, %v5245_v63, %v5249_v26  ;;  %v5253_v15 = vor.u32 %v5251_v42, %v5249_v26 }
 0x2b6   : > { %v5096_v10 = vrot.slane %v5018_v22, 7  ;;  %12221 = vmatmul.mubr.msk.bf16.gmra.mrb[4].mxu0 %vm1024_vm2, %v5250_v6  ;;  %v5177_v28 = vmul.f32 %v16159_v29, %v13972_v50  ;;  %v5259_v26 = vshrl.u32 %v5201_v58, 16  ;;  %v5102_v42 = vrot.slane %v16107_v49, 7 }
 0x2b7   : > { %v5202_v2 = vpack.c.bf16 %v5176_v47, %v5175_v14  ;;  %v5257_v37 = vrot.slane %v5255_v59, 1 }
 0x2b8   : > { %v16164_v56 = vsel %vm1073_vm0, %v5094_v23, %v5096_v10  ;;  %v16174_v63 = vsel %vm1073_vm0, %v5096_v10, %v5098_v18 }
 0x2b9   : > { %19672 = vst [vmem:[#allocation258_spill] sm:$0xff] %v16164_v56  ;;  %v5178_v57 = vmul.f32 %v16164_v56, %v13989_v52  ;;  %v5024_v60 = vpop.permute.xlu1 %5023  ;;  %v5258_v22 = vsel %vm1850_vm5, %v5253_v15, %v5257_v37  ;;  %19673 = vst [vmem:[#allocation259_spill] sm:$0xff] %v16174_v63  ;;  %v5263_v23 = vshll.u32 %v5202_v2, 16  ;;  %v5261_v6 = vor.u32 %v5259_v26, %v5257_v37 }
 0x2ba   : > { %v5100_v14 = vrot.slane %v5024_v60, 7  ;;  %12224 = vmatprep.mubr.msk.bf16.mxu0 %vm1024_vm2, %v5258_v22  ;;  %v5179_v56 = vmul.f32 %v16174_v63, %v14007_v8  ;;  %v5267_v60 = vshrl.u32 %v5202_v2, 16 }
 0x2bb   : > { %v5203_v47 = vpack.c.bf16 %v5178_v57, %v5177_v28  ;;  %v5265_v29 = vrot.slane %v5263_v23, 1  ;;  %v16190_v57 = vpop.permute.xlu0 %5059 }
 0x2bc   : > { %v16179_v59 = vsel %vm1073_vm0, %v5098_v18, %v5100_v14  ;;  %v16186_v58 = vsel %vm1073_vm0, %v5100_v14, %v5102_v42  ;;  %v5106_v18 = vrot.slane %v16129_v38, 7 }
 0x2bd   : > { %19674 = vst [vmem:[#allocation260_spill] sm:$0xff] %v16179_v59  ;;  %v5180_v10 = vmul.f32 %v16179_v59, %v14026_v13  ;;  %v5030_v15 = vpop.permute.xlu1 %5029  ;;  %v5271_v7 = vshll.u32 %v5203_v47, 16  ;;  %19675 = vst [vmem:[#allocation261_spill] sm:$0xff] %v16186_v58  ;;  %v5266_v49 = vsel %vm1850_vm5, %v5261_v6, %v5265_v29  ;;  %v5269_v22 = vor.u32 %v5267_v60, %v5265_v29 }
 0x2be   : > { %v5104_v28 = vrot.slane %v5030_v15, 7  ;;  %12225 = vmatmul.mubr.msk.bf16.gmra.mrb[8].mxu0 %vm1024_vm2, %v5266_v49  ;;  %v5181_v2 = vmul.f32 %v16186_v58, %v14049_v20  ;;  %v5275_v29 = vshrl.u32 %v5203_v47, 16 }
 0x2bf   : > { %v5204_v37 = vpack.c.bf16 %v5180_v10, %v5179_v56  ;;  %v5273_v26 = vrot.slane %v5271_v7, 1  ;;  %v16206_v60 = vpop.permute.xlu0 %911 }
 0x2c0   : > { %v16194_v23 = vsel %vm1073_vm0, %v5102_v42, %v5104_v28  ;;  %v16199_v14 = vsel %vm1073_vm0, %v5104_v28, %v5106_v18  ;;  %v5110_v42 = vrot.slane %v16148_v44, 7 }
 0x2c1   : > { %19676 = vst [vmem:[#allocation262_spill] sm:$0xff] %v16194_v23  ;;  %19677 = vst [vmem:[#allocation263_spill] sm:$0xff] %v16199_v14  ;;  %v5182_v6 = vmul.f32 %v16194_v23, %v14057_v4  ;;  %v5036_v38 = vpop.permute.xlu1 %5035  ;;  %v5274_v15 = vsel %vm1850_vm5, %v5269_v22, %v5273_v26  ;;  %v5279_v7 = vshll.u32 %v5204_v37, 16  ;;  %v5183_v28 = vmul.f32 %v16199_v14, %v14075_v21 }
 0x2c2   : > { %v5108_v56 = vrot.slane %v5036_v38, 7  ;;  %12228 = vmatprep.mubr.msk.bf16.mxu0 %vm1024_vm2, %v5274_v15  ;;  %v5277_v58 = vor.u32 %v5275_v29, %v5273_v26  ;;  %v5283_v15 = vshrl.u32 %v5204_v37, 16  ;;  %v990_v29 = vmul.f32 %v16206_v60, %v19436_v11 }
 0x2c3   : > { %v5205_v10 = vpack.c.bf16 %v5182_v6, %v5181_v2  ;;  %v5281_v23 = vrot.slane %v5279_v7, 1 }
 0x2c4   : > { %v16211_v49 = vsel %vm1073_vm0, %v5106_v18, %v5108_v56  ;;  %v16214_v22 = vsel %vm1073_vm0, %v5108_v56, %v5110_v42 }
 0x2c5   : > { %19678 = vst [vmem:[#allocation264_spill] sm:$0xff] %v16211_v49  ;;  %19679 = vst [vmem:[#allocation265_spill] sm:$0xff] %v16214_v22  ;;  %v5184_v47 = vmul.f32 %v16211_v49, %v19556_v35  ;;  %v5042_v38 = vpop.permute.xlu1 %5041  ;;  %v5287_v44 = vshll.u32 %v5205_v10, 16  ;;  %v5282_v6 = vsel %vm1850_vm5, %v5277_v58, %v5281_v23  ;;  %v5285_v14 = vor.u32 %v5283_v15, %v5281_v23  ;;  %v16230_v58 = vpop.permute.xlu0 %923 }
 0x2c6   : > { %v5112_v2 = vrot.slane %v5042_v38, 7  ;;  %12229 = vmatmul.mubr.msk.bf16.gmra.mrb[12].mxu0 %vm1024_vm2, %v5282_v6  ;;  %v5185_v26 = vmul.f32 %v16214_v22, %v14121_v30  ;;  %v993_v11 = vmul.f32 %v16230_v58, %v13989_v52 }
 0x2c7   : > { %v5206_v63 = vpack.c.bf16 %v5184_v47, %v5183_v28  ;;  %v5289_v18 = vrot.slane %v5287_v44, 1  ;;  %v5291_v28 = vshrl.u32 %v5205_v10, 16 }
 0x2c8   : > { %v16223_v56 = vsel %vm1073_vm0, %v5110_v42, %v5112_v2 }
 0x2c9   : > { %19680 = vst [vmem:[#allocation266_spill] sm:$0xff] %v16223_v56  ;;  %v5186_v37 = vmul.f32 %v16223_v56, %v14124_v27  ;;  %v5290_v7 = vsel %vm1850_vm5, %v5285_v14, %v5289_v18  ;;  %v5295_v47 = vshll.u32 %v5206_v63, 16  ;;  %v5293_v15 = vor.u32 %v5291_v28, %v5289_v18 }
 0x2ca   : > { %v16232_v23 = vpop.permute.xlu1 %915  ;;  %12232 = vmatprep.mubr.msk.bf16.mxu0 %vm1024_vm2, %v5290_v7  ;;  %v5299_v22 = vshrl.u32 %v5206_v63, 16  ;;  %v5116_v63 = vrot.slane %v16168_v61, 7  ;;  %v16260_v61 = vpop.permute.xlu0 %927 }
 0x2cb   : > { %v5207_v38 = vpack.c.bf16 %v5186_v37, %v5185_v26  ;;  %v5297_v42 = vrot.slane %v5295_v47, 1  ;;  %v991_v44 = vmul.f32 %v16232_v23, %v19441_v48 }
 0x2cd   : > { %v5298_v6 = vsel %vm1850_vm5, %v5293_v15, %v5297_v42  ;;  %v1014_v14 = vpack.c.bf16 %v991_v44, %v990_v29  ;;  %v5303_v56 = vshll.u32 %v5207_v38, 16  ;;  %v5301_v18 = vor.u32 %v5299_v22, %v5297_v42 }
 0x2ce   : > { %v16240_v10 = vpop.permute.xlu1 %919  ;;  %12233 = vmatmul.mubr.msk.bf16.gmra.mrb[16].mxu0 %vm1024_vm2, %v5298_v6  ;;  %v5307_v42 = vshrl.u32 %v5207_v38, 16 }
 0x2cf   : > { %v992_v49 = vmul.f32 %v16240_v10, %v13972_v50  ;;  %11960 = vmatprep.mubr.msk.bf16.mxu1 %vm1024_vm2, %v1014_v14  ;;  %v5305_v26 = vrot.slane %v5303_v56, 1 }
 0x2d1   : > { %v1015_v48 = vpack.c.bf16 %v993_v11, %v992_v49  ;;  %v5306_v37 = vsel %vm1850_vm5, %v5301_v18, %v5305_v26  ;;  %v5309_v6 = vor.u32 %v5307_v42, %v5305_v26 }
 0x2d2   : > { %12236 = vmatprep.mubr.msk.bf16.mxu0 %vm1024_vm2, %v5306_v37 }
 0x2d3   : > { %v5045_v52 = vpop.permute.xlu1 %5044  ;;  %11961 = vmatmul.mubr.msk.bf16.vlgmr.msra.gmra.mrb[0].mxu1 %vm1024_vm2, %v1015_v48  ;;  %v994_v48 = vmul.f32 %v16260_v61, %v14007_v8 }
 0x2d4   : > { %v5114_v29 = vrot.slane %v5045_v52, 7 }
 0x2d6   : > { %v16251_v7 = vsel %vm1073_vm0, %v5112_v2, %v5114_v29  ;;  %v16254_v50 = vsel %vm1073_vm0, %v5114_v29, %v5116_v63 }
 0x2d7   : > { %19681 = vst [vmem:[#allocation267_spill] sm:$0xff] %v16251_v7  ;;  %19682 = vst [vmem:[#allocation268_spill] sm:$0xff] %v16254_v50  ;;  %v5187_v22 = vmul.f32 %v16251_v7, %v14130_v5  ;;  %v5188_v49 = vmul.f32 %v16254_v50, %v14196_v36  ;;  %v5051_v56 = vpop.permute.xlu1 %5050 }
 0x2d8   : > { %v5118_v28 = vrot.slane %v5051_v56, 7 }
 0x2d9   : > { %v5208_v47 = vpack.c.bf16 %v5188_v49, %v5187_v22  ;;  %v16280_v22 = vpop.permute.xlu0 %939 }
 0x2da   : > { %v16263_v2 = vsel %vm1073_vm0, %v5116_v63, %v5118_v28  ;;  %v997_v8 = vmul.f32 %v16280_v22, %v14057_v4  ;;  %v5124_v4 = vrot.slane %v16190_v57, 7 }
 0x2db   : > { %v5054_v15 = vpop.permute.xlu1 %5053  ;;  %v5311_v44 = vshll.u32 %v5208_v47, 16  ;;  %19683 = vst [vmem:[#allocation269_spill] sm:$0xff] %v16263_v2  ;;  %v5189_v37 = vmul.f32 %v16263_v2, %v14216_v53  ;;  %v5315_v56 = vshrl.u32 %v5208_v47, 16 }
 0x2dc   : > { %v5120_v11 = vrot.slane %v5054_v15, 7 }
 0x2dd   : > { %v5313_v14 = vrot.slane %v5311_v44, 1 }
 0x2de   : > { %v16266_v18 = vsel %vm1073_vm0, %v5118_v28, %v5120_v11 }
 0x2df   : > { %19684 = vst [vmem:[#allocation270_spill] sm:$0xff] %v16266_v18  ;;  %v5190_v38 = vmul.f32 %v16266_v18, %v14168_v34  ;;  %v5314_v52 = vsel %vm1850_vm5, %v5309_v6, %v5313_v14  ;;  %v5317_v44 = vor.u32 %v5315_v56, %v5313_v14 }
 0x2e0   : > { %v16275_v29 = vpop.permute.xlu1 %931  ;;  %12237 = vmatmul.mubr.msk.bf16.gmra.mrb[20].mxu0 %vm1024_vm2, %v5314_v52 }
 0x2e1   : > { %v5209_v26 = vpack.c.bf16 %v5190_v38, %v5189_v37  ;;  %v995_v63 = vmul.f32 %v16275_v29, %v14026_v13 }
 0x2e3   : > { %v1016_v49 = vpack.c.bf16 %v995_v63, %v994_v48  ;;  %v5319_v28 = vshll.u32 %v5209_v26, 16  ;;  %v5323_v57 = vshrl.u32 %v5209_v26, 16 }
 0x2e4   : > { %v16284_v15 = vpop.permute.xlu1 %935 }
 0x2e5   : > { %v996_v42 = vmul.f32 %v16284_v15, %v14049_v20  ;;  %11964 = vmatprep.mubr.msk.bf16.mxu1 %vm1024_vm2, %v1016_v49  ;;  %v5321_v6 = vrot.slane %v5319_v28, 1 }
 0x2e7   : > { %v1017_v37 = vpack.c.bf16 %v997_v8, %v996_v42  ;;  %v5322_v13 = vsel %vm1850_vm5, %v5317_v44, %v5321_v6  ;;  %v16303_v8 = vpop.permute.xlu0 %943 }
 0x2e8   : > { %12240 = vmatprep.mubr.msk.bf16.mxu0 %vm1024_vm2, %v5322_v13  ;;  %v998_v26 = vmul.f32 %v16303_v8, %v14075_v21 }
 0x2e9   : > { %v5057_v38 = vpop.permute.xlu1 %5056  ;;  %11965 = vmatmul.mubr.msk.bf16.gmra.mrb[4].mxu1 %vm1024_vm2, %v1017_v37  ;;  %v5325_v37 = vor.u32 %v5323_v57, %v5321_v6 }
 0x2ea   : > { %v5122_v47 = vrot.slane %v5057_v38, 7 }
 0x2eb   : > { %v16306_v38 = vpop.permute.xlu0 %955 }
 0x2ec   : > { %v16294_v48 = vsel %vm1073_vm0, %v5120_v11, %v5122_v47  ;;  %v16297_v20 = vsel %vm1073_vm0, %v5122_v47, %v5124_v4  ;;  %v1001_v57 = vmul.f32 %v16306_v38, %v14124_v27 }
 0x2ed   : > { %19685 = vst [vmem:[#allocation271_spill] sm:$0xff] %v16294_v48  ;;  %19686 = vst [vmem:[#allocation272_spill] sm:$0xff] %v16297_v20  ;;  %v5191_v14 = vmul.f32 %v16294_v48, %v19523_v41  ;;  %v5192_v52 = vmul.f32 %v16297_v20, %v19625_v0  ;;  %v5063_v63 = vpop.permute.xlu1 %5062 }
 0x2ee   : > { %v5126_v49 = vrot.slane %v5063_v63, 7 }
 0x2ef   : > { %v5210_v56 = vpack.c.bf16 %v5192_v52, %v5191_v14 }
 0x2f0   : > { %v5127_v11 = vsel %vm1073_vm0, %v5124_v4, %v5126_v49 }
 0x2f1   : > { %v5066_v28 = vpop.permute.xlu1 %5065  ;;  %v5327_v42 = vshll.u32 %v5210_v56, 16  ;;  %v5193_v48 = vmul.f32 0.0, %v5127_v11 }
 0x2f2   : > { %v5128_v44 = vrot.slane %v5066_v28, 7 }
 0x2f3   : > { %v5329_v13 = vrot.slane %v5327_v42, 1  ;;  %v16319_v42 = vpop.permute.xlu0 %963 }
 0x2f4   : > { %v5129_v41 = vsel %vm1073_vm0, %v5126_v49, %v5128_v44  ;;  %v5195_v47 = vmul.f32 0.0, %v5128_v44  ;;  %v5331_v49 = vshrl.u32 %v5210_v56, 16 }
 0x2f5   : > { %v5194_v0 = vmul.f32 0.0, %v5129_v41  ;;  %v5330_v20 = vsel %vm1850_vm5, %v5325_v37, %v5329_v13 }
 0x2f6   : > { %v5212_v2 = vpack.c.bf16 %v5195_v47, %v5195_v47  ;;  %v16310_v63 = vpop.permute.xlu1 %947  ;;  %12241 = vmatmul.mubr.msk.bf16.gmra.mrb[24].mxu0 %vm1024_vm2, %v5330_v20  ;;  %v5333_v21 = vor.u32 %v5331_v49, %v5329_v13 }
 0x2f7   : > { %v5211_v4 = vpack.c.bf16 %v5194_v0, %v5193_v48  ;;  %v999_v6 = vmul.f32 %v16310_v63, %v19556_v35  ;;  %v16342_v47 = vpop.permute.xlu0 %971 }
 0x2f8   : > { %v5343_v14 = vshll.u32 %v5212_v2, 16 }
 0x2f9   : > { %v1018_v52 = vpack.c.bf16 %v999_v6, %v998_v26  ;;  %v5335_v28 = vshll.u32 %v5211_v4, 16  ;;  %v5339_v35 = vshrl.u32 %v5211_v4, 16  ;;  %v13175_v26 = vld [vmem:[%s18835_s7 + $0x10] sm:$0xff]   ;;  %v13176_v6 = vld [vmem:[%s18835_s7 + $0x18] sm:$0xff]  }
 0x2fa   : > { %v16321_v11 = vpop.permute.xlu1 %951  ;;  %v5345_v2 = vrot.slane %v5343_v14, 1  ;;  %12248 = vmatprep.subr.bf16.mxu1 %v13175_v26 }
 0x2fb   : > { %v1000_v20 = vmul.f32 %v16321_v11, %v14121_v30  ;;  %11968 = vmatprep.mubr.msk.bf16.mxu1 %vm1024_vm2, %v1018_v52  ;;  %v16326_v48 = vrot.slane %v5335_v28, 1  ;;  %v1003_v30 = vmul.f32 %v16319_v42, %v14196_v36  ;;  %12249 = vmatpush3.bf16.msra.mxu1 %v13175_v26  ;;  %v19689_v52 = vld [vmem:[#allocation9_spill] sm:$0xff] }
 0x2fc   : > { %12250 = vmatprep.subr.bf16.mxu1 %v13176_v6 }
 0x2fd   : > { %19687 = vst [vmem:[#allocation273_spill] sm:$0xff] %v16326_v48  ;;  %v1019_v44 = vpack.c.bf16 %v1001_v57, %v1000_v20  ;;  %v5338_v56 = vsel %vm1850_vm5, %v5333_v21, %v16326_v48  ;;  %v5341_v27 = vor.u32 %v5339_v35, %v16326_v48 }
 0x2fe   : > { %v16331_v37 = vpop.permute.xlu1 %959  ;;  %12244 = vmatprep.mubr.msk.bf16.mxu0 %vm1024_vm2, %v5338_v56 }
 0x2ff   : > { %v1002_v13 = vmul.f32 %v16331_v37, %v14130_v5  ;;  %11969 = vmatmul.mubr.msk.bf16.gmra.mrb[8].mxu1 %vm1024_vm2, %v1019_v44  ;;  %v16340_v41 = vsel %vm1850_vm5, %v5341_v27, %v5345_v2  ;;  %v1005_v5 = vmul.f32 %v16342_v47, %v14168_v34  ;;  %v13177_v34 = vld [vmem:[%s18835_s7] sm:$0xff]  }
 0x300   : > { %19688 = vst [vmem:[#allocation274_spill] sm:$0xff] %v16340_v41  ;;  %12245 = vmatmul.mubr.msk.bf16.gmra.mrb[28].mxu0 %vm1024_vm2, %v16340_v41  ;;  %12251 = vmatpush3.bf16.msra.mxu1 %v13176_v6  ;;  %v19695_v6 = vld [vmem:[#allocation6_spill] sm:$0xff] }
 0x301   : > { %v1020_v0 = vpack.c.bf16 %v1003_v30, %v1002_v13  ;;  %12284 = vmatprep.subr.bf16.mxu1 %v13177_v34 }
 0x302   : > { %v16349_v4 = vpop.permute.xlu1 %967 }
 0x303   : > { %v1004_v36 = vmul.f32 %v16349_v4, %v14216_v53  ;;  %11972 = vmatprep.mubr.msk.bf16.mxu1 %vm1024_vm2, %v1020_v0  ;;  %v16368_v53 = vld [vmem:[%s18834_s6] ss:$0 sm:$0xff] }
 0x304   : > { %v19693_v0 = vld [vmem:[#allocation10_spill] sm:$0xff] }
 0x305   : > { %v1021_v14 = vpack.c.bf16 %v1005_v5, %v1004_v36  ;;  %v19694_v5 = vld [vmem:[#allocation3_spill] sm:$0xff] }
 0x307   : > { %11973 = vmatmul.mubr.msk.bf16.gmra.mrb[12].mxu1 %vm1024_vm2, %v1021_v14 }
 0x308   : > { %12252 = vmatprep.mubr.msk.bf16.mxu1 %vm5774_vm6, %v19689_v52  ;;  %v19696_v52 = vld [vmem:[#allocation11_spill] sm:$0xff] }
 0x37d   : > { %v12218_v49 = vpop.f32.mrb[0].mxu0 }
 0x37e   : > { %v5600_v28 = vadd.f32 %v12218_v49, %v16368_v53  ;;  %v5432_v57 = vpop.f32.mrb[1].mxu0 }
 0x37f   : > { %v5598_v20 = vadd.f32 %v16368_v53, %v5432_v57  ;;  %v12219_v21 = vpop.f32.mrb[2].mxu0 }
 0x380   : > { %v5601_v35 = vadd.f32 %v12219_v21, %v16368_v53  ;;  %v5435_v2 = vpop.f32.mrb[3].mxu0  ;;  %v16376_v27 = vmax.f32 %v5600_v28, 0.0  ;;  %v13178_v28 = vld [vmem:[%s18835_s7 + $0x8] sm:$0xff]  }
 0x381   : > { %v16373_v44 = vmax.f32 %v5598_v20, 0.0  ;;  %v5599_v56 = vadd.f32 %v16368_v53, %v5435_v2 }
 0x382   : > { %19690 = vst [vmem:[#allocation9_spill] sm:$0xff] %v16376_v27  ;;  %v16378_v30 = vmax.f32 %v5601_v35, 0.0  ;;  %v5714_v49 = vmul.f32 %v16376_v27, %v19696_v52 }
 0x383   : > { %v16380_v13 = vmax.f32 %v5599_v56, 0.0  ;;  %v5712_v36 = vmul.f32 %v16373_v44, %v19694_v5  ;;  %v16399_v56 = vld [vmem:[%s18835_s7 + $0x20] sm:$0xff]  }
 0x384   : > { %19691 = vst [vmem:[#allocation275_spill] sm:$0xff] %v16378_v30  ;;  %v5715_v26 = vmul.f32 %v16378_v30, %v19693_v0 }
 0x385   : > { %19692 = vst [vmem:[#allocation276_spill] sm:$0xff] %v16380_v13  ;;  %v5713_v14 = vmul.f32 %v16380_v13, %v19695_v6 }
 0x386   : > { %v5743_v20 = vpack.c.bf16 %v5715_v26, %v5714_v49 }
 0x387   : > { %v5742_v57 = vpack.c.bf16 %v5713_v14, %v5712_v36 }
 0x389   : > { %12253 = vmatmul.mubr.msk.bf16.vlgmr.msra.gmra.mrb[16].mxu1 %vm5774_vm6, %v5742_v57  ;;  %v12222_v21 = vpop.f32.mrb[4].mxu0  ;;  %v19701_v57 = vld [vmem:[#allocation17_spill] sm:$0xff] }
 0x38a   : > { %12256 = vmatprep.mubr.msk.bf16.mxu1 %vm5774_vm6, %v5743_v20  ;;  %12285 = vmatpush3.bf16.msra.mxu1 %v13177_v34  ;;  %v5604_v35 = vadd.f32 %v12222_v21, %v16368_v53  ;;  %v5448_v2 = vpop.f32.mrb[5].mxu0 }
 0x38b   : > { %12286 = vmatprep.subr.bf16.mxu1 %v13178_v28  ;;  %v5602_v0 = vadd.f32 %v16368_v53, %v5448_v2  ;;  %v12223_v5 = vpop.f32.mrb[6].mxu0  ;;  %v19702_v2 = vld [vmem:[#allocation15_spill] sm:$0xff] }
 0x38c   : > { %v5605_v26 = vadd.f32 %v12223_v5, %v16368_v53  ;;  %v5451_v36 = vpop.f32.mrb[7].mxu0  ;;  %v16406_v34 = vmax.f32 %v5604_v35, 0.0 }
 0x38d   : > { %v16403_v6 = vmax.f32 %v5602_v0, 0.0  ;;  %v5603_v14 = vadd.f32 %v16368_v53, %v5451_v36  ;;  %v19703_v0 = vld [vmem:[#allocation14_spill] sm:$0xff] }
 0x38e   : > { %12287 = vmatpush3.bf16.msra.mxu1 %v13178_v28  ;;  %19698 = vst [vmem:[#allocation3_spill] sm:$0xff] %v16406_v34  ;;  %v16408_v52 = vmax.f32 %v5605_v26, 0.0  ;;  %v19704_v36 = vld [vmem:[#allocation18_spill] sm:$0xff] }
 0x38f   : > { %19697 = vst [vmem:[#allocation10_spill] sm:$0xff] %v16403_v6  ;;  %12320 = vmatprep.subr.bf16.mxu1 %v16399_v56  ;;  %v16411_v49 = vmax.f32 %v5603_v14, 0.0  ;;  %v5716_v5 = vmul.f32 %v16403_v6, %v19702_v2  ;;  %v5718_v26 = vmul.f32 %v16406_v34, %v19704_v36 }
 0x390   : > { %19699 = vst [vmem:[#allocation6_spill] sm:$0xff] %v16408_v52  ;;  %v5719_v20 = vmul.f32 %v16408_v52, %v19701_v57 }
 0x391   : > { %19700 = vst [vmem:[#allocation11_spill] sm:$0xff] %v16411_v49  ;;  %v12226_v21 = vpop.f32.mrb[8].mxu0  ;;  %v5717_v41 = vmul.f32 %v16411_v49, %v19703_v0 }
 0x392   : > { %v5608_v28 = vadd.f32 %v12226_v21, %v16368_v53  ;;  %v5464_v35 = vpop.f32.mrb[9].mxu0  ;;  %v5745_v50 = vpack.c.bf16 %v5719_v20, %v5718_v26  ;;  %v19709_v20 = vld [vmem:[#allocation19_spill] sm:$0xff] }
 0x393   : > { %v5606_v48 = vadd.f32 %v16368_v53, %v5464_v35  ;;  %v12227_v14 = vpop.f32.mrb[10].mxu0  ;;  %v5744_v18 = vpack.c.bf16 %v5717_v41, %v5716_v5  ;;  %v19707_v35 = vld [vmem:[#allocation21_spill] sm:$0xff] }
 0x394   : > { %v5609_v7 = vadd.f32 %v12227_v14, %v16368_v53  ;;  %v5467_v57 = vpop.f32.mrb[11].mxu0  ;;  %v16428_v0 = vmax.f32 %v5608_v28, 0.0  ;;  %v19708_v14 = vld [vmem:[#allocation20_spill] sm:$0xff] }
 0x395   : > { %v16424_v59 = vmax.f32 %v5606_v48, 0.0  ;;  %v5607_v2 = vadd.f32 %v16368_v53, %v5467_v57  ;;  %12257 = vmatmul.mubr.msk.bf16.gmra.mrb[20].mxu1 %vm5774_vm6, %v5744_v18  ;;  %v19710_v57 = vld [vmem:[#allocation27_spill] sm:$0xff] }
 0x396   : > { %19706 = vst [vmem:[#allocation15_spill] sm:$0xff] %v16428_v0  ;;  %v16430_v21 = vmax.f32 %v5609_v7, 0.0  ;;  %12260 = vmatprep.mubr.msk.bf16.mxu1 %vm5774_vm6, %v5745_v50  ;;  %v5722_v7 = vmul.f32 %v16428_v0, %v19710_v57 }
 0x397   : > { %19705 = vst [vmem:[#allocation17_spill] sm:$0xff] %v16424_v59  ;;  %v16433_v36 = vmax.f32 %v5607_v2, 0.0  ;;  %v5720_v48 = vmul.f32 %v16424_v59, %v19708_v14 }
 0x398   : > { %v5723_v41 = vmul.f32 %v16430_v21, %v19707_v35 }
 0x399   : > { %v12230_v5 = vpop.f32.mrb[12].mxu0  ;;  %v5721_v26 = vmul.f32 %v16433_v36, %v19709_v20 }
 0x39a   : > { %v5612_v18 = vadd.f32 %v12230_v5, %v16368_v53  ;;  %v5480_v28 = vpop.f32.mrb[13].mxu0  ;;  %v5747_v55 = vpack.c.bf16 %v5723_v41, %v5722_v7  ;;  %v19716_v7 = vld [vmem:[#allocation31_spill] sm:$0xff] }
 0x39b   : > { %v5610_v50 = vadd.f32 %v16368_v53, %v5480_v28  ;;  %v12231_v2 = vpop.f32.mrb[14].mxu0  ;;  %v5746_v54 = vpack.c.bf16 %v5721_v26, %v5720_v48  ;;  %v19715_v28 = vld [vmem:[#allocation29_spill] sm:$0xff] }
 0x39c   : > { %v5613_v17 = vadd.f32 %v12231_v2, %v16368_v53  ;;  %v5483_v35 = vpop.f32.mrb[15].mxu0  ;;  %v16450_v20 = vmax.f32 %v5612_v18, 0.0 }
 0x39d   : > { %v16446_v40 = vmax.f32 %v5610_v50, 0.0  ;;  %v5611_v14 = vadd.f32 %v16368_v53, %v5483_v35  ;;  %12261 = vmatmul.mubr.msk.bf16.gmra.mrb[24].mxu1 %vm5774_vm6, %v5746_v54 }
 0x39e   : > { %19712 = vst [vmem:[#allocation18_spill] sm:$0xff] %v16450_v20  ;;  %v16452_v5 = vmax.f32 %v5613_v17, 0.0  ;;  %12264 = vmatprep.mubr.msk.bf16.mxu1 %vm5774_vm6, %v5747_v55  ;;  %v5726_v54 = vmul.f32 %v16450_v20, %v16206_v60 }
 0x39f   : > { %19711 = vst [vmem:[#allocation14_spill] sm:$0xff] %v16446_v40  ;;  %v16455_v57 = vmax.f32 %v5611_v14, 0.0  ;;  %v5724_v41 = vmul.f32 %v16446_v40, %v19715_v28 }
 0x3a0   : > { %19713 = vst [vmem:[#allocation21_spill] sm:$0xff] %v16452_v5  ;;  %v5727_v48 = vmul.f32 %v16452_v5, %v16232_v23 }
 0x3a1   : > { %19714 = vst [vmem:[#allocation20_spill] sm:$0xff] %v16455_v57  ;;  %v12234_v26 = vpop.f32.mrb[16].mxu0  ;;  %v5725_v50 = vmul.f32 %v16455_v57, %v19716_v7 }
 0x3a2   : > { %v5496_v2 = vpop.f32.mrb[17].mxu0  ;;  %v5749_v55 = vpack.c.bf16 %v5727_v48, %v5726_v54 }
 0x3a3   : > { %v12235_v17 = vpop.f32.mrb[18].mxu0  ;;  %v5748_v18 = vpack.c.bf16 %v5725_v50, %v5724_v41 }
 0x3a4   : > { %v5499_v35 = vpop.f32.mrb[19].mxu0 }
 0x3a5   : > { %12265 = vmatmul.mubr.msk.bf16.gmra.mrb[28].mxu1 %vm5774_vm6, %v5748_v18 }
 0x3a6   : > { %v11962_v14 = vpop.f32.mrb[0].mxu1  ;;  %12268 = vmatprep.mubr.msk.bf16.mxu1 %vm5774_vm6, %v5749_v55 }
 0x3a7   : > { %v12610_v12 = vadd.f32 %v12234_v26, %v11962_v14  ;;  %v1178_v23 = vpop.f32.mrb[1].mxu1 }
 0x3a8   : > { %v12611_v32 = vadd.f32 %v5496_v2, %v1178_v23  ;;  %v11963_v28 = vpop.f32.mrb[2].mxu1 }
 0x3a9   : > { %v5616_v31 = vadd.f32 %v12610_v12, %v16368_v53  ;;  %v12612_v7 = vadd.f32 %v12235_v17, %v11963_v28  ;;  %v1181_v24 = vpop.f32.mrb[3].mxu1 }
 0x3aa   : > { %v5614_v3 = vadd.f32 %v12611_v32, %v16368_v53  ;;  %v12613_v60 = vadd.f32 %v5499_v35, %v1181_v24 }
 0x3ab   : > { %v5617_v41 = vadd.f32 %v12612_v7, %v16368_v53  ;;  %v16473_v54 = vmax.f32 %v5616_v31, 0.0 }
 0x3ac   : > { %v16470_v50 = vmax.f32 %v5614_v3, 0.0  ;;  %v5615_v48 = vadd.f32 %v12613_v60, %v16368_v53 }
 0x3ad   : > { %v16475_v26 = vmax.f32 %v5617_v41, 0.0  ;;  %v5730_v3 = vmul.f32 %v16473_v54, %v16260_v61 }
 0x3ae   : > { %19717 = vst [vmem:[#allocation19_spill] sm:$0xff] %v16470_v50  ;;  %v16477_v18 = vmax.f32 %v5615_v48, 0.0  ;;  %v5728_v2 = vmul.f32 %v16470_v50, %v16240_v10 }
 0x3af   : > { %v5731_v12 = vmul.f32 %v16475_v26, %v16275_v29 }
 0x3b0   : > { %19718 = vst [vmem:[#allocation27_spill] sm:$0xff] %v16477_v18  ;;  %v5729_v24 = vmul.f32 %v16477_v18, %v16230_v58 }
 0x3b1   : > { %v5751_v31 = vpack.c.bf16 %v5731_v12, %v5730_v3 }
 0x3b2   : > { %v5750_v32 = vpack.c.bf16 %v5729_v24, %v5728_v2 }
 0x3b3   : > { %v12238_v17 = vpop.f32.mrb[20].mxu0 }
 0x3b4   : > { %v5512_v35 = vpop.f32.mrb[21].mxu0  ;;  %12269 = vmatmul.mubr.msk.bf16.gmra.mrb[32].mxu1 %vm5774_vm6, %v5750_v32 }
 0x3b5   : > { %v12239_v55 = vpop.f32.mrb[22].mxu0  ;;  %12272 = vmatprep.mubr.msk.bf16.mxu1 %vm5774_vm6, %v5751_v31 }
 0x3b6   : > { %v5515_v14 = vpop.f32.mrb[23].mxu0 }
 0x3bc   : > { %v11966_v29 = vpop.f32.mrb[4].mxu1 }
 0x3bd   : > { %v12614_v23 = vadd.f32 %v12238_v17, %v11966_v29  ;;  %v1194_v28 = vpop.f32.mrb[5].mxu1 }
 0x3be   : > { %v12615_v10 = vadd.f32 %v5512_v35, %v1194_v28  ;;  %v11967_v7 = vpop.f32.mrb[6].mxu1 }
 0x3bf   : > { %v5620_v58 = vadd.f32 %v12614_v23, %v16368_v53  ;;  %v12616_v60 = vadd.f32 %v12239_v55, %v11967_v7  ;;  %v1197_v41 = vpop.f32.mrb[7].mxu1 }
 0x3c0   : > { %v5618_v61 = vadd.f32 %v12615_v10, %v16368_v53  ;;  %v12617_v48 = vadd.f32 %v5515_v14, %v1197_v41 }
 0x3c1   : > { %v5621_v12 = vadd.f32 %v12616_v60, %v16368_v53  ;;  %v16495_v3 = vmax.f32 %v5620_v58, 0.0  ;;  %v19720_v60 = vld [vmem:[#allocation24_spill] sm:$0xff] }
 0x3c2   : > { %v16492_v2 = vmax.f32 %v5618_v61, 0.0  ;;  %v5619_v24 = vadd.f32 %v12617_v48, %v16368_v53 }
 0x3c3   : > { %v16497_v32 = vmax.f32 %v5621_v12, 0.0  ;;  %v5734_v14 = vmul.f32 %v16495_v3, %v16303_v8 }
 0x3c4   : > { %19719 = vst [vmem:[#allocation29_spill] sm:$0xff] %v16492_v2  ;;  %v16499_v17 = vmax.f32 %v5619_v24, 0.0  ;;  %v5732_v35 = vmul.f32 %v16492_v2, %v16284_v15  ;;  %v5662_v15 = vmul.f32 %v16373_v44, %v19720_v60 }
 0x3c5   : > { %v5735_v31 = vmul.f32 %v16497_v32, %v16310_v63 }
 0x3c6   : > { %v5733_v55 = vmul.f32 %v16499_v17, %v16280_v22  ;;  %v5692_v62 = vpack.c.bf16 %v5662_v15, %v19721_v25 }
 0x3c7   : > { %v5753_v28 = vpack.c.bf16 %v5735_v31, %v5734_v14 }
 0x3c8   : > { %v5752_v29 = vpack.c.bf16 %v5733_v55, %v5732_v35 }
 0x3c9   : > { %v12242_v23 = vpop.f32.mrb[24].mxu0 }
 0x3ca   : > { %v5528_v10 = vpop.f32.mrb[25].mxu0  ;;  %12273 = vmatmul.mubr.msk.bf16.gmra.mrb[36].mxu1 %vm5774_vm6, %v5752_v29 }
 0x3cb   : > { %v12243_v7 = vpop.f32.mrb[26].mxu0  ;;  %12276 = vmatprep.mubr.msk.bf16.mxu1 %vm5774_vm6, %v5753_v28 }
 0x3cc   : > { %v5531_v58 = vpop.f32.mrb[27].mxu0 }
 0x3d2   : > { %v11970_v63 = vpop.f32.mrb[8].mxu1 }
 0x3d3   : > { %v12618_v41 = vadd.f32 %v12242_v23, %v11970_v63  ;;  %v1210_v61 = vpop.f32.mrb[9].mxu1  ;;  %v12246_v22 = vpop.f32.mrb[28].mxu0 }
 0x3d4   : > { %v12619_v48 = vadd.f32 %v5528_v10, %v1210_v61  ;;  %v11971_v12 = vpop.f32.mrb[10].mxu1  ;;  %v5544_v8 = vpop.f32.mrb[29].mxu0  ;;  %v5984_v61 = vshrl.u32 %v5692_v62, 16 }
 0x3d5   : > { %v5624_v24 = vadd.f32 %v12618_v41, %v16368_v53  ;;  %v12620_v31 = vadd.f32 %v12243_v7, %v11971_v12  ;;  %v1213_v35 = vpop.f32.mrb[11].mxu1  ;;  %v12247_v55 = vpop.f32.mrb[30].mxu0  ;;  %v19722_v12 = vld [vmem:[#allocation26_spill] sm:$0xff] }
 0x3d6   : > { %v5622_v14 = vadd.f32 %v12619_v48, %v16368_v53  ;;  %v12621_v29 = vadd.f32 %v5531_v58, %v1213_v35  ;;  %v5547_v28 = vpop.f32.mrb[31].mxu0  ;;  %v5663_v58 = vmul.f32 %v16380_v13, %v19722_v12  ;;  %v19723_v35 = vld [vmem:[#allocation34_spill] sm:$0xff]  ;;  %v5986_v33 = vrot.slane %v5984_v61, 3 }
 0x3d7   : > { %v5625_v45 = vadd.f32 %v12620_v31, %v16368_v53  ;;  %v16520_v10 = vmax.f32 %v5624_v24, 0.0  ;;  %v5987_v31 = vshll.u32 %v5692_v62, 16  ;;  %v5666_v24 = vmul.f32 %v16403_v6, %v19723_v35 }
 0x3d8   : > { %v16517_v60 = vmax.f32 %v5622_v14, 0.0  ;;  %v5623_v23 = vadd.f32 %v12621_v29, %v16368_v53 }
 0x3d9   : > { %v16522_v63 = vmax.f32 %v5625_v45, 0.0  ;;  %v5738_v62 = vmul.f32 %v16520_v10, %v16331_v37 }
 0x3da   : > { %v16524_v41 = vmax.f32 %v5623_v23, 0.0  ;;  %v11974_v7 = vpop.f32.mrb[12].mxu1  ;;  %v5736_v29 = vmul.f32 %v16517_v60, %v16321_v11 }
 0x3db   : > { %v16528_v48 = vadd.f32 %v12246_v22, %v11974_v7  ;;  %v1226_v25 = vpop.f32.mrb[13].mxu1  ;;  %v5739_v15 = vmul.f32 %v16522_v63, %v16319_v42  ;;  %v5664_v22 = vmul.f32 %v16376_v27, %v19724_v19  ;;  %v19725_v42 = vld [vmem:[#allocation33_spill] sm:$0xff] }
 0x3dc   : > { %v12623_v14 = vadd.f32 %v5544_v8, %v1226_v25  ;;  %v11975_v45 = vpop.f32.mrb[14].mxu1  ;;  %v5737_v23 = vmul.f32 %v16524_v41, %v16306_v38  ;;  %v5665_v35 = vmul.f32 %v16378_v30, %v19725_v42  ;;  %v5989_v38 = vrot.slane %v5987_v31, 4 }
 0x3dd   : > { %v16540_v7 = vadd.f32 %v12247_v55, %v11975_v45  ;;  %v1229_v12 = vpop.f32.mrb[15].mxu1  ;;  %v5693_v11 = vpack.c.bf16 %v5664_v22, %v5663_v58  ;;  %v5755_v43 = vpack.c.bf16 %v5739_v15, %v5738_v62 }
 0x3de   : > { %v5626_v8 = vadd.f32 %v12623_v14, %v16368_v53  ;;  %v12625_v25 = vadd.f32 %v5547_v28, %v1229_v12  ;;  %v5754_v9 = vpack.c.bf16 %v5737_v23, %v5736_v29  ;;  %v5694_v39 = vpack.c.bf16 %v5666_v24, %v5665_v35  ;;  %v19726_v29 = vld [vmem:[#allocation35_spill] sm:$0xff]  ;;  %v19727_v24 = vld [vmem:[#allocation40_spill] sm:$0xff] }
 0x3df   : > { %v5993_v55 = vshrl.u32 %v5693_v11, 16  ;;  %v5990_v45 = vor.u32 %v5989_v38, %v5986_v33  ;;  %v5996_v14 = vshll.u32 %v5693_v11, 16  ;;  %v5667_v58 = vmul.f32 %v16411_v49, %v19726_v29  ;;  %v19729_v33 = vld [vmem:[#allocation39_spill] sm:$0xff]  ;;  %v19731_v29 = vld [vmem:[#allocation41_spill] sm:$0xff] }
 0x3e0   : > { %v16547_v46 = vmax.f32 %v5626_v8, 0.0  ;;  %v5627_v19 = vadd.f32 %v12625_v25, %v16368_v53  ;;  %12277 = vmatmul.mubr.msk.bf16.gmra.mrb[40].mxu1 %vm5774_vm6, %v5754_v9  ;;  %v6002_v28 = vshrl.u32 %v5694_v39, 16  ;;  %v6005_v31 = vshll.u32 %v5694_v39, 16 }
 0x3e1   : > { %12280 = vmatprep.mubr.msk.bf16.mxu1 %vm5774_vm6, %v5755_v43  ;;  %v5670_v9 = vmul.f32 %v16424_v59, %v19727_v24  ;;  %v19728_v43 = vld [vmem:[#allocation36_spill] sm:$0xff]  ;;  %v5669_v12 = vmul.f32 %v16408_v52, %v19729_v33  ;;  %v5995_v62 = vrot.slane %v5993_v55, 3  ;;  %v5998_v42 = vrot.slane %v5996_v14, 4 }
 0x3e2   : > { %v16552_v37 = vmax.f32 %v5627_v19, 0.0  ;;  %v5740_v61 = vmul.f32 %v16547_v46, %v16349_v4  ;;  %v5668_v23 = vmul.f32 %v16406_v34, %v19728_v43  ;;  %v19730_v4 = vld [vmem:[#allocation32_spill] sm:$0xff]  ;;  %v6007_v39 = vrot.slane %v6005_v31, 4  ;;  %v19733_v43 = vld [vmem:[#allocation42_spill] sm:$0xff] }
 0x3e3   : > { %v5991_v8 = vsel %vm1241_vm4, %v19730_v4, %v5990_v45  ;;  %v5696_v25 = vpack.c.bf16 %v5670_v9, %v5669_v12  ;;  %v5999_v11 = vor.u32 %v5998_v42, %v5995_v62  ;;  %v13180_v9 = vld [vmem:[%s18835_s7 + $0x28] sm:$0xff]  }
 0x3e4   : > { %v5741_v15 = vmul.f32 %v16552_v37, %v16342_v47  ;;  %v5695_v35 = vpack.c.bf16 %v5668_v23, %v5667_v58  ;;  %v6004_v47 = vrot.slane %v6002_v28, 3  ;;  %v19732_v58 = vld [vmem:[#allocation44_spill] sm:$0xff]  ;;  %v5672_v23 = vmul.f32 %v16428_v0, %v19733_v43  ;;  %v19734_v28 = vld [vmem:[#allocation43_spill] sm:$0xff] }
 0x3e5   : > { %v6020_v55 = vshrl.u32 %v5696_v25, 16  ;;  %v6023_v14 = vshll.u32 %v5696_v25, 16  ;;  %v5674_v24 = vmul.f32 %v16446_v40, %v19732_v58  ;;  %v5673_v31 = vmul.f32 %v16430_v21, %v19734_v28 }
 0x3e6   : > { %v5756_v22 = vpack.c.bf16 %v5741_v15, %v5740_v61  ;;  %v6011_v38 = vshrl.u32 %v5695_v35, 16  ;;  %v6014_v19 = vshll.u32 %v5695_v35, 16  ;;  %v5671_v61 = vmul.f32 %v16433_v36, %v19731_v29 }
 0x3e7   : > { %v6008_v15 = vor.u32 %v6007_v39, %v6004_v47  ;;  %v6022_v35 = vrot.slane %v6020_v55, 3  ;;  %v6025_v4 = vrot.slane %v6023_v14, 4  ;;  %v16589_v47 = vld [vmem:[%s18835_s7 + $0x30] sm:$0xff]   ;;  %v19737_v14 = vld [vmem:[#allocation46_spill] sm:$0xff] }
 0x3e8   : > { %12281 = vmatmul.mubr.msk.bf16.gmra.mrb[44].mxu1 %vm5774_vm6, %v5756_v22  ;;  %v6000_v22 = vsel %vm1241_vm4, %v5990_v45, %v5999_v11  ;;  %v6013_v33 = vrot.slane %v6011_v38, 3  ;;  %v6016_v12 = vrot.slane %v6014_v19, 4  ;;  %v5697_v62 = vpack.c.bf16 %v5672_v23, %v5671_v61  ;;  %v19735_v38 = vld [vmem:[#allocation45_spill] sm:$0xff]  ;;  %v19736_v55 = vld [vmem:[#allocation48_spill] sm:$0xff] }
 0x3e9   : > { %12288 = vmatprep.mubr.msk.bf16.mxu1 %vm5774_vm6, %v5991_v8  ;;  %v6009_v42 = vsel %vm1241_vm4, %v5999_v11, %v6008_v15  ;;  %v5698_v8 = vpack.c.bf16 %v5674_v24, %v5673_v31  ;;  %v5675_v19 = vmul.f32 %v16455_v57, %v19735_v38  ;;  %v6026_v11 = vor.u32 %v6025_v4, %v6022_v35  ;;  %v19738_v24 = vld [vmem:[#allocation47_spill] sm:$0xff] }
 0x3ea   : > { %v6017_v45 = vor.u32 %v6016_v12, %v6013_v33  ;;  %v6029_v39 = vshrl.u32 %v5697_v62, 16  ;;  %v6032_v25 = vshll.u32 %v5697_v62, 16  ;;  %v5676_v58 = vmul.f32 %v16450_v20, %v19737_v14  ;;  %v19741_v14 = vld [vmem:[#allocation51_spill] sm:$0xff] }
 0x3eb   : > { %v6038_v29 = vshrl.u32 %v5698_v8, 16  ;;  %v6041_v61 = vshll.u32 %v5698_v8, 16  ;;  %v5677_v43 = vmul.f32 %v16452_v5, %v19738_v24  ;;  %v19739_v8 = vld [vmem:[#allocation50_spill] sm:$0xff] }
 0x3ec   : > { %v6018_v23 = vsel %vm1241_vm4, %v6008_v15, %v6017_v45  ;;  %v6031_v28 = vrot.slane %v6029_v39, 3  ;;  %v6034_v31 = vrot.slane %v6032_v25, 4  ;;  %v6027_v33 = vsel %vm1241_vm4, %v6017_v45, %v6026_v11  ;;  %v19740_v25 = vld [vmem:[#allocation53_spill] sm:$0xff] }
 0x3ed   : > { %v6040_v12 = vrot.slane %v6038_v29, 3  ;;  %v6043_v62 = vrot.slane %v6041_v61, 4  ;;  %v5679_v38 = vmul.f32 %v16477_v18, %v19739_v8  ;;  %v5680_v45 = vmul.f32 %v16473_v54, %v19741_v14  ;;  %v19742_v29 = vld [vmem:[#allocation52_spill] sm:$0xff]  ;;  %v19745_v14 = vld [vmem:[#allocation55_spill] sm:$0xff] }
 0x3ee   : > { %v5681_v61 = vmul.f32 %v16475_v26, %v19742_v29 }
 0x3f0   : > { %12289 = vmatmul.mubr.msk.bf16.vlgmr.msra.gmra.mrb[16].mxu1 %vm5774_vm6, %v6000_v22  ;;  %v5699_v22 = vpack.c.bf16 %v5676_v58, %v5675_v19  ;;  %v5682_v19 = vmul.f32 %v16492_v2, %v19740_v25 }
 0x3f1   : > { %12321 = vmatpush3.bf16.msra.mxu1 %v16399_v56  ;;  %12292 = vmatprep.mubr.msk.bf16.mxu1 %vm5774_vm6, %v6009_v42  ;;  %v5678_v56 = vmul.f32 %v16470_v50, %v19736_v55  ;;  %v6044_v55 = vor.u32 %v6043_v62, %v6040_v12 }
 0x3f2   : > { %12322 = vmatprep.subr.bf16.mxu1 %v13180_v9  ;;  %v6047_v35 = vshrl.u32 %v5699_v22, 16  ;;  %v6050_v4 = vshll.u32 %v5699_v22, 16  ;;  %v5702_v22 = vpack.c.bf16 %v5682_v19, %v5681_v61 }
 0x3f3   : > { %v5700_v42 = vpack.c.bf16 %v5678_v56, %v5677_v43  ;;  %v5701_v43 = vpack.c.bf16 %v5680_v45, %v5679_v38 }
 0x3f4   : > { %v6049_v58 = vrot.slane %v6047_v35, 3  ;;  %v6052_v24 = vrot.slane %v6050_v4, 4  ;;  %v6077_v35 = vshll.u32 %v5702_v22, 16  ;;  %v19744_v4 = vld [vmem:[#allocation58_spill] sm:$0xff] }
 0x3f5   : > { %12323 = vmatpush3.bf16.msra.mxu1 %v13180_v9  ;;  %v6035_v9 = vor.u32 %v6034_v31, %v6031_v28  ;;  %v6056_v15 = vshrl.u32 %v5700_v42, 16  ;;  %v6059_v39 = vshll.u32 %v5700_v42, 16  ;;  %v6065_v12 = vshrl.u32 %v5701_v43, 16  ;;  %v19743_v42 = vld [vmem:[#allocation54_spill] sm:$0xff] }
 0x3f6   : > { %12356 = vmatprep.subr.bf16.mxu1 %v16589_v47  ;;  %v6068_v62 = vshll.u32 %v5701_v43, 16  ;;  %v5683_v8 = vmul.f32 %v16499_v17, %v19743_v42  ;;  %v5686_v38 = vmul.f32 %v16517_v60, %v19744_v4 }
 0x3f7   : > { %v6036_v56 = vsel %vm1241_vm4, %v6026_v11, %v6035_v9  ;;  %v6058_v28 = vrot.slane %v6056_v15, 3  ;;  %v6061_v31 = vrot.slane %v6059_v39, 4  ;;  %v6074_v11 = vshrl.u32 %v5702_v22, 16  ;;  %v19746_v15 = vld [vmem:[#allocation57_spill] sm:$0xff]  ;;  %v19747_v22 = vld [vmem:[#allocation59_spill] sm:$0xff] }
 0x3f8   : > { %12293 = vmatmul.mubr.msk.bf16.gmra.mrb[20].mxu1 %vm5774_vm6, %v6018_v23  ;;  %v6045_v23 = vsel %vm1241_vm4, %v6035_v9, %v6044_v55  ;;  %v5684_v9 = vmul.f32 %v16495_v3, %v19745_v14  ;;  %v5685_v39 = vmul.f32 %v16497_v32, %v19746_v15  ;;  %v6067_v45 = vrot.slane %v6065_v12, 3  ;;  %v19749_v14 = vld [vmem:[#allocation60_spill] sm:$0xff] }
 0x3f9   : > { %12296 = vmatprep.mubr.msk.bf16.mxu1 %vm5774_vm6, %v6027_v33  ;;  %v6053_v33 = vor.u32 %v6052_v24, %v6049_v58  ;;  %v6062_v25 = vor.u32 %v6061_v31, %v6058_v28  ;;  %v6070_v29 = vrot.slane %v6068_v62, 4  ;;  %v6076_v58 = vrot.slane %v6074_v11, 3  ;;  %v19748_v62 = vld [vmem:[#allocation63_spill] sm:$0xff]  ;;  %v19750_v11 = vld [vmem:[#allocation62_spill] sm:$0xff] }
 0x3fa   : > { %v5703_v61 = vpack.c.bf16 %v5684_v9, %v5683_v8  ;;  %v6079_v24 = vrot.slane %v6077_v35, 4  ;;  %v5704_v43 = vpack.c.bf16 %v5686_v38, %v5685_v39  ;;  %v5687_v42 = vmul.f32 %v16524_v41, %v19747_v22 }
 0x3fb   : > { %v6054_v19 = vsel %vm1241_vm4, %v6044_v55, %v6053_v33  ;;  %v5690_v8 = vmul.f32 %v16547_v46, %v19748_v62  ;;  %v5689_v35 = vmul.f32 %v16522_v63, %v19750_v11 }
 0x3fc   : > { %v6083_v28 = vshrl.u32 %v5703_v61, 16  ;;  %v6086_v31 = vshll.u32 %v5703_v61, 16  ;;  %v6080_v4 = vor.u32 %v6079_v24, %v6076_v58  ;;  %v6092_v55 = vshrl.u32 %v5704_v43, 16 }
 0x3fd   : > { %v6095_v12 = vshll.u32 %v5704_v43, 16  ;;  %v5706_v61 = vpack.c.bf16 %v5690_v8, %v5689_v35  ;;  %v19751_v43 = vld [vmem:[#allocation56_spill] sm:$0xff]  ;;  %v19753_v35 = vld [vmem:[#allocation66_spill] sm:$0xff] }
 0x3fe   : > { %v6085_v9 = vrot.slane %v6083_v28, 3  ;;  %v6088_v15 = vrot.slane %v6086_v31, 4  ;;  %v5691_v22 = vmul.f32 %v16552_v37, %v19751_v43  ;;  %v19752_v8 = vld [vmem:[#allocation68_spill] sm:$0xff] }
 0x3ff   : > { %v6113_v28 = vshll.u32 %v5706_v61, 16  ;;  %v6349_v11 = vmul.f32 %v16380_v13, %v19752_v8  ;;  %v19758_v8 = vld [vmem:[#allocation75_spill] sm:$0xff] }
 0x400   : > { %12297 = vmatmul.mubr.msk.bf16.gmra.mrb[24].mxu1 %vm5774_vm6, %v6036_v56  ;;  %v6063_v56 = vsel %vm1241_vm4, %v6053_v33, %v6062_v25  ;;  %v5688_v33 = vmul.f32 %v16520_v10, %v19749_v14 }
 0x401   : > { %12300 = vmatprep.mubr.msk.bf16.mxu1 %vm5774_vm6, %v6045_v23  ;;  %v6071_v23 = vor.u32 %v6070_v29, %v6067_v45  ;;  %v6094_v45 = vrot.slane %v6092_v55, 3  ;;  %v6097_v29 = vrot.slane %v6095_v12, 4  ;;  %v6115_v12 = vrot.slane %v6113_v28, 4  ;;  %v19756_v28 = vld [vmem:[#allocation72_spill] sm:$0xff] }
 0x402   : > { %v5705_v39 = vpack.c.bf16 %v5688_v33, %v5687_v42  ;;  %v5707_v33 = vpack.c.bf16 %v5691_v22, %v5691_v22  ;;  %v19755_v22 = vld [vmem:[#allocation4_spill] sm:$0xff] }
 0x403   : > { %v6072_v38 = vsel %vm1241_vm4, %v6062_v25, %v6071_v23  ;;  %v6098_v62 = vor.u32 %v6097_v29, %v6094_v45  ;;  %v6110_v25 = vshrl.u32 %v5706_v61, 16  ;;  %v19754_v45 = vld [vmem:[#allocation69_spill] sm:$0xff] }
 0x404   : > { %v6101_v58 = vshrl.u32 %v5705_v39, 16  ;;  %v6104_v24 = vshll.u32 %v5705_v39, 16  ;;  %v6351_v29 = vmul.f32 %v16378_v30, %v19754_v45 }
 0x405   : > { %v6112_v55 = vrot.slane %v6110_v25, 3  ;;  %v6350_v25 = vmul.f32 %v16376_v27, %v19755_v22 }
 0x406   : > { %v6103_v42 = vrot.slane %v6101_v58, 3  ;;  %v6106_v14 = vrot.slane %v6104_v24, 4 }
 0x407   : > { %v6116_v39 = vor.u32 %v6115_v12, %v6112_v55 }
 0x408   : > { %12301 = vmatmul.mubr.msk.bf16.gmra.mrb[28].mxu1 %vm5774_vm6, %v6054_v19  ;;  %v6081_v19 = vsel %vm1241_vm4, %v6071_v23, %v6080_v4 }
 0x409   : > { %12304 = vmatprep.mubr.msk.bf16.mxu1 %vm5774_vm6, %v6063_v56  ;;  %v6089_v56 = vor.u32 %v6088_v15, %v6085_v9  ;;  %v6107_v9 = vor.u32 %v6106_v14, %v6103_v42  ;;  %v6119_v15 = vshrl.u32 %v5707_v33, 16  ;;  %v6380_v42 = vpack.c.bf16 %v6351_v29, %v6350_v25  ;;  %v19757_v14 = vld [vmem:[#allocation8_spill] sm:$0xff]  ;;  %v19761_v29 = vld [vmem:[#allocation79_spill] sm:$0xff] }
 0x40b   : > { %v6090_v31 = vsel %vm1241_vm4, %v6080_v4, %v6089_v56  ;;  %v6099_v23 = vsel %vm1241_vm4, %v6089_v56, %v6098_v62  ;;  %v6122_v4 = vshll.u32 %v5707_v33, 16  ;;  %v6108_v61 = vsel %vm1241_vm4, %v6098_v62, %v6107_v9 }
 0x40c   : > { %v6121_v56 = vrot.slane %v6119_v15, 3  ;;  %v6117_v24 = vsel %vm1241_vm4, %v6107_v9, %v6116_v39  ;;  %v6352_v33 = vmul.f32 %v16403_v6, %v19757_v14  ;;  %v6409_v12 = vshll.u32 %v6380_v42, 16 }
 0x40d   : > { %v6124_v58 = vrot.slane %v6122_v4, 4  ;;  %v19760_v4 = vld [vmem:[#allocation73_spill] sm:$0xff]  ;;  %v6413_v25 = vshrl.u32 %v6380_v42, 16 }
 0x40e   : > { %v6354_v45 = vmul.f32 %v16406_v34, %v19760_v4 }
 0x40f   : > { %v6125_v62 = vor.u32 %v6124_v58, %v6121_v56  ;;  %v6411_v58 = vrot.slane %v6409_v12, 1 }
 0x410   : > { %12305 = vmatmul.mubr.msk.bf16.gmra.mrb[32].mxu1 %vm5774_vm6, %v6072_v38  ;;  %v6348_v38 = vmul.f32 %v16373_v44, %v19753_v35 }
 0x411   : > { %12308 = vmatprep.mubr.msk.bf16.mxu1 %vm5774_vm6, %v6081_v19  ;;  %v6126_v35 = vsel %vm1241_vm4, %v6116_v39, %v6125_v62  ;;  %v6415_v14 = vor.u32 %v6413_v25, %v6411_v58  ;;  %v19763_v62 = vld [vmem:[#allocation82_spill] sm:$0xff] }
 0x412   : > { %v6379_v19 = vpack.c.bf16 %v6349_v11, %v6348_v38  ;;  %v6355_v11 = vmul.f32 %v16408_v52, %v19758_v8  ;;  %v19759_v38 = vld [vmem:[#allocation71_spill] sm:$0xff]  ;;  %v6359_v8 = vmul.f32 %v16430_v21, %v19763_v62 }
 0x414   : > { %v6401_v43 = vshll.u32 %v6379_v19, 16  ;;  %v6405_v56 = vshrl.u32 %v6379_v19, 16  ;;  %v13182_v19 = vld [vmem:[%s18835_s7 + $0x38] sm:$0xff]  }
 0x418   : > { %12309 = vmatmul.mubr.msk.bf16.gmra.mrb[36].mxu1 %vm5774_vm6, %v6090_v31  ;;  %v6353_v31 = vmul.f32 %v16411_v49, %v19756_v28 }
 0x419   : > { %12312 = vmatprep.mubr.msk.bf16.mxu1 %vm5774_vm6, %v6099_v23  ;;  %v6403_v23 = vrot.slane %v6401_v43, 1  ;;  %v19762_v43 = vld [vmem:[#allocation76_spill] sm:$0xff] }
 0x41a   : > { %v6381_v55 = vpack.c.bf16 %v6353_v31, %v6352_v33  ;;  %v6356_v39 = vmul.f32 %v16424_v59, %v19762_v43 }
 0x41b   : > { %v6404_v9 = vsel %vm1850_vm5, %v19759_v38, %v6403_v23  ;;  %v6407_v22 = vor.u32 %v6405_v56, %v6403_v23  ;;  %v19764_v23 = vld [vmem:[#allocation80_spill] sm:$0xff]  ;;  %v19765_v38 = vld [vmem:[#allocation85_spill] sm:$0xff]  ;;  %v16694_v56 = vld [vmem:[%s18835_s7 + $0x40] sm:$0xff]  }
 0x41c   : > { %v6417_v15 = vshll.u32 %v6381_v55, 16  ;;  %v6358_v42 = vmul.f32 %v16428_v0, %v19764_v23 }
 0x41e   : > { %v6419_v28 = vrot.slane %v6417_v15, 1  ;;  %v6421_v15 = vshrl.u32 %v6381_v55, 16 }
 0x420   : > { %12313 = vmatmul.mubr.msk.bf16.gmra.mrb[40].mxu1 %vm5774_vm6, %v6108_v61  ;;  %v6357_v61 = vmul.f32 %v16433_v36, %v19761_v29  ;;  %v6420_v12 = vsel %vm1850_vm5, %v6415_v14, %v6419_v28  ;;  %v19766_v29 = vld [vmem:[#allocation83_spill] sm:$0xff]  ;;  %v19767_v14 = vld [vmem:[#allocation88_spill] sm:$0xff] }
 0x421   : > { %12316 = vmatprep.mubr.msk.bf16.mxu1 %vm5774_vm6, %v6117_v24  ;;  %v6382_v24 = vpack.c.bf16 %v6355_v11, %v6354_v45  ;;  %v6384_v45 = vpack.c.bf16 %v6359_v8, %v6358_v42  ;;  %v6363_v55 = vmul.f32 %v16452_v5, %v19767_v14  ;;  %v19770_v42 = vld [vmem:[#allocation89_spill] sm:$0xff] }
 0x422   : > { %v6383_v31 = vpack.c.bf16 %v6357_v61, %v6356_v39  ;;  %v6360_v61 = vmul.f32 %v16446_v40, %v19766_v29 }
 0x423   : > { %v6425_v33 = vshll.u32 %v6382_v24, 16  ;;  %v6429_v43 = vshrl.u32 %v6382_v24, 16  ;;  %v6441_v25 = vshll.u32 %v6384_v45, 16 }
 0x424   : > { %v6433_v11 = vshll.u32 %v6383_v31, 16 }
 0x425   : > { %v6427_v4 = vrot.slane %v6425_v33, 1 }
 0x426   : > { %v6435_v39 = vrot.slane %v6433_v11, 1  ;;  %v6443_v11 = vrot.slane %v6441_v25, 1 }
 0x428   : > { %12317 = vmatmul.mubr.msk.bf16.gmra.mrb[44].mxu1 %vm5774_vm6, %v6126_v35  ;;  %v6412_v35 = vsel %vm1850_vm5, %v6407_v22, %v6411_v58  ;;  %v6423_v58 = vor.u32 %v6421_v15, %v6419_v28  ;;  %v19769_v28 = vld [vmem:[#allocation91_spill] sm:$0xff]  ;;  %v6445_v15 = vshrl.u32 %v6384_v45, 16 }
 0x429   : > { %12324 = vmatprep.mubr.msk.bf16.mxu1 %vm5774_vm6, %v6404_v9  ;;  %v6361_v9 = vmul.f32 %v16455_v57, %v19765_v38  ;;  %v6364_v38 = vmul.f32 %v16470_v50, %v19770_v42 }
 0x42a   : > { %v6428_v33 = vsel %vm1850_vm5, %v6423_v58, %v6427_v4 }
 0x42b   : > { %v6385_v22 = vpack.c.bf16 %v6361_v9, %v6360_v61  ;;  %v6447_v61 = vor.u32 %v6445_v15, %v6443_v11  ;;  %v19775_v15 = vld [vmem:[#allocation97_spill] sm:$0xff] }
 0x42d   : > { %v6449_v8 = vshll.u32 %v6385_v22, 16 }
 0x430   : > { %12325 = vmatmul.mubr.msk.bf16.vlgmr.msra.gmra.mrb[16].mxu1 %vm5774_vm6, %v6412_v35  ;;  %v19768_v35 = vld [vmem:[#allocation86_spill] sm:$0xff] }
 0x431   : > { %12357 = vmatpush3.bf16.msra.mxu1 %v16589_v47  ;;  %12328 = vmatprep.mubr.msk.bf16.mxu1 %vm5774_vm6, %v6420_v12  ;;  %v6431_v47 = vor.u32 %v6429_v43, %v6427_v4  ;;  %v6362_v24 = vmul.f32 %v16450_v20, %v19768_v35  ;;  %v6437_v12 = vshrl.u32 %v6383_v31, 16  ;;  %v6451_v4 = vrot.slane %v6449_v8, 1  ;;  %v19771_v43 = vld [vmem:[#allocation93_spill] sm:$0xff] }
 0x432   : > { %12358 = vmatprep.subr.bf16.mxu1 %v13182_v19 }
 0x433   : > { %v6436_v62 = vsel %vm1850_vm5, %v6431_v47, %v6435_v39  ;;  %v6386_v23 = vpack.c.bf16 %v6363_v55, %v6362_v24  ;;  %v6439_v9 = vor.u32 %v6437_v12, %v6435_v39  ;;  %v6367_v47 = vmul.f32 %v16475_v26, %v19771_v43  ;;  %v19772_v55 = vld [vmem:[#allocation92_spill] sm:$0xff]  ;;  %v19774_v24 = vld [vmem:[#allocation94_spill] sm:$0xff] }
 0x434   : > { %v6452_v31 = vsel %vm1850_vm5, %v6447_v61, %v6451_v4  ;;  %v6453_v39 = vshrl.u32 %v6385_v22, 16  ;;  %v6371_v61 = vmul.f32 %v16497_v32, %v19775_v15 }
 0x435   : > { %12359 = vmatpush3.bf16.msra.mxu1 %v13182_v19  ;;  %v6365_v19 = vmul.f32 %v16477_v18, %v19769_v28  ;;  %v6457_v58 = vshll.u32 %v6386_v23, 16  ;;  %v6444_v14 = vsel %vm1850_vm5, %v6439_v9, %v6443_v11  ;;  %v6368_v28 = vmul.f32 %v16492_v2, %v19774_v24 }
 0x436   : > { %12392 = vmatprep.subr.bf16.mxu1 %v16694_v56  ;;  %v6461_v12 = vshrl.u32 %v6386_v23, 16 }
 0x437   : > { %v6387_v29 = vpack.c.bf16 %v6365_v19, %v6364_v38  ;;  %v6459_v8 = vrot.slane %v6457_v58, 1  ;;  %v6455_v19 = vor.u32 %v6453_v39, %v6451_v4 }
 0x438   : > { %12329 = vmatmul.mubr.msk.bf16.gmra.mrb[20].mxu1 %vm5774_vm6, %v6428_v33  ;;  %v6366_v33 = vmul.f32 %v16473_v54, %v19772_v55 }
 0x439   : > { %12332 = vmatprep.mubr.msk.bf16.mxu1 %vm5774_vm6, %v6436_v62  ;;  %v6465_v25 = vshll.u32 %v6387_v29, 16  ;;  %v19773_v62 = vld [vmem:[#allocation95_spill] sm:$0xff]  ;;  %v6463_v38 = vor.u32 %v6461_v12, %v6459_v8  ;;  %v6460_v43 = vsel %vm1850_vm5, %v6455_v19, %v6459_v8  ;;  %v6469_v4 = vshrl.u32 %v6387_v29, 16  ;;  %v19779_v12 = vld [vmem:[#allocation101_spill] sm:$0xff] }
 0x43a   : > { %v6369_v45 = vmul.f32 %v16499_v17, %v19773_v62  ;;  %v6388_v35 = vpack.c.bf16 %v6367_v47, %v6366_v33  ;;  %v19776_v47 = vld [vmem:[#allocation96_spill] sm:$0xff]  ;;  %v19778_v33 = vld [vmem:[#allocation98_spill] sm:$0xff] }
 0x43b   : > { %v6467_v11 = vrot.slane %v6465_v25, 1  ;;  %v6372_v62 = vmul.f32 %v16517_v60, %v19778_v33 }
 0x43c   : > { %v6389_v42 = vpack.c.bf16 %v6369_v45, %v6368_v28  ;;  %v6473_v9 = vshll.u32 %v6388_v35, 16  ;;  %v6477_v39 = vshrl.u32 %v6388_v35, 16 }
 0x43d   : > { %v6468_v22 = vsel %vm1850_vm5, %v6463_v38, %v6467_v11  ;;  %v6471_v45 = vor.u32 %v6469_v4, %v6467_v11  ;;  %v6375_v38 = vmul.f32 %v16522_v63, %v19779_v12  ;;  %v5628_v11 = vadd.f32 %v16528_v48, %v16368_v53  ;;  %v19784_v12 = vld [vmem:[#allocation109_spill] sm:$0xff] }
 0x43e   : > { %v6481_v58 = vshll.u32 %v6389_v42, 16  ;;  %v6475_v25 = vrot.slane %v6473_v9, 1  ;;  %v6780_v53 = vmul.f32 %v16376_v27, %v19784_v12 }
 0x440   : > { %12333 = vmatmul.mubr.msk.bf16.gmra.mrb[24].mxu1 %vm5774_vm6, %v6444_v14  ;;  %v6370_v14 = vmul.f32 %v16495_v3, %v19776_v47  ;;  %v6483_v8 = vrot.slane %v6481_v58, 1  ;;  %v6479_v28 = vor.u32 %v6477_v39, %v6475_v25  ;;  %v6476_v15 = vsel %vm1850_vm5, %v6471_v45, %v6475_v25  ;;  %v19783_v25 = vld [vmem:[#allocation108_spill] sm:$0xff] }
 0x441   : > { %12336 = vmatprep.mubr.msk.bf16.mxu1 %vm5774_vm6, %v6452_v31  ;;  %v19777_v31 = vld [vmem:[#allocation99_spill] sm:$0xff]  ;;  %v6485_v58 = vshrl.u32 %v6389_v42, 16  ;;  %v6779_v33 = vmul.f32 %v16380_v13, %v19783_v25 }
 0x442   : > { %v6373_v23 = vmul.f32 %v16524_v41, %v19777_v31  ;;  %v6390_v55 = vpack.c.bf16 %v6371_v61, %v6370_v14  ;;  %v6484_v29 = vsel %vm1850_vm5, %v6479_v28, %v6483_v8  ;;  %v19780_v61 = vld [vmem:[#allocation100_spill] sm:$0xff]  ;;  %v19782_v31 = vld [vmem:[#allocation103_spill] sm:$0xff]  ;;  %v16749_v28 = vmax.f32 %v5628_v11, 0.0 }
 0x443   : > { %v6487_v4 = vor.u32 %v6485_v58, %v6483_v8  ;;  %v19785_v42 = vld [vmem:[#allocation107_spill] sm:$0xff] }
 0x444   : > { %v6391_v24 = vpack.c.bf16 %v6373_v23, %v6372_v62  ;;  %v6489_v19 = vshll.u32 %v6390_v55, 16  ;;  %v6376_v23 = vmul.f32 %v16547_v46, %v19782_v31  ;;  %v6493_v62 = vshrl.u32 %v6390_v55, 16 }
 0x446   : > { %v6497_v9 = vshll.u32 %v6391_v24, 16  ;;  %v6491_v47 = vrot.slane %v6489_v19, 1  ;;  %v6778_v19 = vmul.f32 %v16373_v44, %v19785_v42 }
 0x448   : > { %12337 = vmatmul.mubr.msk.bf16.gmra.mrb[28].mxu1 %vm5774_vm6, %v6460_v43  ;;  %v6374_v43 = vmul.f32 %v16520_v10, %v19780_v61  ;;  %v6499_v45 = vrot.slane %v6497_v9, 1  ;;  %v6495_v48 = vor.u32 %v6493_v62, %v6491_v47  ;;  %v6501_v9 = vshrl.u32 %v6391_v24, 16  ;;  %v19786_v61 = vld [vmem:[#allocation104_spill] sm:$0xff] }
 0x449   : > { %12340 = vmatprep.mubr.msk.bf16.mxu1 %vm5774_vm6, %v6468_v22  ;;  %v19781_v22 = vld [vmem:[#allocation105_spill] sm:$0xff]  ;;  %v19789_v62 = vld [vmem:[#allocation112_spill] sm:$0xff] }
 0x44a   : > { %v6377_v35 = vmul.f32 %v16552_v37, %v19781_v22  ;;  %v6392_v14 = vpack.c.bf16 %v6375_v38, %v6374_v43  ;;  %v6492_v38 = vsel %vm1850_vm5, %v6487_v4, %v6491_v47  ;;  %v6500_v8 = vsel %vm1850_vm5, %v6495_v48, %v6499_v45  ;;  %v19790_v48 = vld [vmem:[#allocation110_spill] sm:$0xff] }
 0x44b   : > { %v6378_v43 = vmul.f32 %v16749_v28, %v19786_v61  ;;  %v6503_v58 = vor.u32 %v6501_v9, %v6499_v45  ;;  %v6783_v12 = vmul.f32 %v16411_v49, %v19789_v62  ;;  %v6781_v24 = vmul.f32 %v16378_v30, %v19790_v48 }
 0x44c   : > { %v6393_v39 = vpack.c.bf16 %v6377_v35, %v6376_v23  ;;  %v19787_v35 = vld [vmem:[#allocation106_spill] sm:$0xff]  ;;  %v19788_v23 = vld [vmem:[#allocation111_spill] sm:$0xff]  ;;  %v6509_v4 = vshrl.u32 %v6392_v14, 16 }
 0x44d   : > { %v6810_v11 = vpack.c.bf16 %v6778_v19, %v19787_v35  ;;  %v6782_v47 = vmul.f32 %v16403_v6, %v19788_v23 }
 0x44e   : > { %v6513_v55 = vshll.u32 %v6393_v39, 16 }
 0x44f   : > { %v6812_v9 = vpack.c.bf16 %v6782_v47, %v6781_v24 }
 0x450   : > { %12341 = vmatmul.mubr.msk.bf16.gmra.mrb[32].mxu1 %vm5774_vm6, %v6476_v15  ;;  %v6505_v15 = vshll.u32 %v6392_v14, 16  ;;  %v6515_v25 = vrot.slane %v6513_v55, 1 }
 0x451   : > { %12344 = vmatprep.mubr.msk.bf16.mxu1 %vm5774_vm6, %v6484_v29  ;;  %v6811_v29 = vpack.c.bf16 %v6780_v53, %v6779_v33  ;;  %v6394_v53 = vpack.c.bf16 %v6378_v43, %v6378_v43  ;;  %v6517_v43 = vshrl.u32 %v6393_v39, 16  ;;  %v6850_v62 = vshrl.u32 %v6812_v9, 16 }
 0x452   : > { %v6507_v22 = vrot.slane %v6505_v15, 1  ;;  %v6836_v15 = vshll.u32 %v6810_v11, 16  ;;  %v6853_v48 = vshll.u32 %v6812_v9, 16 }
 0x453   : > { %v6841_v31 = vshrl.u32 %v6811_v29, 16  ;;  %v6844_v33 = vshll.u32 %v6811_v29, 16  ;;  %v6521_v35 = vshll.u32 %v6394_v53, 16  ;;  %v19795_v53 = vld [vmem:[#allocation118_spill] sm:$0xff] }
 0x454   : > { %v6511_v42 = vor.u32 %v6509_v4, %v6507_v22  ;;  %v6508_v19 = vsel %vm1850_vm5, %v6503_v58, %v6507_v22  ;;  %v6838_v4 = vrot.slane %v6836_v15, 4  ;;  %v6852_v15 = vrot.slane %v6850_v62, 3 }
 0x455   : > { %v6843_v29 = vrot.slane %v6841_v31, 3  ;;  %v6846_v55 = vrot.slane %v6844_v33, 4  ;;  %v6523_v33 = vrot.slane %v6521_v35, 1 }
 0x456   : > { %v6516_v14 = vsel %vm1850_vm5, %v6511_v42, %v6515_v25 }
 0x457   : > { %v6847_v58 = vor.u32 %v6846_v55, %v6843_v29 }
 0x458   : > { %12345 = vmatmul.mubr.msk.bf16.gmra.mrb[36].mxu1 %vm5774_vm6, %v6492_v38  ;;  %v6833_v38 = vshrl.u32 %v6810_v11, 16  ;;  %v6519_v11 = vor.u32 %v6517_v43, %v6515_v25 }
 0x459   : > { %12348 = vmatprep.mubr.msk.bf16.mxu1 %vm5774_vm6, %v6500_v8  ;;  %v19791_v8 = vld [vmem:[#allocation113_spill] sm:$0xff] }
 0x45a   : > { %v6784_v45 = vmul.f32 %v16406_v34, %v19791_v8  ;;  %v6835_v23 = vrot.slane %v6833_v38, 3  ;;  %v19792_v8 = vld [vmem:[#allocation116_spill] sm:$0xff]  ;;  %v6788_v38 = vmul.f32 %v16428_v0, %v19795_v53  ;;  %v6524_v25 = vsel %vm1850_vm5, %v6519_v11, %v6523_v33  ;;  %v19798_v33 = vld [vmem:[#allocation23_spill] sm:$0xff] }
 0x45b   : > { %v6786_v22 = vmul.f32 %v16424_v59, %v19792_v8 }
 0x45c   : > { %v6813_v61 = vpack.c.bf16 %v6784_v45, %v6783_v12  ;;  %v19794_v12 = vld [vmem:[#allocation115_spill] sm:$0xff]  ;;  %v6839_v39 = vor.u32 %v6838_v4, %v6835_v23  ;;  %v6855_v45 = vrot.slane %v6853_v48, 4  ;;  %v19796_v4 = vld [vmem:[#allocation78_spill] sm:$0xff]  ;;  %v19797_v48 = vld [vmem:[#allocation61_spill] sm:$0xff] }
 0x45d   : > { %v6785_v42 = vmul.f32 %v16408_v52, %v19794_v12  ;;  %v6790_v8 = vmul.f32 %v16446_v40, %v19796_v4  ;;  %v6789_v12 = vmul.f32 %v16430_v21, %v19798_v33 }
 0x45e   : > { %v6859_v47 = vshrl.u32 %v6813_v61, 16  ;;  %v6862_v24 = vshll.u32 %v6813_v61, 16  ;;  %v6856_v43 = vor.u32 %v6855_v45, %v6852_v15 }
 0x45f   : > { %v6814_v9 = vpack.c.bf16 %v6786_v22, %v6785_v42  ;;  %v6791_v22 = vmul.f32 %v16455_v57, %v19797_v48  ;;  %v19803_v48 = vld [vmem:[#allocation65_spill] sm:$0xff] }
 0x460   : > { %12349 = vmatmul.mubr.msk.bf16.gmra.mrb[40].mxu1 %vm5774_vm6, %v6508_v19  ;;  %v19793_v19 = vld [vmem:[#allocation117_spill] sm:$0xff]  ;;  %v6861_v29 = vrot.slane %v6859_v47, 3  ;;  %v6864_v55 = vrot.slane %v6862_v24, 4  ;;  %v19799_v47 = vld [vmem:[#allocation22_spill] sm:$0xff]  ;;  %v6857_v42 = vsel %vm1241_vm4, %v6847_v58, %v6856_v43 }
 0x461   : > { %12352 = vmatprep.mubr.msk.bf16.mxu1 %vm5774_vm6, %v6516_v14  ;;  %v6787_v31 = vmul.f32 %v16433_v36, %v19793_v19  ;;  %v6848_v14 = vsel %vm1241_vm4, %v6839_v39, %v6847_v58  ;;  %v6868_v35 = vshrl.u32 %v6814_v9, 16  ;;  %v6871_v23 = vshll.u32 %v6814_v9, 16 }
 0x462   : > { %v6865_v19 = vor.u32 %v6864_v55, %v6861_v29  ;;  %v6792_v24 = vmul.f32 %v16450_v20, %v19799_v47 }
 0x463   : > { %v6815_v61 = vpack.c.bf16 %v6788_v38, %v6787_v31  ;;  %v13184_v31 = vld [vmem:[%s18835_s7 + $0x48] sm:$0xff]   ;;  %v6870_v39 = vrot.slane %v6868_v35, 3  ;;  %v6873_v53 = vrot.slane %v6871_v23, 4  ;;  %v6816_v38 = vpack.c.bf16 %v6790_v8, %v6789_v12  ;;  %v19801_v8 = vld [vmem:[#allocation37_spill] sm:$0xff] }
 0x464   : > { %v6817_v9 = vpack.c.bf16 %v6792_v24, %v6791_v22  ;;  %v6796_v22 = vmul.f32 %v16473_v54, %v19803_v48 }
 0x465   : > { %v6877_v11 = vshrl.u32 %v6815_v61, 16  ;;  %v6880_v62 = vshll.u32 %v6815_v61, 16  ;;  %v6874_v58 = vor.u32 %v6873_v53, %v6870_v39  ;;  %v6886_v29 = vshrl.u32 %v6816_v38, 16  ;;  %v19800_v61 = vld [vmem:[#allocation30_spill] sm:$0xff] }
 0x466   : > { %v6889_v55 = vshll.u32 %v6816_v38, 16  ;;  %v6794_v35 = vmul.f32 %v16470_v50, %v19800_v61  ;;  %v6895_v23 = vshrl.u32 %v6817_v9, 16  ;;  %v6898_v4 = vshll.u32 %v6817_v9, 16 }
 0x467   : > { %v6879_v15 = vrot.slane %v6877_v11, 3  ;;  %v6882_v45 = vrot.slane %v6880_v62, 4  ;;  %v19802_v11 = vld [vmem:[#allocation64_spill] sm:$0xff]  ;;  %v6875_v33 = vsel %vm1241_vm4, %v6865_v19, %v6874_v58  ;;  %v6888_v12 = vrot.slane %v6886_v29, 3 }
 0x468   : > { %12353 = vmatmul.mubr.msk.bf16.gmra.mrb[44].mxu1 %vm5774_vm6, %v6524_v25  ;;  %v6866_v25 = vsel %vm1241_vm4, %v6856_v43, %v6865_v19  ;;  %v6793_v62 = vmul.f32 %v16452_v5, %v19802_v11  ;;  %v6891_v47 = vrot.slane %v6889_v55, 4  ;;  %v6897_v39 = vrot.slane %v6895_v23, 3  ;;  %v19805_v55 = vld [vmem:[#allocation70_spill] sm:$0xff]  ;;  %v19807_v23 = vld [vmem:[#allocation119_spill] sm:$0xff] }
 0x469   : > { %12360 = vmatprep.mubr.msk.bf16.mxu1 %vm5774_vm6, %v6848_v14  ;;  %v16805_v14 = vld [vmem:[%s18835_s7 + $0x50] sm:$0xff]   ;;  %v6883_v43 = vor.u32 %v6882_v45, %v6879_v15  ;;  %v6900_v53 = vrot.slane %v6898_v4, 4  ;;  %v19804_v45 = vld [vmem:[#allocation67_spill] sm:$0xff]  ;;  %v6800_v4 = vmul.f32 %v16495_v3, %v19807_v23 }
 0x46a   : > { %v6818_v24 = vpack.c.bf16 %v6794_v35, %v6793_v62  ;;  %v6798_v9 = vmul.f32 %v16492_v2, %v19804_v45  ;;  %v6799_v35 = vmul.f32 %v16499_v17, %v19805_v55 }
 0x46b   : > { %v6901_v61 = vor.u32 %v6900_v53, %v6897_v39 }
 0x46c   : > { %v6907_v15 = vshll.u32 %v6818_v24, 16 }
 0x46e   : > { %v6909_v62 = vrot.slane %v6907_v15, 4 }
 0x470   : > { %12361 = vmatmul.mubr.msk.bf16.vlgmr.msra.gmra.mrb[16].mxu1 %vm5774_vm6, %v6857_v42  ;;  %v6884_v42 = vsel %vm1241_vm4, %v6874_v58, %v6883_v43 }
 0x471   : > { %12393 = vmatpush3.bf16.msra.mxu1 %v16694_v56  ;;  %12364 = vmatprep.mubr.msk.bf16.mxu1 %vm5774_vm6, %v6866_v25  ;;  %v6795_v56 = vmul.f32 %v16477_v18, %v19801_v8  ;;  %v6904_v25 = vshrl.u32 %v6818_v24, 16  ;;  %v19806_v8 = vld [vmem:[#allocation38_spill] sm:$0xff] }
 0x472   : > { %12394 = vmatprep.subr.bf16.mxu1 %v13184_v31  ;;  %v6797_v58 = vmul.f32 %v16475_v26, %v19806_v8  ;;  %v16835_v24 = vld [vmem:[%s18830_s2] sm:$0xff] }
 0x473   : > { %v6819_v38 = vpack.c.bf16 %v6796_v22, %v6795_v56  ;;  %v6906_v11 = vrot.slane %v6904_v25, 3  ;;  %9597 = vrot.lane.b32.xlu1 %v16835_v24, %s13386_s24 }
 0x474   : > { %v6820_v48 = vpack.c.bf16 %v6798_v9, %v6797_v58  ;;  %v19809_v9 = vld [vmem:[#allocation126_spill] sm:$0xff] }
 0x475   : > { %12395 = vmatpush3.bf16.msra.mxu1 %v13184_v31  ;;  %v6892_v31 = vor.u32 %v6891_v47, %v6888_v12  ;;  %v6913_v19 = vshrl.u32 %v6819_v38, 16  ;;  %v6916_v29 = vshll.u32 %v6819_v38, 16  ;;  %v6821_v47 = vpack.c.bf16 %v6800_v4, %v6799_v35  ;;  %v19808_v38 = vld [vmem:[#allocation122_spill] sm:$0xff]  ;;  %v19811_v35 = vld [vmem:[#allocation127_spill] sm:$0xff] }
 0x476   : > { %12428 = vmatprep.subr.bf16.mxu1 %v16805_v14  ;;  %v6922_v39 = vshrl.u32 %v6820_v48, 16  ;;  %v6925_v53 = vshll.u32 %v6820_v48, 16  ;;  %v6804_v8 = vmul.f32 %v16520_v10, %v19811_v35  ;;  %v19814_v35 = vld [vmem:[#allocation129_spill] sm:$0xff] }
 0x477   : > { %v6893_v56 = vsel %vm1241_vm4, %v6883_v43, %v6892_v31  ;;  %v6902_v22 = vsel %vm1241_vm4, %v6892_v31, %v6901_v61  ;;  %v6918_v12 = vrot.slane %v6916_v29, 4  ;;  %v16840_v43 = vld [vmem:[%s18830_s2 + $0x8] sm:$0xff]  ;;  %v6802_v31 = vmul.f32 %v16517_v60, %v19808_v38  ;;  %v19810_v29 = vld [vmem:[#allocation121_spill] sm:$0xff] }
 0x478   : > { %12365 = vmatmul.mubr.msk.bf16.gmra.mrb[20].mxu1 %vm5774_vm6, %v6875_v33  ;;  %v6915_v33 = vrot.slane %v6913_v19, 3  ;;  %9599 = vrot.lane.b32.xlu0 %v16840_v43, %s13386_s24  ;;  %v6931_v15 = vshrl.u32 %v6821_v47, 16  ;;  %v6934_v45 = vshll.u32 %v6821_v47, 16  ;;  %v6803_v19 = vmul.f32 %v16524_v41, %v19809_v9 }
 0x479   : > { %12368 = vmatprep.mubr.msk.bf16.mxu1 %vm5774_vm6, %v6884_v42  ;;  %v6910_v42 = vor.u32 %v6909_v62, %v6906_v11  ;;  %v6801_v55 = vmul.f32 %v16497_v32, %v19810_v29  ;;  %v6924_v23 = vrot.slane %v6922_v39, 3  ;;  %v6927_v4 = vrot.slane %v6925_v53, 4  ;;  %v19813_v29 = vld [vmem:[#allocation132_spill] sm:$0xff] }
 0x47a   : > { %v6919_v25 = vor.u32 %v6918_v12, %v6915_v33  ;;  %v6933_v62 = vrot.slane %v6931_v15, 3  ;;  %v6936_v48 = vrot.slane %v6934_v45, 4  ;;  %v16860_v33 = vld [vmem:[%s18830_s2 + $0x10] sm:$0xff]  ;;  %v16865_v12 = vld [vmem:[%s18830_s2 + $0x18] sm:$0xff]  ;;  %v16886_v45 = vld [vmem:[%s18830_s2 + $0x28] sm:$0xff] }
 0x47b   : > { %v6911_v58 = vsel %vm1241_vm4, %v6901_v61, %v6910_v42  ;;  %9601 = vrot.lane.b32.xlu1 %v16860_v33, %s13386_s24  ;;  %v13335_v61 = vld [vmem:[%s18834_s6] ss:$0 sm:$0xff]  ;;  %v6928_v39 = vor.u32 %v6927_v4, %v6924_v23  ;;  %v19815_v23 = vld [vmem:[#allocation133_spill] sm:$0xff] }
 0x47c   : > { %v6920_v11 = vsel %vm1241_vm4, %v6910_v42, %v6919_v25  ;;  %v5629_v47 = vadd.f32 %v13335_v61, %v16540_v7  ;;  %9603 = vrot.lane.b32.xlu0 %v16865_v12, %s13386_s24  ;;  %v16879_v42 = vld [vmem:[%s18830_s2 + $0x20] sm:$0xff]  ;;  %v6937_v7 = vor.u32 %v6936_v48, %v6933_v62  ;;  %v6808_v4 = vmul.f32 %v16749_v28, %v19815_v23 }
 0x47f   : > { %9605 = vrot.lane.b32.xlu1 %v16879_v42, %s13386_s24 }
 0x480   : > { %12369 = vmatmul.mubr.msk.bf16.gmra.mrb[24].mxu1 %vm5774_vm6, %v6893_v56  ;;  %v6822_v56 = vpack.c.bf16 %v6802_v31, %v6801_v55  ;;  %v19812_v31 = vld [vmem:[#allocation130_spill] sm:$0xff]  ;;  %v6807_v55 = vmul.f32 %v16552_v37, %v19813_v29  ;;  %9607 = vrot.lane.b32.xlu0 %v16886_v45, %s13386_s24 }
 0x481   : > { %12372 = vmatprep.mubr.msk.bf16.mxu1 %vm5774_vm6, %v6902_v22  ;;  %v6823_v22 = vpack.c.bf16 %v6804_v8, %v6803_v19  ;;  %v6806_v15 = vmul.f32 %v16547_v46, %v19812_v31  ;;  %v6805_v8 = vmul.f32 %v16522_v63, %v19814_v35  ;;  %v16911_v35 = vld [vmem:[%s18830_s2 + $0x38] sm:$0xff] }
 0x482   : > { %v6940_v53 = vshrl.u32 %v6822_v56, 16  ;;  %v6943_v38 = vshll.u32 %v6822_v56, 16  ;;  %v6929_v56 = vsel %vm1241_vm4, %v6919_v25, %v6928_v39  ;;  %v6825_v29 = vpack.c.bf16 %v6808_v4, %v6807_v55  ;;  %v16921_v25 = vld [vmem:[%s18830_s2 + $0x40] sm:$0xff] }
 0x483   : > { %v6949_v9 = vshrl.u32 %v6823_v22, 16  ;;  %v6952_v19 = vshll.u32 %v6823_v22, 16  ;;  %v6824_v48 = vpack.c.bf16 %v6806_v15, %v6805_v8  ;;  %v6938_v22 = vsel %vm1241_vm4, %v6928_v39, %v6937_v7  ;;  %v19816_v15 = vld [vmem:[#allocation124_spill] sm:$0xff] }
 0x484   : > { %v6945_v62 = vrot.slane %v6943_v38, 4  ;;  %9611 = vrot.lane.b32.xlu0 %v16911_v35, %s13386_s24  ;;  %v6967_v8 = vshrl.u32 %v6825_v29, 16  ;;  %v6970_v23 = vshll.u32 %v6825_v29, 16 }
 0x485   : > { %v6951_v61 = vrot.slane %v6949_v9, 3  ;;  %v6954_v31 = vrot.slane %v6952_v19, 4  ;;  %v6961_v38 = vshll.u32 %v6824_v48, 16  ;;  %v16928_v19 = vld [vmem:[%s18830_s2 + $0x48] sm:$0xff] }
 0x487   : > { %v6955_v55 = vor.u32 %v6954_v31, %v6951_v61  ;;  %v16940_v61 = vld [vmem:[%s18830_s2 + $0x50] sm:$0xff]  ;;  %v16945_v31 = vld [vmem:[%s18830_s2 + $0x58] sm:$0xff] }
 0x488   : > { %12373 = vmatmul.mubr.msk.bf16.gmra.mrb[28].mxu1 %vm5774_vm6, %v6911_v58  ;;  %v16894_v58 = vmax.f32 %v5629_v47, 0.0  ;;  %v16906_v47 = vld [vmem:[%s18830_s2 + $0x30] sm:$0xff]  ;;  %9615 = vrot.lane.b32.xlu0 %v16928_v19, %s13386_s24 }
 0x489   : > { %12376 = vmatprep.mubr.msk.bf16.mxu1 %vm5774_vm6, %v6920_v11  ;;  %v6942_v11 = vrot.slane %v6940_v53, 3  ;;  %9609 = vrot.lane.b32.xlu1 %v16906_v47, %s13386_s24  ;;  %v6958_v53 = vshrl.u32 %v6824_v48, 16 }
 0x48a   : > { %v6809_v9 = vmul.f32 %v16894_v58, %v19816_v15  ;;  %v6972_v15 = vrot.slane %v6970_v23, 4 }
 0x48b   : > { %v6946_v39 = vor.u32 %v6945_v62, %v6942_v11  ;;  %v6963_v11 = vrot.slane %v6961_v38, 4  ;;  %v16960_v38 = vld [vmem:[%s18830_s2 + $0x68] sm:$0xff] }
 0x48c   : > { %v6826_v62 = vpack.c.bf16 %v6809_v9, %v6809_v9  ;;  %9619 = vrot.lane.b32.xlu0 %v16945_v31, %s13386_s24 }
 0x48d   : > { %9613 = vrot.lane.b32.xlu1 %v16921_v25, %s13386_s24  ;;  %v6947_v4 = vsel %vm1241_vm4, %v6937_v7, %v6946_v39  ;;  %v6956_v48 = vsel %vm1241_vm4, %v6946_v39, %v6955_v55  ;;  %v16955_v7 = vld [vmem:[%s18830_s2 + $0x60] sm:$0xff] }
 0x48e   : > { %v6976_v39 = vshrl.u32 %v6826_v62, 16 }
 0x490   : > { %12377 = vmatmul.mubr.msk.bf16.gmra.mrb[32].mxu1 %vm5774_vm6, %v6929_v56  ;;  %v6960_v56 = vrot.slane %v6958_v53, 3  ;;  %v6979_v53 = vshll.u32 %v6826_v62, 16  ;;  %9623 = vrot.lane.b32.xlu0 %v16960_v38, %s13386_s24  ;;  %v6978_v23 = vrot.slane %v6976_v39, 3  ;;  %v16977_v62 = vld [vmem:[%s18830_s2 + $0x78] sm:$0xff]  ;;  %v19822_v39 = vld [vmem:[#allocation87_spill] sm:$0xff] }
 0x491   : > { %12380 = vmatprep.mubr.msk.bf16.mxu1 %vm5774_vm6, %v6938_v22  ;;  %v6969_v22 = vrot.slane %v6967_v8, 3  ;;  %9617 = vrot.lane.b32.xlu1 %v16940_v61, %s13386_s24  ;;  %19818 = vst [vmem:[#allocation24_spill] sm:$0xff] %v16977_v62 }
 0x492   : > { %v6964_v29 = vor.u32 %v6963_v11, %v6960_v56  ;;  %v16972_v11 = vld [vmem:[%s18830_s2 + $0x70] sm:$0xff] }
 0x493   : > { %v6973_v9 = vor.u32 %v6972_v15, %v6969_v22  ;;  %19817 = vst [vmem:[#allocation31_spill] sm:$0xff] %v16972_v11  ;;  %v19820_v22 = vld [vmem:[#allocation120_spill] sm:$0xff] }
 0x494   : > { %v6965_v8 = vsel %vm1241_vm4, %v6955_v55, %v6964_v29  ;;  %9627 = vrot.lane.b32.xlu0 %v16977_v62, %s13386_s24  ;;  %v16987_v55 = vld [vmem:[%s18830_s2 + $0x80] sm:$0xff]  ;;  %v7238_v15 = vmul.f32 %v16380_v13, %v19820_v22 }
 0x495   : > { %9621 = vrot.lane.b32.xlu1 %v16955_v7, %s13386_s24  ;;  %v6974_v56 = vsel %vm1241_vm4, %v6964_v29, %v6973_v9  ;;  %19819 = vst [vmem:[#allocation25_spill] sm:$0xff] %v16987_v55  ;;  %v16994_v29 = vld [vmem:[%s18830_s2 + $0x88] sm:$0xff]  ;;  %v19825_v22 = vld [vmem:[#allocation138_spill] sm:$0xff] }
 0x496   : > { %19821 = vst [vmem:[#allocation26_spill] sm:$0xff] %v16994_v29 }
 0x498   : > { %12381 = vmatmul.mubr.msk.bf16.gmra.mrb[36].mxu1 %vm5774_vm6, %v6947_v4  ;;  %v6981_v4 = vrot.slane %v6979_v53, 4  ;;  %v7237_v53 = vmul.f32 %v16373_v44, %v19822_v39  ;;  %9631 = vrot.lane.b32.xlu0 %v16994_v29, %s13386_s24  ;;  %v19855_v29 = vld [vmem:[#allocation144_spill] sm:$0xff] }
 0x499   : > { %12384 = vmatprep.mubr.msk.bf16.mxu1 %vm5774_vm6, %v6956_v48  ;;  %9625 = vrot.lane.b32.xlu1 %v16972_v11, %s13386_s24 }
 0x49a   : > { %v6982_v48 = vor.u32 %v6981_v4, %v6978_v23  ;;  %v7269_v23 = vpack.c.bf16 %v7238_v15, %v7237_v53  ;;  %v17007_v4 = vld [vmem:[%s18830_s2 + $0x90] sm:$0xff]  ;;  %v19827_v15 = vld [vmem:[#allocation141_spill] sm:$0xff]  ;;  %v17031_v53 = vld [vmem:[%s18830_s2 + $0xa8] sm:$0xff] }
 0x49b   : > { %19823 = vst [vmem:[#allocation34_spill] sm:$0xff] %v17007_v4  ;;  %v7242_v39 = vmul.f32 %v16411_v49, %v19827_v15  ;;  %19828 = vst [vmem:[#allocation35_spill] sm:$0xff] %v17031_v53 }
 0x49d   : > { %9629 = vrot.lane.b32.xlu1 %v16987_v55, %s13386_s24  ;;  %v19856_v55 = vld [vmem:[#allocation147_spill] sm:$0xff] }
 0x4a0   : > { %12385 = vmatmul.mubr.msk.bf16.gmra.mrb[40].mxu1 %vm5774_vm6, %v6965_v8  ;;  %v6983_v8 = vsel %vm1241_vm4, %v6973_v9, %v6982_v48  ;;  %v7240_v9 = vmul.f32 %v16378_v30, %v19825_v22  ;;  %v17024_v48 = vld [vmem:[%s18830_s2 + $0xa0] sm:$0xff]  ;;  %v19830_v22 = vld [vmem:[#allocation123_spill] sm:$0xff] }
 0x4a1   : > { %12388 = vmatprep.mubr.msk.bf16.mxu1 %vm5774_vm6, %v6974_v56  ;;  %v17012_v56 = vld [vmem:[%s18830_s2 + $0x98] sm:$0xff]  ;;  %9633 = vrot.lane.b32.xlu1 %v17007_v4, %s13386_s24  ;;  %19826 = vst [vmem:[#allocation33_spill] sm:$0xff] %v17024_v48  ;;  %v7241_v1 = vmul.f32 %v16403_v6, %v19830_v22 }
 0x4a2   : > { %19824 = vst [vmem:[#allocation28_spill] sm:$0xff] %v17012_v56  ;;  %9635 = vrot.lane.b32.xlu0 %v17012_v56, %s13386_s24  ;;  %v13186_v56 = vld [vmem:[%s18835_s7 + $0x58] sm:$0xff]  }
 0x4a3   : > { %v7271_v15 = vpack.c.bf16 %v7242_v39, %v7241_v1  ;;  %v19834_v1 = vld [vmem:[#allocation148_spill] sm:$0xff]  ;;  %v17073_v39 = vld [vmem:[%s18830_s2 + $0xc0] sm:$0xff] }
 0x4a4   : > { %19835 = vst [vmem:[#allocation39_spill] sm:$0xff] %v17073_v39 }
 0x4a5   : > { %9637 = vrot.lane.b32.xlu1 %v17024_v48, %s13386_s24 }
 0x4a6   : > { %9639 = vrot.lane.b32.xlu0 %v17031_v53, %s13386_s24  ;;  %v17080_v53 = vld [vmem:[%s18830_s2 + $0xc8] sm:$0xff] }
 0x4a7   : > { %19837 = vst [vmem:[#allocation32_spill] sm:$0xff] %v17080_v53 }
 0x4a8   : > { %12389 = vmatmul.mubr.msk.bf16.gmra.mrb[44].mxu1 %vm5774_vm6, %v6983_v8  ;;  %v19829_v8 = vld [vmem:[#allocation136_spill] sm:$0xff] }
 0x4a9   : > { %12396 = vmatprep.mubr.msk.bf16.mxu1 %vm5774_vm6, %v7269_v23  ;;  %v7239_v23 = vmul.f32 %v16376_v27, %v19829_v8  ;;  %v17050_v8 = vld [vmem:[%s18830_s2 + $0xb0] sm:$0xff] }
 0x4aa   : > { %19831 = vst [vmem:[#allocation40_spill] sm:$0xff] %v17050_v8  ;;  %9641 = vrot.lane.b32.xlu1 %v17050_v8, %s13386_s24  ;;  %v19838_v8 = vld [vmem:[#allocation131_spill] sm:$0xff] }
 0x4ab   : > { %v7270_v51 = vpack.c.bf16 %v7240_v9, %v7239_v23  ;;  %v17055_v9 = vld [vmem:[%s18830_s2 + $0xb8] sm:$0xff]  ;;  %v7245_v48 = vmul.f32 %v16424_v59, %v19838_v8  ;;  %v19841_v8 = vld [vmem:[#allocation151_spill] sm:$0xff] }
 0x4ac   : > { %19832 = vst [vmem:[#allocation36_spill] sm:$0xff] %v17055_v9  ;;  %v19833_v23 = vld [vmem:[#allocation145_spill] sm:$0xff]  ;;  %9643 = vrot.lane.b32.xlu0 %v17055_v9, %s13386_s24 }
 0x4ad   : > { %v7244_v22 = vmul.f32 %v16408_v52, %v19833_v23 }
 0x4ae   : > { %9645 = vrot.lane.b32.xlu1 %v17073_v39, %s13386_s24  ;;  %v17136_v39 = vld [vmem:[%s18830_s2 + $0xf8] sm:$0xff] }
 0x4af   : > { %19848 = vst [vmem:[#allocation48_spill] sm:$0xff] %v17136_v39 }
 0x4b0   : > { %12397 = vmatmul.mubr.msk.bf16.vlgmr.msra.gmra.mrb[16].mxu1 %vm5774_vm6, %v7270_v51  ;;  %v17062_v51 = vld [vmem:[%s18835_s7 + $0x60] sm:$0xff]   ;;  %9647 = vrot.lane.b32.xlu0 %v17080_v53, %s13386_s24 }
 0x4b1   : > { %12429 = vmatpush3.bf16.msra.mxu1 %v16805_v14  ;;  %12400 = vmatprep.mubr.msk.bf16.mxu1 %vm5774_vm6, %v7271_v15  ;;  %v7246_v14 = vmul.f32 %v16433_v36, %v19834_v1  ;;  %v19836_v15 = vld [vmem:[#allocation128_spill] sm:$0xff] }
 0x4b2   : > { %12430 = vmatprep.subr.bf16.mxu1 %v13186_v56  ;;  %v7243_v23 = vmul.f32 %v16406_v34, %v19836_v15  ;;  %v17093_v15 = vld [vmem:[%s18830_s2 + $0xd0] sm:$0xff] }
 0x4b3   : > { %v7273_v9 = vpack.c.bf16 %v7246_v14, %v7245_v48  ;;  %19839 = vst [vmem:[#allocation41_spill] sm:$0xff] %v17093_v15  ;;  %v7248_v48 = vmul.f32 %v16430_v21, %v19841_v8  ;;  %9649 = vrot.lane.b32.xlu1 %v17093_v15, %s13386_s24  ;;  %v17119_v8 = vld [vmem:[%s18830_s2 + $0xe8] sm:$0xff] }
 0x4b4   : > { %v7272_v1 = vpack.c.bf16 %v7244_v22, %v7243_v23  ;;  %v19842_v22 = vld [vmem:[#allocation153_spill] sm:$0xff]  ;;  %v17112_v23 = vld [vmem:[%s18830_s2 + $0xe0] sm:$0xff]  ;;  %19845 = vst [vmem:[#allocation43_spill] sm:$0xff] %v17119_v8  ;;  %v19846_v15 = vld [vmem:[#allocation135_spill] sm:$0xff] }
 0x4b5   : > { %12431 = vmatpush3.bf16.msra.mxu1 %v13186_v56  ;;  %v17098_v56 = vld [vmem:[%s18830_s2 + $0xd8] sm:$0xff]  ;;  %v7250_v14 = vmul.f32 %v16455_v57, %v19842_v22  ;;  %19843 = vst [vmem:[#allocation42_spill] sm:$0xff] %v17112_v23  ;;  %v7249_v53 = vmul.f32 %v16446_v40, %v19846_v15  ;;  %v19849_v15 = vld [vmem:[#allocation156_spill] sm:$0xff] }
 0x4b6   : > { %12464 = vmatprep.subr.bf16.mxu1 %v17062_v51  ;;  %19840 = vst [vmem:[#allocation44_spill] sm:$0xff] %v17098_v56  ;;  %9651 = vrot.lane.b32.xlu0 %v17098_v56, %s13386_s24 }
 0x4b7   : > { %9653 = vrot.lane.b32.xlu1 %v17112_v23, %s13386_s24  ;;  %v7275_v56 = vpack.c.bf16 %v7250_v14, %v7249_v53  ;;  %v7252_v53 = vmul.f32 %v16452_v5, %v19849_v15  ;;  %v19853_v15 = vld [vmem:[#allocation161_spill] sm:$0xff] }
 0x4b8   : > { %12401 = vmatmul.mubr.msk.bf16.gmra.mrb[20].mxu1 %vm5774_vm6, %v7272_v1  ;;  %v19844_v1 = vld [vmem:[#allocation134_spill] sm:$0xff] }
 0x4b9   : > { %12404 = vmatprep.mubr.msk.bf16.mxu1 %vm5774_vm6, %v7273_v9  ;;  %v7247_v9 = vmul.f32 %v16428_v0, %v19844_v1  ;;  %v17131_v1 = vld [vmem:[%s18830_s2 + $0xf0] sm:$0xff] }
 0x4ba   : > { %9655 = vrot.lane.b32.xlu0 %v17119_v8, %s13386_s24  ;;  %19847 = vst [vmem:[#allocation45_spill] sm:$0xff] %v17131_v1  ;;  %v19852_v8 = vld [vmem:[#allocation140_spill] sm:$0xff] }
 0x4bb   : > { %v7274_v22 = vpack.c.bf16 %v7248_v48, %v7247_v9  ;;  %9657 = vrot.lane.b32.xlu1 %v17131_v1, %s13386_s24  ;;  %v19850_v48 = vld [vmem:[#allocation159_spill] sm:$0xff]  ;;  %v19851_v9 = vld [vmem:[#allocation137_spill] sm:$0xff]  ;;  %v7253_v23 = vmul.f32 %v16470_v50, %v19852_v8  ;;  %v7256_v1 = vmul.f32 %v16475_v26, %v19853_v15  ;;  %v19861_v15 = vld [vmem:[#allocation152_spill] sm:$0xff] }
 0x4bc   : > { %v7254_v14 = vmul.f32 %v16477_v18, %v19850_v48  ;;  %v7258_v48 = vmul.f32 %v16499_v17, %v19854_v16 }
 0x4be   : > { %9659 = vrot.lane.b32.xlu0 %v17136_v39, %s13386_s24  ;;  %v7255_v39 = vmul.f32 %v16473_v54, %v19855_v29 }
 0x4c0   : > { %12405 = vmatmul.mubr.msk.bf16.gmra.mrb[24].mxu1 %vm5774_vm6, %v7274_v22  ;;  %v7251_v22 = vmul.f32 %v16450_v20, %v19851_v9  ;;  %v7257_v9 = vmul.f32 %v16492_v2, %v19856_v55  ;;  %v7278_v62 = vpack.c.bf16 %v7256_v1, %v7255_v39  ;;  %v7261_v55 = vmul.f32 %v16517_v60, %v19861_v15  ;;  %v19862_v1 = vld [vmem:[#allocation168_spill] sm:$0xff]  ;;  %v19866_v15 = vld [vmem:[#allocation155_spill] sm:$0xff] }
 0x4c1   : > { %12408 = vmatprep.mubr.msk.bf16.mxu1 %vm5774_vm6, %v7275_v56  ;;  %v7277_v56 = vpack.c.bf16 %v7254_v14, %v7253_v23 }
 0x4c2   : > { %v7276_v4 = vpack.c.bf16 %v7252_v53, %v7251_v22  ;;  %v7279_v8 = vpack.c.bf16 %v7258_v48, %v7257_v9  ;;  %v19858_v53 = vld [vmem:[#allocation165_spill] sm:$0xff]  ;;  %v19859_v22 = vld [vmem:[#allocation150_spill] sm:$0xff] }
 0x4c3   : > { %v7262_v14 = vmul.f32 %v16524_v41, %v19858_v53  ;;  %v7259_v16 = vmul.f32 %v16495_v3, %v19859_v22  ;;  %v19864_v53 = vld [vmem:[#allocation171_spill] sm:$0xff] }
 0x4c4   : > { %v7546_v22 = vmul.f32 %v16378_v30, %v19864_v53 }
 0x4c5   : > { %v7281_v48 = vpack.c.bf16 %v7262_v14, %v7261_v55  ;;  %v19868_v55 = vld [vmem:[#allocation175_spill] sm:$0xff] }
 0x4c8   : > { %12409 = vmatmul.mubr.msk.bf16.gmra.mrb[28].mxu1 %vm5774_vm6, %v7276_v4  ;;  %v19857_v4 = vld [vmem:[#allocation164_spill] sm:$0xff] }
 0x4c9   : > { %12412 = vmatprep.mubr.msk.bf16.mxu1 %vm5774_vm6, %v7277_v56  ;;  %v7260_v23 = vmul.f32 %v16497_v32, %v19857_v4  ;;  %v19860_v56 = vld [vmem:[#allocation169_spill] sm:$0xff] }
 0x4ca   : > { %v7544_v29 = vmul.f32 %v16380_v13, %v19860_v56  ;;  %v19865_v56 = vld [vmem:[#allocation158_spill] sm:$0xff] }
 0x4cb   : > { %v7280_v39 = vpack.c.bf16 %v7260_v23, %v7259_v16  ;;  %v7266_v13 = vmul.f32 %v16552_v37, %v19865_v56  ;;  %v7263_v23 = vmul.f32 %v16520_v10, %v19866_v15  ;;  %v19867_v16 = vld [vmem:[#allocation170_spill] sm:$0xff] }
 0x4d0   : > { %12413 = vmatmul.mubr.msk.bf16.gmra.mrb[32].mxu1 %vm5774_vm6, %v7278_v62  ;;  %v7543_v62 = vmul.f32 %v16373_v44, %v19862_v1  ;;  %v7545_v44 = vmul.f32 %v16376_v27, %v19867_v16  ;;  %v19871_v16 = vld [vmem:[#allocation114_spill] sm:$0xff] }
 0x4d1   : > { %12416 = vmatprep.mubr.msk.bf16.mxu1 %vm5774_vm6, %v7279_v8  ;;  %v19863_v8 = vld [vmem:[#allocation167_spill] sm:$0xff]  ;;  %v7268_v27 = vmul.f32 %v16894_v58, %v19871_v16 }
 0x4d2   : > { %v7575_v9 = vpack.c.bf16 %v7544_v29, %v7543_v62  ;;  %v7264_v4 = vmul.f32 %v16522_v63, %v19863_v8  ;;  %v7548_v29 = vmul.f32 %v16411_v49, %v19868_v55  ;;  %v19870_v8 = vld [vmem:[#allocation102_spill] sm:$0xff]  ;;  %v19872_v49 = vld [vmem:[#allocation177_spill] sm:$0xff] }
 0x4d3   : > { %v7547_v53 = vmul.f32 %v16403_v6, %v19870_v8 }
 0x4d4   : > { %v7599_v14 = vshll.u32 %v7575_v9, 16  ;;  %v7282_v62 = vpack.c.bf16 %v7264_v4, %v7263_v23  ;;  %v7597_v11 = vshrl.u32 %v7575_v9, 16  ;;  %v19873_v4 = vld [vmem:[#allocation174_spill] sm:$0xff] }
 0x4d5   : > { %v7577_v15 = vpack.c.bf16 %v7548_v29, %v7547_v53  ;;  %v19876_v53 = vld [vmem:[#allocation178_spill] sm:$0xff] }
 0x4d6   : > { %v7601_v56 = vrot.slane %v7599_v14, 1  ;;  %v19875_v14 = vld [vmem:[#allocation179_spill] sm:$0xff]  ;;  %v7551_v9 = vmul.f32 %v16424_v59, %v19876_v53 }
 0x4d7   : > { %v7552_v29 = vmul.f32 %v16433_v36, %v19875_v14 }
 0x4d8   : > { %12417 = vmatmul.mubr.msk.bf16.gmra.mrb[36].mxu1 %vm5774_vm6, %v7280_v39  ;;  %v19869_v39 = vld [vmem:[#allocation172_spill] sm:$0xff]  ;;  %v7602_v23 = vor.u32 %v7601_v56, %v7597_v11  ;;  %v7616_v11 = vshrl.u32 %v7577_v15, 16 }
 0x4d9   : > { %12420 = vmatprep.mubr.msk.bf16.mxu1 %vm5774_vm6, %v7281_v48  ;;  %v7265_v1 = vmul.f32 %v16547_v46, %v19869_v39  ;;  %v7576_v48 = vpack.c.bf16 %v7546_v22, %v7545_v44  ;;  %v7550_v39 = vmul.f32 %v16408_v52, %v19872_v49  ;;  %v7267_v22 = vmul.f32 %v16749_v28, %v19873_v4 }
 0x4da   : > { %v7612_v44 = vshll.u32 %v7577_v15, 16  ;;  %v7579_v4 = vpack.c.bf16 %v7552_v29, %v7551_v9  ;;  %v19880_v29 = vld [vmem:[#allocation125_spill] sm:$0xff]  ;;  %v13188_v15 = vld [vmem:[%s18835_s7 + $0x68] sm:$0xff]  }
 0x4db   : > { %v7283_v30 = vpack.c.bf16 %v7266_v13, %v7265_v1  ;;  %v7604_v55 = vshll.u32 %v7576_v48, 16  ;;  %v19874_v13 = vld [vmem:[#allocation176_spill] sm:$0xff]  ;;  %v7608_v14 = vshrl.u32 %v7576_v48, 16  ;;  %v7555_v9 = vmul.f32 %v16446_v40, %v19880_v29 }
 0x4dc   : > { %v7549_v1 = vmul.f32 %v16406_v34, %v19874_v13  ;;  %v7614_v16 = vrot.slane %v7612_v44, 1  ;;  %v19877_v13 = vld [vmem:[#allocation180_spill] sm:$0xff] }
 0x4dd   : > { %v7554_v52 = vmul.f32 %v16430_v21, %v19877_v13 }
 0x4de   : > { %v7578_v8 = vpack.c.bf16 %v7550_v39, %v7549_v1  ;;  %v19878_v39 = vld [vmem:[#allocation74_spill] sm:$0xff]  ;;  %v19879_v1 = vld [vmem:[#allocation181_spill] sm:$0xff] }
 0x4e0   : > { %12421 = vmatmul.mubr.msk.bf16.gmra.mrb[40].mxu1 %vm5774_vm6, %v7282_v62  ;;  %v7606_v62 = vrot.slane %v7604_v55, 1  ;;  %v7620_v56 = vshll.u32 %v7578_v8, 16  ;;  %v7628_v55 = vshll.u32 %v7579_v4, 16 }
 0x4e1   : > { %12424 = vmatprep.mubr.msk.bf16.mxu1 %vm5774_vm6, %v7283_v30  ;;  %v7284_v30 = vpack.c.bf16 %v7268_v27, %v7267_v22  ;;  %v7618_v27 = vor.u32 %v7616_v11, %v7614_v16  ;;  %v7553_v22 = vmul.f32 %v16428_v0, %v19878_v39  ;;  %v7624_v39 = vshrl.u32 %v7578_v8, 16 }
 0x4e2   : > { %v7607_v49 = vsel %vm1850_vm5, %v7602_v23, %v7606_v62  ;;  %v7610_v53 = vor.u32 %v7608_v14, %v7606_v62  ;;  %v7622_v23 = vrot.slane %v7620_v56, 1  ;;  %v7630_v11 = vrot.slane %v7628_v55, 1  ;;  %v19881_v56 = vld [vmem:[#allocation182_spill] sm:$0xff]  ;;  %v19882_v55 = vld [vmem:[#allocation81_spill] sm:$0xff] }
 0x4e3   : > { %v7580_v44 = vpack.c.bf16 %v7554_v52, %v7553_v22  ;;  %v7632_v52 = vshrl.u32 %v7579_v4, 16  ;;  %v7558_v14 = vmul.f32 %v16452_v5, %v19881_v56 }
 0x4e4   : > { %v7615_v48 = vsel %vm1850_vm5, %v7610_v53, %v7614_v16  ;;  %v17231_v16 = vld [vmem:[%s18835_s7 + $0x70] sm:$0xff]   ;;  %v7626_v29 = vor.u32 %v7624_v39, %v7622_v23  ;;  %v19886_v39 = vld [vmem:[#allocation185_spill] sm:$0xff] }
 0x4e5   : > { %v7636_v62 = vshll.u32 %v7580_v44, 16  ;;  %v7634_v22 = vor.u32 %v7632_v52, %v7630_v11  ;;  %v9598_v4 = vpop.permute.xlu1 %9597  ;;  %v19885_v52 = vld [vmem:[#allocation84_spill] sm:$0xff] }
 0x4e6   : > { %v7559_v56 = vmul.f32 %v16470_v50, %v19885_v52 }
 0x4e8   : > { %12425 = vmatmul.mubr.msk.bf16.gmra.mrb[44].mxu1 %vm5774_vm6, %v7284_v30  ;;  %v7556_v30 = vmul.f32 %v16455_v57, %v19879_v1  ;;  %v7557_v1 = vmul.f32 %v16450_v20, %v19882_v55  ;;  %v7631_v55 = vsel %vm1850_vm5, %v7626_v29, %v7630_v11  ;;  %v7640_v11 = vshrl.u32 %v7580_v44, 16 }
 0x4e9   : > { %12432 = vmatprep.mubr.msk.bf16.mxu1 %vm5774_vm6, %v7607_v49  ;;  %v7623_v49 = vsel %vm1850_vm5, %v7618_v27, %v7622_v23 }
 0x4ea   : > { %v7581_v13 = vpack.c.bf16 %v7556_v30, %v7555_v9  ;;  %v9600_v53 = vpop.permute.xlu0 %9599  ;;  %v17238_v9 = vsub.f32 %v16835_v24, %v9598_v4  ;;  %v7582_v8 = vpack.c.bf16 %v7558_v14, %v7557_v1  ;;  %v7562_v1 = vmul.f32 %v16475_v26, %v19886_v39  ;;  %v19887_v4 = vld [vmem:[#allocation187_spill] sm:$0xff] }
 0x4ec   : > { %v7644_v27 = vshll.u32 %v7581_v13, 16  ;;  %v7652_v14 = vshll.u32 %v7582_v8, 16 }
 0x4ed   : > { %v9602_v29 = vpop.permute.xlu1 %9601 }
 0x4ee   : > { %v7654_v44 = vrot.slane %v7652_v14, 1 }
 0x4f0   : > { %12433 = vmatmul.mubr.msk.bf16.vlgmr.msra.gmra.mrb[16].mxu1 %vm5774_vm6, %v7615_v48  ;;  %v17241_v48 = vsub.f32 %v16840_v43, %v9600_v53  ;;  %v7564_v53 = vmul.f32 %v16499_v17, %v19887_v4 }
 0x4f1   : > { %12465 = vmatpush3.bf16.msra.mxu1 %v17062_v51  ;;  %12436 = vmatprep.mubr.msk.bf16.mxu1 %vm5774_vm6, %v7623_v49  ;;  %v19883_v51 = vld [vmem:[#allocation183_spill] sm:$0xff]  ;;  %v7638_v49 = vrot.slane %v7636_v62, 1  ;;  %v7648_v62 = vshrl.u32 %v7581_v13, 16  ;;  %v17261_v13 = vsub.f32 %v16860_v33, %v9602_v29  ;;  %v9606_v33 = vpop.permute.xlu1 %9605 }
 0x4f2   : > { %12466 = vmatprep.subr.bf16.mxu1 %v13188_v15  ;;  %v7560_v30 = vmul.f32 %v16477_v18, %v19883_v51  ;;  %19884 = vst [vmem:[#allocation46_spill] sm:$0xff] %v17241_v48  ;;  %v9725_v51 = vmul.f32 0.5, %v17238_v9  ;;  %v9726_v23 = vmul.f32 0.5, %v17241_v48  ;;  %v17276_v29 = vsub.f32 %v16879_v42, %v9606_v33 }
 0x4f3   : > { %v7639_v24 = vsel %vm1850_vm5, %v7634_v22, %v7638_v49  ;;  %v7656_v42 = vshrl.u32 %v7582_v8, 16 }
 0x4f4   : > { %v7583_v43 = vpack.c.bf16 %v7560_v30, %v7559_v56  ;;  %9789 = vrot.lane.b32.xlu1 %v9725_v51, %s13387_s17  ;;  %9791 = vrot.lane.b32.xlu0 %v9726_v23, %s13387_s17  ;;  %v19888_v30 = vld [vmem:[#allocation184_spill] sm:$0xff]  ;;  %v9604_v56 = vpop.permute.xlu0 %9603 }
 0x4f5   : > { %12467 = vmatpush3.bf16.msra.mxu1 %v13188_v15  ;;  %v7646_v15 = vrot.slane %v7644_v27, 1  ;;  %v7561_v52 = vmul.f32 %v16473_v54, %v19888_v30  ;;  %v17266_v23 = vsub.f32 %v16865_v12, %v9604_v56  ;;  %v7658_v33 = vor.u32 %v7656_v42, %v7654_v44 }
 0x4f6   : > { %12500 = vmatprep.subr.bf16.mxu1 %v17231_v16  ;;  %v7660_v27 = vshll.u32 %v7583_v43, 16 }
 0x4f7   : > { %v7650_v22 = vor.u32 %v7648_v62, %v7646_v15  ;;  %v17268_v39 = vpack.c.bf16 %v7562_v1, %v7561_v52  ;;  %v9727_v62 = vmul.f32 0.5, %v17261_v13  ;;  %v9728_v30 = vmul.f32 0.5, %v17266_v23 }
 0x4f8   : > { %12437 = vmatmul.mubr.msk.bf16.gmra.mrb[20].mxu1 %vm5774_vm6, %v7631_v55  ;;  %v7642_v55 = vor.u32 %v7640_v11, %v7638_v49  ;;  %v7662_v11 = vrot.slane %v7660_v27, 1  ;;  %v9608_v12 = vpop.permute.xlu0 %9607  ;;  %v9729_v27 = vmul.f32 0.5, %v17276_v29 }
 0x4f9   : > { %12440 = vmatprep.mubr.msk.bf16.mxu1 %vm5774_vm6, %v7639_v24  ;;  %v19889_v24 = vld [vmem:[#allocation186_spill] sm:$0xff]  ;;  %v7655_v49 = vsel %vm1850_vm5, %v7650_v22, %v7654_v44  ;;  %9793 = vrot.lane.b32.xlu1 %v9727_v62, %s13387_s17  ;;  %v17281_v14 = vsub.f32 %v16886_v45, %v9608_v12  ;;  %v7668_v1 = vshll.u32 %v17268_v39, 16  ;;  %v19892_v62 = vld [vmem:[#allocation49_spill] sm:$0xff] }
 0x4fa   : > { %v7563_v51 = vmul.f32 %v16492_v2, %v19889_v24  ;;  %v7647_v4 = vsel %vm1850_vm5, %v7642_v55, %v7646_v15  ;;  %9795 = vrot.lane.b32.xlu0 %v9728_v30, %s13387_s17  ;;  %v7664_v15 = vshrl.u32 %v7583_v43, 16 }
 0x4fb   : > { %v9730_v56 = vmul.f32 0.5, %v17281_v14  ;;  %v9610_v55 = vpop.permute.xlu1 %9609 }
 0x4fc   : > { %v7585_v48 = vpack.c.bf16 %v7564_v53, %v7563_v51  ;;  %v19890_v53 = vld [vmem:[#allocation188_spill] sm:$0xff]  ;;  %v7666_v24 = vor.u32 %v7664_v15, %v7662_v11  ;;  %v19891_v51 = vld [vmem:[#allocation139_spill] sm:$0xff]  ;;  %v17294_v43 = vsub.f32 %v16906_v47, %v9610_v55  ;;  %v9612_v30 = vpop.permute.xlu0 %9611  ;;  %v7663_v47 = vsel %vm1850_vm5, %v7658_v33, %v7662_v11 }
 0x4fd   : > { %v7566_v22 = vmul.f32 %v16497_v32, %v19890_v53  ;;  %v7565_v45 = vmul.f32 %v16495_v3, %v19891_v51  ;;  %9797 = vrot.lane.b32.xlu1 %v9729_v27, %s13387_s17  ;;  %v17298_v8 = vsub.f32 %v16911_v35, %v9612_v30  ;;  %v19893_v15 = vld [vmem:[#allocation143_spill] sm:$0xff] }
 0x4fe   : > { %v7676_v52 = vshll.u32 %v7585_v48, 16  ;;  %9799 = vrot.lane.b32.xlu0 %v9730_v56, %s13387_s17  ;;  %v7567_v53 = vmul.f32 %v16517_v60, %v19893_v15  ;;  %v9731_v51 = vmul.f32 0.5, %v17294_v43  ;;  %v7680_v42 = vshrl.u32 %v7585_v48, 16  ;;  %v19894_v56 = vld [vmem:[#allocation189_spill] sm:$0xff]  ;;  %v19895_v48 = vld [vmem:[#allocation146_spill] sm:$0xff] }
 0x4ff   : > { %v17301_v12 = vpack.c.bf16 %v7566_v22, %v7565_v45  ;;  %v9614_v27 = vpop.permute.xlu1 %9613 }
 0x500   : > { %12441 = vmatmul.mubr.msk.bf16.gmra.mrb[24].mxu1 %vm5774_vm6, %v7647_v4  ;;  %v7568_v4 = vmul.f32 %v16524_v41, %v19892_v62  ;;  %v7678_v55 = vrot.slane %v7676_v52, 1  ;;  %v9732_v62 = vmul.f32 0.5, %v17298_v8  ;;  %v9616_v22 = vpop.permute.xlu0 %9615 }
 0x501   : > { %12444 = vmatprep.mubr.msk.bf16.mxu1 %vm5774_vm6, %v7655_v49  ;;  %v7670_v49 = vrot.slane %v7668_v1, 1  ;;  %v17311_v1 = vsub.f32 %v16921_v25, %v9614_v27  ;;  %9801 = vrot.lane.b32.xlu1 %v9731_v51, %s13387_s17  ;;  %v17316_v11 = vsub.f32 %v16928_v19, %v9616_v22  ;;  %v7684_v52 = vshll.u32 %v17301_v12, 16 }
 0x502   : > { %v7587_v44 = vpack.c.bf16 %v7568_v4, %v7567_v53  ;;  %9803 = vrot.lane.b32.xlu0 %v9732_v62, %s13387_s17  ;;  %v7672_v25 = vshrl.u32 %v17268_v39, 16  ;;  %v7682_v4 = vor.u32 %v7680_v42, %v7678_v55  ;;  %v7569_v19 = vmul.f32 %v16520_v10, %v19895_v48  ;;  %v19896_v53 = vld [vmem:[#allocation191_spill] sm:$0xff]  ;;  %v19899_v42 = vld [vmem:[#allocation190_spill] sm:$0xff] }
 0x503   : > { %v7671_v35 = vsel %vm1850_vm5, %v7666_v24, %v7670_v49  ;;  %v7570_v24 = vmul.f32 %v16522_v63, %v19894_v56  ;;  %v9733_v45 = vmul.f32 0.5, %v17311_v1  ;;  %v9734_v30 = vmul.f32 0.5, %v17316_v11  ;;  %v9618_v33 = vpop.permute.xlu1 %9617 }
 0x504   : > { %v7692_v15 = vshll.u32 %v7587_v44, 16  ;;  %v7572_v51 = vmul.f32 %v16552_v37, %v19896_v53  ;;  %v9620_v62 = vpop.permute.xlu0 %9619  ;;  %v7674_v27 = vor.u32 %v7672_v25, %v7670_v49  ;;  %v7571_v56 = vmul.f32 %v16547_v46, %v19899_v42 }
 0x505   : > { %9805 = vrot.lane.b32.xlu1 %v9733_v45, %s13387_s17  ;;  %v17334_v39 = vsub.f32 %v16945_v31, %v9620_v62  ;;  %v17337_v22 = vpack.c.bf16 %v7570_v24, %v7569_v19  ;;  %v19902_v19 = vld [vmem:[#allocation194_spill] sm:$0xff] }
 0x506   : > { %9807 = vrot.lane.b32.xlu0 %v9734_v30, %s13387_s17  ;;  %v7694_v49 = vrot.slane %v7692_v15, 1  ;;  %v7589_v45 = vpack.c.bf16 %v7572_v51, %v7571_v56  ;;  %v19903_v51 = vld [vmem:[#allocation173_spill] sm:$0xff] }
 0x507   : > { %19898 = vst [vmem:[#allocation50_spill] sm:$0xff] %v17334_v39  ;;  %v9622_v53 = vpop.permute.xlu1 %9621  ;;  %v7700_v30 = vshll.u32 %v17337_v22, 16  ;;  %v7980_v62 = vmul.f32 %v16403_v6, %v19903_v51  ;;  %v19910_v51 = vld [vmem:[#allocation275_spill] sm:$0xff] }
 0x508   : > { %12445 = vmatmul.mubr.msk.bf16.gmra.mrb[28].mxu1 %vm5774_vm6, %v7663_v47  ;;  %v17330_v47 = vsub.f32 %v16940_v61, %v9618_v33  ;;  %v7679_v61 = vsel %vm1850_vm5, %v7674_v27, %v7678_v55  ;;  %v9736_v33 = vmul.f32 0.5, %v17334_v39  ;;  %v9624_v24 = vpop.permute.xlu0 %9623  ;;  %v7696_v55 = vshrl.u32 %v7587_v44, 16 }
 0x509   : > { %12448 = vmatprep.mubr.msk.bf16.mxu1 %vm5774_vm6, %v7671_v35  ;;  %v7686_v35 = vrot.slane %v7684_v52, 1  ;;  %v17347_v52 = vsub.f32 %v16955_v7, %v9622_v53  ;;  %v17352_v25 = vsub.f32 %v16960_v38, %v9624_v24  ;;  %v7688_v7 = vshrl.u32 %v17301_v12, 16  ;;  %v19907_v24 = vld [vmem:[#allocation142_spill] sm:$0xff]  ;;  %v19908_v12 = vld [vmem:[#allocation276_spill] sm:$0xff] }
 0x50a   : > { %19897 = vst [vmem:[#allocation47_spill] sm:$0xff] %v17330_v47  ;;  %v9735_v48 = vmul.f32 0.5, %v17330_v47  ;;  %9811 = vrot.lane.b32.xlu0 %v9736_v33, %s13387_s17  ;;  %v7698_v38 = vor.u32 %v7696_v55, %v7694_v49  ;;  %v7708_v56 = vshll.u32 %v7589_v45, 16  ;;  %v7702_v55 = vrot.slane %v7700_v30, 1 }
 0x50b   : > { %v7687_v31 = vsel %vm1850_vm5, %v7682_v4, %v7686_v35  ;;  %19900 = vst [vmem:[#allocation53_spill] sm:$0xff] %v17347_v52  ;;  %19901 = vst [vmem:[#allocation51_spill] sm:$0xff] %v17352_v25  ;;  %v7574_v4 = vmul.f32 %v16894_v58, %v19902_v19  ;;  %v9737_v15 = vmul.f32 0.5, %v17347_v52  ;;  %v9738_v27 = vmul.f32 0.5, %v17352_v25  ;;  %v9626_v42 = vpop.permute.xlu1 %9625  ;;  %v19909_v52 = vld [vmem:[#allocation149_spill] sm:$0xff]  ;;  %v19911_v25 = vld [vmem:[#allocation24_spill] sm:$0xff] }
 0x50c   : > { %9809 = vrot.lane.b32.xlu1 %v9735_v48, %s13387_s17  ;;  %v19904_v48 = vld [vmem:[#allocation193_spill] sm:$0xff]  ;;  %v9628_v53 = vpop.permute.xlu0 %9627  ;;  %v7977_v19 = vmul.f32 %v19908_v12, %v19907_v24  ;;  %v7979_v6 = vmul.f32 %v19910_v51, %v19909_v52  ;;  %v7703_v52 = vsel %vm1850_vm5, %v7698_v38, %v7702_v55  ;;  %v19920_v38 = vld [vmem:[#allocation11_spill] sm:$0xff] }
 0x50d   : > { %v7573_v44 = vmul.f32 %v16749_v28, %v19904_v48  ;;  %v17374_v39 = vsub.f32 %v19911_v25, %v9628_v53  ;;  %v7710_v25 = vrot.slane %v7708_v56, 1 }
 0x50e   : > { %9815 = vrot.lane.b32.xlu0 %v9738_v27, %s13387_s17  ;;  %v8009_v47 = vpack.c.bf16 %v7980_v62, %v7979_v6  ;;  %v19915_v27 = vld [vmem:[#allocation25_spill] sm:$0xff]  ;;  %v7712_v6 = vshrl.u32 %v7589_v45, 16 }
 0x50f   : > { %19912 = vst [vmem:[#allocation54_spill] sm:$0xff] %v17374_v39  ;;  %v17377_v48 = vpack.c.bf16 %v7574_v4, %v7573_v44  ;;  %v9740_v24 = vmul.f32 0.5, %v17374_v39  ;;  %v9630_v12 = vpop.permute.xlu1 %9629  ;;  %v19917_v44 = vld [vmem:[#allocation26_spill] sm:$0xff] }
 0x510   : > { %12449 = vmatmul.mubr.msk.bf16.gmra.mrb[32].mxu1 %vm5774_vm6, %v7679_v61  ;;  %v19905_v61 = vld [vmem:[#allocation31_spill] sm:$0xff]  ;;  %9813 = vrot.lane.b32.xlu1 %v9737_v15, %s13387_s17  ;;  %v17387_v30 = vsub.f32 %v19915_v27, %v9630_v12  ;;  %v9632_v4 = vpop.permute.xlu0 %9631  ;;  %v8038_v12 = vshrl.u32 %v8009_v47, 16  ;;  %v19921_v27 = vld [vmem:[#allocation198_spill] sm:$0xff] }
 0x511   : > { %12452 = vmatprep.mubr.msk.bf16.mxu1 %vm5774_vm6, %v7687_v31  ;;  %v17366_v33 = vsub.f32 %v19905_v61, %v9626_v42  ;;  %v7690_v31 = vor.u32 %v7688_v7, %v7686_v35  ;;  %v19913_v15 = vld [vmem:[#allocation195_spill] sm:$0xff]  ;;  %v19914_v35 = vld [vmem:[#allocation9_spill] sm:$0xff]  ;;  %v17392_v53 = vsub.f32 %v19917_v44, %v9632_v4  ;;  %v7716_v62 = vshll.u32 %v17377_v48, 16  ;;  %v19923_v44 = vld [vmem:[#allocation34_spill] sm:$0xff] }
 0x512   : > { %v7978_v7 = vmul.f32 %v19914_v35, %v19913_v15  ;;  %19916 = vst [vmem:[#allocation58_spill] sm:$0xff] %v17387_v30  ;;  %9819 = vrot.lane.b32.xlu0 %v9740_v24, %s13387_s17  ;;  %v7704_v15 = vshrl.u32 %v17337_v22, 16  ;;  %v7982_v4 = vmul.f32 %v16406_v34, %v19921_v27  ;;  %v19922_v24 = vld [vmem:[#allocation166_spill] sm:$0xff]  ;;  %v19927_v27 = vld [vmem:[#allocation200_spill] sm:$0xff] }
 0x513   : > { %19906 = vst [vmem:[#allocation52_spill] sm:$0xff] %v17366_v33  ;;  %v9739_v42 = vmul.f32 0.5, %v17366_v33  ;;  %v7695_v61 = vsel %vm1850_vm5, %v7690_v31, %v7694_v49  ;;  %19918 = vst [vmem:[#allocation55_spill] sm:$0xff] %v17392_v53  ;;  %v19919_v31 = vld [vmem:[#allocation197_spill] sm:$0xff]  ;;  %v7984_v45 = vmul.f32 %v16424_v59, %v19922_v24  ;;  %v19928_v34 = vld [vmem:[#allocation6_spill] sm:$0xff] }
 0x514   : > { %v8008_v49 = vpack.c.bf16 %v7978_v7, %v7977_v19  ;;  %v7981_v56 = vmul.f32 %v19920_v38, %v19919_v31  ;;  %v9634_v19 = vpop.permute.xlu1 %9633  ;;  %v7714_v7 = vor.u32 %v7712_v6, %v7710_v25  ;;  %v9636_v31 = vpop.permute.xlu0 %9635  ;;  %v7706_v38 = vor.u32 %v7704_v15, %v7702_v55  ;;  %v19937_v59 = vld [vmem:[#allocation40_spill] sm:$0xff] }
 0x515   : > { %9817 = vrot.lane.b32.xlu1 %v9739_v42, %s13387_s17  ;;  %v8041_v42 = vshll.u32 %v8009_v47, 16  ;;  %v17406_v35 = vsub.f32 %v19923_v44, %v9634_v19  ;;  %v19925_v47 = vld [vmem:[#allocation28_spill] sm:$0xff]  ;;  %v7718_v6 = vrot.slane %v7716_v62, 1  ;;  %v7983_v39 = vmul.f32 %v19928_v34, %v19927_v27 }
 0x516   : > { %v8030_v22 = vshrl.u32 %v8008_v49, 16  ;;  %v8033_v51 = vshll.u32 %v8008_v49, 16  ;;  %v7711_v19 = vsel %vm1850_vm5, %v7706_v38, %v7710_v25  ;;  %v8040_v44 = vrot.slane %v8038_v12, 3 }
 0x517   : > { %19924 = vst [vmem:[#allocation57_spill] sm:$0xff] %v17406_v35  ;;  %v9743_v24 = vmul.f32 0.5, %v17406_v35  ;;  %v7719_v49 = vsel %vm1850_vm5, %v7714_v7, %v7718_v6  ;;  %v8043_v15 = vrot.slane %v8041_v42, 4  ;;  %v7720_v25 = vshrl.u32 %v17377_v48, 16 }
 0x518   : > { %12453 = vmatmul.mubr.msk.bf16.gmra.mrb[36].mxu1 %vm5774_vm6, %v7695_v61  ;;  %v9741_v61 = vmul.f32 0.5, %v17387_v30  ;;  %v17410_v30 = vsub.f32 %v19925_v47, %v9636_v31  ;;  %v9638_v55 = vpop.permute.xlu1 %9637  ;;  %v8011_v31 = vpack.c.bf16 %v7984_v45, %v7983_v39  ;;  %v8032_v38 = vrot.slane %v8030_v22, 3  ;;  %v19933_v39 = vld [vmem:[#allocation201_spill] sm:$0xff] }
 0x519   : > { %12456 = vmatprep.mubr.msk.bf16.mxu1 %vm5774_vm6, %v7703_v52  ;;  %v9742_v52 = vmul.f32 0.5, %v17392_v53  ;;  %v8010_v53 = vpack.c.bf16 %v7982_v4, %v7981_v56  ;;  %v9640_v56 = vpop.permute.xlu0 %9639  ;;  %v8035_v12 = vrot.slane %v8033_v51, 4  ;;  %v19931_v4 = vld [vmem:[#allocation35_spill] sm:$0xff]  ;;  %v7985_v45 = vmul.f32 %v16433_v36, %v19933_v39 }
 0x51a   : > { %9821 = vrot.lane.b32.xlu1 %v9741_v61, %s13387_s17  ;;  %19926 = vst [vmem:[#allocation59_spill] sm:$0xff] %v17410_v30  ;;  %v9744_v61 = vmul.f32 0.5, %v17410_v30  ;;  %v17427_v47 = vsub.f32 %v19931_v4, %v9640_v56  ;;  %v8044_v22 = vor.u32 %v8043_v15, %v8040_v44  ;;  %v8056_v51 = vshrl.u32 %v8011_v31, 16  ;;  %v19936_v4 = vld [vmem:[#allocation203_spill] sm:$0xff] }
 0x51b   : > { %9823 = vrot.lane.b32.xlu0 %v9742_v52, %s13387_s17  ;;  %v19929_v52 = vld [vmem:[#allocation33_spill] sm:$0xff]  ;;  %v8047_v7 = vshrl.u32 %v8010_v53, 16  ;;  %v8050_v42 = vshll.u32 %v8010_v53, 16  ;;  %v8036_v53 = vor.u32 %v8035_v12, %v8032_v38  ;;  %v7987_v39 = vmul.f32 %v16430_v21, %v19936_v4 }
 0x51c   : > { %v17421_v62 = vsub.f32 %v19929_v52, %v9638_v55  ;;  %19932 = vst [vmem:[#allocation60_spill] sm:$0xff] %v17427_v47  ;;  %v9746_v48 = vmul.f32 0.5, %v17427_v47  ;;  %v19935_v52 = vld [vmem:[#allocation202_spill] sm:$0xff] }
 0x51d   : > { %v7986_v56 = vmul.f32 %v16428_v0, %v19935_v52  ;;  %v8052_v44 = vrot.slane %v8050_v42, 4  ;;  %v19941_v52 = vld [vmem:[#allocation196_spill] sm:$0xff] }
 0x51e   : > { %19930 = vst [vmem:[#allocation63_spill] sm:$0xff] %v17421_v62  ;;  %9825 = vrot.lane.b32.xlu1 %v9743_v24, %s13387_s17  ;;  %v9745_v27 = vmul.f32 0.5, %v17421_v62  ;;  %v19934_v24 = vld [vmem:[#allocation2_spill] sm:$0xff]  ;;  %v19942_v0 = vrot.slane %v19941_v52, 1 }
 0x51f   : > { %9827 = vrot.lane.b32.xlu0 %v9744_v61, %s13387_s17  ;;  %v7988_v55 = vmul.f32 %v16446_v40, %v19934_v24  ;;  %v9642_v61 = vpop.permute.xlu1 %9641  ;;  %v8049_v24 = vrot.slane %v8047_v7, 3  ;;  %v8012_v15 = vpack.c.bf16 %v7986_v56, %v7985_v45  ;;  %v19943_v45 = vld [vmem:[#allocation39_spill] sm:$0xff] }
 0x520   : > { %12457 = vmatmul.mubr.msk.bf16.gmra.mrb[40].mxu1 %vm5774_vm6, %v7711_v19  ;;  %v7722_v19 = vor.u32 %v7720_v25, %v7718_v6  ;;  %v17442_v6 = vsub.f32 %v19937_v59, %v9642_v61  ;;  %v9644_v25 = vpop.permute.xlu0 %9643  ;;  %v8045_v59 = vsel %vm1241_vm4, %v8036_v53, %v8044_v22  ;;  %v8058_v61 = vrot.slane %v8056_v51, 3 }
 0x521   : > { %12460 = vmatprep.mubr.msk.bf16.mxu1 %vm5774_vm6, %v7719_v49  ;;  %v8059_v49 = vshll.u32 %v8011_v31, 16  ;;  %v19939_v31 = vld [vmem:[#allocation36_spill] sm:$0xff]  ;;  %v8013_v38 = vpack.c.bf16 %v7988_v55, %v7987_v39  ;;  %v19945_v55 = vld [vmem:[#allocation90_spill] sm:$0xff]  ;;  %v8068_v51 = vshll.u32 %v8012_v15, 16 }
 0x522   : > { %9829 = vrot.lane.b32.xlu1 %v9745_v27, %s13387_s17  ;;  %19938 = vst [vmem:[#allocation62_spill] sm:$0xff] %v17442_v6  ;;  %v17446_v40 = vsub.f32 %v19939_v31, %v9644_v25  ;;  %v7723_v27 = vsel %vm1850_vm5, %v7722_v19, %v19942_v0  ;;  %v9747_v12 = vmul.f32 0.5, %v17442_v6  ;;  %v8053_v0 = vor.u32 %v8052_v44, %v8049_v24  ;;  %v19946_v25 = vld [vmem:[#allocation32_spill] sm:$0xff] }
 0x523   : > { %9831 = vrot.lane.b32.xlu0 %v9746_v48, %s13387_s17  ;;  %v8061_v4 = vrot.slane %v8059_v49, 4  ;;  %v9646_v42 = vpop.permute.xlu1 %9645  ;;  %v8065_v19 = vshrl.u32 %v8012_v15, 16  ;;  %v7989_v39 = vmul.f32 %v16455_v57, %v19945_v55  ;;  %v8074_v49 = vshrl.u32 %v8013_v38, 16  ;;  %v19950_v55 = vld [vmem:[#allocation206_spill] sm:$0xff] }
 0x524   : > { %19940 = vst [vmem:[#allocation56_spill] sm:$0xff] %v17446_v40  ;;  %v9748_v7 = vmul.f32 0.5, %v17446_v40  ;;  %v17457_v48 = vsub.f32 %v19943_v45, %v9646_v42  ;;  %v9648_v56 = vpop.permute.xlu0 %9647  ;;  %v8077_v31 = vshll.u32 %v8013_v38, 16  ;;  %v8054_v38 = vsel %vm1241_vm4, %v8044_v22, %v8053_v0 }
 0x525   : > { %v17463_v53 = vsub.f32 %v19946_v25, %v9648_v56  ;;  %v7991_v56 = vmul.f32 %v16452_v5, %v19950_v55  ;;  %v19951_v25 = vld [vmem:[#allocation41_spill] sm:$0xff]  ;;  %v8070_v55 = vrot.slane %v8068_v51, 4 }
 0x526   : > { %19944 = vst [vmem:[#allocation68_spill] sm:$0xff] %v17457_v48  ;;  %9833 = vrot.lane.b32.xlu1 %v9747_v12, %s13387_s17  ;;  %v9749_v52 = vmul.f32 0.5, %v17457_v48  ;;  %v19949_v12 = vld [vmem:[#allocation157_spill] sm:$0xff] }
 0x527   : > { %19947 = vst [vmem:[#allocation66_spill] sm:$0xff] %v17463_v53  ;;  %9835 = vrot.lane.b32.xlu0 %v9748_v7, %s13387_s17  ;;  %v7992_v24 = vmul.f32 %v16470_v50, %v19949_v12  ;;  %v9750_v44 = vmul.f32 0.5, %v17463_v53  ;;  %v9650_v45 = vpop.permute.xlu1 %9649  ;;  %v19953_v12 = vld [vmem:[#allocation44_spill] sm:$0xff] }
 0x528   : > { %12461 = vmatmul.mubr.msk.bf16.gmra.mrb[44].mxu1 %vm5774_vm6, %v7723_v27  ;;  %v8062_v27 = vor.u32 %v8061_v4, %v8058_v61  ;;  %v17475_v7 = vsub.f32 %v19951_v25, %v9650_v45  ;;  %v9652_v15 = vpop.permute.xlu0 %9651  ;;  %v8067_v61 = vrot.slane %v8065_v19, 3  ;;  %v8079_v45 = vrot.slane %v8077_v31, 4 }
 0x529   : > { %12468 = vmatprep.mubr.msk.bf16.mxu1 %vm5774_vm6, %v8045_v59  ;;  %v19948_v59 = vld [vmem:[#allocation205_spill] sm:$0xff]  ;;  %v17483_v50 = vsub.f32 %v19953_v12, %v9652_v15  ;;  %v8015_v19 = vpack.c.bf16 %v7992_v24, %v7991_v56 }
 0x52a   : > { %v7990_v42 = vmul.f32 %v16450_v20, %v19948_v59  ;;  %19952 = vst [vmem:[#allocation69_spill] sm:$0xff] %v17475_v7  ;;  %9837 = vrot.lane.b32.xlu1 %v9749_v52, %s13387_s17  ;;  %v13190_v59 = vld [vmem:[%s18835_s7 + $0x78] sm:$0xff]   ;;  %v8076_v20 = vrot.slane %v8074_v49, 3  ;;  %v9751_v25 = vmul.f32 0.5, %v17475_v7  ;;  %v8063_v22 = vsel %vm1241_vm4, %v8053_v0, %v8062_v27  ;;  %v19957_v0 = vld [vmem:[#allocation43_spill] sm:$0xff] }
 0x52b   : > { %19954 = vst [vmem:[#allocation4_spill] sm:$0xff] %v17483_v50  ;;  %9839 = vrot.lane.b32.xlu0 %v9750_v44, %s13387_s17  ;;  %v9654_v52 = vpop.permute.xlu1 %9653  ;;  %v17498_v44 = vld [vmem:[%s18835_s7 + $0x80] sm:$0xff]  }
 0x52c   : > { %v8014_v4 = vpack.c.bf16 %v7990_v42, %v7989_v39  ;;  %v9752_v39 = vmul.f32 0.5, %v17483_v50  ;;  %v19955_v42 = vld [vmem:[#allocation42_spill] sm:$0xff]  ;;  %v9656_v51 = vpop.permute.xlu0 %9655  ;;  %v8080_v56 = vor.u32 %v8079_v45, %v8076_v20  ;;  %v19962_v20 = vld [vmem:[#allocation45_spill] sm:$0xff] }
 0x52d   : > { %v17493_v15 = vsub.f32 %v19955_v42, %v9654_v52  ;;  %v17501_v24 = vsub.f32 %v19957_v0, %v9656_v51  ;;  %v8095_v52 = vshll.u32 %v8015_v19, 16  ;;  %v19960_v42 = vld [vmem:[#allocation209_spill] sm:$0xff]  ;;  %v19961_v0 = vld [vmem:[#allocation160_spill] sm:$0xff] }
 0x52e   : > { %v8083_v49 = vshrl.u32 %v8014_v4, 16  ;;  %v8086_v31 = vshll.u32 %v8014_v4, 16  ;;  %9841 = vrot.lane.b32.xlu1 %v9751_v25, %s13387_s17  ;;  %v8092_v4 = vshrl.u32 %v8015_v19, 16  ;;  %v7996_v5 = vmul.f32 %v16492_v2, %v19960_v42  ;;  %v19965_v19 = vld [vmem:[#allocation48_spill] sm:$0xff] }
 0x52f   : > { %19956 = vst [vmem:[#allocation72_spill] sm:$0xff] %v17493_v15  ;;  %19958 = vst [vmem:[#allocation8_spill] sm:$0xff] %v17501_v24  ;;  %9843 = vrot.lane.b32.xlu0 %v9752_v39, %s13387_s17  ;;  %v9754_v57 = vmul.f32 0.5, %v17501_v24  ;;  %v9658_v51 = vpop.permute.xlu1 %9657  ;;  %v7994_v25 = vmul.f32 %v16473_v54, %v19961_v0 }
 0x530   : > { %12469 = vmatmul.mubr.msk.bf16.vlgmr.msra.gmra.mrb[16].mxu1 %vm5774_vm6, %v8054_v38  ;;  %v19959_v38 = vld [vmem:[#allocation207_spill] sm:$0xff]  ;;  %v8085_v45 = vrot.slane %v8083_v49, 3  ;;  %v8094_v49 = vrot.slane %v8092_v4, 3  ;;  %v19968_v4 = vld [vmem:[#allocation214_spill] sm:$0xff] }
 0x531   : > { %12501 = vmatpush3.bf16.msra.mxu1 %v17231_v16  ;;  %12472 = vmatprep.mubr.msk.bf16.mxu1 %vm5774_vm6, %v8063_v22  ;;  %v8071_v16 = vor.u32 %v8070_v55, %v8067_v61  ;;  %v7993_v12 = vmul.f32 %v16477_v18, %v19959_v38  ;;  %v9753_v22 = vmul.f32 0.5, %v17493_v15  ;;  %v17514_v61 = vsub.f32 %v19962_v20, %v9658_v51  ;;  %v9660_v55 = vpop.permute.xlu0 %9659  ;;  %v19964_v18 = vld [vmem:[#allocation208_spill] sm:$0xff] }
 0x532   : > { %12502 = vmatprep.subr.bf16.mxu1 %v13190_v59  ;;  %v8088_v38 = vrot.slane %v8086_v31, 4  ;;  %v7995_v39 = vmul.f32 %v16475_v26, %v19964_v18  ;;  %v17520_v42 = vsub.f32 %v19965_v19, %v9660_v55  ;;  %v8097_v18 = vrot.slane %v8095_v52, 4  ;;  %v19969_v52 = vld [vmem:[#allocation211_spill] sm:$0xff]  ;;  %v19970_v19 = vld [vmem:[#allocation213_spill] sm:$0xff] }
 0x533   : > { %19963 = vst [vmem:[#allocation75_spill] sm:$0xff] %v17514_v61  ;;  %9845 = vrot.lane.b32.xlu1 %v9753_v22, %s13387_s17  ;;  %v8072_v2 = vsel %vm1241_vm4, %v8062_v27, %v8071_v16  ;;  %v8016_v0 = vpack.c.bf16 %v7994_v25, %v7993_v12  ;;  %v9755_v51 = vmul.f32 0.5, %v17514_v61  ;;  %9847 = vrot.lane.b32.xlu0 %v9754_v57, %s13387_s17 }
 0x534   : > { %19966 = vst [vmem:[#allocation71_spill] sm:$0xff] %v17520_v42  ;;  %v8017_v31 = vpack.c.bf16 %v7996_v5, %v7995_v39  ;;  %v9756_v20 = vmul.f32 0.5, %v17520_v42  ;;  %v8089_v22 = vor.u32 %v8088_v38, %v8085_v45  ;;  %v8098_v57 = vor.u32 %v8097_v18, %v8094_v49  ;;  %v19971_v49 = vld [vmem:[#allocation46_spill] sm:$0xff] }
 0x535   : > { %12503 = vmatpush3.bf16.msra.mxu1 %v13190_v59  ;;  %v8081_v59 = vsel %vm1241_vm4, %v8071_v16, %v8080_v56  ;;  %v8101_v27 = vshrl.u32 %v8016_v0, 16  ;;  %v8104_v55 = vshll.u32 %v8016_v0, 16  ;;  %v19967_v16 = vld [vmem:[#allocation210_spill] sm:$0xff]  ;;  %v8000_v5 = vmul.f32 %v16517_v60, %v19968_v4 }
 0x536   : > { %12536 = vmatprep.subr.bf16.mxu1 %v17498_v44  ;;  %v7997_v12 = vmul.f32 %v16499_v17, %v19967_v16  ;;  %v8110_v25 = vshrl.u32 %v8017_v31, 16  ;;  %v7998_v39 = vmul.f32 %v16495_v3, %v19969_v52  ;;  %v8090_v45 = vsel %vm1241_vm4, %v8080_v56, %v8089_v22 }
 0x537   : > { %9849 = vrot.lane.b32.xlu1 %v9755_v51, %s13387_s17  ;;  %9851 = vrot.lane.b32.xlu0 %v9756_v20, %s13387_s17  ;;  %v8103_v38 = vrot.slane %v8101_v27, 3  ;;  %v8106_v0 = vrot.slane %v8104_v55, 4  ;;  %v8099_v18 = vsel %vm1241_vm4, %v8089_v22, %v8098_v57  ;;  %v19972_v55 = vld [vmem:[#allocation215_spill] sm:$0xff] }
 0x538   : > { %12473 = vmatmul.mubr.msk.bf16.gmra.mrb[20].mxu1 %vm5774_vm6, %v8072_v2  ;;  %v8113_v2 = vshll.u32 %v8017_v31, 16  ;;  %v8018_v51 = vpack.c.bf16 %v7998_v39, %v7997_v12  ;;  %v8112_v31 = vrot.slane %v8110_v25, 3  ;;  %v8001_v12 = vmul.f32 %v16524_v41, %v19972_v55  ;;  %v19973_v25 = vld [vmem:[#allocation219_spill] sm:$0xff] }
 0x539   : > { %12476 = vmatprep.mubr.msk.bf16.mxu1 %vm5774_vm6, %v8081_v59  ;;  %v7999_v59 = vmul.f32 %v16497_v32, %v19970_v19  ;;  %v8107_v4 = vor.u32 %v8106_v0, %v8103_v38 }
 0x53a   : > { %v8115_v20 = vrot.slane %v8113_v2, 4  ;;  %v8119_v56 = vshrl.u32 %v8018_v51, 16  ;;  %v8122_v27 = vshll.u32 %v8018_v51, 16  ;;  %v8004_v2 = vmul.f32 %v16547_v46, %v19973_v25 }
 0x53b   : > { %9949 = vrot.lane.b32.xlu1 %v17238_v9, %s13388_s23  ;;  %9951 = vrot.lane.b32.xlu0 %v19971_v49, %s13388_s23  ;;  %v8019_v16 = vpack.c.bf16 %v8000_v5, %v7999_v59  ;;  %v19974_v5 = vld [vmem:[#allocation217_spill] sm:$0xff]  ;;  %v19975_v59 = vld [vmem:[#allocation218_spill] sm:$0xff]  ;;  %v8108_v38 = vsel %vm1241_vm4, %v8098_v57, %v8107_v4 }
 0x53c   : > { %v8116_v52 = vor.u32 %v8115_v20, %v8112_v31  ;;  %v8002_v19 = vmul.f32 %v16520_v10, %v19974_v5  ;;  %v8121_v0 = vrot.slane %v8119_v56, 3  ;;  %v8124_v51 = vrot.slane %v8122_v27, 4  ;;  %v19976_v27 = vld [vmem:[#allocation221_spill] sm:$0xff] }
 0x53d   : > { %v8128_v39 = vshrl.u32 %v8019_v16, 16  ;;  %v8131_v22 = vshll.u32 %v8019_v16, 16 }
 0x53e   : > { %v8117_v31 = vsel %vm1241_vm4, %v8107_v4, %v8116_v52  ;;  %v8125_v25 = vor.u32 %v8124_v51, %v8121_v0 }
 0x53f   : > { %9953 = vrot.lane.b32.xlu1 %v17261_v13, %s13388_s23  ;;  %9955 = vrot.lane.b32.xlu0 %v17266_v23, %s13388_s23  ;;  %v8130_v20 = vrot.slane %v8128_v39, 3  ;;  %v8133_v16 = vrot.slane %v8131_v22, 4  ;;  %v19977_v39 = vld [vmem:[#allocation223_spill] sm:$0xff] }
 0x540   : > { %12477 = vmatmul.mubr.msk.bf16.gmra.mrb[24].mxu1 %vm5774_vm6, %v8090_v45  ;;  %v8003_v45 = vmul.f32 %v16522_v63, %v19975_v59  ;;  %v8007_v22 = vmul.f32 %v16894_v58, %v19977_v39 }
 0x541   : > { %12480 = vmatprep.mubr.msk.bf16.mxu1 %vm5774_vm6, %v8099_v18  ;;  %v8020_v18 = vpack.c.bf16 %v8002_v19, %v8001_v12  ;;  %v8005_v12 = vmul.f32 %v16552_v37, %v19976_v27  ;;  %v8134_v5 = vor.u32 %v8133_v16, %v8130_v20  ;;  %v19979_v16 = vld [vmem:[#allocation77_spill] sm:$0xff]  ;;  %v19980_v27 = vld [vmem:[#allocation47_spill] sm:$0xff] }
 0x542   : > { %v8021_v55 = vpack.c.bf16 %v8004_v2, %v8003_v45  ;;  %v19978_v2 = vld [vmem:[#allocation222_spill] sm:$0xff]  ;;  %v8126_v45 = vsel %vm1241_vm4, %v8116_v52, %v8125_v25 }
 0x543   : > { %9957 = vrot.lane.b32.xlu1 %v17276_v29, %s13388_s23  ;;  %9959 = vrot.lane.b32.xlu0 %v17281_v14, %s13388_s23  ;;  %v8137_v57 = vshrl.u32 %v8020_v18, 16  ;;  %v8140_v56 = vshll.u32 %v8020_v18, 16  ;;  %v8006_v59 = vmul.f32 %v16749_v28, %v19978_v2  ;;  %v8135_v18 = vsel %vm1241_vm4, %v8125_v25, %v8134_v5  ;;  %v19982_v25 = vld [vmem:[#allocation53_spill] sm:$0xff] }
 0x544   : > { %v8146_v19 = vshrl.u32 %v8021_v55, 16  ;;  %v8149_v4 = vshll.u32 %v8021_v55, 16  ;;  %v8023_v55 = vpack.c.bf16 %v19979_v16, %v8007_v22 }
 0x545   : > { %v8142_v0 = vrot.slane %v8140_v56, 4  ;;  %v8022_v51 = vpack.c.bf16 %v8006_v59, %v8005_v12  ;;  %v19981_v12 = vld [vmem:[#allocation50_spill] sm:$0xff] }
 0x546   : > { %v8151_v20 = vrot.slane %v8149_v4, 4  ;;  %v8164_v2 = vshrl.u32 %v8023_v55, 16  ;;  %v8167_v59 = vshll.u32 %v8023_v55, 16  ;;  %v19986_v55 = vld [vmem:[#allocation55_spill] sm:$0xff] }
 0x547   : > { %9961 = vrot.lane.b32.xlu1 %v17294_v43, %s13388_s23  ;;  %9963 = vrot.lane.b32.xlu0 %v17298_v8, %s13388_s23  ;;  %v8158_v56 = vshll.u32 %v8022_v51, 16 }
 0x548   : > { %12481 = vmatmul.mubr.msk.bf16.gmra.mrb[28].mxu1 %vm5774_vm6, %v8108_v38  ;;  %v8139_v38 = vrot.slane %v8137_v57, 3  ;;  %v8155_v57 = vshrl.u32 %v8022_v51, 16  ;;  %v8169_v51 = vrot.slane %v8167_v59, 4  ;;  %v19989_v59 = vld [vmem:[#allocation204_spill] sm:$0xff] }
 0x549   : > { %12484 = vmatprep.mubr.msk.bf16.mxu1 %vm5774_vm6, %v8117_v31  ;;  %v8148_v31 = vrot.slane %v8146_v19, 3  ;;  %v8160_v22 = vrot.slane %v8158_v56, 4  ;;  %v19988_v56 = vld [vmem:[#allocation275_spill] sm:$0xff] }
 0x54a   : > { %v8143_v52 = vor.u32 %v8142_v0, %v8139_v38  ;;  %v8157_v4 = vrot.slane %v8155_v57, 3  ;;  %v8166_v0 = vrot.slane %v8164_v2, 3  ;;  %v19987_v57 = vld [vmem:[#allocation225_spill] sm:$0xff] }
 0x54b   : > { %9965 = vrot.lane.b32.xlu1 %v17311_v1, %s13388_s23  ;;  %9967 = vrot.lane.b32.xlu0 %v17316_v11, %s13388_s23  ;;  %v8152_v39 = vor.u32 %v8151_v20, %v8148_v31  ;;  %v19984_v31 = vld [vmem:[#allocation54_spill] sm:$0xff]  ;;  %v8427_v2 = vmul.f32 %v19988_v56, %v19987_v57  ;;  %v19995_v57 = vld [vmem:[#allocation227_spill] sm:$0xff] }
 0x54c   : > { %v8144_v19 = vsel %vm1241_vm4, %v8134_v5, %v8143_v52  ;;  %v8170_v5 = vor.u32 %v8169_v51, %v8166_v0  ;;  %v19985_v20 = vld [vmem:[#allocation58_spill] sm:$0xff] }
 0x54d   : > { %v8153_v38 = vsel %vm1241_vm4, %v8143_v52, %v8152_v39  ;;  %v13193_v0 = vld [vmem:[%s18837_s9] sm:$0xff]  }
 0x54e   : > { %v19992_v51 = vld [vmem:[#allocation154_spill] sm:$0xff]  ;;  %12572 = vmatprep.subr.bf16.mxu0 %v13193_v0 }
 0x54f   : > { %9969 = vrot.lane.b32.xlu1 %v19980_v27, %s13388_s23  ;;  %9971 = vrot.lane.b32.xlu0 %v19981_v12, %s13388_s23 }
 0x550   : > { %12485 = vmatmul.mubr.msk.bf16.gmra.mrb[32].mxu1 %vm5774_vm6, %v8126_v45  ;;  %v19983_v45 = vld [vmem:[#allocation51_spill] sm:$0xff]  ;;  %12573 = vmatpush3.bf16.msra.mxu0 %v13193_v0 }
 0x551   : > { %12488 = vmatprep.mubr.msk.bf16.mxu1 %vm5774_vm6, %v8135_v18  ;;  %v8161_v18 = vor.u32 %v8160_v22, %v8157_v4  ;;  %v19991_v4 = vld [vmem:[#allocation229_spill] sm:$0xff]  ;;  %v13194_v0 = vld [vmem:[%s18837_s9 + $0x8] sm:$0xff]  }
 0x552   : > { %v8172_v22 = vsel %vm1241_vm4, %v8170_v5, %v19991_v4  ;;  %v19997_v4 = vld [vmem:[#allocation228_spill] sm:$0xff]  ;;  %12574 = vmatprep.subr.bf16.mxu0 %v13194_v0 }
 0x553   : > { %9973 = vrot.lane.b32.xlu1 %v19982_v25, %s13388_s23  ;;  %9975 = vrot.lane.b32.xlu0 %v19983_v45, %s13388_s23  ;;  %v8162_v16 = vsel %vm1241_vm4, %v8152_v39, %v8161_v18  ;;  %v8171_v52 = vsel %vm1241_vm4, %v8161_v18, %v8170_v5  ;;  %v19990_v39 = vld [vmem:[#allocation9_spill] sm:$0xff]  ;;  %v19993_v18 = vld [vmem:[#allocation11_spill] sm:$0xff] }
 0x554   : > { %v19994_v5 = vld [vmem:[#allocation5_spill] sm:$0xff]  ;;  %12575 = vmatpush3.bf16.msra.mxu0 %v13194_v0  ;;  %v20006_v0 = vld [vmem:[#allocation20_spill] sm:$0xff] }
 0x557   : > { %9977 = vrot.lane.b32.xlu1 %v17366_v33, %s13388_s23  ;;  %9979 = vrot.lane.b32.xlu0 %v19984_v31, %s13388_s23  ;;  %v20018_v31 = vld [vmem:[#allocation199_spill] sm:$0xff] }
 0x558   : > { %12489 = vmatmul.mubr.msk.bf16.gmra.mrb[36].mxu1 %vm5774_vm6, %v8144_v19  ;;  %v8426_v19 = vmul.f32 %v19990_v39, %v19989_v59 }
 0x559   : > { %12492 = vmatprep.mubr.msk.bf16.mxu1 %vm5774_vm6, %v8153_v38 }
 0x55a   : > { %v8456_v38 = vpack.c.bf16 %v8427_v2, %v8426_v19  ;;  %v19996_v2 = vld [vmem:[#allocation10_spill] sm:$0xff] }
 0x55b   : > { %9981 = vrot.lane.b32.xlu1 %v19985_v20, %s13388_s23  ;;  %9983 = vrot.lane.b32.xlu0 %v19986_v55, %s13388_s23  ;;  %v8428_v59 = vmul.f32 %v19996_v2, %v19995_v57 }
 0x55f   : > { %9985 = vrot.lane.b32.xlu1 %v17406_v35, %s13388_s23  ;;  %9987 = vrot.lane.b32.xlu0 %v17410_v30, %s13388_s23 }
 0x560   : > { %12493 = vmatmul.mubr.msk.bf16.gmra.mrb[40].mxu1 %vm5774_vm6, %v8162_v16  ;;  %v8429_v16 = vmul.f32 %v19993_v18, %v19992_v51 }
 0x561   : > { %12496 = vmatprep.mubr.msk.bf16.mxu1 %vm5774_vm6, %v8171_v52  ;;  %v8431_v52 = vmul.f32 %v19928_v34, %v19994_v5 }
 0x562   : > { %v8457_v51 = vpack.c.bf16 %v8429_v16, %v8428_v59  ;;  %v19999_v16 = vld [vmem:[#allocation162_spill] sm:$0xff]  ;;  %v20000_v59 = vld [vmem:[#allocation212_spill] sm:$0xff] }
 0x563   : > { %9989 = vrot.lane.b32.xlu1 %v17421_v62, %s13388_s23  ;;  %9991 = vrot.lane.b32.xlu0 %v17427_v47, %s13388_s23  ;;  %v8433_v57 = vmul.f32 %v16433_v36, %v19999_v16 }
 0x566   : > { %v9790_v19 = vpop.permute.xlu1 %9789  ;;  %v9792_v47 = vpop.permute.xlu0 %9791 }
 0x567   : > { %9993 = vrot.lane.b32.xlu1 %v17442_v6, %s13388_s23  ;;  %9995 = vrot.lane.b32.xlu0 %v17446_v40, %s13388_s23  ;;  %v13192_v6 = vld [vmem:[%s18835_s7 + $0x88] sm:$0xff]  }
 0x568   : > { %12497 = vmatmul.mubr.msk.bf16.gmra.mrb[44].mxu1 %vm5774_vm6, %v8172_v22  ;;  %v19998_v22 = vld [vmem:[#allocation3_spill] sm:$0xff] }
 0x569   : > { %12504 = vmatprep.mubr.msk.bf16.mxu1 %vm5774_vm6, %v8456_v38  ;;  %v8430_v38 = vmul.f32 %v19998_v22, %v19997_v4  ;;  %v8435_v4 = vmul.f32 %v16430_v21, %v20000_v59 }
 0x56b   : > { %9997 = vrot.lane.b32.xlu1 %v17457_v48, %s13388_s23  ;;  %v8458_v5 = vpack.c.bf16 %v8431_v52, %v8430_v38  ;;  %9999 = vrot.lane.b32.xlu0 %v17463_v53, %s13388_s23  ;;  %v9794_v52 = vpop.permute.xlu1 %9793  ;;  %v20004_v48 = vld [vmem:[#allocation15_spill] sm:$0xff] }
 0x56c   : > { %v9796_v38 = vpop.permute.xlu0 %9795 }
 0x56f   : > { %10001 = vrot.lane.b32.xlu1 %v17475_v7, %s13388_s23  ;;  %10003 = vrot.lane.b32.xlu0 %v17483_v50, %s13388_s23  ;;  %v9798_v7 = vpop.permute.xlu1 %9797 }
 0x570   : > { %12505 = vmatmul.mubr.msk.bf16.vlgmr.msra.gmra.mrb[16].mxu1 %vm5774_vm6, %v8457_v51  ;;  %v20001_v51 = vld [vmem:[#allocation192_spill] sm:$0xff]  ;;  %v9800_v59 = vpop.permute.xlu0 %9799 }
 0x571   : > { %12537 = vmatpush3.bf16.msra.mxu1 %v17498_v44  ;;  %12508 = vmatprep.mubr.msk.bf16.mxu1 %vm5774_vm6, %v8458_v5  ;;  %v20002_v44 = vld [vmem:[#allocation17_spill] sm:$0xff]  ;;  %v20003_v5 = vld [vmem:[#allocation12_spill] sm:$0xff] }
 0x572   : > { %12538 = vmatprep.subr.bf16.mxu1 %v13192_v6  ;;  %v8432_v53 = vmul.f32 %v20002_v44, %v20001_v51  ;;  %v8434_v16 = vmul.f32 %v20004_v48, %v20003_v5  ;;  %v20005_v51 = vld [vmem:[#allocation216_spill] sm:$0xff]  ;;  %v20008_v5 = vld [vmem:[#allocation21_spill] sm:$0xff] }
 0x573   : > { %10005 = vrot.lane.b32.xlu1 %v17493_v15, %s13388_s23  ;;  %10007 = vrot.lane.b32.xlu0 %v17501_v24, %s13388_s23  ;;  %v8437_v50 = vmul.f32 %v20006_v0, %v20005_v51  ;;  %v20009_v24 = vld [vmem:[#allocation13_spill] sm:$0xff]  ;;  %v20010_v15 = vld [vmem:[#allocation14_spill] sm:$0xff] }
 0x574   : > { %v8459_v40 = vpack.c.bf16 %v8433_v57, %v8432_v53  ;;  %v8460_v62 = vpack.c.bf16 %v8435_v4, %v8434_v16  ;;  %v9802_v57 = vpop.permute.xlu1 %9801  ;;  %v20007_v4 = vld [vmem:[#allocation220_spill] sm:$0xff]  ;;  %v9804_v51 = vpop.permute.xlu0 %9803  ;;  %v8436_v30 = vmul.f32 %v20010_v15, %v20009_v24 }
 0x575   : > { %12539 = vmatpush3.bf16.msra.mxu1 %v13192_v6  ;;  %v13336_v6 = vld [vmem:[%s18830_s2] sm:$0xff]  ;;  %v8439_v16 = vmul.f32 %v20008_v5, %v20007_v4  ;;  %v13338_v4 = vld [vmem:[%s18830_s2 + $0x10] sm:$0xff] }
 0x576   : > { %v9885_v53 = vadd.f32 %v13336_v6, %v9790_v19  ;;  %v20011_v19 = vld [vmem:[#allocation231_spill] sm:$0xff]  ;;  %v20012_v6 = vld [vmem:[#allocation18_spill] sm:$0xff]  ;;  %v9887_v55 = vadd.f32 %v13338_v4, %v9794_v52  ;;  %v20016_v4 = vld [vmem:[#allocation233_spill] sm:$0xff] }
 0x577   : > { %10009 = vrot.lane.b32.xlu1 %v17514_v61, %s13388_s23  ;;  %10011 = vrot.lane.b32.xlu0 %v17520_v42, %s13388_s23  ;;  %v8438_v35 = vmul.f32 %v20012_v6, %v20011_v19  ;;  %v8461_v61 = vpack.c.bf16 %v8437_v50, %v8436_v30  ;;  %v13339_v42 = vld [vmem:[%s18830_s2 + $0x18] sm:$0xff]  ;;  %v20013_v50 = vld [vmem:[#allocation224_spill] sm:$0xff]  ;;  %v20014_v30 = vld [vmem:[#allocation27_spill] sm:$0xff] }
 0x578   : > { %12509 = vmatmul.mubr.msk.bf16.gmra.mrb[20].mxu1 %vm5774_vm6, %v8459_v40  ;;  %v13337_v40 = vld [vmem:[%s18830_s2 + $0x8] sm:$0xff]  ;;  %v9888_v20 = vadd.f32 %v13339_v42, %v9796_v38  ;;  %v9808_v24 = vpop.permute.xlu0 %9807  ;;  %v8441_v52 = vmul.f32 %v20014_v30, %v20013_v50  ;;  %v20015_v19 = vld [vmem:[#allocation226_spill] sm:$0xff] }
 0x579   : > { %12512 = vmatprep.mubr.msk.bf16.mxu1 %vm5774_vm6, %v8460_v62  ;;  %v9886_v62 = vadd.f32 %v13337_v40, %v9792_v47  ;;  %v9806_v47 = vpop.permute.xlu1 %9805  ;;  %v8462_v40 = vpack.c.bf16 %v8439_v16, %v8438_v35  ;;  %v8443_v42 = vmul.f32 %v16475_v26, %v20015_v19 }
 0x57b   : > { %10109 = vrot.lane.b32.xlu1 %v9885_v53, %s13389_s20  ;;  %10111 = vrot.lane.b32.xlu0 %v9886_v62, %s13389_s20  ;;  %v13340_v53 = vld [vmem:[%s18830_s2 + $0x20] sm:$0xff] }
 0x57c   : > { %v9889_v35 = vadd.f32 %v13340_v53, %v9798_v7  ;;  %v9812_v62 = vpop.permute.xlu0 %9811  ;;  %v8442_v7 = vmul.f32 %v16473_v54, %v20018_v31  ;;  %v20019_v31 = vld [vmem:[#allocation7_spill] sm:$0xff] }
 0x57e   : > { %v9810_v16 = vpop.permute.xlu1 %9809  ;;  %v8464_v45 = vpack.c.bf16 %v8443_v42, %v8442_v7  ;;  %v20021_v7 = vld [vmem:[#allocation235_spill] sm:$0xff] }
 0x57f   : > { %10113 = vrot.lane.b32.xlu1 %v9887_v55, %s13389_s20  ;;  %10115 = vrot.lane.b32.xlu0 %v9888_v20, %s13389_s20  ;;  %v13342_v55 = vld [vmem:[%s18830_s2 + $0x30] sm:$0xff]  ;;  %v13343_v20 = vld [vmem:[%s18830_s2 + $0x38] sm:$0xff] }
 0x580   : > { %12513 = vmatmul.mubr.msk.bf16.gmra.mrb[24].mxu1 %vm5774_vm6, %v8461_v61  ;;  %v13341_v61 = vld [vmem:[%s18830_s2 + $0x28] sm:$0xff]  ;;  %v9891_v19 = vadd.f32 %v13342_v55, %v9802_v57  ;;  %v13344_v57 = vld [vmem:[%s18830_s2 + $0x40] sm:$0xff] }
 0x581   : > { %12516 = vmatprep.mubr.msk.bf16.mxu1 %vm5774_vm6, %v8462_v40  ;;  %v9890_v38 = vadd.f32 %v13341_v61, %v9800_v59  ;;  %v20017_v40 = vld [vmem:[#allocation19_spill] sm:$0xff]  ;;  %v9892_v59 = vadd.f32 %v13343_v20, %v9804_v51  ;;  %v9816_v61 = vpop.permute.xlu0 %9815  ;;  %v20023_v20 = vld [vmem:[#allocation237_spill] sm:$0xff] }
 0x582   : > { %v8440_v50 = vmul.f32 %v20017_v40, %v20016_v4  ;;  %v9814_v33 = vpop.permute.xlu1 %9813  ;;  %v20020_v4 = vld [vmem:[#allocation230_spill] sm:$0xff] }
 0x583   : > { %10117 = vrot.lane.b32.xlu1 %v9889_v35, %s13389_s20  ;;  %10119 = vrot.lane.b32.xlu0 %v9890_v38, %s13389_s20  ;;  %v9893_v35 = vadd.f32 %v13344_v57, %v9806_v47  ;;  %v8447_v51 = vmul.f32 %v16497_v32, %v20020_v4  ;;  %v13345_v38 = vld [vmem:[%s18830_s2 + $0x48] sm:$0xff]  ;;  %v8446_v47 = vmul.f32 %v16495_v3, %v20023_v20 }
 0x584   : > { %v8463_v53 = vpack.c.bf16 %v8441_v52, %v8440_v50  ;;  %v8445_v52 = vmul.f32 %v16499_v17, %v20019_v31  ;;  %v9894_v50 = vadd.f32 %v13345_v38, %v9808_v24  ;;  %v13347_v24 = vld [vmem:[%s18830_s2 + $0x58] sm:$0xff] }
 0x585   : > { %v8466_v25 = vpack.c.bf16 %v8447_v51, %v8446_v47  ;;  %v20026_v47 = vld [vmem:[#allocation238_spill] sm:$0xff] }
 0x587   : > { %10121 = vrot.lane.b32.xlu1 %v9891_v19, %s13389_s20  ;;  %v9818_v42 = vpop.permute.xlu1 %9817  ;;  %10123 = vrot.lane.b32.xlu0 %v9892_v59, %s13389_s20  ;;  %v13346_v19 = vld [vmem:[%s18830_s2 + $0x50] sm:$0xff]  ;;  %v9896_v59 = vadd.f32 %v13347_v24, %v9812_v62 }
 0x588   : > { %12517 = vmatmul.mubr.msk.bf16.gmra.mrb[28].mxu1 %vm5774_vm6, %v8463_v53  ;;  %v20022_v53 = vld [vmem:[#allocation29_spill] sm:$0xff]  ;;  %v9895_v57 = vadd.f32 %v13346_v19, %v9810_v16  ;;  %v13348_v16 = vld [vmem:[%s18830_s2 + $0x60] sm:$0xff]  ;;  %v20027_v19 = vld [vmem:[#allocation239_spill] sm:$0xff] }
 0x589   : > { %12520 = vmatprep.mubr.msk.bf16.mxu1 %vm5774_vm6, %v8464_v45  ;;  %v9820_v45 = vpop.permute.xlu0 %9819  ;;  %v8444_v55 = vmul.f32 %v20022_v53, %v20021_v7 }
 0x58b   : > { %v8465_v31 = vpack.c.bf16 %v8445_v52, %v8444_v55  ;;  %10125 = vrot.lane.b32.xlu1 %v9893_v35, %s13389_s20  ;;  %10127 = vrot.lane.b32.xlu0 %v9894_v50, %s13389_s20  ;;  %v20024_v52 = vld [vmem:[#allocation16_spill] sm:$0xff]  ;;  %v9897_v35 = vadd.f32 %v13348_v16, %v9814_v33  ;;  %v13349_v50 = vld [vmem:[%s18830_s2 + $0x68] sm:$0xff]  ;;  %v8450_v33 = vmul.f32 %v16520_v10, %v20027_v19 }
 0x58c   : > { %v9822_v4 = vpop.permute.xlu1 %9821  ;;  %v8449_v7 = vmul.f32 %v16524_v41, %v20024_v52  ;;  %v20025_v55 = vld [vmem:[#allocation232_spill] sm:$0xff]  ;;  %v9898_v20 = vadd.f32 %v13349_v50, %v9816_v61 }
 0x58d   : > { %v9824_v38 = vpop.permute.xlu0 %9823  ;;  %v8451_v62 = vmul.f32 %v16522_v63, %v20025_v55  ;;  %v13350_v16 = vld [vmem:[%s18830_s2 + $0x70] sm:$0xff] }
 0x58e   : > { %v9899_v55 = vadd.f32 %v13350_v16, %v9818_v42  ;;  %v13353_v16 = vld [vmem:[%s18830_s2 + $0x88] sm:$0xff] }
 0x58f   : > { %10129 = vrot.lane.b32.xlu1 %v9895_v57, %s13389_s20  ;;  %10131 = vrot.lane.b32.xlu0 %v9896_v59, %s13389_s20  ;;  %v20028_v57 = vld [vmem:[#allocation242_spill] sm:$0xff]  ;;  %v8468_v61 = vpack.c.bf16 %v8451_v62, %v8450_v33  ;;  %v13351_v59 = vld [vmem:[%s18830_s2 + $0x78] sm:$0xff]  ;;  %v20032_v33 = vld [vmem:[#allocation243_spill] sm:$0xff] }
 0x590   : > { %12521 = vmatmul.mubr.msk.bf16.gmra.mrb[32].mxu1 %vm5774_vm6, %v8465_v31  ;;  %v9826_v51 = vpop.permute.xlu1 %9825  ;;  %v8448_v31 = vmul.f32 %v16517_v60, %v20026_v47  ;;  %v8729_v52 = vmul.f32 %v19988_v56, %v20028_v57  ;;  %v9900_v50 = vadd.f32 %v13351_v59, %v9820_v45  ;;  %v8730_v45 = vmul.f32 %v19996_v2, %v20032_v33  ;;  %v20034_v59 = vld [vmem:[#allocation240_spill] sm:$0xff] }
 0x591   : > { %12524 = vmatprep.mubr.msk.bf16.mxu1 %vm5774_vm6, %v8466_v25  ;;  %v9828_v25 = vpop.permute.xlu0 %9827  ;;  %v8452_v2 = vmul.f32 %v16547_v46, %v20034_v59  ;;  %v20038_v59 = vld [vmem:[#allocation250_spill] sm:$0xff] }
 0x592   : > { %v8467_v24 = vpack.c.bf16 %v8449_v7, %v8448_v31  ;;  %v20029_v7 = vld [vmem:[#allocation241_spill] sm:$0xff]  ;;  %v20030_v31 = vld [vmem:[#allocation244_spill] sm:$0xff] }
 0x593   : > { %10133 = vrot.lane.b32.xlu1 %v9897_v35, %s13389_s20  ;;  %10135 = vrot.lane.b32.xlu0 %v9898_v20, %s13389_s20  ;;  %v8728_v56 = vmul.f32 %v19990_v39, %v20029_v7  ;;  %v8731_v19 = vmul.f32 %v19993_v18, %v20030_v31  ;;  %v20031_v35 = vld [vmem:[#allocation234_spill] sm:$0xff]  ;;  %v20033_v39 = vld [vmem:[#allocation245_spill] sm:$0xff]  ;;  %v20035_v7 = vld [vmem:[#allocation236_spill] sm:$0xff] }
 0x594   : > { %v9830_v47 = vpop.permute.xlu1 %9829  ;;  %v8453_v62 = vmul.f32 %v16552_v37, %v20031_v35  ;;  %v13352_v20 = vld [vmem:[%s18830_s2 + $0x80] sm:$0xff]  ;;  %v8455_v18 = vmul.f32 %v16894_v58, %v20033_v39  ;;  %v20036_v35 = vld [vmem:[#allocation248_spill] sm:$0xff] }
 0x595   : > { %v9832_v42 = vpop.permute.xlu0 %9831  ;;  %v8758_v57 = vpack.c.bf16 %v8729_v52, %v8728_v56  ;;  %v8759_v52 = vpack.c.bf16 %v8731_v19, %v8730_v45  ;;  %v8454_v56 = vmul.f32 %v16749_v28, %v20035_v7  ;;  %v8733_v33 = vmul.f32 %v19928_v34, %v20036_v35  ;;  %v13355_v19 = vld [vmem:[%s18830_s2 + $0x98] sm:$0xff]  ;;  %v20037_v34 = vld [vmem:[#allocation247_spill] sm:$0xff] }
 0x596   : > { %v8469_v31 = vpack.c.bf16 %v8453_v62, %v8452_v2  ;;  %v9904_v45 = vadd.f32 %v13355_v19, %v9828_v25  ;;  %v20039_v2 = vld [vmem:[#allocation249_spill] sm:$0xff]  ;;  %v13356_v25 = vld [vmem:[%s18830_s2 + $0xa0] sm:$0xff] }
 0x597   : > { %10137 = vrot.lane.b32.xlu1 %v9899_v55, %s13389_s20  ;;  %10139 = vrot.lane.b32.xlu0 %v9900_v50, %s13389_s20  ;;  %v8781_v55 = vshll.u32 %v8758_v57, 16  ;;  %v8470_v50 = vpack.c.bf16 %v8455_v18, %v8454_v56  ;;  %v8786_v62 = vshll.u32 %v8759_v52, 16  ;;  %v8734_v7 = vmul.f32 %v20002_v44, %v20039_v2 }
 0x598   : > { %12525 = vmatmul.mubr.msk.bf16.gmra.mrb[36].mxu1 %vm5774_vm6, %v8467_v24  ;;  %v9901_v24 = vadd.f32 %v13352_v20, %v9822_v4  ;;  %v9834_v4 = vpop.permute.xlu1 %9833  ;;  %v13354_v20 = vld [vmem:[%s18830_s2 + $0x90] sm:$0xff] }
 0x599   : > { %12528 = vmatprep.mubr.msk.bf16.mxu1 %vm5774_vm6, %v8468_v61  ;;  %v9902_v61 = vadd.f32 %v13353_v16, %v9824_v38  ;;  %v9903_v38 = vadd.f32 %v13354_v20, %v9826_v51  ;;  %v9836_v39 = vpop.permute.xlu0 %9835  ;;  %v8732_v16 = vmul.f32 %v19998_v22, %v20037_v34  ;;  %v8735_v51 = vmul.f32 %v16433_v36, %v20038_v59  ;;  %v13357_v22 = vld [vmem:[%s18830_s2 + $0xa8] sm:$0xff]  ;;  %v20043_v59 = vld [vmem:[#allocation254_spill] sm:$0xff] }
 0x59a   : > { %v9906_v56 = vadd.f32 %v13357_v22, %v9832_v42  ;;  %v13359_v42 = vld [vmem:[%s18830_s2 + $0xb8] sm:$0xff]  ;;  %v20042_v34 = vld [vmem:[#allocation251_spill] sm:$0xff] }
 0x59b   : > { %10141 = vrot.lane.b32.xlu1 %v9901_v24, %s13389_s20  ;;  %10143 = vrot.lane.b32.xlu0 %v9902_v61, %s13389_s20  ;;  %v8783_v24 = vrot.slane %v8781_v55, 1  ;;  %v8760_v18 = vpack.c.bf16 %v8733_v33, %v8732_v16  ;;  %v9905_v61 = vadd.f32 %v13356_v25, %v9830_v47  ;;  %v8788_v55 = vrot.slane %v8786_v62, 1  ;;  %v13358_v47 = vld [vmem:[%s18830_s2 + $0xb0] sm:$0xff] }
 0x59c   : > { %v9838_v36 = vpop.permute.xlu1 %9837  ;;  %v8761_v35 = vpack.c.bf16 %v8735_v51, %v8734_v7  ;;  %v8736_v16 = vmul.f32 %v20004_v48, %v20042_v34  ;;  %v8790_v51 = vshrl.u32 %v8759_v52, 16  ;;  %v20044_v7 = vld [vmem:[#allocation253_spill] sm:$0xff] }
 0x59d   : > { %v9840_v33 = vpop.permute.xlu0 %9839  ;;  %v8794_v20 = vshll.u32 %v8760_v18, 16  ;;  %v8738_v25 = vmul.f32 %v20010_v15, %v20044_v7  ;;  %v13364_v7 = vld [vmem:[%s18830_s2 + $0xe0] sm:$0xff] }
 0x59e   : > { %v8792_v48 = vor.u32 %v8790_v51, %v8788_v55 }
 0x59f   : > { %10145 = vrot.lane.b32.xlu1 %v9903_v38, %s13389_s20  ;;  %10147 = vrot.lane.b32.xlu0 %v9904_v45, %s13389_s20  ;;  %v9907_v38 = vadd.f32 %v13358_v47, %v9834_v4  ;;  %v20041_v45 = vld [vmem:[#allocation246_spill] sm:$0xff]  ;;  %v8739_v4 = vmul.f32 %v20006_v0, %v20043_v59  ;;  %v8796_v2 = vrot.slane %v8794_v20, 1  ;;  %v13361_v0 = vld [vmem:[%s18830_s2 + $0xc8] sm:$0xff]  ;;  %v8806_v59 = vshrl.u32 %v8761_v35, 16 }
 0x5a0   : > { %12529 = vmatmul.mubr.msk.bf16.gmra.mrb[40].mxu1 %vm5774_vm6, %v8469_v31  ;;  %v8779_v31 = vshrl.u32 %v8758_v57, 16  ;;  %v9908_v57 = vadd.f32 %v13359_v42, %v9836_v39  ;;  %v9910_v52 = vadd.f32 %v13361_v0, %v9840_v33 }
 0x5a1   : > { %12532 = vmatprep.mubr.msk.bf16.mxu1 %vm5774_vm6, %v8470_v50  ;;  %v20040_v50 = vld [vmem:[#allocation252_spill] sm:$0xff]  ;;  %v8763_v20 = vpack.c.bf16 %v8739_v4, %v8738_v25 }
 0x5a2   : > { %v8784_v44 = vor.u32 %v8783_v24, %v8779_v31  ;;  %v8737_v19 = vmul.f32 %v16430_v21, %v20040_v50  ;;  %v8802_v21 = vshll.u32 %v8761_v35, 16  ;;  %v9842_v24 = vpop.permute.xlu1 %9841  ;;  %v8798_v31 = vshrl.u32 %v8760_v18, 16  ;;  %v13363_v18 = vld [vmem:[%s18830_s2 + $0xd8] sm:$0xff] }
 0x5a3   : > { %10149 = vrot.lane.b32.xlu1 %v9905_v61, %s13389_s20  ;;  %10151 = vrot.lane.b32.xlu0 %v9906_v56, %s13389_s20  ;;  %v13360_v61 = vld [vmem:[%s18830_s2 + $0xc0] sm:$0xff]  ;;  %v9844_v56 = vpop.permute.xlu0 %9843 }
 0x5a4   : > { %v8789_v62 = vsel %vm1850_vm5, %v8784_v44, %v8788_v55  ;;  %v8762_v39 = vpack.c.bf16 %v8737_v19, %v8736_v16  ;;  %v9909_v22 = vadd.f32 %v13360_v61, %v9838_v36  ;;  %v8804_v44 = vrot.slane %v8802_v21, 1  ;;  %v20045_v19 = vld [vmem:[#allocation256_spill] sm:$0xff]  ;;  %v20047_v21 = vld [vmem:[#allocation258_spill] sm:$0xff] }
 0x5a5   : > { %v8800_v15 = vor.u32 %v8798_v31, %v8796_v2  ;;  %v8741_v47 = vmul.f32 %v20008_v5, %v20045_v19  ;;  %v13362_v36 = vld [vmem:[%s18830_s2 + $0xd0] sm:$0xff]  ;;  %v9912_v33 = vadd.f32 %v13363_v18, %v9844_v56  ;;  %v8743_v34 = vmul.f32 %v20014_v30, %v20047_v21  ;;  %v13365_v30 = vld [vmem:[%s18830_s2 + $0xe8] sm:$0xff]  ;;  %v20051_v18 = vld [vmem:[#allocation262_spill] sm:$0xff] }
 0x5a6   : > { %v8810_v50 = vshll.u32 %v8762_v39, 16  ;;  %v9911_v55 = vadd.f32 %v13362_v36, %v9842_v24  ;;  %v9846_v42 = vpop.permute.xlu1 %9845  ;;  %v20048_v24 = vld [vmem:[#allocation257_spill] sm:$0xff]  ;;  %v8814_v35 = vshrl.u32 %v8762_v39, 16 }
 0x5a7   : > { %10153 = vrot.lane.b32.xlu1 %v9907_v38, %s13389_s20  ;;  %10155 = vrot.lane.b32.xlu0 %v9908_v57, %s13389_s20  ;;  %v8797_v38 = vsel %vm1850_vm5, %v8792_v48, %v8796_v2  ;;  %v8805_v5 = vsel %vm1850_vm5, %v8800_v15, %v8804_v44  ;;  %v8818_v57 = vshll.u32 %v8763_v20, 16  ;;  %v9848_v16 = vpop.permute.xlu0 %9847  ;;  %v8742_v2 = vmul.f32 %v20017_v40, %v20048_v24  ;;  %v13367_v39 = vld [vmem:[%s18830_s2 + $0xf8] sm:$0xff]  ;;  %v20053_v24 = vld [vmem:[#allocation264_spill] sm:$0xff] }
 0x5a8   : > { %12533 = vmatmul.mubr.msk.bf16.gmra.mrb[44].mxu1 %vm5774_vm6, %v20041_v45  ;;  %v20046_v45 = vld [vmem:[#allocation255_spill] sm:$0xff]  ;;  %v8812_v4 = vrot.slane %v8810_v50, 1  ;;  %v9913_v25 = vadd.f32 %v13364_v7, %v9846_v42  ;;  %v9914_v61 = vadd.f32 %v13365_v30, %v9848_v16  ;;  %v8822_v42 = vshrl.u32 %v8763_v20, 16 }
 0x5a9   : > { %12540 = vmatprep.mubr.msk.bf16.mxu1 %vm5774_vm6, %v8789_v62  ;;  %v8740_v62 = vmul.f32 %v20012_v6, %v20046_v45  ;;  %v8808_v6 = vor.u32 %v8806_v59, %v8804_v44  ;;  %v8765_v56 = vpack.c.bf16 %v8743_v34, %v8742_v2  ;;  %v13366_v44 = vld [vmem:[%s18830_s2 + $0xf0] sm:$0xff]  ;;  %v20052_v45 = vld [vmem:[#allocation261_spill] sm:$0xff]  ;;  %v20054_v2 = vld [vmem:[#allocation263_spill] sm:$0xff] }
 0x5aa   : > { %v9850_v48 = vpop.permute.xlu1 %9849  ;;  %v8816_v40 = vor.u32 %v8814_v35, %v8812_v4  ;;  %v8748_v7 = vmul.f32 %v16495_v3, %v20054_v2  ;;  %v20069_v2 = vld [vmem:[#allocation273_spill] sm:$0xff] }
 0x5ab   : > { %10157 = vrot.lane.b32.xlu1 %v9909_v22, %s13389_s20  ;;  %10159 = vrot.lane.b32.xlu0 %v9910_v52, %s13389_s20  ;;  %v8764_v51 = vpack.c.bf16 %v8741_v47, %v8740_v62  ;;  %v8820_v22 = vrot.slane %v8818_v57, 1  ;;  %v20049_v52 = vld [vmem:[#allocation260_spill] sm:$0xff]  ;;  %v9915_v15 = vadd.f32 %v13366_v44, %v9850_v48  ;;  %v9852_v50 = vpop.permute.xlu0 %9851  ;;  %v8813_v19 = vsel %vm1850_vm5, %v8808_v6, %v8812_v4  ;;  %v20059_v44 = vld [vmem:[#allocation270_spill] sm:$0xff] }
 0x5ac   : > { %v8745_v31 = vmul.f32 %v16475_v26, %v20049_v52  ;;  %v9916_v47 = vadd.f32 %v13367_v39, %v9852_v50  ;;  %v8834_v36 = vshll.u32 %v8765_v56, 16  ;;  %v8746_v62 = vmul.f32 %v20022_v53, %v20052_v45  ;;  %v20058_v52 = vld [vmem:[#allocation267_spill] sm:$0xff] }
 0x5ad   : > { %v8826_v0 = vshll.u32 %v8764_v51, 16  ;;  %v8821_v26 = vsel %vm1850_vm5, %v8816_v40, %v8820_v22  ;;  %v8824_v21 = vor.u32 %v8822_v42, %v8820_v22  ;;  %v8830_v34 = vshrl.u32 %v8764_v51, 16 }
 0x5ae   : > { %v8836_v16 = vrot.slane %v8834_v36, 1  ;;  %v20061_v36 = vld [vmem:[#allocation272_spill] sm:$0xff] }
 0x5af   : > { %10161 = vrot.lane.b32.xlu1 %v9911_v55, %s13389_s20  ;;  %10163 = vrot.lane.b32.xlu0 %v9912_v33, %s13389_s20  ;;  %v20050_v55 = vld [vmem:[#allocation259_spill] sm:$0xff]  ;;  %v8747_v33 = vmul.f32 %v16499_v17, %v20051_v18  ;;  %v8749_v17 = vmul.f32 %v16497_v32, %v20053_v24  ;;  %v8838_v32 = vshrl.u32 %v8765_v56, 16  ;;  %v20066_v24 = vld [vmem:[#allocation54_spill] sm:$0xff] }
 0x5b0   : > { %12541 = vmatmul.mubr.msk.bf16.vlgmr.msra.gmra.mrb[16].mxu1 %vm5774_vm6, %v8797_v38  ;;  %v8744_v38 = vmul.f32 %v16473_v54, %v20050_v55  ;;  %v20062_v18 = vld [vmem:[#allocation271_spill] sm:$0xff] }
 0x5b1   : > { %12544 = vmatprep.mubr.msk.bf16.mxu1 %vm5774_vm6, %v8805_v5  ;;  %v8828_v5 = vrot.slane %v8826_v0, 1  ;;  %v8767_v59 = vpack.c.bf16 %v8747_v33, %v8746_v62  ;;  %v8768_v30 = vpack.c.bf16 %v8749_v17, %v8748_v7  ;;  %v20057_v0 = vld [vmem:[#allocation268_spill] sm:$0xff]  ;;  %v8756_v33 = vmul.f32 %v16749_v28, %v20062_v18  ;;  %v20063_v62 = vld [vmem:[#allocation53_spill] sm:$0xff] }
 0x5b2   : > { %v8766_v57 = vpack.c.bf16 %v8745_v31, %v8744_v38  ;;  %v8753_v56 = vmul.f32 %v16522_v63, %v20057_v0  ;;  %v8752_v31 = vmul.f32 %v16520_v10, %v20058_v52  ;;  %v20083_v0 = vld [vmem:[#allocation75_spill] sm:$0xff] }
 0x5b3   : > { %10165 = vrot.lane.b32.xlu1 %v9913_v25, %s13389_s20  ;;  %10167 = vrot.lane.b32.xlu0 %v9914_v61, %s13389_s20  ;;  %v8832_v54 = vor.u32 %v8830_v34, %v8828_v5  ;;  %v8829_v20 = vsel %vm1850_vm5, %v8824_v21, %v8828_v5  ;;  %v8850_v51 = vshll.u32 %v8767_v59, 16  ;;  %v20055_v25 = vld [vmem:[#allocation266_spill] sm:$0xff]  ;;  %v20056_v61 = vld [vmem:[#allocation265_spill] sm:$0xff]  ;;  %v8854_v63 = vshrl.u32 %v8767_v59, 16  ;;  %v20064_v34 = vld [vmem:[#allocation51_spill] sm:$0xff] }
 0x5b4   : > { %v8842_v4 = vshll.u32 %v8766_v57, 16  ;;  %v8751_v6 = vmul.f32 %v16524_v41, %v20055_v25  ;;  %v8750_v35 = vmul.f32 %v16517_v60, %v20056_v61  ;;  %v8846_v22 = vshrl.u32 %v8766_v57, 16  ;;  %v20070_v25 = vld [vmem:[#allocation57_spill] sm:$0xff]  ;;  %v20075_v61 = vld [vmem:[#allocation62_spill] sm:$0xff] }
 0x5b5   : > { %v8837_v53 = vsel %vm1850_vm5, %v8832_v54, %v8836_v16  ;;  %v8852_v3 = vrot.slane %v8850_v51, 1  ;;  %v8858_v41 = vshll.u32 %v8768_v30, 16  ;;  %v8770_v50 = vpack.c.bf16 %v8753_v56, %v8752_v31  ;;  %v20065_v54 = vld [vmem:[#allocation52_spill] sm:$0xff]  ;;  %v20068_v51 = vld [vmem:[#allocation55_spill] sm:$0xff] }
 0x5b6   : > { %v8769_v48 = vpack.c.bf16 %v8751_v6, %v8750_v35  ;;  %v20071_v6 = vld [vmem:[#allocation59_spill] sm:$0xff]  ;;  %v20076_v35 = vld [vmem:[#allocation56_spill] sm:$0xff] }
 0x5b7   : > { %10169 = vrot.lane.b32.xlu1 %v9915_v15, %s13389_s20  ;;  %10171 = vrot.lane.b32.xlu0 %v9916_v47, %s13389_s20  ;;  %v8755_v15 = vmul.f32 %v16552_v37, %v20059_v44  ;;  %v8862_v47 = vshrl.u32 %v8768_v30, 16  ;;  %v8757_v37 = vmul.f32 %v16894_v58, %v20061_v36  ;;  %v8874_v38 = vshll.u32 %v8770_v50, 16  ;;  %v20074_v30 = vld [vmem:[#allocation274_spill] sm:$0xff]  ;;  %v20084_v56 = vld [vmem:[#allocation71_spill] sm:$0xff] }
 0x5b8   : > { %12545 = vmatmul.mubr.msk.bf16.gmra.mrb[20].mxu1 %vm5774_vm6, %v8813_v19  ;;  %v20060_v19 = vld [vmem:[#allocation269_spill] sm:$0xff]  ;;  %v8870_v58 = vshrl.u32 %v8769_v48, 16 }
 0x5b9   : > { %12548 = vmatprep.mubr.msk.bf16.mxu1 %vm5774_vm6, %v8821_v26  ;;  %v8754_v39 = vmul.f32 %v16547_v46, %v20060_v19  ;;  %v8772_v42 = vpack.c.bf16 %v8757_v37, %v8756_v33  ;;  %v8876_v5 = vrot.slane %v8874_v38, 1 }
 0x5bb   : > { %10301 = vrot.lane.b32.xlu1 %v17238_v9, %s13389_s20  ;;  %10303 = vrot.lane.b32.xlu0 %v19971_v49, %s13389_s20  ;;  %v8844_v9 = vrot.slane %v8842_v4, 1  ;;  %v8840_v49 = vor.u32 %v8838_v32, %v8836_v16  ;;  %v8771_v26 = vpack.c.bf16 %v8755_v15, %v8754_v39  ;;  %v8894_v59 = vshrl.u32 %v8772_v42, 16  ;;  %v20072_v32 = vld [vmem:[#allocation63_spill] sm:$0xff] }
 0x5bd   : > { %v8848_v40 = vor.u32 %v8846_v22, %v8844_v9  ;;  %v8845_v60 = vsel %vm1850_vm5, %v8840_v49, %v8844_v9  ;;  %v20073_v9 = vld [vmem:[#allocation60_spill] sm:$0xff]  ;;  %v20078_v22 = vld [vmem:[#allocation66_spill] sm:$0xff] }
 0x5be   : > { %v20077_v49 = vld [vmem:[#allocation68_spill] sm:$0xff] }
 0x5bf   : > { %10305 = vrot.lane.b32.xlu1 %v17261_v13, %s13389_s20  ;;  %10307 = vrot.lane.b32.xlu0 %v17266_v23, %s13389_s20  ;;  %v8853_v13 = vsel %vm1850_vm5, %v8848_v40, %v8852_v3  ;;  %v8866_v23 = vshll.u32 %v8769_v48, 16  ;;  %v20080_v48 = vld [vmem:[#allocation4_spill] sm:$0xff] }
 0x5c0   : > { %12549 = vmatmul.mubr.msk.bf16.gmra.mrb[24].mxu1 %vm5774_vm6, %v8829_v20  ;;  %v20067_v20 = vld [vmem:[#allocation58_spill] sm:$0xff]  ;;  %v20081_v40 = vld [vmem:[#allocation72_spill] sm:$0xff] }
 0x5c1   : > { %12552 = vmatprep.mubr.msk.bf16.mxu1 %vm5774_vm6, %v8837_v53  ;;  %v8868_v10 = vrot.slane %v8866_v23, 1 }
 0x5c3   : > { %10309 = vrot.lane.b32.xlu1 %v17276_v29, %s13389_s20  ;;  %10311 = vrot.lane.b32.xlu0 %v17281_v14, %s13389_s20  ;;  %v8860_v29 = vrot.slane %v8858_v41, 1  ;;  %v8856_v14 = vor.u32 %v8854_v63, %v8852_v3  ;;  %v8872_v28 = vor.u32 %v8870_v58, %v8868_v10  ;;  %v20079_v3 = vld [vmem:[#allocation69_spill] sm:$0xff]  ;;  %v20082_v41 = vld [vmem:[#allocation8_spill] sm:$0xff] }
 0x5c5   : > { %v8864_v55 = vor.u32 %v8862_v47, %v8860_v29  ;;  %v8861_v46 = vsel %vm1850_vm5, %v8856_v14, %v8860_v29  ;;  %v8877_v21 = vsel %vm1850_vm5, %v8872_v28, %v8876_v5  ;;  %v18031_v28 = vpop.permute.xlu0 %9951 }
 0x5c7   : > { %10313 = vrot.lane.b32.xlu1 %v17294_v43, %s13389_s20  ;;  %10315 = vrot.lane.b32.xlu0 %v17298_v8, %s13389_s20  ;;  %v8869_v43 = vsel %vm1850_vm5, %v8864_v55, %v8868_v10  ;;  %v8882_v8 = vshll.u32 %v8771_v26, 16 }
 0x5c8   : > { %12553 = vmatmul.mubr.msk.bf16.gmra.mrb[28].mxu1 %vm5774_vm6, %v8845_v60  ;;  %v18017_v60 = vld [vmem:[%s18836_s8] ss:$0 sm:$0xff] }
 0x5c9   : > { %12556 = vmatprep.mubr.msk.bf16.mxu1 %vm5774_vm6, %v8853_v13  ;;  %v8884_v57 = vrot.slane %v8882_v8, 1 }
 0x5cb   : > { %10317 = vrot.lane.b32.xlu1 %v17311_v1, %s13389_s20  ;;  %10319 = vrot.lane.b32.xlu0 %v17316_v11, %s13389_s20  ;;  %v8878_v1 = vshrl.u32 %v8770_v50, 16  ;;  %v8890_v11 = vshll.u32 %v8772_v42, 16 }
 0x5cd   : > { %v8880_v45 = vor.u32 %v8878_v1, %v8876_v5  ;;  %v8892_v16 = vrot.slane %v8890_v11, 1 }
 0x5cf   : > { %10321 = vrot.lane.b32.xlu1 %v19980_v27, %s13389_s20  ;;  %10323 = vrot.lane.b32.xlu0 %v19981_v12, %s13389_s20  ;;  %v8885_v27 = vsel %vm1850_vm5, %v8880_v45, %v8884_v57  ;;  %v8886_v12 = vshrl.u32 %v8771_v26, 16  ;;  %v8896_v17 = vor.u32 %v8894_v59, %v8892_v16 }
 0x5d0   : > { %12557 = vmatmul.mubr.msk.bf16.gmra.mrb[32].mxu1 %vm5774_vm6, %v8861_v46 }
 0x5d1   : > { %12560 = vmatprep.mubr.msk.bf16.mxu1 %vm5774_vm6, %v8869_v43  ;;  %v8888_v4 = vor.u32 %v8886_v12, %v8884_v57  ;;  %v8897_v7 = vsel %vm1850_vm5, %v8896_v17, %v20069_v2  ;;  %v18029_v43 = vpop.permute.xlu1 %9949 }
 0x5d3   : > { %10325 = vrot.lane.b32.xlu1 %v20063_v62, %s13389_s20  ;;  %10327 = vrot.lane.b32.xlu0 %v20064_v34, %s13389_s20  ;;  %v8893_v53 = vsel %vm1850_vm5, %v8888_v4, %v8892_v16 }
 0x5d7   : > { %10329 = vrot.lane.b32.xlu1 %v20065_v54, %s13389_s20  ;;  %10331 = vrot.lane.b32.xlu0 %v20066_v24, %s13389_s20  ;;  %v18041_v54 = vpop.permute.xlu0 %9955 }
 0x5d8   : > { %12561 = vmatmul.mubr.msk.bf16.gmra.mrb[36].mxu1 %vm5774_vm6, %v8877_v21 }
 0x5d9   : > { %12564 = vmatprep.mubr.msk.bf16.mxu1 %vm5774_vm6, %v8885_v27  ;;  %v18036_v27 = vpop.permute.xlu1 %9953 }
 0x5db   : > { %10333 = vrot.lane.b32.xlu1 %v20067_v20, %s13389_s20  ;;  %10335 = vrot.lane.b32.xlu0 %v20068_v51, %s13389_s20 }
 0x5df   : > { %10337 = vrot.lane.b32.xlu1 %v20070_v25, %s13389_s20  ;;  %10339 = vrot.lane.b32.xlu0 %v20071_v6, %s13389_s20 }
 0x5e0   : > { %12565 = vmatmul.mubr.msk.bf16.gmra.mrb[40].mxu1 %vm5774_vm6, %v8893_v53 }
 0x5e1   : > { %12568 = vmatprep.mubr.msk.bf16.mxu1 %vm5774_vm6, %v8897_v7  ;;  %v18043_v7 = vpop.permute.xlu1 %9957 }
 0x5e3   : > { %10341 = vrot.lane.b32.xlu1 %v20072_v32, %s13389_s20  ;;  %10343 = vrot.lane.b32.xlu0 %v20073_v9, %s13389_s20 }
 0x5e7   : > { %10345 = vrot.lane.b32.xlu1 %v20075_v61, %s13389_s20  ;;  %10347 = vrot.lane.b32.xlu0 %v20076_v35, %s13389_s20 }
 0x5e8   : > { %12569 = vmatmul.mubr.msk.bf16.gmra.mrb[44].mxu1 %vm5774_vm6, %v20074_v30  ;;  %v18048_v30 = vpop.permute.xlu0 %9959 }
 0x5eb   : > { %10349 = vrot.lane.b32.xlu1 %v20077_v49, %s13389_s20  ;;  %10351 = vrot.lane.b32.xlu0 %v20078_v22, %s13389_s20 }
 0x5ef   : > { %10353 = vrot.lane.b32.xlu1 %v20079_v3, %s13389_s20  ;;  %10355 = vrot.lane.b32.xlu0 %v20080_v48, %s13389_s20 }
 0x5f3   : > { %10357 = vrot.lane.b32.xlu1 %v20081_v40, %s13389_s20  ;;  %10359 = vrot.lane.b32.xlu0 %v20082_v41, %s13389_s20  ;;  %v18053_v41 = vpop.permute.xlu1 %9961 }
 0x5f7   : > { %10361 = vrot.lane.b32.xlu1 %v20083_v0, %s13389_s20  ;;  %10363 = vrot.lane.b32.xlu0 %v20084_v56, %s13389_s20 }
 0x683   : > { %v12542_v13 = vpop.f32.mrb[16].mxu1 }
 0x684   : > { %v9159_v23 = vadd.f32 %v12542_v13, %v18017_v60  ;;  %v8991_v52 = vpop.f32.mrb[17].mxu1 }
 0x685   : > { %v9157_v31 = vadd.f32 %v18017_v60, %v8991_v52  ;;  %v12543_v44 = vpop.f32.mrb[18].mxu1 }
 0x686   : > { %v9160_v15 = vadd.f32 %v12543_v44, %v18017_v60  ;;  %v8994_v63 = vpop.f32.mrb[19].mxu1  ;;  %v9191_v50 = vmax.f32 %v9159_v23, 0.0  ;;  %v18055_v23 = vpop.permute.xlu0 %9963 }
 0x687   : > { %v9158_v29 = vadd.f32 %v18017_v60, %v8994_v63  ;;  %v9189_v39 = vmax.f32 %v9157_v31, 0.0 }
 0x688   : > { %v9192_v19 = vmax.f32 %v9160_v15, 0.0 }
 0x689   : > { %v9190_v14 = vmax.f32 %v9158_v29, 0.0 }
 0x68a   : > { %v9222_v47 = vpack.c.bf16 %v9192_v19, %v9191_v50  ;;  %v18063_v19 = vpop.permute.xlu1 %9965 }
 0x68b   : > { %v9221_v10 = vpack.c.bf16 %v9190_v14, %v9189_v39  ;;  %v12546_v26 = vpop.f32.mrb[20].mxu1 }
 0x68c   : > { %v9163_v36 = vadd.f32 %v12546_v26, %v18017_v60  ;;  %v9007_v37 = vpop.f32.mrb[21].mxu1  ;;  %v18065_v26 = vpop.permute.xlu0 %9967 }
 0x68d   : > { %v9161_v55 = vadd.f32 %v18017_v60, %v9007_v37  ;;  %v12547_v38 = vpop.f32.mrb[22].mxu1  ;;  %12576 = vmatprep.mubr.msk.bf16.mxu0 %vm5774_vm6, %v9221_v10 }
 0x68e   : > { %v9164_v18 = vadd.f32 %v12547_v38, %v18017_v60  ;;  %v9010_v33 = vpop.f32.mrb[23].mxu1  ;;  %12577 = vmatmul.mubr.msk.bf16.vlgmr.msra.gmra.mrb[32].mxu0 %vm5774_vm6, %v9222_v47  ;;  %v9195_v8 = vmax.f32 %v9163_v36, 0.0 }
 0x68f   : > { %v9162_v46 = vadd.f32 %v18017_v60, %v9010_v33  ;;  %v9193_v58 = vmax.f32 %v9161_v55, 0.0 }
 0x690   : > { %v9196_v42 = vmax.f32 %v9164_v18, 0.0 }
 0x691   : > { %v9194_v5 = vmax.f32 %v9162_v46, 0.0 }
 0x692   : > { %v9224_v1 = vpack.c.bf16 %v9196_v42, %v9195_v8  ;;  %v18070_v8 = vpop.permute.xlu1 %9969 }
 0x693   : > { %v9223_v57 = vpack.c.bf16 %v9194_v5, %v9193_v58  ;;  %v12550_v11 = vpop.f32.mrb[24].mxu1 }
 0x694   : > { %v9167_v45 = vadd.f32 %v12550_v11, %v18017_v60  ;;  %v9023_v62 = vpop.f32.mrb[25].mxu1 }
 0x695   : > { %v9165_v21 = vadd.f32 %v18017_v60, %v9023_v62  ;;  %v12551_v34 = vpop.f32.mrb[26].mxu1  ;;  %12580 = vmatprep.mubr.msk.bf16.mxu0 %vm5774_vm6, %v9223_v57 }
 0x696   : > { %v9168_v16 = vadd.f32 %v12551_v34, %v18017_v60  ;;  %v9026_v12 = vpop.f32.mrb[27].mxu1  ;;  %12581 = vmatmul.mubr.msk.bf16.gmra.mrb[36].mxu0 %vm5774_vm6, %v9224_v1  ;;  %v9199_v4 = vmax.f32 %v9167_v45, 0.0  ;;  %v18075_v1 = vpop.permute.xlu0 %9971 }
 0x697   : > { %v9166_v59 = vadd.f32 %v18017_v60, %v9026_v12  ;;  %v9197_v17 = vmax.f32 %v9165_v21, 0.0  ;;  %v18077_v12 = vpop.permute.xlu1 %9973 }
 0x698   : > { %v9200_v24 = vmax.f32 %v9168_v16, 0.0  ;;  %20085 = vst [vmem:[#allocation73_spill] sm:$0xff] %v18077_v12 }
 0x699   : > { %v9198_v20 = vmax.f32 %v9166_v59, 0.0 }
 0x69a   : > { %v9226_v53 = vpack.c.bf16 %v9200_v24, %v9199_v4 }
 0x69b   : > { %v9225_v51 = vpack.c.bf16 %v9198_v20, %v9197_v17  ;;  %v12554_v2 = vpop.f32.mrb[28].mxu1  ;;  %v18082_v20 = vpop.permute.xlu0 %9975 }
 0x69c   : > { %v9171_v25 = vadd.f32 %v12554_v2, %v18017_v60  ;;  %v9039_v6 = vpop.f32.mrb[29].mxu1  ;;  %20086 = vst [vmem:[#allocation79_spill] sm:$0xff] %v18082_v20 }
 0x69d   : > { %v9169_v32 = vadd.f32 %v18017_v60, %v9039_v6  ;;  %v12555_v9 = vpop.f32.mrb[30].mxu1  ;;  %12584 = vmatprep.mubr.msk.bf16.mxu0 %vm5774_vm6, %v9225_v51 }
 0x69e   : > { %v9172_v61 = vadd.f32 %v12555_v9, %v18017_v60  ;;  %v9042_v35 = vpop.f32.mrb[31].mxu1  ;;  %12585 = vmatmul.mubr.msk.bf16.gmra.mrb[40].mxu0 %vm5774_vm6, %v9226_v53  ;;  %v9203_v22 = vmax.f32 %v9171_v25, 0.0 }
 0x69f   : > { %v9170_v49 = vadd.f32 %v18017_v60, %v9042_v35  ;;  %v9201_v48 = vmax.f32 %v9169_v32, 0.0 }
 0x6a0   : > { %v9204_v3 = vmax.f32 %v9172_v61, 0.0  ;;  %v18087_v61 = vpop.permute.xlu1 %9977 }
 0x6a1   : > { %v9202_v40 = vmax.f32 %v9170_v49, 0.0  ;;  %20087 = vst [vmem:[#allocation76_spill] sm:$0xff] %v18087_v61 }
 0x6a2   : > { %v9228_v0 = vpack.c.bf16 %v9204_v3, %v9203_v22  ;;  %v18089_v3 = vpop.permute.xlu0 %9979 }
 0x6a3   : > { %v9227_v56 = vpack.c.bf16 %v9202_v40, %v9201_v48  ;;  %v12558_v13 = vpop.f32.mrb[32].mxu1  ;;  %20088 = vst [vmem:[#allocation82_spill] sm:$0xff] %v18089_v3 }
 0x6a4   : > { %v9175_v52 = vadd.f32 %v12558_v13, %v18017_v60  ;;  %v9055_v31 = vpop.f32.mrb[33].mxu1 }
 0x6a5   : > { %v9173_v44 = vadd.f32 %v18017_v60, %v9055_v31  ;;  %v12559_v15 = vpop.f32.mrb[34].mxu1  ;;  %12588 = vmatprep.mubr.msk.bf16.mxu0 %vm5774_vm6, %v9227_v56 }
 0x6a6   : > { %v9176_v63 = vadd.f32 %v12559_v15, %v18017_v60  ;;  %v9058_v29 = vpop.f32.mrb[35].mxu1  ;;  %12589 = vmatmul.mubr.msk.bf16.gmra.mrb[44].mxu0 %vm5774_vm6, %v9228_v0  ;;  %v9207_v39 = vmax.f32 %v9175_v52, 0.0 }
 0x6a7   : > { %v9174_v50 = vadd.f32 %v18017_v60, %v9058_v29  ;;  %v9205_v47 = vmax.f32 %v9173_v44, 0.0  ;;  %v18097_v44 = vpop.permute.xlu1 %9981 }
 0x6a8   : > { %v9208_v14 = vmax.f32 %v9176_v63, 0.0  ;;  %20089 = vst [vmem:[#allocation80_spill] sm:$0xff] %v18097_v44 }
 0x6a9   : > { %v9206_v10 = vmax.f32 %v9174_v50, 0.0 }
 0x6aa   : > { %v9230_v36 = vpack.c.bf16 %v9208_v14, %v9207_v39  ;;  %v18099_v39 = vpop.permute.xlu0 %9983 }
 0x6ab   : > { %v9229_v37 = vpack.c.bf16 %v9206_v10, %v9205_v47  ;;  %v12562_v55 = vpop.f32.mrb[36].mxu1  ;;  %20090 = vst [vmem:[#allocation85_spill] sm:$0xff] %v18099_v39  ;;  %v18102_v10 = vpop.permute.xlu1 %9985 }
 0x6ac   : > { %v9179_v38 = vadd.f32 %v12562_v55, %v18017_v60  ;;  %v9071_v18 = vpop.f32.mrb[37].mxu1  ;;  %20091 = vst [vmem:[#allocation83_spill] sm:$0xff] %v18102_v10 }
 0x6ad   : > { %v9177_v33 = vadd.f32 %v18017_v60, %v9071_v18  ;;  %v12563_v46 = vpop.f32.mrb[38].mxu1  ;;  %12592 = vmatprep.mubr.msk.bf16.mxu0 %vm5774_vm6, %v9229_v37 }
 0x6ae   : > { %v9180_v42 = vadd.f32 %v12563_v46, %v18017_v60  ;;  %v9074_v58 = vpop.f32.mrb[39].mxu1  ;;  %12593 = vmatmul.mubr.msk.bf16.gmra.mrb[48].mxu0 %vm5774_vm6, %v9230_v36  ;;  %v9211_v57 = vmax.f32 %v9179_v38, 0.0  ;;  %v18105_v36 = vpop.permute.xlu0 %9987 }
 0x6af   : > { %v9178_v5 = vadd.f32 %v18017_v60, %v9074_v58  ;;  %v9209_v45 = vmax.f32 %v9177_v33, 0.0  ;;  %20092 = vst [vmem:[#allocation88_spill] sm:$0xff] %v18105_v36  ;;  %v18107_v37 = vpop.permute.xlu1 %9989 }
 0x6b0   : > { %v9212_v11 = vmax.f32 %v9180_v42, 0.0  ;;  %20093 = vst [vmem:[#allocation86_spill] sm:$0xff] %v18107_v37 }
 0x6b1   : > { %v9210_v62 = vmax.f32 %v9178_v5, 0.0 }
 0x6b2   : > { %v9232_v21 = vpack.c.bf16 %v9212_v11, %v9211_v57 }
 0x6b3   : > { %v9231_v34 = vpack.c.bf16 %v9210_v62, %v9209_v45  ;;  %v12566_v16 = vpop.f32.mrb[40].mxu1  ;;  %v18111_v55 = vpop.permute.xlu1 %9993 }
 0x6b4   : > { %v9183_v59 = vadd.f32 %v12566_v16, %v18017_v60  ;;  %v9087_v4 = vpop.f32.mrb[41].mxu1  ;;  %20095 = vst [vmem:[#allocation89_spill] sm:$0xff] %v18111_v55 }
 0x6b5   : > { %v9181_v24 = vadd.f32 %v18017_v60, %v9087_v4  ;;  %v12567_v17 = vpop.f32.mrb[42].mxu1  ;;  %12596 = vmatprep.mubr.msk.bf16.mxu0 %vm5774_vm6, %v9231_v34 }
 0x6b6   : > { %v9184_v53 = vadd.f32 %v12567_v17, %v18017_v60  ;;  %v9090_v51 = vpop.f32.mrb[43].mxu1  ;;  %12597 = vmatmul.mubr.msk.bf16.gmra.mrb[52].mxu0 %vm5774_vm6, %v9232_v21  ;;  %v9215_v25 = vmax.f32 %v9183_v59, 0.0 }
 0x6b7   : > { %v9182_v2 = vadd.f32 %v18017_v60, %v9090_v51  ;;  %v9213_v32 = vmax.f32 %v9181_v24, 0.0  ;;  %v18115_v18 = vpop.permute.xlu1 %9997 }
 0x6b8   : > { %v9216_v6 = vmax.f32 %v9184_v53, 0.0  ;;  %20097 = vst [vmem:[#allocation92_spill] sm:$0xff] %v18115_v18 }
 0x6b9   : > { %v9214_v9 = vmax.f32 %v9182_v2, 0.0 }
 0x6ba   : > { %v9234_v35 = vpack.c.bf16 %v9216_v6, %v9215_v25 }
 0x6bb   : > { %v9233_v49 = vpack.c.bf16 %v9214_v9, %v9213_v32  ;;  %v12570_v22 = vpop.f32.mrb[44].mxu1  ;;  %v18119_v46 = vpop.permute.xlu1 %10001 }
 0x6bc   : > { %v9187_v48 = vadd.f32 %v12570_v22, %v18017_v60  ;;  %v9103_v40 = vpop.f32.mrb[45].mxu1  ;;  %20099 = vst [vmem:[#allocation94_spill] sm:$0xff] %v18119_v46 }
 0x6bd   : > { %v9185_v0 = vadd.f32 %v18017_v60, %v9103_v40  ;;  %v12571_v56 = vpop.f32.mrb[46].mxu1  ;;  %12600 = vmatprep.mubr.msk.bf16.mxu0 %vm5774_vm6, %v9233_v49 }
 0x6be   : > { %v9188_v13 = vadd.f32 %v12571_v56, %v18017_v60  ;;  %v9106_v52 = vpop.f32.mrb[47].mxu1  ;;  %12601 = vmatmul.mubr.msk.bf16.gmra.mrb[56].mxu0 %vm5774_vm6, %v9234_v35  ;;  %v9219_v15 = vmax.f32 %v9187_v48, 0.0 }
 0x6bf   : > { %v9186_v31 = vadd.f32 %v18017_v60, %v9106_v52  ;;  %v9217_v29 = vmax.f32 %v9185_v0, 0.0  ;;  %v18109_v60 = vpop.permute.xlu0 %9991  ;;  %v18123_v58 = vpop.permute.xlu1 %10005 }
 0x6c0   : > { %v9220_v63 = vmax.f32 %v9188_v13, 0.0  ;;  %20094 = vst [vmem:[#allocation91_spill] sm:$0xff] %v18109_v60  ;;  %20101 = vst [vmem:[#allocation96_spill] sm:$0xff] %v18123_v58 }
 0x6c1   : > { %v9218_v50 = vmax.f32 %v9186_v31, 0.0 }
 0x6c2   : > { %v9236_v14 = vpack.c.bf16 %v9220_v63, %v9219_v15 }
 0x6c3   : > { %v9235_v47 = vpack.c.bf16 %v9218_v50, %v9217_v29  ;;  %v18113_v38 = vpop.permute.xlu0 %9995  ;;  %v18127_v57 = vpop.permute.xlu1 %10009 }
 0x6c4   : > { %20096 = vst [vmem:[#allocation93_spill] sm:$0xff] %v18113_v38  ;;  %20103 = vst [vmem:[#allocation98_spill] sm:$0xff] %v18127_v57 }
 0x6c5   : > { %12604 = vmatprep.mubr.msk.bf16.mxu0 %vm5774_vm6, %v9235_v47 }
 0x6c6   : > { %12605 = vmatmul.mubr.msk.bf16.gmra.mrb[60].mxu0 %vm5774_vm6, %v9236_v14 }
 0x6c7   : > { %v18117_v33 = vpop.permute.xlu0 %9999  ;;  %v18131_v45 = vpop.permute.xlu1 %10109 }
 0x6c8   : > { %20098 = vst [vmem:[#allocation95_spill] sm:$0xff] %v18117_v33 }
 0x6cb   : > { %v18121_v42 = vpop.permute.xlu0 %10003  ;;  %v18135_v21 = vpop.permute.xlu1 %10113 }
 0x6cc   : > { %20100 = vst [vmem:[#allocation97_spill] sm:$0xff] %v18121_v42 }
 0x6cf   : > { %v18125_v5 = vpop.permute.xlu0 %10007  ;;  %v18139_v16 = vpop.permute.xlu1 %10117 }
 0x6d0   : > { %20102 = vst [vmem:[#allocation99_spill] sm:$0xff] %v18125_v5 }
 0x6d3   : > { %v18129_v11 = vpop.permute.xlu0 %10011  ;;  %v18143_v4 = vpop.permute.xlu1 %10121 }
 0x6d4   : > { %20104 = vst [vmem:[#allocation101_spill] sm:$0xff] %v18129_v11 }
 0x6d7   : > { %v18133_v62 = vpop.permute.xlu0 %10111  ;;  %v18147_v17 = vpop.permute.xlu1 %10125 }
 0x6d8   : > { %20105 = vst [vmem:[#allocation100_spill] sm:$0xff] %v18147_v17 }
 0x6db   : > { %v18137_v34 = vpop.permute.xlu0 %10115  ;;  %v18151_v51 = vpop.permute.xlu1 %10129 }
 0x6df   : > { %v18141_v59 = vpop.permute.xlu0 %10119  ;;  %v18155_v25 = vpop.permute.xlu1 %10133 }
 0x6e0   : > { %20107 = vst [vmem:[#allocation103_spill] sm:$0xff] %v18155_v25 }
 0x6e3   : > { %v18145_v24 = vpop.permute.xlu0 %10123  ;;  %v18159_v32 = vpop.permute.xlu1 %10137 }
 0x6e4   : > { %20109 = vst [vmem:[#allocation109_spill] sm:$0xff] %v18159_v32 }
 0x6e7   : > { %v18149_v53 = vpop.permute.xlu0 %10127  ;;  %v18163_v35 = vpop.permute.xlu1 %10141 }
 0x6e8   : > { %20106 = vst [vmem:[#allocation105_spill] sm:$0xff] %v18149_v53  ;;  %20111 = vst [vmem:[#allocation104_spill] sm:$0xff] %v18163_v35 }
 0x6eb   : > { %v18153_v2 = vpop.permute.xlu0 %10131  ;;  %v18167_v22 = vpop.permute.xlu1 %10145 }
 0x6ec   : > { %20113 = vst [vmem:[#allocation111_spill] sm:$0xff] %v18167_v22 }
 0x6ef   : > { %v18157_v6 = vpop.permute.xlu0 %10135  ;;  %v18171_v40 = vpop.permute.xlu1 %10149 }
 0x6f0   : > { %20108 = vst [vmem:[#allocation108_spill] sm:$0xff] %v18157_v6  ;;  %20115 = vst [vmem:[#allocation110_spill] sm:$0xff] %v18171_v40 }
 0x6f3   : > { %v18161_v9 = vpop.permute.xlu0 %10139  ;;  %v18175_v56 = vpop.permute.xlu1 %10153 }
 0x6f4   : > { %20110 = vst [vmem:[#allocation107_spill] sm:$0xff] %v18161_v9  ;;  %20117 = vst [vmem:[#allocation116_spill] sm:$0xff] %v18175_v56 }
 0x6f7   : > { %v18165_v49 = vpop.permute.xlu0 %10143  ;;  %v18179_v52 = vpop.permute.xlu1 %10157 }
 0x6f8   : > { %20112 = vst [vmem:[#allocation106_spill] sm:$0xff] %v18165_v49  ;;  %20119 = vst [vmem:[#allocation115_spill] sm:$0xff] %v18179_v52 }
 0x6fb   : > { %v18169_v48 = vpop.permute.xlu0 %10147  ;;  %v18183_v15 = vpop.permute.xlu1 %10161 }
 0x6fc   : > { %20114 = vst [vmem:[#allocation112_spill] sm:$0xff] %v18169_v48  ;;  %20121 = vst [vmem:[#allocation78_spill] sm:$0xff] %v18183_v15 }
 0x6ff   : > { %v18173_v0 = vpop.permute.xlu0 %10151  ;;  %v18187_v29 = vpop.permute.xlu1 %10165 }
 0x700   : > { %20116 = vst [vmem:[#allocation113_spill] sm:$0xff] %v18173_v0  ;;  %20123 = vst [vmem:[#allocation23_spill] sm:$0xff] %v18187_v29 }
 0x703   : > { %v18177_v13 = vpop.permute.xlu0 %10155  ;;  %v18191_v14 = vpop.permute.xlu1 %10169 }
 0x704   : > { %20118 = vst [vmem:[#allocation117_spill] sm:$0xff] %v18177_v13  ;;  %20125 = vst [vmem:[#allocation30_spill] sm:$0xff] %v18191_v14 }
 0x707   : > { %v18181_v31 = vpop.permute.xlu0 %10159  ;;  %v18195_v5 = vpop.permute.xlu1 %10301 }
 0x708   : > { %20120 = vst [vmem:[#allocation118_spill] sm:$0xff] %v18181_v31 }
 0x70b   : > { %v18185_v63 = vpop.permute.xlu0 %10163  ;;  %v18199_v11 = vpop.permute.xlu1 %10305 }
 0x70c   : > { %20122 = vst [vmem:[#allocation61_spill] sm:$0xff] %v18185_v63 }
 0x70f   : > { %v18189_v50 = vpop.permute.xlu0 %10167  ;;  %v18203_v31 = vpop.permute.xlu1 %10309 }
 0x710   : > { %20124 = vst [vmem:[#allocation22_spill] sm:$0xff] %v18189_v50  ;;  %v18210_v50 = vld [vmem:[%s18838_s10] ss:$0 sm:$0xff] }
 0x713   : > { %v18193_v47 = vpop.permute.xlu0 %10171 }
 0x714   : > { %20126 = vst [vmem:[#allocation37_spill] sm:$0xff] %v18193_v47  ;;  %v18218_v47 = vpop.permute.xlu1 %10313 }
 0x717   : > { %v18197_v58 = vpop.permute.xlu0 %10303 }
 0x718   : > { %v18250_v13 = vpop.permute.xlu1 %10317 }
 0x71b   : > { %v18201_v57 = vpop.permute.xlu0 %10307 }
 0x71f   : > { %v18205_v52 = vpop.permute.xlu0 %10311 }
 0x723   : > { %v18226_v15 = vpop.permute.xlu0 %10315 }
 0x727   : > { %v18252_v38 = vpop.permute.xlu0 %10319 }
 0x72b   : > { %v18284_v44 = vpop.permute.xlu0 %10323 }
 0x72f   : > { %v18310_v12 = vpop.permute.xlu0 %10327 }
 0x761   : > { %v12578_v29 = vpop.f32.mrb[32].mxu0 }
 0x762   : > { %v18221_v14 = vadd.f32 %v12578_v29, %v18210_v50  ;;  %v9342_v33 = vpop.f32.mrb[33].mxu0 }
 0x763   : > { %v18224_v18 = vadd.f32 %v18210_v50, %v9342_v33  ;;  %v12579_v63 = vpop.f32.mrb[34].mxu0 }
 0x764   : > { %9471 = vst.msk [vmem:[%s18216_s19 + $0x10] sm:$0xff] %vm1024_vm2, %v18221_v14  ;;  %v9503_v42 = vmin.f32 %v18221_v14, 4.1351666  ;;  %v18233_v46 = vadd.f32 %v12579_v63, %v18210_v50  ;;  %v9345_v0 = vpop.f32.mrb[35].mxu0 }
 0x765   : > { %9469 = vst.msk [vmem:[%s18216_s19] sm:$0xff] %vm1024_vm2, %v18224_v18  ;;  %v9501_v29 = vmin.f32 %v18224_v18, 4.1351666  ;;  %v18240_v33 = vadd.f32 %v18210_v50, %v9345_v0 }
 0x766   : > { %v10241_v40 = vmul.f32 1.442695, %v9503_v42  ;;  %9472 = vst.msk [vmem:[%s18216_s19 + $0x18] sm:$0xff] %vm1024_vm2, %v18233_v46  ;;  %v9504_v60 = vmin.f32 %v18233_v46, 4.1351666 }
 0x767   : > { %v10237_v37 = vmul.f32 1.442695, %v9501_v29  ;;  %9470 = vst.msk [vmem:[%s18216_s19 + $0x8] sm:$0xff] %vm1024_vm2, %v18240_v33  ;;  %v9502_v63 = vmin.f32 %v18240_v33, 4.1351666 }
 0x768   : > { %13195 = vpow2.f32 %v10241_v40  ;;  %v10243_v56 = vmul.f32 1.442695, %v9504_v60 }
 0x769   : > { %13197 = vpow2.f32 %v10237_v37  ;;  %v10239_v0 = vmul.f32 1.442695, %v9502_v63  ;;  %v12582_v42 = vpop.f32.mrb[36].mxu0 }
 0x76a   : > { %13199 = vpow2.f32 %v10243_v56  ;;  %v18255_v29 = vadd.f32 %v12582_v42, %v18210_v50  ;;  %v9358_v55 = vpop.f32.mrb[37].mxu0 }
 0x76b   : > { %13201 = vpow2.f32 %v10239_v0  ;;  %v18258_v49 = vadd.f32 %v18210_v50, %v9358_v55  ;;  %v12583_v35 = vpop.f32.mrb[38].mxu0  ;;  %v18274_v55 = vpop.permute.xlu1 %10321 }
 0x76c   : > { %9475 = vst.msk [vmem:[%s18216_s19 + $0x30] sm:$0xff] %vm1024_vm2, %v18255_v29  ;;  %v9507_v37 = vmin.f32 %v18255_v29, 4.1351666  ;;  %v18265_v60 = vadd.f32 %v12583_v35, %v18210_v50  ;;  %v9361_v40 = vpop.f32.mrb[39].mxu0 }
 0x76d   : > { %9473 = vst.msk [vmem:[%s18216_s19 + $0x20] sm:$0xff] %vm1024_vm2, %v18258_v49  ;;  %v9505_v56 = vmin.f32 %v18258_v49, 4.1351666  ;;  %v18272_v63 = vadd.f32 %v18210_v50, %v9361_v40 }
 0x76e   : > { %v10249_v0 = vmul.f32 1.442695, %v9507_v37  ;;  %9476 = vst.msk [vmem:[%s18216_s19 + $0x38] sm:$0xff] %vm1024_vm2, %v18265_v60  ;;  %v9508_v42 = vmin.f32 %v18265_v60, 4.1351666 }
 0x76f   : > { %v10245_v39 = vmul.f32 1.442695, %v9505_v56  ;;  %9474 = vst.msk [vmem:[%s18216_s19 + $0x28] sm:$0xff] %vm1024_vm2, %v18272_v63  ;;  %v9506_v35 = vmin.f32 %v18272_v63, 4.1351666 }
 0x770   : > { %13203 = vpow2.f32 %v10249_v0  ;;  %v10251_v40 = vmul.f32 1.442695, %v9508_v42 }
 0x771   : > { %13205 = vpow2.f32 %v10245_v39  ;;  %v10247_v48 = vmul.f32 1.442695, %v9506_v35  ;;  %v12586_v22 = vpop.f32.mrb[40].mxu0  ;;  %v18293_v39 = vpop.permute.xlu1 %10325 }
 0x772   : > { %v13196_v37 = vpop.eup %13195  ;;  %13207 = vpow2.f32 %v10251_v40  ;;  %v18287_v36 = vadd.f32 %v12586_v22, %v18210_v50  ;;  %v9374_v56 = vpop.f32.mrb[41].mxu0 }
 0x773   : > { %v13198_v10 = vpop.eup %13197  ;;  %13209 = vpow2.f32 %v10247_v48  ;;  %v18290_v6 = vadd.f32 %v18210_v50, %v9374_v56  ;;  %v12587_v25 = vpop.f32.mrb[42].mxu0  ;;  %v10399_v0 = vmul.f32 %v13196_v37, %v18199_v11 }
 0x774   : > { %v13200_v42 = vpop.eup %13199  ;;  %9479 = vst.msk [vmem:[%s18216_s19 + $0x50] sm:$0xff] %vm1024_vm2, %v18287_v36  ;;  %v9511_v22 = vmin.f32 %v18287_v36, 4.1351666  ;;  %v18300_v35 = vadd.f32 %v12587_v25, %v18210_v50  ;;  %v9377_v48 = vpop.f32.mrb[43].mxu0  ;;  %v10397_v20 = vmul.f32 %v13198_v10, %v18195_v5 }
 0x775   : > { %v13202_v40 = vpop.eup %13201  ;;  %9477 = vst.msk [vmem:[%s18216_s19 + $0x40] sm:$0xff] %vm1024_vm2, %v18290_v6  ;;  %v9509_v56 = vmin.f32 %v18290_v6, 4.1351666  ;;  %v18307_v11 = vadd.f32 %v18210_v50, %v9377_v48  ;;  %v10431_v37 = vmul.f32 0.5, %v10399_v0  ;;  %v10400_v32 = vmul.f32 %v13200_v42, %v18201_v57  ;;  %v18323_v57 = vpop.permute.xlu1 %10329 }
 0x776   : > { %v10257_v9 = vmul.f32 1.442695, %v9511_v22  ;;  %9480 = vst.msk [vmem:[%s18216_s19 + $0x58] sm:$0xff] %vm1024_vm2, %v18300_v35  ;;  %v9512_v25 = vmin.f32 %v18300_v35, 4.1351666  ;;  %v10398_v0 = vmul.f32 %v13202_v40, %v18197_v58  ;;  %v10429_v53 = vmul.f32 0.5, %v10397_v20  ;;  %v18334_v40 = vpop.permute.xlu0 %10331 }
 0x777   : > { %v10253_v3 = vmul.f32 1.442695, %v9509_v56  ;;  %9478 = vst.msk [vmem:[%s18216_s19 + $0x48] sm:$0xff] %vm1024_vm2, %v18307_v11  ;;  %v9510_v48 = vmin.f32 %v18307_v11, 4.1351666  ;;  %10497 = vrot.lane.b32.xlu1 %v10431_v37, %s13387_s17  ;;  %v10432_v5 = vmul.f32 0.5, %v10400_v32 }
 0x778   : > { %13211 = vpow2.f32 %v10257_v9  ;;  %v10259_v10 = vmul.f32 1.442695, %v9512_v25 }
 0x779   : > { %13213 = vpow2.f32 %v10253_v3  ;;  %v10255_v22 = vmul.f32 1.442695, %v9510_v48  ;;  %v12590_v61 = vpop.f32.mrb[44].mxu0  ;;  %10499 = vrot.lane.b32.xlu0 %v10432_v5, %s13387_s17  ;;  %v10430_v48 = vmul.f32 0.5, %v10398_v0 }
 0x77a   : > { %v13204_v17 = vpop.eup %13203  ;;  %13215 = vpow2.f32 %v10259_v10  ;;  %v18327_v42 = vadd.f32 %v12590_v61, %v18210_v50  ;;  %v9390_v9 = vpop.f32.mrb[45].mxu0 }
 0x77b   : > { %v13206_v56 = vpop.eup %13205  ;;  %13217 = vpow2.f32 %v10255_v22  ;;  %v18330_v58 = vadd.f32 %v18210_v50, %v9390_v9  ;;  %10493 = vrot.lane.b32.xlu1 %v10429_v53, %s13387_s17  ;;  %v12591_v3 = vpop.f32.mrb[46].mxu0  ;;  %v10403_v20 = vmul.f32 %v13204_v17, %v18218_v47 }
 0x77c   : > { %v13208_v32 = vpop.eup %13207  ;;  %9483 = vst.msk [vmem:[%s18216_s19 + $0x70] sm:$0xff] %vm1024_vm2, %v18327_v42  ;;  %v9515_v61 = vmin.f32 %v18327_v42, 4.1351666  ;;  %v18341_v37 = vadd.f32 %v12591_v3, %v18210_v50  ;;  %v9393_v25 = vpop.f32.mrb[47].mxu0  ;;  %v10401_v5 = vmul.f32 %v13206_v56, %v18203_v31 }
 0x77d   : > { %20127 = vst [vmem:[#allocation64_spill] sm:$0xff] %v18330_v58  ;;  %v13210_v10 = vpop.eup %13209  ;;  %9481 = vst.msk [vmem:[%s18216_s19 + $0x60] sm:$0xff] %vm1024_vm2, %v18330_v58  ;;  %v9513_v17 = vmin.f32 %v18330_v58, 4.1351666  ;;  %v18348_v53 = vadd.f32 %v18210_v50, %v9393_v25  ;;  %v10435_v47 = vmul.f32 0.5, %v10403_v20  ;;  %10495 = vrot.lane.b32.xlu0 %v10430_v48, %s13387_s17  ;;  %v10404_v0 = vmul.f32 %v13208_v32, %v18226_v15  ;;  %v18362_v20 = vpop.permute.xlu1 %10333 }
 0x77e   : > { %v10265_v22 = vmul.f32 1.442695, %v9515_v61  ;;  %9484 = vst.msk [vmem:[%s18216_s19 + $0x78] sm:$0xff] %vm1024_vm2, %v18341_v37  ;;  %v9516_v9 = vmin.f32 %v18341_v37, 4.1351666  ;;  %v10402_v61 = vmul.f32 %v13210_v10, %v18205_v52  ;;  %v10433_v15 = vmul.f32 0.5, %v10401_v5 }
 0x77f   : > { %20128 = vst [vmem:[#allocation65_spill] sm:$0xff] %v18348_v53  ;;  %v10261_v3 = vmul.f32 1.442695, %v9513_v17  ;;  %9482 = vst.msk [vmem:[%s18216_s19 + $0x68] sm:$0xff] %vm1024_vm2, %v18348_v53  ;;  %v9514_v25 = vmin.f32 %v18348_v53, 4.1351666  ;;  %10505 = vrot.lane.b32.xlu1 %v10435_v47, %s13387_s17  ;;  %v18365_v17 = vpop.permute.xlu0 %10335 }
 0x780   : > { %13219 = vpow2.f32 %v10265_v22  ;;  %v10267_v31 = vmul.f32 1.442695, %v9516_v9  ;;  %v10436_v56 = vmul.f32 0.5, %v10404_v0 }
 0x781   : > { %13221 = vpow2.f32 %v10261_v3  ;;  %v10263_v58 = vmul.f32 1.442695, %v9514_v25  ;;  %v12594_v48 = vpop.f32.mrb[48].mxu0 }
 0x782   : > { %v13212_v32 = vpop.eup %13211  ;;  %13223 = vpow2.f32 %v10267_v31  ;;  %10507 = vrot.lane.b32.xlu0 %v10436_v56, %s13387_s17  ;;  %v18369_v47 = vadd.f32 %v12594_v48, %v18210_v50  ;;  %v9406_v22 = vpop.f32.mrb[49].mxu0  ;;  %v10434_v31 = vmul.f32 0.5, %v10402_v61 }
 0x783   : > { %v13214_v9 = vpop.eup %13213  ;;  %13225 = vpow2.f32 %v10263_v58  ;;  %v18372_v52 = vadd.f32 %v18210_v50, %v9406_v22  ;;  %10501 = vrot.lane.b32.xlu1 %v10433_v15, %s13387_s17  ;;  %v12595_v10 = vpop.f32.mrb[50].mxu0  ;;  %v10407_v5 = vmul.f32 %v13212_v32, %v18274_v55 }
 0x784   : > { %20129 = vst [vmem:[#allocation67_spill] sm:$0xff] %v18369_v47  ;;  %v13216_v0 = vpop.eup %13215  ;;  %9487 = vst.msk [vmem:[%s18216_s19 + $0x90] sm:$0xff] %vm1024_vm2, %v18369_v47  ;;  %v9519_v3 = vmin.f32 %v18369_v47, 4.1351666  ;;  %v18381_v25 = vadd.f32 %v12595_v10, %v18210_v50  ;;  %v9409_v58 = vpop.f32.mrb[51].mxu0  ;;  %v10405_v32 = vmul.f32 %v13214_v9, %v18250_v13 }
 0x785   : > { %20130 = vst [vmem:[#allocation70_spill] sm:$0xff] %v18372_v52  ;;  %v13218_v56 = vpop.eup %13217  ;;  %9485 = vst.msk [vmem:[%s18216_s19 + $0x80] sm:$0xff] %vm1024_vm2, %v18372_v52  ;;  %v9517_v48 = vmin.f32 %v18372_v52, 4.1351666  ;;  %v18388_v55 = vadd.f32 %v18210_v50, %v9409_v58  ;;  %v10439_v15 = vmul.f32 0.5, %v10407_v5  ;;  %v18391_v22 = vpop.permute.xlu1 %10337  ;;  %v10408_v10 = vmul.f32 %v13216_v0, %v18284_v44 }
 0x786   : > { %v10273_v47 = vmul.f32 1.442695, %v9519_v3  ;;  %9488 = vst.msk [vmem:[%s18216_s19 + $0x98] sm:$0xff] %vm1024_vm2, %v18381_v25  ;;  %v9520_v61 = vmin.f32 %v18381_v25, 4.1351666  ;;  %10503 = vrot.lane.b32.xlu0 %v10434_v31, %s13387_s17  ;;  %v18404_v13 = vpop.permute.xlu0 %10339  ;;  %v10406_v58 = vmul.f32 %v13218_v56, %v18252_v38  ;;  %v10437_v44 = vmul.f32 0.5, %v10405_v32 }
 0x787   : > { %20131 = vst [vmem:[#allocation38_spill] sm:$0xff] %v18388_v55  ;;  %v10269_v53 = vmul.f32 1.442695, %v9517_v48  ;;  %9486 = vst.msk [vmem:[%s18216_s19 + $0x88] sm:$0xff] %vm1024_vm2, %v18388_v55  ;;  %v9518_v5 = vmin.f32 %v18388_v55, 4.1351666  ;;  %10513 = vrot.lane.b32.xlu1 %v10439_v15, %s13387_s17 }
 0x788   : > { %13227 = vpow2.f32 %v10273_v47  ;;  %v10275_v9 = vmul.f32 1.442695, %v9520_v61  ;;  %v10440_v3 = vmul.f32 0.5, %v10408_v10 }
 0x789   : > { %13229 = vpow2.f32 %v10269_v53  ;;  %v10271_v52 = vmul.f32 1.442695, %v9518_v5  ;;  %v12598_v31 = vpop.f32.mrb[52].mxu0  ;;  %v18416_v32 = vpop.permute.xlu1 %10341  ;;  %v10438_v5 = vmul.f32 0.5, %v10406_v58 }
 0x78a   : > { %v13220_v0 = vpop.eup %13219  ;;  %13231 = vpow2.f32 %v10275_v9  ;;  %10515 = vrot.lane.b32.xlu0 %v10440_v3, %s13387_s17  ;;  %v18409_v48 = vadd.f32 %v12598_v31, %v18210_v50  ;;  %v9422_v15 = vpop.f32.mrb[53].mxu0 }
 0x78b   : > { %v13222_v55 = vpop.eup %13221  ;;  %13233 = vpow2.f32 %v10271_v52  ;;  %v18412_v47 = vadd.f32 %v18210_v50, %v9422_v15  ;;  %10509 = vrot.lane.b32.xlu1 %v10437_v44, %s13387_s17  ;;  %v12599_v38 = vpop.f32.mrb[54].mxu0  ;;  %v10411_v53 = vmul.f32 %v13220_v0, %v18323_v57 }
 0x78c   : > { %20132 = vst [vmem:[#allocation119_spill] sm:$0xff] %v18409_v48  ;;  %v13224_v56 = vpop.eup %13223  ;;  %9491 = vst.msk [vmem:[%s18216_s19 + $0xb0] sm:$0xff] %vm1024_vm2, %v18409_v48  ;;  %v9523_v61 = vmin.f32 %v18409_v48, 4.1351666  ;;  %v18423_v10 = vadd.f32 %v12599_v38, %v18210_v50  ;;  %v9425_v52 = vpop.f32.mrb[55].mxu0  ;;  %v10409_v44 = vmul.f32 %v13222_v55, %v18293_v39 }
 0x78d   : > { %20133 = vst [vmem:[#allocation122_spill] sm:$0xff] %v18412_v47  ;;  %v13226_v9 = vpop.eup %13225  ;;  %9489 = vst.msk [vmem:[%s18216_s19 + $0xa0] sm:$0xff] %vm1024_vm2, %v18412_v47  ;;  %v9521_v57 = vmin.f32 %v18412_v47, 4.1351666  ;;  %v18430_v3 = vadd.f32 %v18210_v50, %v9425_v52  ;;  %v10443_v31 = vmul.f32 0.5, %v10411_v53  ;;  %v18433_v0 = vpop.permute.xlu0 %10343  ;;  %v10412_v38 = vmul.f32 %v13224_v56, %v18334_v40 }
 0x78e   : > { %20134 = vst [vmem:[#allocation126_spill] sm:$0xff] %v18423_v10  ;;  %v10281_v15 = vmul.f32 1.442695, %v9523_v61  ;;  %9492 = vst.msk [vmem:[%s18216_s19 + $0xb8] sm:$0xff] %vm1024_vm2, %v18423_v10  ;;  %v9524_v58 = vmin.f32 %v18423_v10, 4.1351666  ;;  %10511 = vrot.lane.b32.xlu0 %v10438_v5, %s13387_s17  ;;  %v10410_v61 = vmul.f32 %v13226_v9, %v18310_v12  ;;  %v10346_v40 = vpop.permute.xlu1 %10345 }
 0x78f   : > { %v10277_v48 = vmul.f32 1.442695, %v9521_v57  ;;  %9490 = vst.msk [vmem:[%s18216_s19 + $0xa8] sm:$0xff] %vm1024_vm2, %v18430_v3  ;;  %v9522_v53 = vmin.f32 %v18430_v3, 4.1351666  ;;  %10521 = vrot.lane.b32.xlu1 %v10443_v31, %s13387_s17  ;;  %v10444_v55 = vmul.f32 0.5, %v10412_v38 }
 0x790   : > { %13235 = vpow2.f32 %v10281_v15  ;;  %v10283_v39 = vmul.f32 1.442695, %v9524_v58  ;;  %v10441_v5 = vmul.f32 0.5, %v10409_v44 }
 0x791   : > { %13237 = vpow2.f32 %v10277_v48  ;;  %v10279_v52 = vmul.f32 1.442695, %v9522_v53  ;;  %v12602_v47 = vpop.f32.mrb[56].mxu0  ;;  %v10348_v44 = vpop.permute.xlu0 %10347  ;;  %v10442_v53 = vmul.f32 0.5, %v10410_v61 }
 0x792   : > { %v13228_v10 = vpop.eup %13227  ;;  %13239 = vpow2.f32 %v10283_v39  ;;  %10523 = vrot.lane.b32.xlu0 %v10444_v55, %s13387_s17  ;;  %v18449_v56 = vadd.f32 %v12602_v47, %v18210_v50  ;;  %v9438_v57 = vpop.f32.mrb[57].mxu0 }
 0x793   : > { %v13230_v31 = vpop.eup %13229  ;;  %13241 = vpow2.f32 %v10279_v52  ;;  %v18452_v15 = vadd.f32 %v18210_v50, %v9438_v57  ;;  %10517 = vrot.lane.b32.xlu1 %v10441_v5, %s13387_s17  ;;  %v12603_v12 = vpop.f32.mrb[58].mxu0  ;;  %v10415_v48 = vmul.f32 %v13228_v10, %v18391_v22 }
 0x794   : > { %v13232_v9 = vpop.eup %13231  ;;  %9495 = vst.msk [vmem:[%s18216_s19 + $0xd0] sm:$0xff] %vm1024_vm2, %v18449_v56  ;;  %v9527_v47 = vmin.f32 %v18449_v56, 4.1351666  ;;  %v18461_v58 = vadd.f32 %v12603_v12, %v18210_v50  ;;  %v9441_v38 = vpop.f32.mrb[59].mxu0  ;;  %v10413_v52 = vmul.f32 %v13230_v31, %v18362_v20 }
 0x795   : > { %20135 = vst [vmem:[#allocation121_spill] sm:$0xff] %v18452_v15  ;;  %v13234_v39 = vpop.eup %13233  ;;  %9493 = vst.msk [vmem:[%s18216_s19 + $0xc0] sm:$0xff] %vm1024_vm2, %v18452_v15  ;;  %v9525_v55 = vmin.f32 %v18452_v15, 4.1351666  ;;  %v18468_v22 = vadd.f32 %v18210_v50, %v9441_v38  ;;  %v10447_v10 = vmul.f32 0.5, %v10415_v48  ;;  %v10416_v61 = vmul.f32 %v13232_v9, %v18404_v13  ;;  %v18482_v48 = vpop.permute.xlu1 %10349 }
 0x796   : > { %v10289_v5 = vmul.f32 1.442695, %v9527_v47  ;;  %9496 = vst.msk [vmem:[%s18216_s19 + $0xd8] sm:$0xff] %vm1024_vm2, %v18461_v58  ;;  %v9528_v57 = vmin.f32 %v18461_v58, 4.1351666  ;;  %10519 = vrot.lane.b32.xlu0 %v10442_v53, %s13387_s17  ;;  %v10414_v47 = vmul.f32 %v13234_v39, %v18365_v17  ;;  %v10445_v13 = vmul.f32 0.5, %v10413_v52 }
 0x797   : > { %20136 = vst [vmem:[#allocation127_spill] sm:$0xff] %v18468_v22  ;;  %v10285_v12 = vmul.f32 1.442695, %v9525_v55  ;;  %9494 = vst.msk [vmem:[%s18216_s19 + $0xc8] sm:$0xff] %vm1024_vm2, %v18468_v22  ;;  %v9526_v38 = vmin.f32 %v18468_v22, 4.1351666  ;;  %10529 = vrot.lane.b32.xlu1 %v10447_v10, %s13387_s17  ;;  %v10352_v55 = vpop.permute.xlu0 %10351 }
 0x798   : > { %13243 = vpow2.f32 %v10289_v5  ;;  %v10291_v20 = vmul.f32 1.442695, %v9528_v57  ;;  %v10448_v31 = vmul.f32 0.5, %v10416_v61 }
 0x799   : > { %13245 = vpow2.f32 %v10285_v12  ;;  %v10287_v15 = vmul.f32 1.442695, %v9526_v38  ;;  %v12606_v53 = vpop.f32.mrb[60].mxu0 }
 0x79a   : > { %v13236_v9 = vpop.eup %13235  ;;  %13247 = vpow2.f32 %v10291_v20  ;;  %10531 = vrot.lane.b32.xlu0 %v10448_v31, %s13387_s17  ;;  %v18487_v10 = vadd.f32 %v12606_v53, %v18210_v50  ;;  %v9454_v22 = vpop.f32.mrb[61].mxu0 }
 0x79b   : > { %v13238_v5 = vpop.eup %13237  ;;  %13249 = vpow2.f32 %v10287_v15  ;;  %v18490_v57 = vadd.f32 %v18210_v50, %v9454_v22  ;;  %10525 = vrot.lane.b32.xlu1 %v10445_v13, %s13387_s17  ;;  %v12607_v17 = vpop.f32.mrb[62].mxu0  ;;  %v10419_v39 = vmul.f32 %v13236_v9, %v10346_v40  ;;  %v10446_v15 = vmul.f32 0.5, %v10414_v47 }
 0x79c   : > { %20137 = vst [vmem:[#allocation130_spill] sm:$0xff] %v18487_v10  ;;  %v13240_v52 = vpop.eup %13239  ;;  %9499 = vst.msk [vmem:[%s18216_s19 + $0xf0] sm:$0xff] %vm1024_vm2, %v18487_v10  ;;  %v9531_v61 = vmin.f32 %v18487_v10, 4.1351666  ;;  %v18498_v12 = vadd.f32 %v12607_v17, %v18210_v50  ;;  %v9457_v38 = vpop.f32.mrb[63].mxu0  ;;  %v10417_v53 = vmul.f32 %v13238_v5, %v18416_v32 }
 0x79d   : > { %20138 = vst [vmem:[#allocation132_spill] sm:$0xff] %v18490_v57  ;;  %v13242_v20 = vpop.eup %13241  ;;  %9497 = vst.msk [vmem:[%s18216_s19 + $0xe0] sm:$0xff] %vm1024_vm2, %v18490_v57  ;;  %v9529_v22 = vmin.f32 %v18490_v57, 4.1351666  ;;  %v18505_v40 = vadd.f32 %v18210_v50, %v9457_v38  ;;  %v10451_v31 = vmul.f32 0.5, %v10419_v39  ;;  %v10354_v13 = vpop.permute.xlu1 %10353  ;;  %v10420_v47 = vmul.f32 %v13240_v52, %v10348_v44 }
 0x79e   : > { %20139 = vst [vmem:[#allocation129_spill] sm:$0xff] %v18498_v12  ;;  %v10297_v9 = vmul.f32 1.442695, %v9531_v61  ;;  %9500 = vst.msk [vmem:[%s18216_s19 + $0xf8] sm:$0xff] %vm1024_vm2, %v18498_v12  ;;  %v9532_v17 = vmin.f32 %v18498_v12, 4.1351666  ;;  %10527 = vrot.lane.b32.xlu0 %v10446_v15, %s13387_s17  ;;  %v10356_v39 = vpop.permute.xlu0 %10355  ;;  %v10418_v61 = vmul.f32 %v13242_v20, %v18433_v0 }
 0x79f   : > { %v10293_v10 = vmul.f32 1.442695, %v9529_v22  ;;  %9498 = vst.msk [vmem:[%s18216_s19 + $0xe8] sm:$0xff] %vm1024_vm2, %v18505_v40  ;;  %v9530_v50 = vmin.f32 %v18505_v40, 4.1351666  ;;  %10537 = vrot.lane.b32.xlu1 %v10451_v31, %s13387_s17  ;;  %v10452_v5 = vmul.f32 0.5, %v10420_v47 }
 0x7a0   : > { %13251 = vpow2.f32 %v10297_v9  ;;  %v10299_v32 = vmul.f32 1.442695, %v9532_v17  ;;  %v10449_v57 = vmul.f32 0.5, %v10417_v53  ;;  %v10450_v31 = vmul.f32 0.5, %v10418_v61 }
 0x7a1   : > { %13253 = vpow2.f32 %v10293_v10  ;;  %v10295_v38 = vmul.f32 1.442695, %v9530_v50  ;;  %v10358_v22 = vpop.permute.xlu1 %10357 }
 0x7a2   : > { %v13244_v12 = vpop.eup %13243  ;;  %13255 = vpow2.f32 %v10299_v32  ;;  %10539 = vrot.lane.b32.xlu0 %v10452_v5, %s13387_s17  ;;  %v10360_v10 = vpop.permute.xlu0 %10359 }
 0x7a3   : > { %v13246_v44 = vpop.eup %13245  ;;  %13257 = vpow2.f32 %v10295_v38  ;;  %10533 = vrot.lane.b32.xlu1 %v10449_v57, %s13387_s17  ;;  %v10423_v52 = vmul.f32 %v13244_v12, %v10354_v13 }
 0x7a4   : > { %v13248_v15 = vpop.eup %13247  ;;  %v10421_v0 = vmul.f32 %v13246_v44, %v18482_v48 }
 0x7a5   : > { %v13250_v9 = vpop.eup %13249  ;;  %v10455_v17 = vmul.f32 0.5, %v10423_v52  ;;  %v10424_v47 = vmul.f32 %v13248_v15, %v10356_v39  ;;  %v10362_v5 = vpop.permute.xlu1 %10361 }
 0x7a6   : > { %10535 = vrot.lane.b32.xlu0 %v10450_v31, %s13387_s17  ;;  %v10422_v53 = vmul.f32 %v13250_v9, %v10352_v55  ;;  %v10453_v50 = vmul.f32 0.5, %v10421_v0  ;;  %v10364_v39 = vpop.permute.xlu0 %10363 }
 0x7a7   : > { %10545 = vrot.lane.b32.xlu1 %v10455_v17, %s13387_s17  ;;  %v10456_v20 = vmul.f32 0.5, %v10424_v47  ;;  %v10047_v17 = vmul.f32 %v18036_v27, %v18221_v14  ;;  %v10045_v47 = vmul.f32 %v18029_v43, %v18224_v18 }
 0x7a8   : > { %v10454_v61 = vmul.f32 0.5, %v10422_v53 }
 0x7a9   : > { %v10207_v0 = vadd.f32 %v18135_v21, %v10047_v17  ;;  %v10205_v27 = vadd.f32 %v18131_v45, %v10045_v47 }
 0x7aa   : > { %v13252_v32 = vpop.eup %13251  ;;  %10547 = vrot.lane.b32.xlu0 %v10456_v20, %s13387_s17 }
 0x7ab   : > { %v13254_v57 = vpop.eup %13253  ;;  %10541 = vrot.lane.b32.xlu1 %v10453_v50, %s13387_s17  ;;  %v10427_v12 = vmul.f32 %v13252_v32, %v10362_v5  ;;  %v10046_v50 = vmul.f32 %v18031_v28, %v18240_v33 }
 0x7ac   : > { %v13256_v13 = vpop.eup %13255  ;;  %v10425_v52 = vmul.f32 %v13254_v57, %v10358_v22  ;;  %v10048_v22 = vmul.f32 %v18041_v54, %v18233_v46 }
 0x7ad   : > { %v13258_v48 = vpop.eup %13257  ;;  %v10459_v38 = vmul.f32 0.5, %v10427_v12  ;;  %v10428_v44 = vmul.f32 %v13256_v13, %v10364_v39  ;;  %v10206_v21 = vadd.f32 %v18133_v62, %v10046_v50  ;;  %v10051_v39 = vmul.f32 %v18053_v41, %v18255_v29 }
 0x7ae   : > { %10543 = vrot.lane.b32.xlu0 %v10454_v61, %s13387_s17  ;;  %v10426_v15 = vmul.f32 %v13258_v48, %v10360_v10  ;;  %v10457_v31 = vmul.f32 0.5, %v10425_v52  ;;  %v10208_v32 = vadd.f32 %v18137_v34, %v10048_v22 }
 0x7af   : > { %10553 = vrot.lane.b32.xlu1 %v10459_v38, %s13387_s17  ;;  %v10460_v55 = vmul.f32 0.5, %v10428_v44  ;;  %v10052_v44 = vmul.f32 %v18055_v23, %v18265_v60  ;;  %v10211_v62 = vadd.f32 %v18143_v4, %v10051_v39  ;;  %v10049_v23 = vmul.f32 %v18043_v7, %v18258_v49 }
 0x7b0   : > { %v10458_v9 = vmul.f32 0.5, %v10426_v15 }
 0x7b1   : > { %v10212_v22 = vadd.f32 %v18145_v24, %v10052_v44  ;;  %v10209_v24 = vadd.f32 %v18139_v16, %v10049_v23 }
 0x7b2   : > { %10555 = vrot.lane.b32.xlu0 %v10460_v55, %s13387_s17 }
 0x7b3   : > { %10549 = vrot.lane.b32.xlu1 %v10457_v31, %s13387_s17 }
 0x7b6   : > { %10551 = vrot.lane.b32.xlu0 %v10458_v9, %s13387_s17 }
 0x7e9   : > { %v10498_v10 = vpop.permute.xlu1 %10497 }
 0x7ea   : > { %v10591_v20 = vsub.f32 %v10207_v0, %v10498_v10  ;;  %v10687_v53 = vadd.f32 %v10498_v10, %v10207_v0 }
 0x7eb   : > { %v10500_v57 = vpop.permute.xlu0 %10499 }
 0x7ec   : > { %v10623_v5 = vmax.f32 %v10591_v20, 0.0  ;;  %v10592_v14 = vsub.f32 %v10208_v32, %v10500_v57  ;;  %v10688_v12 = vadd.f32 %v10500_v57, %v10208_v32  ;;  %v10719_v13 = vmax.f32 %v10687_v53, 0.0 }
 0x7ed   : > { %v10494_v54 = vpop.permute.xlu1 %10493  ;;  %v10050_v53 = vmul.f32 %v18048_v30, %v18272_v63  ;;  %v10055_v30 = vmul.f32 %v18070_v8, %v18287_v36 }
 0x7ee   : > { %v10655_v46 = vmin.f32 %v10623_v5, 16.0  ;;  %v10589_v43 = vsub.f32 %v10205_v27, %v10494_v54  ;;  %v10624_v18 = vmax.f32 %v10592_v14, 0.0  ;;  %v10720_v34 = vmax.f32 %v10688_v12, 0.0 }
 0x7ef   : > { %v10496_v61 = vpop.permute.xlu0 %10495  ;;  %v10751_v48 = vmin.f32 %v10719_v13, 16.0  ;;  %v10685_v38 = vadd.f32 %v10494_v54, %v10205_v27  ;;  %v10210_v12 = vadd.f32 %v18141_v59, %v10050_v53  ;;  %v10215_v59 = vadd.f32 %v18151_v51, %v10055_v30  ;;  %v20143_v53 = vld [vmem:[#allocation82_spill] sm:$0xff]  ;;  %v20145_v30 = vld [vmem:[#allocation107_spill] sm:$0xff] }
 0x7f0   : > { %10817 = vrot.lane.b32.xlu1 %v10655_v46, %s13388_s23  ;;  %v10656_v28 = vmin.f32 %v10624_v18, 16.0  ;;  %v10590_v33 = vsub.f32 %v10206_v21, %v10496_v61  ;;  %v10621_v45 = vmax.f32 %v10589_v43, 0.0  ;;  %v10752_v41 = vmin.f32 %v10720_v34, 16.0 }
 0x7f1   : > { %v10506_v52 = vpop.permute.xlu1 %10505  ;;  %v10686_v55 = vadd.f32 %v10496_v61, %v10206_v21  ;;  %v10717_v31 = vmax.f32 %v10685_v38, 0.0  ;;  %v10056_v18 = vmul.f32 %v18075_v1, %v18300_v35  ;;  %v10053_v1 = vmul.f32 %v18063_v19, %v18290_v6 }
 0x7f2   : > { %10819 = vrot.lane.b32.xlu0 %v10656_v28, %s13388_s23  ;;  %v10622_v29 = vmax.f32 %v10590_v33, 0.0  ;;  %v10653_v15 = vmin.f32 %v10621_v45, 16.0  ;;  %v10595_v9 = vsub.f32 %v10211_v62, %v10506_v52  ;;  %v10691_v20 = vadd.f32 %v10506_v52, %v10211_v62 }
 0x7f3   : > { %v10718_v4 = vmax.f32 %v10686_v55, 0.0  ;;  %v10749_v0 = vmin.f32 %v10717_v31, 16.0  ;;  %v10054_v62 = vmul.f32 %v18065_v26, %v18307_v11  ;;  %v20142_v26 = vld [vmem:[#allocation76_spill] sm:$0xff] }
 0x7f4   : > { %10945 = vrot.lane.b32.xlu1 %v10751_v48, %s13389_s20  ;;  %v10508_v17 = vpop.permute.xlu0 %10507  ;;  %v10654_v60 = vmin.f32 %v10622_v29, 16.0  ;;  %v10627_v10 = vmax.f32 %v10595_v9, 0.0  ;;  %v10723_v57 = vmax.f32 %v10691_v20, 0.0  ;;  %v10216_v48 = vadd.f32 %v18153_v2, %v10056_v18  ;;  %v20140_v2 = vld [vmem:[#allocation100_spill] sm:$0xff] }
 0x7f5   : > { %v10596_v47 = vsub.f32 %v10212_v22, %v10508_v17  ;;  %v10502_v50 = vpop.permute.xlu1 %10501  ;;  %v10750_v32 = vmin.f32 %v10718_v4, 16.0  ;;  %v10692_v49 = vadd.f32 %v10508_v17, %v10212_v22  ;;  %v10213_v29 = vadd.f32 %v20140_v2, %v10053_v1  ;;  %v20141_v22 = vld [vmem:[#allocation105_spill] sm:$0xff] }
 0x7f6   : > { %10947 = vrot.lane.b32.xlu0 %v10752_v41, %s13389_s20  ;;  %v10659_v5 = vmin.f32 %v10627_v10, 16.0  ;;  %v10593_v27 = vsub.f32 %v10209_v24, %v10502_v50  ;;  %v10755_v46 = vmin.f32 %v10723_v57, 16.0  ;;  %v10689_v43 = vadd.f32 %v10502_v50, %v10209_v24 }
 0x7f7   : > { %v10628_v7 = vmax.f32 %v10596_v47, 0.0  ;;  %v10724_v16 = vmax.f32 %v10692_v49, 0.0  ;;  %v10214_v23 = vadd.f32 %v20141_v22, %v10054_v62  ;;  %v10059_v11 = vmul.f32 %v20142_v26, %v18327_v42  ;;  %v20152_v62 = vld [vmem:[#allocation67_spill] sm:$0xff] }
 0x7f8   : > { %10813 = vrot.lane.b32.xlu1 %v10653_v15, %s13388_s23  ;;  %v10504_v14 = vpop.permute.xlu0 %10503  ;;  %v10625_v13 = vmax.f32 %v10593_v27, 0.0  ;;  %v10721_v28 = vmax.f32 %v10689_v43, 0.0  ;;  %v10060_v50 = vmul.f32 %v20143_v53, %v18341_v37  ;;  %v20147_v37 = vld [vmem:[#allocation73_spill] sm:$0xff]  ;;  %v20156_v53 = vld [vmem:[#allocation112_spill] sm:$0xff] }
 0x7f9   : > { %v10660_v63 = vmin.f32 %v10628_v7, 16.0  ;;  %v10594_v54 = vsub.f32 %v10210_v12, %v10504_v14  ;;  %v10514_v21 = vpop.permute.xlu1 %10513  ;;  %v10756_v39 = vmin.f32 %v10724_v16, 16.0  ;;  %v10690_v36 = vadd.f32 %v10504_v14, %v10210_v12  ;;  %v20146_v16 = vld [vmem:[#allocation64_spill] sm:$0xff] }
 0x7fa   : > { %10815 = vrot.lane.b32.xlu0 %v10654_v60, %s13388_s23  ;;  %v10657_v61 = vmin.f32 %v10625_v13, 16.0  ;;  %v10599_v34 = vsub.f32 %v10215_v59, %v10514_v21  ;;  %v10753_v38 = vmin.f32 %v10721_v28, 16.0  ;;  %v10695_v52 = vadd.f32 %v10514_v21, %v10215_v59  ;;  %v20150_v28 = vld [vmem:[#allocation103_spill] sm:$0xff] }
 0x7fb   : > { %v10626_v8 = vmax.f32 %v10594_v54, 0.0  ;;  %v10722_v51 = vmax.f32 %v10690_v36, 0.0  ;;  %v10057_v54 = vmul.f32 %v20147_v37, %v20146_v16  ;;  %v20161_v16 = vld [vmem:[#allocation104_spill] sm:$0xff] }
 0x7fc   : > { %10941 = vrot.lane.b32.xlu1 %v10749_v0, %s13389_s20  ;;  %v10516_v33 = vpop.permute.xlu0 %10515  ;;  %v10631_v44 = vmax.f32 %v10599_v34, 0.0  ;;  %v10727_v31 = vmax.f32 %v10695_v52, 0.0 }
 0x7fd   : > { %v10658_v35 = vmin.f32 %v10626_v8, 16.0  ;;  %v10600_v45 = vsub.f32 %v10216_v48, %v10516_v33  ;;  %v10510_v41 = vpop.permute.xlu1 %10509  ;;  %v10754_v55 = vmin.f32 %v10722_v51, 16.0  ;;  %v10696_v6 = vadd.f32 %v10516_v33, %v10216_v48  ;;  %v20149_v8 = vld [vmem:[#allocation79_spill] sm:$0xff] }
 0x7fe   : > { %10943 = vrot.lane.b32.xlu0 %v10750_v32, %s13389_s20  ;;  %v10663_v15 = vmin.f32 %v10631_v44, 16.0  ;;  %v10597_v9 = vsub.f32 %v10213_v29, %v10510_v41  ;;  %v10759_v0 = vmin.f32 %v10727_v31, 16.0  ;;  %v10693_v20 = vadd.f32 %v10510_v41, %v10213_v29  ;;  %v20144_v32 = vld [vmem:[#allocation109_spill] sm:$0xff]  ;;  %v20151_v44 = vld [vmem:[#allocation108_spill] sm:$0xff]  ;;  %v20153_v41 = vld [vmem:[#allocation83_spill] sm:$0xff] }
 0x7ff   : > { %v10632_v19 = vmax.f32 %v10600_v45, 0.0  ;;  %v10728_v4 = vmax.f32 %v10696_v6, 0.0  ;;  %v10219_v7 = vadd.f32 %v20144_v32, %v10059_v11  ;;  %v10217_v34 = vadd.f32 %v20150_v28, %v10057_v54 }
 0x800   : > { %10825 = vrot.lane.b32.xlu1 %v10659_v5, %s13388_s23  ;;  %v10512_v17 = vpop.permute.xlu0 %10511  ;;  %v10629_v10 = vmax.f32 %v10597_v9, 0.0  ;;  %v10725_v27 = vmax.f32 %v10693_v20, 0.0  ;;  %v10063_v2 = vmul.f32 %v20153_v41, %v20152_v62  ;;  %v20154_v9 = vld [vmem:[#allocation88_spill] sm:$0xff] }
 0x801   : > { %v10664_v60 = vmin.f32 %v10632_v19, 16.0  ;;  %v10598_v47 = vsub.f32 %v10214_v23, %v10512_v17  ;;  %v10522_v24 = vpop.permute.xlu1 %10521  ;;  %v10760_v49 = vmin.f32 %v10728_v4, 16.0  ;;  %v10694_v5 = vadd.f32 %v10512_v17, %v10214_v23  ;;  %v20155_v23 = vld [vmem:[#allocation111_spill] sm:$0xff]  ;;  %v20167_v62 = vld [vmem:[#allocation116_spill] sm:$0xff] }
 0x802   : > { %10827 = vrot.lane.b32.xlu0 %v10660_v63, %s13388_s23  ;;  %v10661_v57 = vmin.f32 %v10629_v10, 16.0  ;;  %v10603_v14 = vsub.f32 %v10219_v7, %v10522_v24  ;;  %v10220_v63 = vadd.f32 %v20145_v30, %v10060_v50  ;;  %v10757_v18 = vmin.f32 %v10725_v27, 16.0 }
 0x803   : > { %v10630_v42 = vmax.f32 %v10598_v47, 0.0  ;;  %v10726_v13 = vmax.f32 %v10694_v5, 0.0  ;;  %v10699_v59 = vadd.f32 %v10522_v24, %v10219_v7  ;;  %v10064_v17 = vmul.f32 %v20154_v9, %v18381_v25  ;;  %v20157_v24 = vld [vmem:[#allocation70_spill] sm:$0xff]  ;;  %v20158_v25 = vld [vmem:[#allocation80_spill] sm:$0xff]  ;;  %v20168_v9 = vld [vmem:[#allocation117_spill] sm:$0xff] }
 0x804   : > { %10953 = vrot.lane.b32.xlu1 %v10755_v46, %s13389_s20  ;;  %v10524_v12 = vpop.permute.xlu0 %10523  ;;  %v10635_v21 = vmax.f32 %v10603_v14, 0.0  ;;  %v10223_v26 = vadd.f32 %v20155_v23, %v10063_v2  ;;  %v10061_v32 = vmul.f32 %v20158_v25, %v20157_v24  ;;  %v20159_v14 = vld [vmem:[#allocation38_spill] sm:$0xff] }
 0x805   : > { %v10662_v46 = vmin.f32 %v10630_v42, 16.0  ;;  %v10604_v43 = vsub.f32 %v10220_v63, %v10524_v12  ;;  %v10758_v33 = vmin.f32 %v10726_v13, 16.0  ;;  %v10700_v1 = vadd.f32 %v10524_v12, %v10220_v63  ;;  %v20160_v12 = vld [vmem:[#allocation85_spill] sm:$0xff]  ;;  %v20170_v23 = vld [vmem:[#allocation86_spill] sm:$0xff] }
 0x806   : > { %10955 = vrot.lane.b32.xlu0 %v10756_v39, %s13389_s20  ;;  %v20148_v39 = vld [vmem:[#allocation65_spill] sm:$0xff]  ;;  %v10731_v51 = vmax.f32 %v10699_v59, 0.0  ;;  %v10224_v50 = vadd.f32 %v20156_v53, %v10064_v17  ;;  %v10062_v30 = vmul.f32 %v20160_v12, %v20159_v14  ;;  %v10221_v37 = vadd.f32 %v20161_v16, %v10061_v32  ;;  %v20172_v24 = vld [vmem:[#allocation110_spill] sm:$0xff] }
 0x807   : > { %v10058_v36 = vmul.f32 %v20149_v8, %v20148_v39  ;;  %v10636_v48 = vmax.f32 %v10604_v43, 0.0  ;;  %v20162_v39 = vld [vmem:[#allocation106_spill] sm:$0xff]  ;;  %v20173_v14 = vld [vmem:[#allocation113_spill] sm:$0xff] }
 0x808   : > { %10821 = vrot.lane.b32.xlu1 %v10657_v61, %s13388_s23  ;;  %v10518_v61 = vpop.permute.xlu1 %10517  ;;  %v10763_v6 = vmin.f32 %v10731_v51, 16.0  ;;  %v10222_v8 = vadd.f32 %v20162_v39, %v10062_v30 }
 0x809   : > { %v10601_v45 = vsub.f32 %v10217_v34, %v10518_v61  ;;  %v10218_v52 = vadd.f32 %v20151_v44, %v10058_v36  ;;  %v10668_v29 = vmin.f32 %v10636_v48, 16.0  ;;  %v10697_v31 = vadd.f32 %v10518_v61, %v10217_v34  ;;  %v20163_v36 = vld [vmem:[#allocation119_spill] sm:$0xff]  ;;  %v20164_v61 = vld [vmem:[#allocation89_spill] sm:$0xff] }
 0x80a   : > { %10823 = vrot.lane.b32.xlu0 %v10658_v35, %s13388_s23  ;;  %v10667_v35 = vmin.f32 %v10635_v21, 16.0  ;;  %v10067_v28 = vmul.f32 %v20164_v61, %v20163_v36 }
 0x80c   : > { %10949 = vrot.lane.b32.xlu1 %v10753_v38, %s13389_s20  ;;  %v10520_v38 = vpop.permute.xlu0 %10519  ;;  %v10530_v22 = vpop.permute.xlu1 %10529  ;;  %v10227_v41 = vadd.f32 %v20167_v62, %v10067_v28 }
 0x80d   : > { %v10602_v19 = vsub.f32 %v10218_v52, %v10520_v38  ;;  %v10698_v4 = vadd.f32 %v10520_v38, %v10218_v52  ;;  %v10607_v10 = vsub.f32 %v10223_v26, %v10530_v22  ;;  %v10703_v27 = vadd.f32 %v10530_v22, %v10223_v26  ;;  %v20166_v38 = vld [vmem:[#allocation93_spill] sm:$0xff]  ;;  %v20169_v22 = vld [vmem:[#allocation122_spill] sm:$0xff] }
 0x80e   : > { %10951 = vrot.lane.b32.xlu0 %v10754_v55, %s13389_s20  ;;  %v10732_v55 = vmax.f32 %v10700_v1, 0.0  ;;  %v10065_v26 = vmul.f32 %v20170_v23, %v20169_v22 }
 0x810   : > { %10833 = vrot.lane.b32.xlu1 %v10663_v15, %s13388_s23  ;;  %v10633_v15 = vmax.f32 %v10601_v45, 0.0  ;;  %v10764_v11 = vmin.f32 %v10732_v55, 16.0  ;;  %v10532_v20 = vpop.permute.xlu0 %10531  ;;  %v10526_v63 = vpop.permute.xlu1 %10525  ;;  %v20165_v45 = vld [vmem:[#allocation126_spill] sm:$0xff]  ;;  %v10225_v25 = vadd.f32 %v20172_v24, %v10065_v26 }
 0x811   : > { %v10608_v42 = vsub.f32 %v10224_v50, %v10532_v20  ;;  %v10704_v13 = vadd.f32 %v10532_v20, %v10224_v50  ;;  %v10605_v21 = vsub.f32 %v10221_v37, %v10526_v63  ;;  %v10701_v51 = vadd.f32 %v10526_v63, %v10221_v37  ;;  %v20171_v20 = vld [vmem:[#allocation91_spill] sm:$0xff] }
 0x812   : > { %10835 = vrot.lane.b32.xlu0 %v10664_v60, %s13388_s23  ;;  %v10634_v60 = vmax.f32 %v10602_v19, 0.0  ;;  %v10665_v47 = vmin.f32 %v10633_v15, 16.0  ;;  %v10068_v44 = vmul.f32 %v20166_v38, %v20165_v45  ;;  %v10066_v53 = vmul.f32 %v20171_v20, %v18430_v3  ;;  %v20174_v3 = vld [vmem:[#allocation94_spill] sm:$0xff] }
 0x813   : > { %v10071_v30 = vmul.f32 %v20174_v3, %v18449_v56 }
 0x814   : > { %10961 = vrot.lane.b32.xlu1 %v10759_v0, %s13389_s20  ;;  %v10729_v0 = vmax.f32 %v10697_v31, 0.0  ;;  %v10666_v7 = vmin.f32 %v10634_v60, 16.0  ;;  %v10528_v59 = vpop.permute.xlu0 %10527  ;;  %v10538_v52 = vpop.permute.xlu1 %10537  ;;  %v10228_v17 = vadd.f32 %v20168_v9, %v10068_v44  ;;  %v10226_v12 = vadd.f32 %v20173_v14, %v10066_v53 }
 0x815   : > { %v10606_v48 = vsub.f32 %v10222_v8, %v10528_v59  ;;  %v10702_v55 = vadd.f32 %v10528_v59, %v10222_v8  ;;  %v10611_v15 = vsub.f32 %v10227_v41, %v10538_v52  ;;  %v20176_v59 = vld [vmem:[#allocation78_spill] sm:$0xff] }
 0x816   : > { %10963 = vrot.lane.b32.xlu0 %v10760_v49, %s13389_s20  ;;  %v10730_v49 = vmax.f32 %v10698_v4, 0.0  ;;  %v10761_v5 = vmin.f32 %v10729_v0, 16.0  ;;  %v10231_v39 = vadd.f32 %v20176_v59, %v10071_v30 }
 0x817   : > { %v10734_v60 = vmax.f32 %v10702_v55, 0.0  ;;  %v10643_v0 = vmax.f32 %v10611_v15, 0.0 }
 0x818   : > { %10829 = vrot.lane.b32.xlu1 %v10661_v57, %s13388_s23  ;;  %v10639_v57 = vmax.f32 %v10607_v10, 0.0  ;;  %v10762_v54 = vmin.f32 %v10730_v49, 16.0  ;;  %v10540_v31 = vpop.permute.xlu0 %10539  ;;  %v10707_v10 = vadd.f32 %v10538_v52, %v10227_v41  ;;  %v10534_v50 = vpop.permute.xlu1 %10533 }
 0x819   : > { %v10612_v4 = vsub.f32 %v10228_v17, %v10540_v31  ;;  %v10766_v32 = vmin.f32 %v10734_v60, 16.0  ;;  %v10708_v49 = vadd.f32 %v10540_v31, %v10228_v17  ;;  %v20183_v60 = vld [vmem:[#allocation118_spill] sm:$0xff] }
 0x81a   : > { %10831 = vrot.lane.b32.xlu0 %v10662_v46, %s13388_s23  ;;  %v10640_v46 = vmax.f32 %v10608_v42, 0.0  ;;  %v10671_v43 = vmin.f32 %v10639_v57, 16.0  ;;  %v10675_v42 = vmin.f32 %v10643_v0, 16.0  ;;  %v10609_v57 = vsub.f32 %v10225_v25, %v10534_v50  ;;  %v20185_v0 = vld [vmem:[#allocation98_spill] sm:$0xff] }
 0x81b   : > { %v10740_v16 = vmax.f32 %v10708_v49, 0.0  ;;  %v20186_v49 = vld [vmem:[#allocation129_spill] sm:$0xff] }
 0x81c   : > { %10957 = vrot.lane.b32.xlu1 %v10757_v18, %s13389_s20  ;;  %v10735_v18 = vmax.f32 %v10703_v27, 0.0  ;;  %v10672_v34 = vmin.f32 %v10640_v46, 16.0  ;;  %v10536_v27 = vpop.permute.xlu0 %10535  ;;  %v10641_v46 = vmax.f32 %v10609_v57, 0.0  ;;  %v20188_v57 = vld [vmem:[#allocation132_spill] sm:$0xff] }
 0x81d   : > { %v10610_v37 = vsub.f32 %v10226_v12, %v10536_v27  ;;  %v10772_v8 = vmin.f32 %v10740_v16, 16.0  ;;  %v10706_v36 = vadd.f32 %v10536_v27, %v10226_v12  ;;  %v20189_v27 = vld [vmem:[#allocation96_spill] sm:$0xff]  ;;  %v20190_v12 = vld [vmem:[#allocation30_spill] sm:$0xff] }
 0x81e   : > { %10959 = vrot.lane.b32.xlu0 %v10758_v33, %s13389_s20  ;;  %v10736_v33 = vmax.f32 %v10704_v13, 0.0  ;;  %v10767_v1 = vmin.f32 %v10735_v18, 16.0  ;;  %v10705_v13 = vadd.f32 %v10534_v50, %v10225_v25  ;;  %v10673_v61 = vmin.f32 %v10641_v46, 16.0 }
 0x81f   : > { %v10642_v56 = vmax.f32 %v10610_v37, 0.0  ;;  %v10738_v38 = vmax.f32 %v10706_v36, 0.0  ;;  %v10073_v14 = vmul.f32 %v20189_v27, %v20188_v57 }
 0x820   : > { %10841 = vrot.lane.b32.xlu1 %v10667_v35, %s13388_s23  ;;  %v10637_v35 = vmax.f32 %v10605_v21, 0.0  ;;  %v10768_v2 = vmin.f32 %v10736_v33, 16.0  ;;  %v10546_v21 = vpop.permute.xlu1 %10545  ;;  %v10737_v28 = vmax.f32 %v10705_v13, 0.0  ;;  %v10548_v33 = vpop.permute.xlu0 %10547 }
 0x821   : > { %v10674_v45 = vmin.f32 %v10642_v56, 16.0  ;;  %v10711_v41 = vadd.f32 %v10546_v21, %v10231_v39  ;;  %v10770_v31 = vmin.f32 %v10738_v38, 16.0 }
 0x822   : > { %10843 = vrot.lane.b32.xlu0 %v10668_v29, %s13388_s23  ;;  %v10638_v29 = vmax.f32 %v10606_v48, 0.0  ;;  %v10669_v19 = vmin.f32 %v10637_v35, 16.0  ;;  %v20177_v48 = vld [vmem:[#allocation61_spill] sm:$0xff]  ;;  %v10769_v52 = vmin.f32 %v10737_v28, 16.0 }
 0x823   : > { %v20178_v35 = vld [vmem:[#allocation121_spill] sm:$0xff]  ;;  %v10743_v23 = vmax.f32 %v10711_v41, 0.0 }
 0x824   : > { %10969 = vrot.lane.b32.xlu1 %v10763_v6, %s13389_s20  ;;  %v10733_v6 = vmax.f32 %v10701_v51, 0.0 }
 0x825   : > { %v10775_v25 = vmin.f32 %v10743_v23, 16.0 }
 0x826   : > { %10971 = vrot.lane.b32.xlu0 %v10764_v11, %s13389_s20  ;;  %v10670_v11 = vmin.f32 %v10638_v29, 16.0  ;;  %v20181_v29 = vld [vmem:[#allocation95_spill] sm:$0xff] }
 0x828   : > { %10837 = vrot.lane.b32.xlu1 %v10665_v47, %s13388_s23  ;;  %v10765_v47 = vmin.f32 %v10733_v6, 16.0  ;;  %v20182_v6 = vld [vmem:[#allocation115_spill] sm:$0xff] }
 0x82a   : > { %10839 = vrot.lane.b32.xlu0 %v10666_v7, %s13388_s23  ;;  %v10644_v7 = vmax.f32 %v10612_v4, 0.0 }
 0x82c   : > { %10965 = vrot.lane.b32.xlu1 %v10761_v5, %s13389_s20  ;;  %v10739_v5 = vmax.f32 %v10707_v10, 0.0  ;;  %v10676_v63 = vmin.f32 %v10644_v7, 16.0 }
 0x82e   : > { %10967 = vrot.lane.b32.xlu0 %v10762_v54, %s13389_s20  ;;  %v10771_v54 = vmin.f32 %v10739_v5, 16.0 }
 0x830   : > { %10849 = vrot.lane.b32.xlu1 %v10671_v43, %s13388_s23  ;;  %v20175_v43 = vld [vmem:[#allocation97_spill] sm:$0xff] }
 0x831   : > { %v10072_v18 = vmul.f32 %v20175_v43, %v18461_v58  ;;  %v20179_v58 = vld [vmem:[#allocation92_spill] sm:$0xff]  ;;  %v20191_v43 = vld [vmem:[#allocation99_spill] sm:$0xff] }
 0x832   : > { %10851 = vrot.lane.b32.xlu0 %v10672_v34, %s13388_s23  ;;  %v10615_v34 = vsub.f32 %v10231_v39, %v10546_v21  ;;  %v10069_v51 = vmul.f32 %v20179_v58, %v20178_v35  ;;  %v20192_v21 = vld [vmem:[#allocation37_spill] sm:$0xff]  ;;  %v20194_v35 = vld [vmem:[#allocation22_spill] sm:$0xff] }
 0x834   : > { %10977 = vrot.lane.b32.xlu1 %v10767_v1, %s13389_s20  ;;  %v10232_v1 = vadd.f32 %v20177_v48, %v10072_v18  ;;  %v10647_v62 = vmax.f32 %v10615_v34, 0.0  ;;  %v10229_v15 = vadd.f32 %v20182_v6, %v10069_v51  ;;  %v10074_v18 = vmul.f32 %v20191_v43, %v18505_v40 }
 0x836   : > { %10979 = vrot.lane.b32.xlu0 %v10768_v2, %s13389_s20  ;;  %v10616_v44 = vsub.f32 %v10232_v1, %v10548_v33  ;;  %v20180_v2 = vld [vmem:[#allocation127_spill] sm:$0xff]  ;;  %v10712_v17 = vadd.f32 %v10548_v33, %v10232_v1  ;;  %v10679_v22 = vmin.f32 %v10647_v62, 16.0  ;;  %v10234_v58 = vadd.f32 %v20194_v35, %v10074_v18 }
 0x837   : > { %v10070_v55 = vmul.f32 %v20181_v29, %v20180_v2 }
 0x838   : > { %10845 = vrot.lane.b32.xlu1 %v10669_v19, %s13388_s23  ;;  %v10542_v19 = vpop.permute.xlu1 %10541  ;;  %v10648_v9 = vmax.f32 %v10616_v44, 0.0  ;;  %v10744_v53 = vmax.f32 %v10712_v17, 0.0 }
 0x839   : > { %v10613_v26 = vsub.f32 %v10229_v15, %v10542_v19  ;;  %v10230_v4 = vadd.f32 %v20183_v60, %v10070_v55  ;;  %v10709_v7 = vadd.f32 %v10542_v19, %v10229_v15 }
 0x83a   : > { %10847 = vrot.lane.b32.xlu0 %v10670_v11, %s13388_s23  ;;  %v10544_v11 = vpop.permute.xlu0 %10543  ;;  %v10680_v20 = vmin.f32 %v10648_v9, 16.0 }
 0x83b   : > { %v10614_v50 = vsub.f32 %v10230_v4, %v10544_v11  ;;  %v10710_v37 = vadd.f32 %v10544_v11, %v10230_v4  ;;  %v10741_v46 = vmax.f32 %v10709_v7, 0.0 }
 0x83c   : > { %10973 = vrot.lane.b32.xlu1 %v10765_v47, %s13389_s20  ;;  %v20184_v47 = vld [vmem:[#allocation130_spill] sm:$0xff]  ;;  %v10554_v24 = vpop.permute.xlu1 %10553 }
 0x83d   : > { %v10075_v10 = vmul.f32 %v20185_v0, %v20184_v47  ;;  %v10646_v16 = vmax.f32 %v10614_v50, 0.0  ;;  %v10773_v34 = vmin.f32 %v10741_v46, 16.0 }
 0x83e   : > { %10975 = vrot.lane.b32.xlu0 %v10766_v32, %s13389_s20  ;;  %v10645_v32 = vmax.f32 %v10613_v26, 0.0  ;;  %v10556_v30 = vpop.permute.xlu0 %10555 }
 0x83f   : > { %v10235_v3 = vadd.f32 %v20190_v12, %v10075_v10  ;;  %v10678_v36 = vmin.f32 %v10646_v16, 16.0 }
 0x840   : > { %10857 = vrot.lane.b32.xlu1 %v10675_v42, %s13388_s23  ;;  %v20187_v42 = vld [vmem:[#allocation101_spill] sm:$0xff]  ;;  %v10550_v39 = vpop.permute.xlu1 %10549 }
 0x841   : > { %v10076_v5 = vmul.f32 %v20187_v42, %v20186_v49  ;;  %v10619_v13 = vsub.f32 %v10235_v3, %v10554_v24  ;;  %v10715_v29 = vadd.f32 %v10554_v24, %v10235_v3 }
 0x842   : > { %10859 = vrot.lane.b32.xlu0 %v10676_v63, %s13388_s23  ;;  %v10776_v63 = vmin.f32 %v10744_v53, 16.0  ;;  %v10552_v1 = vpop.permute.xlu0 %10551 }
 0x843   : > { %v10236_v59 = vadd.f32 %v20192_v21, %v10076_v5  ;;  %v10651_v33 = vmax.f32 %v10619_v13, 0.0  ;;  %v10714_v2 = vadd.f32 %v10552_v1, %v10234_v58 }
 0x844   : > { %10985 = vrot.lane.b32.xlu1 %v10771_v54, %s13389_s20  ;;  %v10677_v54 = vmin.f32 %v10645_v32, 16.0 }
 0x845   : > { %v10620_v28 = vsub.f32 %v10236_v59, %v10556_v30  ;;  %v10683_v38 = vmin.f32 %v10651_v33, 16.0  ;;  %v10716_v15 = vadd.f32 %v10556_v30, %v10236_v59  ;;  %v10746_v9 = vmax.f32 %v10714_v2, 0.0 }
 0x846   : > { %10987 = vrot.lane.b32.xlu0 %v10772_v8, %s13389_s20  ;;  %v20193_v8 = vld [vmem:[#allocation23_spill] sm:$0xff] }
 0x847   : > { %v10233_v56 = vadd.f32 %v20193_v8, %v10073_v14  ;;  %v10652_v51 = vmax.f32 %v10620_v28, 0.0  ;;  %v10748_v4 = vmax.f32 %v10716_v15, 0.0  ;;  %v10778_v47 = vmin.f32 %v10746_v9, 16.0 }
 0x848   : > { %10853 = vrot.lane.b32.xlu1 %v10673_v61, %s13388_s23  ;;  %v10742_v61 = vmax.f32 %v10710_v37, 0.0 }
 0x849   : > { %v10617_v48 = vsub.f32 %v10233_v56, %v10550_v39  ;;  %v10684_v62 = vmin.f32 %v10652_v51, 16.0  ;;  %v10780_v24 = vmin.f32 %v10748_v4, 16.0 }
 0x84a   : > { %10855 = vrot.lane.b32.xlu0 %v10674_v45, %s13388_s23  ;;  %v10774_v40 = vmin.f32 %v10742_v61, 16.0  ;;  %v10618_v45 = vsub.f32 %v10234_v58, %v10552_v1 }
 0x84b   : > { %v10649_v44 = vmax.f32 %v10617_v48, 0.0 }
 0x84c   : > { %10981 = vrot.lane.b32.xlu1 %v10769_v52, %s13389_s20  ;;  %v10713_v52 = vadd.f32 %v10550_v39, %v10233_v56  ;;  %v10650_v41 = vmax.f32 %v10618_v45, 0.0 }
 0x84d   : > { %v10681_v55 = vmin.f32 %v10649_v44, 16.0 }
 0x84e   : > { %10983 = vrot.lane.b32.xlu0 %v10770_v31, %s13389_s20  ;;  %v10745_v19 = vmax.f32 %v10713_v52, 0.0  ;;  %v10682_v31 = vmin.f32 %v10650_v41, 16.0 }
 0x850   : > { %10865 = vrot.lane.b32.xlu1 %v10679_v22, %s13388_s23  ;;  %v10747_v22 = vmax.f32 %v10715_v29, 0.0  ;;  %v10777_v23 = vmin.f32 %v10745_v19, 16.0 }
 0x852   : > { %10867 = vrot.lane.b32.xlu0 %v10680_v20, %s13388_s23  ;;  %v10779_v10 = vmin.f32 %v10747_v22, 16.0 }
 0x854   : > { %10993 = vrot.lane.b32.xlu1 %v10775_v25, %s13389_s20 }
 0x856   : > { %10995 = vrot.lane.b32.xlu0 %v10776_v63, %s13389_s20 }
 0x858   : > { %10861 = vrot.lane.b32.xlu1 %v10677_v54, %s13388_s23 }
 0x85a   : > { %10863 = vrot.lane.b32.xlu0 %v10678_v36, %s13388_s23 }
 0x85c   : > { %10989 = vrot.lane.b32.xlu1 %v10773_v34, %s13389_s20 }
 0x85e   : > { %10991 = vrot.lane.b32.xlu0 %v10774_v40, %s13389_s20 }
 0x860   : > { %10873 = vrot.lane.b32.xlu1 %v10683_v38, %s13388_s23 }
 0x862   : > { %v10818_v6 = vpop.permute.xlu1 %10817  ;;  %10875 = vrot.lane.b32.xlu0 %v10684_v62, %s13388_s23 }
 0x864   : > { %10869 = vrot.lane.b32.xlu1 %v10681_v55, %s13388_s23  ;;  %v10820_v17 = vpop.permute.xlu0 %10819 }
 0x866   : > { %v10946_v26 = vpop.permute.xlu1 %10945  ;;  %10871 = vrot.lane.b32.xlu0 %v10682_v31, %s13388_s23 }
 0x867   : > { %v11040_v11 = vsel %vm11037_vm7, %v10818_v6, %v10946_v26 }
 0x868   : > { %v11073_v60 = vsel %vm11070_vm8, %v11040_v11, %v10946_v26  ;;  %10997 = vrot.lane.b32.xlu1 %v10777_v23, %s13389_s20  ;;  %v10948_v0 = vpop.permute.xlu0 %10947 }
 0x869   : > { %11106 = vst.msk [vmem:[%s18690_s25 + $0x10] sm:$0xff] %vm11103_vm9, %v11073_v60  ;;  %v11041_v20 = vsel %vm11037_vm7, %v10820_v17, %v10948_v0 }
 0x86a   : > { %v10814_v53 = vpop.permute.xlu1 %10813  ;;  %v11074_v50 = vsel %vm11070_vm8, %v11041_v20, %v10948_v0  ;;  %10999 = vrot.lane.b32.xlu0 %v10778_v47, %s13389_s20 }
 0x86b   : > { %11107 = vst.msk [vmem:[%s18690_s25 + $0x18] sm:$0xff] %vm11103_vm9, %v11074_v50 }
 0x86c   : > { %11001 = vrot.lane.b32.xlu1 %v10779_v10, %s13389_s20  ;;  %v10816_v25 = vpop.permute.xlu0 %10815 }
 0x86e   : > { %v10942_v32 = vpop.permute.xlu1 %10941  ;;  %11003 = vrot.lane.b32.xlu0 %v10780_v24, %s13389_s20 }
 0x86f   : > { %v11038_v7 = vsel %vm11037_vm7, %v10814_v53, %v10942_v32 }
 0x870   : > { %v11071_v49 = vsel %vm11070_vm8, %v11038_v7, %v10942_v32  ;;  %v10944_v42 = vpop.permute.xlu0 %10943 }
 0x871   : > { %11104 = vst.msk [vmem:[%s18690_s25] sm:$0xff] %vm11103_vm9, %v11071_v49  ;;  %v11039_v5 = vsel %vm11037_vm7, %v10816_v25, %v10944_v42 }
 0x872   : > { %v10826_v57 = vpop.permute.xlu1 %10825  ;;  %v11072_v27 = vsel %vm11070_vm8, %v11039_v5, %v10944_v42 }
 0x873   : > { %11105 = vst.msk [vmem:[%s18690_s25 + $0x8] sm:$0xff] %vm11103_vm9, %v11072_v27 }
 0x874   : > { %v10828_v14 = vpop.permute.xlu0 %10827 }
 0x876   : > { %v10954_v12 = vpop.permute.xlu1 %10953 }
 0x877   : > { %v11044_v3 = vsel %vm11037_vm7, %v10826_v57, %v10954_v12 }
 0x878   : > { %v11077_v30 = vsel %vm11070_vm8, %v11044_v3, %v10954_v12  ;;  %v10956_v63 = vpop.permute.xlu0 %10955 }
 0x879   : > { %11110 = vst.msk [vmem:[%s18690_s25 + $0x30] sm:$0xff] %vm11103_vm9, %v11077_v30  ;;  %v11045_v16 = vsel %vm11037_vm7, %v10828_v14, %v10956_v63 }
 0x87a   : > { %v10822_v37 = vpop.permute.xlu1 %10821  ;;  %v11078_v54 = vsel %vm11070_vm8, %v11045_v16, %v10956_v63 }
 0x87b   : > { %11111 = vst.msk [vmem:[%s18690_s25 + $0x38] sm:$0xff] %vm11103_vm9, %v11078_v54 }
 0x87c   : > { %v10824_v46 = vpop.permute.xlu0 %10823 }
 0x87e   : > { %v10950_v13 = vpop.permute.xlu1 %10949 }
 0x87f   : > { %v11042_v43 = vsel %vm11037_vm7, %v10822_v37, %v10950_v13 }
 0x880   : > { %v11075_v18 = vsel %vm11070_vm8, %v11042_v43, %v10950_v13  ;;  %v10952_v21 = vpop.permute.xlu0 %10951 }
 0x881   : > { %11108 = vst.msk [vmem:[%s18690_s25 + $0x20] sm:$0xff] %vm11103_vm9, %v11075_v18  ;;  %v11043_v59 = vsel %vm11037_vm7, %v10824_v46, %v10952_v21 }
 0x882   : > { %v10834_v39 = vpop.permute.xlu1 %10833  ;;  %v11076_v8 = vsel %vm11070_vm8, %v11043_v59, %v10952_v21 }
 0x883   : > { %11109 = vst.msk [vmem:[%s18690_s25 + $0x28] sm:$0xff] %vm11103_vm9, %v11076_v8 }
 0x884   : > { %v10836_v56 = vpop.permute.xlu0 %10835 }
 0x886   : > { %v10962_v36 = vpop.permute.xlu1 %10961 }
 0x887   : > { %v11048_v61 = vsel %vm11037_vm7, %v10834_v39, %v10962_v36 }
 0x888   : > { %v11081_v28 = vsel %vm11070_vm8, %v11048_v61, %v10962_v36  ;;  %v10964_v34 = vpop.permute.xlu0 %10963 }
 0x889   : > { %11114 = vst.msk [vmem:[%s18690_s25 + $0x50] sm:$0xff] %vm11103_vm9, %v11081_v28  ;;  %v11049_v33 = vsel %vm11037_vm7, %v10836_v56, %v10964_v34 }
 0x88a   : > { %v10830_v48 = vpop.permute.xlu1 %10829  ;;  %v11082_v1 = vsel %vm11070_vm8, %v11049_v33, %v10964_v34 }
 0x88b   : > { %11115 = vst.msk [vmem:[%s18690_s25 + $0x58] sm:$0xff] %vm11103_vm9, %v11082_v1 }
 0x88c   : > { %v10832_v35 = vpop.permute.xlu0 %10831 }
 0x88e   : > { %v10958_v58 = vpop.permute.xlu1 %10957 }
 0x88f   : > { %v11046_v40 = vsel %vm11037_vm7, %v10830_v48, %v10958_v58 }
 0x890   : > { %v11079_v51 = vsel %vm11070_vm8, %v11046_v40, %v10958_v58  ;;  %v10960_v45 = vpop.permute.xlu0 %10959 }
 0x891   : > { %11112 = vst.msk [vmem:[%s18690_s25 + $0x40] sm:$0xff] %vm11103_vm9, %v11079_v51  ;;  %v11047_v38 = vsel %vm11037_vm7, %v10832_v35, %v10960_v45 }
 0x892   : > { %v10842_v44 = vpop.permute.xlu1 %10841  ;;  %v11080_v52 = vsel %vm11070_vm8, %v11047_v38, %v10960_v45 }
 0x893   : > { %11113 = vst.msk [vmem:[%s18690_s25 + $0x48] sm:$0xff] %vm11103_vm9, %v11080_v52 }
 0x894   : > { %v10844_v62 = vpop.permute.xlu0 %10843 }
 0x896   : > { %v10970_v41 = vpop.permute.xlu1 %10969 }
 0x897   : > { %v11052_v2 = vsel %vm11037_vm7, %v10842_v44, %v10970_v41 }
 0x898   : > { %v11085_v29 = vsel %vm11070_vm8, %v11052_v2, %v10970_v41  ;;  %v10972_v55 = vpop.permute.xlu0 %10971 }
 0x899   : > { %11118 = vst.msk [vmem:[%s18690_s25 + $0x70] sm:$0xff] %vm11103_vm9, %v11085_v29  ;;  %v11053_v19 = vsel %vm11037_vm7, %v10844_v62, %v10972_v55 }
 0x89a   : > { %v10838_v6 = vpop.permute.xlu1 %10837  ;;  %v11086_v15 = vsel %vm11070_vm8, %v11053_v19, %v10972_v55 }
 0x89b   : > { %11119 = vst.msk [vmem:[%s18690_s25 + $0x78] sm:$0xff] %vm11103_vm9, %v11086_v15 }
 0x89c   : > { %v10840_v31 = vpop.permute.xlu0 %10839 }
 0x89e   : > { %v10966_v9 = vpop.permute.xlu1 %10965 }
 0x89f   : > { %v11050_v17 = vsel %vm11037_vm7, %v10838_v6, %v10966_v9 }
 0x8a0   : > { %v11083_v22 = vsel %vm11070_vm8, %v11050_v17, %v10966_v9  ;;  %v10968_v23 = vpop.permute.xlu0 %10967 }
 0x8a1   : > { %11116 = vst.msk [vmem:[%s18690_s25 + $0x60] sm:$0xff] %vm11103_vm9, %v11083_v22  ;;  %v11051_v26 = vsel %vm11037_vm7, %v10840_v31, %v10968_v23 }
 0x8a2   : > { %v10850_v11 = vpop.permute.xlu1 %10849  ;;  %v11084_v60 = vsel %vm11070_vm8, %v11051_v26, %v10968_v23 }
 0x8a3   : > { %11117 = vst.msk [vmem:[%s18690_s25 + $0x68] sm:$0xff] %vm11103_vm9, %v11084_v60 }
 0x8a4   : > { %v10852_v4 = vpop.permute.xlu0 %10851 }
 0x8a6   : > { %v10978_v47 = vpop.permute.xlu1 %10977 }
 0x8a7   : > { %v11056_v0 = vsel %vm11037_vm7, %v10850_v11, %v10978_v47 }
 0x8a8   : > { %v11089_v10 = vsel %vm11070_vm8, %v11056_v0, %v10978_v47  ;;  %v10980_v20 = vpop.permute.xlu0 %10979 }
 0x8a9   : > { %11122 = vst.msk [vmem:[%s18690_s25 + $0x90] sm:$0xff] %vm11103_vm9, %v11089_v10  ;;  %v11057_v53 = vsel %vm11037_vm7, %v10852_v4, %v10980_v20 }
 0x8aa   : > { %v10846_v50 = vpop.permute.xlu1 %10845  ;;  %v11090_v24 = vsel %vm11070_vm8, %v11057_v53, %v10980_v20 }
 0x8ab   : > { %11123 = vst.msk [vmem:[%s18690_s25 + $0x98] sm:$0xff] %vm11103_vm9, %v11090_v24 }
 0x8ac   : > { %v10848_v25 = vpop.permute.xlu0 %10847 }
 0x8ae   : > { %v10974_v32 = vpop.permute.xlu1 %10973 }
 0x8af   : > { %v11054_v7 = vsel %vm11037_vm7, %v10846_v50, %v10974_v32 }
 0x8b0   : > { %v11087_v49 = vsel %vm11070_vm8, %v11054_v7, %v10974_v32  ;;  %v10976_v42 = vpop.permute.xlu0 %10975 }
 0x8b1   : > { %11120 = vst.msk [vmem:[%s18690_s25 + $0x80] sm:$0xff] %vm11103_vm9, %v11087_v49  ;;  %v11055_v5 = vsel %vm11037_vm7, %v10848_v25, %v10976_v42 }
 0x8b2   : > { %v10858_v57 = vpop.permute.xlu1 %10857  ;;  %v11088_v27 = vsel %vm11070_vm8, %v11055_v5, %v10976_v42 }
 0x8b3   : > { %11121 = vst.msk [vmem:[%s18690_s25 + $0x88] sm:$0xff] %vm11103_vm9, %v11088_v27 }
 0x8b4   : > { %v10860_v14 = vpop.permute.xlu0 %10859 }
 0x8b6   : > { %v10986_v12 = vpop.permute.xlu1 %10985 }
 0x8b7   : > { %v11060_v3 = vsel %vm11037_vm7, %v10858_v57, %v10986_v12 }
 0x8b8   : > { %v11093_v30 = vsel %vm11070_vm8, %v11060_v3, %v10986_v12  ;;  %v10988_v63 = vpop.permute.xlu0 %10987 }
 0x8b9   : > { %11126 = vst.msk [vmem:[%s18690_s25 + $0xb0] sm:$0xff] %vm11103_vm9, %v11093_v30  ;;  %v11061_v16 = vsel %vm11037_vm7, %v10860_v14, %v10988_v63 }
 0x8ba   : > { %v10854_v37 = vpop.permute.xlu1 %10853  ;;  %v11094_v54 = vsel %vm11070_vm8, %v11061_v16, %v10988_v63 }
 0x8bb   : > { %11127 = vst.msk [vmem:[%s18690_s25 + $0xb8] sm:$0xff] %vm11103_vm9, %v11094_v54 }
 0x8bc   : > { %v10856_v46 = vpop.permute.xlu0 %10855 }
 0x8be   : > { %v10982_v13 = vpop.permute.xlu1 %10981 }
 0x8bf   : > { %v11058_v43 = vsel %vm11037_vm7, %v10854_v37, %v10982_v13 }
 0x8c0   : > { %v11091_v18 = vsel %vm11070_vm8, %v11058_v43, %v10982_v13  ;;  %v10984_v21 = vpop.permute.xlu0 %10983 }
 0x8c1   : > { %11124 = vst.msk [vmem:[%s18690_s25 + $0xa0] sm:$0xff] %vm11103_vm9, %v11091_v18  ;;  %v11059_v59 = vsel %vm11037_vm7, %v10856_v46, %v10984_v21 }
 0x8c2   : > { %v10866_v39 = vpop.permute.xlu1 %10865  ;;  %v11092_v8 = vsel %vm11070_vm8, %v11059_v59, %v10984_v21 }
 0x8c3   : > { %11125 = vst.msk [vmem:[%s18690_s25 + $0xa8] sm:$0xff] %vm11103_vm9, %v11092_v8 }
 0x8c4   : > { %v10868_v56 = vpop.permute.xlu0 %10867 }
 0x8c6   : > { %v10994_v36 = vpop.permute.xlu1 %10993 }
 0x8c7   : > { %v11064_v61 = vsel %vm11037_vm7, %v10866_v39, %v10994_v36 }
 0x8c8   : > { %v11097_v28 = vsel %vm11070_vm8, %v11064_v61, %v10994_v36  ;;  %v10996_v34 = vpop.permute.xlu0 %10995 }
 0x8c9   : > { %11130 = vst.msk [vmem:[%s18690_s25 + $0xd0] sm:$0xff] %vm11103_vm9, %v11097_v28  ;;  %v11065_v33 = vsel %vm11037_vm7, %v10868_v56, %v10996_v34 }
 0x8ca   : > { %v10862_v48 = vpop.permute.xlu1 %10861  ;;  %v11098_v1 = vsel %vm11070_vm8, %v11065_v33, %v10996_v34 }
 0x8cb   : > { %11131 = vst.msk [vmem:[%s18690_s25 + $0xd8] sm:$0xff] %vm11103_vm9, %v11098_v1 }
 0x8cc   : > { %v10864_v35 = vpop.permute.xlu0 %10863 }
 0x8ce   : > { %v10990_v58 = vpop.permute.xlu1 %10989 }
 0x8cf   : > { %v11062_v40 = vsel %vm11037_vm7, %v10862_v48, %v10990_v58 }
 0x8d0   : > { %v11095_v51 = vsel %vm11070_vm8, %v11062_v40, %v10990_v58  ;;  %v10992_v45 = vpop.permute.xlu0 %10991 }
 0x8d1   : > { %11128 = vst.msk [vmem:[%s18690_s25 + $0xc0] sm:$0xff] %vm11103_vm9, %v11095_v51  ;;  %v11063_v38 = vsel %vm11037_vm7, %v10864_v35, %v10992_v45 }
 0x8d2   : > { %v10874_v44 = vpop.permute.xlu1 %10873  ;;  %v11096_v52 = vsel %vm11070_vm8, %v11063_v38, %v10992_v45 }
 0x8d3   : > { %11129 = vst.msk [vmem:[%s18690_s25 + $0xc8] sm:$0xff] %vm11103_vm9, %v11096_v52 }
 0x8d4   : > { %v10876_v62 = vpop.permute.xlu0 %10875 }
 0x8d6   : > { %v10870_v41 = vpop.permute.xlu1 %10869 }
 0x8d8   : > { %v10872_v2 = vpop.permute.xlu0 %10871 }
 0x8da   : > { %v10998_v29 = vpop.permute.xlu1 %10997 }
 0x8db   : > { %v11066_v55 = vsel %vm11037_vm7, %v10870_v41, %v10998_v29 }
 0x8dc   : > { %v11099_v19 = vsel %vm11070_vm8, %v11066_v55, %v10998_v29  ;;  %v11000_v6 = vpop.permute.xlu0 %10999 }
 0x8dd   : > { %11132 = vst.msk [vmem:[%s18690_s25 + $0xe0] sm:$0xff] %vm11103_vm9, %v11099_v19  ;;  %v11067_v15 = vsel %vm11037_vm7, %v10872_v2, %v11000_v6 }
 0x8de   : > { %v11002_v31 = vpop.permute.xlu1 %11001  ;;  %v11100_v9 = vsel %vm11070_vm8, %v11067_v15, %v11000_v6 }
 0x8df   : > { %v11068_v17 = vsel %vm11037_vm7, %v10874_v44, %v11002_v31  ;;  %11133 = vst.msk [vmem:[%s18690_s25 + $0xe8] sm:$0xff] %vm11103_vm9, %v11100_v9 }
 0x8e0   : > { %v11101_v22 = vsel %vm11070_vm8, %v11068_v17, %v11002_v31  ;;  %v11004_v23 = vpop.permute.xlu0 %11003 }
 0x8e1   : > { %11134 = vst.msk [vmem:[%s18690_s25 + $0xf0] sm:$0xff] %vm11103_vm9, %v11101_v22  ;;  %v11069_v26 = vsel %vm11037_vm7, %v10876_v62, %v11004_v23 }
 0x8e2   : > { %v11102_v11 = vsel %vm11070_vm8, %v11069_v26, %v11004_v23 }
 0x8e3   : > { %11135 = vst.msk [vmem:[%s18690_s25 + $0xf8] sm:$0xff] %vm11103_vm9, %v11102_v11 }
 0x8e4 PF: > { %s23_s21 = sadd.s32 1, %s13374_s21  }
 0x8e5   : > { %p20_p4 = scmp.ge.s32.totalorder %s23_s21, 4  }
 0x8e7   :  { %22 = sbr.rel (!%p20_p4) target bundleno = 1 (0x1), region = 122 }

</bundles_post_ra>
